<compile_context>
chip_gen: v7x
topology: tpu7x:2x2x1
jax: 0.10.0
libtpu: 0.0.40
codegen_flags: <defaults>
</compile_context>

<pallas_src>
import functools

import numpy as np

import jax
import jax.numpy as jnp
from jax.experimental import pallas as pl
from jax.experimental.pallas import tpu as pltpu


# ----------------------------------------------------------------------------
# Pallas kernel: matmul + fused epilogue (activation, optional BatchNorm)
# ----------------------------------------------------------------------------
def _fused_kernel(*refs, epilogue, phases, cpad, rows, eps):
    bn = epilogue in ("bn_leaky", "bn_relu")
    if bn:
        a_ref, b_ref, g_ref, bt_ref, o_ref = refs
    else:
        a_ref, b_ref, o_ref = refs

    # bf16 x bf16 on the MXU, f32 accumulation.
    y = jnp.dot(a_ref[...], b_ref[...], preferred_element_type=jnp.float32)

    if bn:
        # Training-mode BatchNorm (batch statistics, biased variance).
        # Columns are `phases` lane-aligned groups of width `cpad`; statistics
        # for a channel pool over all valid rows and all phase groups.  Padded
        # (zero) rows beyond `rows` contribute 0 to both running sums, so the
        # sum / sum-of-squares formulation keeps the statistics exact.
        cnt = float(rows * phases)
        s = jnp.zeros((1, cpad), jnp.float32)
        sq = jnp.zeros((1, cpad), jnp.float32)
        for p in range(phases):
            g = y[:, p * cpad:(p + 1) * cpad]
            s = s + jnp.sum(g, axis=0, keepdims=True)
            sq = sq + jnp.sum(g * g, axis=0, keepdims=True)
        mean = s / cnt
        var = jnp.maximum(sq / cnt - mean * mean, 0.0)
        inv = jax.lax.rsqrt(var + eps)
        if phases > 1:
            mean = jnp.concatenate([mean] * phases, axis=1)
            inv = jnp.concatenate([inv] * phases, axis=1)
        y = (y - mean) * inv * g_ref[...] + bt_ref[...]

    if epilogue in ("leaky", "bn_leaky"):
        y = jnp.maximum(y, 0.2 * y)          # LeakyReLU(0.2)
    elif epilogue == "bn_relu":
        y = jnp.maximum(y, 0.0)
    elif epilogue == "tanh":
        y = jnp.tanh(y)

    o_ref[...] = y.astype(o_ref.dtype)


def _round_up(v, m):
    return -(-v // m) * m


def fused_matmul(patches, wmat, epilogue, gamma=None, beta=None, *,
                 phases=1, cpad, out_dtype=jnp.bfloat16, eps=1e-5):
    """(M, K) @ (K, cols) with fused BN/activation epilogue, tiled over M."""
    M, K = patches.shape
    cols = wmat.shape[1]
    bn = epilogue in ("bn_leaky", "bn_relu")

    if bn:
        # Batch statistics need every output row resident in a single tile.
        tm = _round_up(M, 8)
    else:
        if M >= 256 and M % 128 == 0:
            tm = 128
        elif M >= 128 and M % 16 == 0:
            tm = M // 2      # >=2 parallel grid steps (v7x megacore)
        else:
            tm = _round_up(M, 8)
    grid_m = pl.cdiv(M, tm)
    mp = grid_m * tm
    if mp != M:  # pad rows so nothing is ever silently dropped
        patches = jnp.pad(patches, ((0, mp - M), (0, 0)))

    in_specs = [pl.BlockSpec((tm, K), lambda i: (i, 0)),
                pl.BlockSpec((K, cols), lambda i: (0, 0))]
    args = [patches, wmat]
    if bn:
        in_specs += [pl.BlockSpec((1, cols), lambda i: (0, 0)),
                     pl.BlockSpec((1, cols), lambda i: (0, 0))]
        args += [gamma, beta]

    out = pl.pallas_call(
        functools.partial(_fused_kernel, epilogue=epilogue, phases=phases,
                          cpad=cpad, rows=M, eps=eps),
        out_shape=jax.ShapeDtypeStruct((mp, cols), out_dtype),
        grid_spec=pltpu.PrefetchScalarGridSpec(
            num_scalar_prefetch=0,
            grid=(grid_m,),
            in_specs=in_specs,
            out_specs=pl.BlockSpec((tm, cols), lambda i: (i, 0)),
        ),
        compiler_params=pltpu.CompilerParams(
            dimension_semantics=("parallel",)),
    )(*args)
    if mp != M:
        out = out[:M]
    return out


# ----------------------------------------------------------------------------
# JAX glue: im2col patch extraction, layer wrappers (bf16 throughout)
# ----------------------------------------------------------------------------
def im2col(x, k, stride, pad):
    """x: NHWC -> patches (N*Ho*Wo, k*k*C); column order (kh, kw, C)."""
    xp = jnp.pad(x, ((0, 0), (pad, pad), (pad, pad), (0, 0)))
    N, Hp, Wp, C = xp.shape
    Ho = (Hp - k) // stride + 1
    Wo = (Wp - k) // stride + 1
    cols = []
    for i in range(k):
        for j in range(k):
            cols.append(
                xp[:, i:i + stride * Ho:stride, j:j + stride * Wo:stride, :])
    patches = jnp.stack(cols, axis=3).reshape(N * Ho * Wo, k * k * C)
    return patches, (N, Ho, Wo)


def conv_layer(x, wmat, cout, cpad, epilogue, gamma, beta, out_dtype):
    """Conv2d(k=4, s=2, p=1, bias=False) + fused epilogue."""
    p, (n, h, w) = im2col(x, 4, 2, 1)
    y = fused_matmul(p, wmat, epilogue, gamma, beta, phases=1, cpad=cpad,
                     out_dtype=out_dtype)
    return y[:, :cout].reshape(n, h, w, cout)


def convt_layer(x, wmat, cout, cpad, epilogue, gamma, beta, out_dtype):
    """ConvTranspose2d(k=4, s=2, p=1, bias=False) + fused epilogue.

    Phase decomposition: a single 3x3 im2col of the un-dilated input is
    multiplied by a phase-major (9*Cin, 4*Cpad) weight matrix; column group
    ry*2+rx holds output phase (2i+ry, 2j+rx).  No zero-dilation, 4x less MXU
    work per output than the dilated formulation.
    """
    p, (n, h, w) = im2col(x, 3, 1, 1)
    y = fused_matmul(p, wmat, epilogue, gamma, beta, phases=4, cpad=cpad,
                     out_dtype=out_dtype)
    y = y.reshape(n, h, w, 2, 2, cpad)[..., :cout]
    y = jnp.transpose(y, (0, 1, 3, 2, 4, 5)).reshape(n, 2 * h, 2 * w, cout)
    return y


# ----------------------------------------------------------------------------
# One-time parameter preparation (hoisted out of the jitted forward)
# ----------------------------------------------------------------------------
def _conv_weight_mat(w_oikk):
    """PyTorch Conv2d weight (Cout, Cin, k, k) -> (k*k*Cin, Cpad) bf16."""
    w = np.asarray(jax.device_get(w_oikk), np.float32)
    cout, cin, k, _ = w.shape
    cpad = max(128, _round_up(cout, 128))
    wm = np.zeros((k * k * cin, cpad), np.float32)
    wm[:, :cout] = np.transpose(w, (2, 3, 1, 0)).reshape(k * k * cin, cout)
    return jnp.asarray(wm, jnp.bfloat16), cout, cpad


def _convt_phase_weight_mat(w_iokk):
    """PyTorch ConvTranspose2d weight (Cin, Cout, 4, 4) -> phase-major
    (9*Cin, 4*Cpad) bf16 matrix for the 3x3-patch formulation.

    For k=4, s=2, p=1: output y=2q+ry gets contributions from input rows
    {q-1, q} (ry=0, taps kh={3,1}) or {q, q+1} (ry=1, taps kh={2,0}); same
    along the width.  Patch offset index d in {0,1,2} means input row q+d-1.
    """
    w = np.asarray(jax.device_get(w_iokk), np.float32)
    cin, cout, k, _ = w.shape
    assert k == 4, "phase decomposition derived for kernel size 4"
    cpad = max(128, _round_up(cout, 128))
    taps = {0: {0: 3, 1: 1}, 1: {1: 2, 2: 0}}   # r -> {patch offset: kernel tap}
    wb = np.zeros((9 * cin, 4 * cpad), np.float32)
    for ry in (0, 1):
        for rx in (0, 1):
            ph = ry * 2 + rx
            for dh, kh in taps[ry].items():
                for dw, kw in taps[rx].items():
                    r0 = (dh * 3 + dw) * cin
                    wb[r0:r0 + cin, ph * cpad:ph * cpad + cout] = w[:, :, kh, kw]
    return jnp.asarray(wb, jnp.bfloat16), cout, cpad


def _bn_vecs(gamma, beta, cout, cpad, phases):
    """Pad gamma/beta to Cpad (gamma=1, beta=0 in padding) and tile per phase."""
    g = np.ones((cpad,), np.float32)
    b = np.zeros((cpad,), np.float32)
    g[:cout] = np.asarray(jax.device_get(gamma), np.float32)
    b[:cout] = np.asarray(jax.device_get(beta), np.float32)
    return (jnp.asarray(np.tile(g, phases)[None, :]),
            jnp.asarray(np.tile(b, phases)[None, :]))


def prepare_params(params):
    """Raw PyTorch-layout params -> (static layer config, matmul-ready arrays)."""
    weights = {}
    cfg = []

    def add(kind, name, wkey, bnkey, epilogue):
        if kind == "conv":
            wm, cout, cpad = _conv_weight_mat(params[wkey])
            phases = 1
        else:
            wm, cout, cpad = _convt_phase_weight_mat(params[wkey])
            phases = 4
        weights[name + "_w"] = wm
        entry = dict(kind=kind, epilogue=epilogue, cout=cout, cpad=cpad,
                     w=name + "_w", g=None, b=None)
        if bnkey is not None:
            g, b = _bn_vecs(params[bnkey + "_g"], params[bnkey + "_b"],
                            cout, cpad, phases)
            weights[name + "_g"] = g
            weights[name + "_b"] = b
            entry["g"] = name + "_g"
            entry["b"] = name + "_b"
        cfg.append(entry)

    add("conv",  "l1", "w1", None,  "leaky")
    add("conv",  "l2", "w2", "bn2", "bn_leaky")
    add("conv",  "l3", "w3", "bn3", "bn_leaky")
    add("convt", "l4", "w4", "bn4", "bn_relu")
    add("convt", "l5", "w5", "bn5", "bn_relu")
    add("convt", "l6", "w6", None,  "tanh")
    return tuple(cfg), weights


# ----------------------------------------------------------------------------
# GenDt forward
# ----------------------------------------------------------------------------
def init_params(key, nz, nc, nb_classes, base=64):
    cin0 = nz + nc + nb_classes
    shapes = {
        "w1": (base, cin0, 4, 4),            # Conv2d (Cout, Cin, k, k)
        "w2": (base * 2, base, 4, 4),        # Conv2d
        "w3": (base * 4, base * 2, 4, 4),    # Conv2d
        "w4": (base * 4, base * 2, 4, 4),    # ConvTranspose2d (Cin, Cout, k, k)
        "w5": (base * 2, base, 4, 4),        # ConvTranspose2d
        "w6": (base, nc, 4, 4),              # ConvTranspose2d
    }
    params = {}
    keys = jax.random.split(key, len(shapes))
    for k_, (name, shp) in zip(keys, sorted(shapes.items())):
        params[name] = 0.05 * jax.random.normal(k_, shp, dtype=jnp.float32)
    # BatchNorm2d default init: gamma = 1, beta = 0.
    for name, c in (("bn2", base * 2), ("bn3", base * 4),
                    ("bn4", base * 2), ("bn5", base)):
        params[name + "_g"] = jnp.ones((c,), jnp.float32)
        params[name + "_b"] = jnp.zeros((c,), jnp.float32)
    return params


def gen_dt_forward(cfg, weights, x_nchw):
    x = jnp.transpose(x_nchw, (0, 2, 3, 1)).astype(jnp.bfloat16)   # NCHW->NHWC
    n_layers = len(cfg)
    for li, layer in enumerate(cfg):
        wmat = weights[layer["w"]]
        gamma = weights[layer["g"]] if layer["g"] is not None else None
        beta = weights[layer["b"]] if layer["b"] is not None else None
        out_dtype = jnp.float32 if li == n_layers - 1 else jnp.bfloat16
        fn = conv_layer if layer["kind"] == "conv" else convt_layer
        x = fn(x, wmat, layer["cout"], layer["cpad"], layer["epilogue"],
               gamma, beta, out_dtype)
    return jnp.transpose(x, (0, 3, 1, 2))                          # -> NCHW


# ----------------------------------------------------------------------------
if __name__ == "__main__":
    # Small, module-consistent shapes: nz=8, nc=3, nb_classes=5 -> Cin = 16.
    nz, nc, nb_classes = 8, 3, 5
    batch, spatial = 2, 16

    key = jax.random.PRNGKey(0)
    key_p, key_x = jax.random.split(key)
    params = init_params(key_p, nz, nc, nb_classes)
    cfg, weights = prepare_params(params)   # one-time weight prep (outside jit)

    x = jax.random.normal(
        key_x, (batch, nz + nc + nb_classes, spatial, spatial), jnp.float32)

    fwd = jax.jit(functools.partial(gen_dt_forward, cfg))
    out = jax.block_until_ready(fwd(weights, x))

    assert out.shape == (batch, nc, spatial, spatial), out.shape
    assert bool(jnp.all(jnp.isfinite(out)))
    assert bool(jnp.all(jnp.abs(out) <= 1.0 + 1e-6))  # tanh range
    print("KERNEL_OK")
</pallas_src>

<mosaic_0001>
module attributes {stable_mosaic.version = 11 : i64} {
  func.func @_fused_kernel(%arg0: i32, %arg1: memref<64x256xbf16, #tpu.memory_space<vmem>>, %arg2: memref<256x128xbf16, #tpu.memory_space<vmem>>, %arg3: memref<64x128xbf16, #tpu.memory_space<vmem>>) attributes {dimension_semantics = [#tpu.dimension_semantics<parallel>], iteration_bounds = array<i64: 2>, scalar_prefetch = 0 : i64, scratch_operands = 0 : i64, tpu.core_type = #tpu.core_type<tc>, window_params = [{transform_indices = @transform_0, window_bounds = array<i64: 64, 256>}, {pipeline_mode = #tpu.pipeline_mode<synchronous>, transform_indices = @transform_1, window_bounds = array<i64: 256, 128>}, {transform_indices = @transform_2, window_bounds = array<i64: 64, 128>}]} {
    %c0 = arith.constant 0 : index
    %c0_0 = arith.constant 0 : index
    %0 = vector.load %arg1[%c0, %c0_0] : memref<64x256xbf16, #tpu.memory_space<vmem>>, vector<64x256xbf16>
    %c0_1 = arith.constant 0 : index
    %c0_2 = arith.constant 0 : index
    %1 = vector.load %arg2[%c0_1, %c0_2] : memref<256x128xbf16, #tpu.memory_space<vmem>>, vector<256x128xbf16>
    %cst = arith.constant dense<0.000000e+00> : vector<64x128xf32>
    %2 = tpu.matmul %0, %1, %cst {dimension_numbers = #tpu.dot_dimension_numbers<[1], [0], [0], [1], [0, 0, 1, 1], [], []>} : vector<64x256xbf16>, vector<256x128xbf16>, vector<64x128xf32> -> vector<64x128xf32>
    %cst_3 = arith.constant 2.000000e-01 : f32
    %3 = vector.broadcast %cst_3 : f32 to vector<64x128xf32>
    %4 = arith.mulf %3, %2 : vector<64x128xf32>
    %5 = arith.maximumf %2, %4 : vector<64x128xf32>
    %6 = arith.truncf %5 : vector<64x128xf32> to vector<64x128xbf16>
    %c0_4 = arith.constant 0 : index
    %c0_5 = arith.constant 0 : index
    %7 = vector.load %arg3[%c0_4, %c0_5] : memref<64x128xbf16, #tpu.memory_space<vmem>>, vector<64x128xbf16>
    tpu.vector_store %arg3[%c0_4, %c0_5], %6 {strides = array<i32>} : memref<64x128xbf16, #tpu.memory_space<vmem>>, vector<64x128xbf16>,
    return
  }
  func.func @transform_0(%arg0: i32) -> (i32, i32) {
    %c0_i32 = arith.constant 0 : i32
    %c0_i32_0 = arith.constant 0 : i32
    return %arg0, %c0_i32 : i32, i32
  }
  func.func @transform_1(%arg0: i32) -> (i32, i32) {
    %c0_i32 = arith.constant 0 : i32
    %c0_i32_0 = arith.constant 0 : i32
    %c0_i32_1 = arith.constant 0 : i32
    return %c0_i32, %c0_i32_0 : i32, i32
  }
  func.func @transform_2(%arg0: i32) -> (i32, i32) {
    %c0_i32 = arith.constant 0 : i32
    %c0_i32_0 = arith.constant 0 : i32
    return %arg0, %c0_i32 : i32, i32
  }
}

module attributes {stable_mosaic.version = 11 : i64} {
  func.func @_fused_kernel(%arg0: i32, %arg1: memref<32x1024xbf16, #tpu.memory_space<vmem>>, %arg2: memref<1024x128xbf16, #tpu.memory_space<vmem>>, %arg3: memref<1x128xf32, #tpu.memory_space<vmem>>, %arg4: memref<1x128xf32, #tpu.memory_space<vmem>>, %arg5: memref<32x128xbf16, #tpu.memory_space<vmem>>) attributes {dimension_semantics = [#tpu.dimension_semantics<parallel>], iteration_bounds = array<i64: 1>, scalar_prefetch = 0 : i64, scratch_operands = 0 : i64, tpu.core_type = #tpu.core_type<tc>, window_params = [{transform_indices = @transform_0, window_bounds = array<i64: 32, 1024>}, {pipeline_mode = #tpu.pipeline_mode<synchronous>, transform_indices = @transform_1, window_bounds = array<i64: 1024, 128>}, {pipeline_mode = #tpu.pipeline_mode<synchronous>, transform_indices = @transform_2, window_bounds = array<i64: 1, 128>}, {pipeline_mode = #tpu.pipeline_mode<synchronous>, transform_indices = @transform_3, window_bounds = array<i64: 1, 128>}, {transform_indices = @transform_4, window_bounds = array<i64: 32, 128>}]} {
    %c0 = arith.constant 0 : index
    %c0_0 = arith.constant 0 : index
    %0 = vector.load %arg1[%c0, %c0_0] : memref<32x1024xbf16, #tpu.memory_space<vmem>>, vector<32x1024xbf16>
    %c0_1 = arith.constant 0 : index
    %c0_2 = arith.constant 0 : index
    %1 = vector.load %arg2[%c0_1, %c0_2] : memref<1024x128xbf16, #tpu.memory_space<vmem>>, vector<1024x128xbf16>
    %cst = arith.constant dense<0.000000e+00> : vector<32x128xf32>
    %2 = tpu.matmul %0, %1, %cst {dimension_numbers = #tpu.dot_dimension_numbers<[1], [0], [0], [1], [0, 0, 1, 1], [], []>} : vector<32x1024xbf16>, vector<1024x128xbf16>, vector<32x128xf32> -> vector<32x128xf32>
    %cst_3 = arith.constant 0.000000e+00 : f32
    %3 = vector.broadcast %cst_3 : f32 to vector<1x128xf32>
    %cst_4 = arith.constant 0.000000e+00 : f32
    %4 = vector.broadcast %cst_4 : f32 to vector<1x128xf32>
    %cst_5 = arith.constant dense<0.000000e+00> : vector<128xf32>
    %5 = vector.multi_reduction <add>, %2, %cst_5 [0] : vector<32x128xf32> to vector<128xf32>
    %6 = vector.shape_cast %5 : vector<128xf32> to vector<1x128xf32>
    %7 = arith.addf %3, %6 : vector<1x128xf32>
    %8 = arith.mulf %2, %2 : vector<32x128xf32>
    %cst_6 = arith.constant dense<0.000000e+00> : vector<128xf32>
    %9 = vector.multi_reduction <add>, %8, %cst_6 [0] : vector<32x128xf32> to vector<128xf32>
    %10 = vector.shape_cast %9 : vector<128xf32> to vector<1x128xf32>
    %11 = arith.addf %4, %10 : vector<1x128xf32>
    %cst_7 = arith.constant 3.200000e+01 : f32
    %12 = vector.broadcast %cst_7 : f32 to vector<1x128xf32>
    %13 = arith.divf %7, %12 : vector<1x128xf32>
    %cst_8 = arith.constant 3.200000e+01 : f32
    %14 = vector.broadcast %cst_8 : f32 to vector<1x128xf32>
    %15 = arith.divf %11, %14 : vector<1x128xf32>
    %16 = arith.mulf %13, %13 : vector<1x128xf32>
    %17 = arith.subf %15, %16 : vector<1x128xf32>
    %cst_9 = arith.constant 0.000000e+00 : f32
    %18 = vector.broadcast %cst_9 : f32 to vector<1x128xf32>
    %19 = arith.maximumf %17, %18 : vector<1x128xf32>
    %cst_10 = arith.constant 9.99999974E-6 : f32
    %20 = vector.broadcast %cst_10 : f32 to vector<1x128xf32>
    %21 = arith.addf %19, %20 : vector<1x128xf32>
    %22 = math.rsqrt %21 : vector<1x128xf32>
    %23 = vector.broadcast %13 : vector<1x128xf32> to vector<32x128xf32>
    %24 = arith.subf %2, %23 : vector<32x128xf32>
    %25 = vector.broadcast %22 : vector<1x128xf32> to vector<32x128xf32>
    %26 = arith.mulf %24, %25 : vector<32x128xf32>
    %c0_11 = arith.constant 0 : index
    %c0_12 = arith.constant 0 : index
    %27 = vector.load %arg3[%c0_11, %c0_12] : memref<1x128xf32, #tpu.memory_space<vmem>>, vector<1x128xf32>
    %28 = vector.broadcast %27 : vector<1x128xf32> to vector<32x128xf32>
    %29 = arith.mulf %26, %28 : vector<32x128xf32>
    %c0_13 = arith.constant 0 : index
    %c0_14 = arith.constant 0 : index
    %30 = vector.load %arg4[%c0_13, %c0_14] : memref<1x128xf32, #tpu.memory_space<vmem>>, vector<1x128xf32>
    %31 = vector.broadcast %30 : vector<1x128xf32> to vector<32x128xf32>
    %32 = arith.addf %29, %31 : vector<32x128xf32>
    %cst_15 = arith.constant 2.000000e-01 : f32
    %33 = vector.broadcast %cst_15 : f32 to vector<32x128xf32>
    %34 = arith.mulf %33, %32 : vector<32x128xf32>
    %35 = arith.maximumf %32, %34 : vector<32x128xf32>
    %36 = arith.truncf %35 : vector<32x128xf32> to vector<32x128xbf16>
    %c0_16 = arith.constant 0 : index
    %c0_17 = arith.constant 0 : index
    %37 = vector.load %arg5[%c0_16, %c0_17] : memref<32x128xbf16, #tpu.memory_space<vmem>>, vector<32x128xbf16>
    tpu.vector_store %arg5[%c0_16, %c0_17], %36 {strides = array<i32>} : memref<32x128xbf16, #tpu.memory_space<vmem>>, vector<32x128xbf16>,
    return
  }
  func.func @transform_0(%arg0: i32) -> (i32, i32) {
    %c0_i32 = arith.constant 0 : i32
    %c0_i32_0 = arith.constant 0 : i32
    return %arg0, %c0_i32 : i32, i32
  }
  func.func @transform_1(%arg0: i32) -> (i32, i32) {
    %c0_i32 = arith.constant 0 : i32
    %c0_i32_0 = arith.constant 0 : i32
    %c0_i32_1 = arith.constant 0 : i32
    return %c0_i32, %c0_i32_0 : i32, i32
  }
  func.func @transform_2(%arg0: i32) -> (i32, i32) {
    %c0_i32 = arith.constant 0 : i32
    %c0_i32_0 = arith.constant 0 : i32
    %c0_i32_1 = arith.constant 0 : i32
    return %c0_i32, %c0_i32_0 : i32, i32
  }
  func.func @transform_3(%arg0: i32) -> (i32, i32) {
    %c0_i32 = arith.constant 0 : i32
    %c0_i32_0 = arith.constant 0 : i32
    %c0_i32_1 = arith.constant 0 : i32
    return %c0_i32, %c0_i32_0 : i32, i32
  }
  func.func @transform_4(%arg0: i32) -> (i32, i32) {
    %c0_i32 = arith.constant 0 : i32
    %c0_i32_0 = arith.constant 0 : i32
    return %arg0, %c0_i32 : i32, i32
  }
}

module attributes {stable_mosaic.version = 11 : i64} {
  func.func @_fused_kernel(%arg0: i32, %arg1: memref<8x2048xbf16, #tpu.memory_space<vmem>>, %arg2: memref<2048x256xbf16, #tpu.memory_space<vmem>>, %arg3: memref<1x256xf32, #tpu.memory_space<vmem>>, %arg4: memref<1x256xf32, #tpu.memory_space<vmem>>, %arg5: memref<8x256xbf16, #tpu.memory_space<vmem>>) attributes {dimension_semantics = [#tpu.dimension_semantics<parallel>], iteration_bounds = array<i64: 1>, scalar_prefetch = 0 : i64, scratch_operands = 0 : i64, tpu.core_type = #tpu.core_type<tc>, window_params = [{transform_indices = @transform_0, window_bounds = array<i64: 8, 2048>}, {pipeline_mode = #tpu.pipeline_mode<synchronous>, transform_indices = @transform_1, window_bounds = array<i64: 2048, 256>}, {pipeline_mode = #tpu.pipeline_mode<synchronous>, transform_indices = @transform_2, window_bounds = array<i64: 1, 256>}, {pipeline_mode = #tpu.pipeline_mode<synchronous>, transform_indices = @transform_3, window_bounds = array<i64: 1, 256>}, {transform_indices = @transform_4, window_bounds = array<i64: 8, 256>}]} {
    %c0 = arith.constant 0 : index
    %c0_0 = arith.constant 0 : index
    %0 = vector.load %arg1[%c0, %c0_0] : memref<8x2048xbf16, #tpu.memory_space<vmem>>, vector<8x2048xbf16>
    %c0_1 = arith.constant 0 : index
    %c0_2 = arith.constant 0 : index
    %1 = vector.load %arg2[%c0_1, %c0_2] : memref<2048x256xbf16, #tpu.memory_space<vmem>>, vector<2048x256xbf16>
    %cst = arith.constant dense<0.000000e+00> : vector<8x256xf32>
    %2 = tpu.matmul %0, %1, %cst {dimension_numbers = #tpu.dot_dimension_numbers<[1], [0], [0], [1], [0, 0, 1, 1], [], []>} : vector<8x2048xbf16>, vector<2048x256xbf16>, vector<8x256xf32> -> vector<8x256xf32>
    %cst_3 = arith.constant 0.000000e+00 : f32
    %3 = vector.broadcast %cst_3 : f32 to vector<1x256xf32>
    %cst_4 = arith.constant 0.000000e+00 : f32
    %4 = vector.broadcast %cst_4 : f32 to vector<1x256xf32>
    %cst_5 = arith.constant dense<0.000000e+00> : vector<256xf32>
    %5 = vector.multi_reduction <add>, %2, %cst_5 [0] : vector<8x256xf32> to vector<256xf32>
    %6 = vector.shape_cast %5 : vector<256xf32> to vector<1x256xf32>
    %7 = arith.addf %3, %6 : vector<1x256xf32>
    %8 = arith.mulf %2, %2 : vector<8x256xf32>
    %cst_6 = arith.constant dense<0.000000e+00> : vector<256xf32>
    %9 = vector.multi_reduction <add>, %8, %cst_6 [0] : vector<8x256xf32> to vector<256xf32>
    %10 = vector.shape_cast %9 : vector<256xf32> to vector<1x256xf32>
    %11 = arith.addf %4, %10 : vector<1x256xf32>
    %cst_7 = arith.constant 8.000000e+00 : f32
    %12 = vector.broadcast %cst_7 : f32 to vector<1x256xf32>
    %13 = arith.divf %7, %12 : vector<1x256xf32>
    %cst_8 = arith.constant 8.000000e+00 : f32
    %14 = vector.broadcast %cst_8 : f32 to vector<1x256xf32>
    %15 = arith.divf %11, %14 : vector<1x256xf32>
    %16 = arith.mulf %13, %13 : vector<1x256xf32>
    %17 = arith.subf %15, %16 : vector<1x256xf32>
    %cst_9 = arith.constant 0.000000e+00 : f32
    %18 = vector.broadcast %cst_9 : f32 to vector<1x256xf32>
    %19 = arith.maximumf %17, %18 : vector<1x256xf32>
    %cst_10 = arith.constant 9.99999974E-6 : f32
    %20 = vector.broadcast %cst_10 : f32 to vector<1x256xf32>
    %21 = arith.addf %19, %20 : vector<1x256xf32>
    %22 = math.rsqrt %21 : vector<1x256xf32>
    %23 = vector.broadcast %13 : vector<1x256xf32> to vector<8x256xf32>
    %24 = arith.subf %2, %23 : vector<8x256xf32>
    %25 = vector.broadcast %22 : vector<1x256xf32> to vector<8x256xf32>
    %26 = arith.mulf %24, %25 : vector<8x256xf32>
    %c0_11 = arith.constant 0 : index
    %c0_12 = arith.constant 0 : index
    %27 = vector.load %arg3[%c0_11, %c0_12] : memref<1x256xf32, #tpu.memory_space<vmem>>, vector<1x256xf32>
    %28 = vector.broadcast %27 : vector<1x256xf32> to vector<8x256xf32>
    %29 = arith.mulf %26, %28 : vector<8x256xf32>
    %c0_13 = arith.constant 0 : index
    %c0_14 = arith.constant 0 : index
    %30 = vector.load %arg4[%c0_13, %c0_14] : memref<1x256xf32, #tpu.memory_space<vmem>>, vector<1x256xf32>
    %31 = vector.broadcast %30 : vector<1x256xf32> to vector<8x256xf32>
    %32 = arith.addf %29, %31 : vector<8x256xf32>
    %cst_15 = arith.constant 2.000000e-01 : f32
    %33 = vector.broadcast %cst_15 : f32 to vector<8x256xf32>
    %34 = arith.mulf %33, %32 : vector<8x256xf32>
    %35 = arith.maximumf %32, %34 : vector<8x256xf32>
    %36 = arith.truncf %35 : vector<8x256xf32> to vector<8x256xbf16>
    %c0_16 = arith.constant 0 : index
    %c0_17 = arith.constant 0 : index
    %37 = vector.load %arg5[%c0_16, %c0_17] : memref<8x256xbf16, #tpu.memory_space<vmem>>, vector<8x256xbf16>
    tpu.vector_store %arg5[%c0_16, %c0_17], %36 {strides = array<i32>} : memref<8x256xbf16, #tpu.memory_space<vmem>>, vector<8x256xbf16>,
    return
  }
  func.func @transform_0(%arg0: i32) -> (i32, i32) {
    %c0_i32 = arith.constant 0 : i32
    %c0_i32_0 = arith.constant 0 : i32
    return %arg0, %c0_i32 : i32, i32
  }
  func.func @transform_1(%arg0: i32) -> (i32, i32) {
    %c0_i32 = arith.constant 0 : i32
    %c0_i32_0 = arith.constant 0 : i32
    %c0_i32_1 = arith.constant 0 : i32
    return %c0_i32, %c0_i32_0 : i32, i32
  }
  func.func @transform_2(%arg0: i32) -> (i32, i32) {
    %c0_i32 = arith.constant 0 : i32
    %c0_i32_0 = arith.constant 0 : i32
    %c0_i32_1 = arith.constant 0 : i32
    return %c0_i32, %c0_i32_0 : i32, i32
  }
  func.func @transform_3(%arg0: i32) -> (i32, i32) {
    %c0_i32 = arith.constant 0 : i32
    %c0_i32_0 = arith.constant 0 : i32
    %c0_i32_1 = arith.constant 0 : i32
    return %c0_i32, %c0_i32_0 : i32, i32
  }
  func.func @transform_4(%arg0: i32) -> (i32, i32) {
    %c0_i32 = arith.constant 0 : i32
    %c0_i32_0 = arith.constant 0 : i32
    return %arg0, %c0_i32 : i32, i32
  }
}

module attributes {stable_mosaic.version = 11 : i64} {
  func.func @_fused_kernel(%arg0: i32, %arg1: memref<8x2304xbf16, #tpu.memory_space<vmem>>, %arg2: memref<2304x512xbf16, #tpu.memory_space<vmem>>, %arg3: memref<1x512xf32, #tpu.memory_space<vmem>>, %arg4: memref<1x512xf32, #tpu.memory_space<vmem>>, %arg5: memref<8x512xbf16, #tpu.memory_space<vmem>>) attributes {dimension_semantics = [#tpu.dimension_semantics<parallel>], iteration_bounds = array<i64: 1>, scalar_prefetch = 0 : i64, scratch_operands = 0 : i64, tpu.core_type = #tpu.core_type<tc>, window_params = [{transform_indices = @transform_0, window_bounds = array<i64: 8, 2304>}, {pipeline_mode = #tpu.pipeline_mode<synchronous>, transform_indices = @transform_1, window_bounds = array<i64: 2304, 512>}, {pipeline_mode = #tpu.pipeline_mode<synchronous>, transform_indices = @transform_2, window_bounds = array<i64: 1, 512>}, {pipeline_mode = #tpu.pipeline_mode<synchronous>, transform_indices = @transform_3, window_bounds = array<i64: 1, 512>}, {transform_indices = @transform_4, window_bounds = array<i64: 8, 512>}]} {
    %c0 = arith.constant 0 : index
    %c0_0 = arith.constant 0 : index
    %0 = vector.load %arg1[%c0, %c0_0] : memref<8x2304xbf16, #tpu.memory_space<vmem>>, vector<8x2304xbf16>
    %c0_1 = arith.constant 0 : index
    %c0_2 = arith.constant 0 : index
    %1 = vector.load %arg2[%c0_1, %c0_2] : memref<2304x512xbf16, #tpu.memory_space<vmem>>, vector<2304x512xbf16>
    %cst = arith.constant dense<0.000000e+00> : vector<8x512xf32>
    %2 = tpu.matmul %0, %1, %cst {dimension_numbers = #tpu.dot_dimension_numbers<[1], [0], [0], [1], [0, 0, 1, 1], [], []>} : vector<8x2304xbf16>, vector<2304x512xbf16>, vector<8x512xf32> -> vector<8x512xf32>
    %cst_3 = arith.constant 0.000000e+00 : f32
    %3 = vector.broadcast %cst_3 : f32 to vector<1x128xf32>
    %cst_4 = arith.constant 0.000000e+00 : f32
    %4 = vector.broadcast %cst_4 : f32 to vector<1x128xf32>
    %5 = vector.extract_strided_slice %2 {offsets = [0, 0], sizes = [8, 128], strides = [1, 1]} : vector<8x512xf32> to vector<8x128xf32>
    %cst_5 = arith.constant dense<0.000000e+00> : vector<128xf32>
    %6 = vector.multi_reduction <add>, %5, %cst_5 [0] : vector<8x128xf32> to vector<128xf32>
    %7 = vector.shape_cast %6 : vector<128xf32> to vector<1x128xf32>
    %8 = arith.addf %3, %7 : vector<1x128xf32>
    %9 = arith.mulf %5, %5 : vector<8x128xf32>
    %cst_6 = arith.constant dense<0.000000e+00> : vector<128xf32>
    %10 = vector.multi_reduction <add>, %9, %cst_6 [0] : vector<8x128xf32> to vector<128xf32>
    %11 = vector.shape_cast %10 : vector<128xf32> to vector<1x128xf32>
    %12 = arith.addf %4, %11 : vector<1x128xf32>
    %13 = vector.extract_strided_slice %2 {offsets = [0, 128], sizes = [8, 128], strides = [1, 1]} : vector<8x512xf32> to vector<8x128xf32>
    %cst_7 = arith.constant dense<0.000000e+00> : vector<128xf32>
    %14 = vector.multi_reduction <add>, %13, %cst_7 [0] : vector<8x128xf32> to vector<128xf32>
    %15 = vector.shape_cast %14 : vector<128xf32> to vector<1x128xf32>
    %16 = arith.addf %8, %15 : vector<1x128xf32>
    %17 = arith.mulf %13, %13 : vector<8x128xf32>
    %cst_8 = arith.constant dense<0.000000e+00> : vector<128xf32>
    %18 = vector.multi_reduction <add>, %17, %cst_8 [0] : vector<8x128xf32> to vector<128xf32>
    %19 = vector.shape_cast %18 : vector<128xf32> to vector<1x128xf32>
    %20 = arith.addf %12, %19 : vector<1x128xf32>
    %21 = vector.extract_strided_slice %2 {offsets = [0, 256], sizes = [8, 128], strides = [1, 1]} : vector<8x512xf32> to vector<8x128xf32>
    %cst_9 = arith.constant dense<0.000000e+00> : vector<128xf32>
    %22 = vector.multi_reduction <add>, %21, %cst_9 [0] : vector<8x128xf32> to vector<128xf32>
    %23 = vector.shape_cast %22 : vector<128xf32> to vector<1x128xf32>
    %24 = arith.addf %16, %23 : vector<1x128xf32>
    %25 = arith.mulf %21, %21 : vector<8x128xf32>
    %cst_10 = arith.constant dense<0.000000e+00> : vector<128xf32>
    %26 = vector.multi_reduction <add>, %25, %cst_10 [0] : vector<8x128xf32> to vector<128xf32>
    %27 = vector.shape_cast %26 : vector<128xf32> to vector<1x128xf32>
    %28 = arith.addf %20, %27 : vector<1x128xf32>
    %29 = vector.extract_strided_slice %2 {offsets = [0, 384], sizes = [8, 128], strides = [1, 1]} : vector<8x512xf32> to vector<8x128xf32>
    %cst_11 = arith.constant dense<0.000000e+00> : vector<128xf32>
    %30 = vector.multi_reduction <add>, %29, %cst_11 [0] : vector<8x128xf32> to vector<128xf32>
    %31 = vector.shape_cast %30 : vector<128xf32> to vector<1x128xf32>
    %32 = arith.addf %24, %31 : vector<1x128xf32>
    %33 = arith.mulf %29, %29 : vector<8x128xf32>
    %cst_12 = arith.constant dense<0.000000e+00> : vector<128xf32>
    %34 = vector.multi_reduction <add>, %33, %cst_12 [0] : vector<8x128xf32> to vector<128xf32>
    %35 = vector.shape_cast %34 : vector<128xf32> to vector<1x128xf32>
    %36 = arith.addf %28, %35 : vector<1x128xf32>
    %cst_13 = arith.constant 3.200000e+01 : f32
    %37 = vector.broadcast %cst_13 : f32 to vector<1x128xf32>
    %38 = arith.divf %32, %37 : vector<1x128xf32>
    %cst_14 = arith.constant 3.200000e+01 : f32
    %39 = vector.broadcast %cst_14 : f32 to vector<1x128xf32>
    %40 = arith.divf %36, %39 : vector<1x128xf32>
    %41 = arith.mulf %38, %38 : vector<1x128xf32>
    %42 = arith.subf %40, %41 : vector<1x128xf32>
    %cst_15 = arith.constant 0.000000e+00 : f32
    %43 = vector.broadcast %cst_15 : f32 to vector<1x128xf32>
    %44 = arith.maximumf %42, %43 : vector<1x128xf32>
    %cst_16 = arith.constant 9.99999974E-6 : f32
    %45 = vector.broadcast %cst_16 : f32 to vector<1x128xf32>
    %46 = arith.addf %44, %45 : vector<1x128xf32>
    %47 = math.rsqrt %46 : vector<1x128xf32>
    %48 = tpu.concatenate %38, %38, %38, %38 in 1 : vector<1x128xf32>, vector<1x128xf32>, vector<1x128xf32>, vector<1x128xf32> -> vector<1x512xf32>
    %49 = tpu.concatenate %47, %47, %47, %47 in 1 : vector<1x128xf32>, vector<1x128xf32>, vector<1x128xf32>, vector<1x128xf32> -> vector<1x512xf32>
    %50 = vector.broadcast %48 : vector<1x512xf32> to vector<8x512xf32>
    %51 = arith.subf %2, %50 : vector<8x512xf32>
    %52 = vector.broadcast %49 : vector<1x512xf32> to vector<8x512xf32>
    %53 = arith.mulf %51, %52 : vector<8x512xf32>
    %c0_17 = arith.constant 0 : index
    %c0_18 = arith.constant 0 : index
    %54 = vector.load %arg3[%c0_17, %c0_18] : memref<1x512xf32, #tpu.memory_space<vmem>>, vector<1x512xf32>
    %55 = vector.broadcast %54 : vector<1x512xf32> to vector<8x512xf32>
    %56 = arith.mulf %53, %55 : vector<8x512xf32>
    %c0_19 = arith.constant 0 : index
    %c0_20 = arith.constant 0 : index
    %57 = vector.load %arg4[%c0_19, %c0_20] : memref<1x512xf32, #tpu.memory_space<vmem>>, vector<1x512xf32>
    %58 = vector.broadcast %57 : vector<1x512xf32> to vector<8x512xf32>
    %59 = arith.addf %56, %58 : vector<8x512xf32>
    %cst_21 = arith.constant 0.000000e+00 : f32
    %60 = vector.broadcast %cst_21 : f32 to vector<8x512xf32>
    %61 = arith.maximumf %59, %60 : vector<8x512xf32>
    %62 = arith.truncf %61 : vector<8x512xf32> to vector<8x512xbf16>
    %c0_22 = arith.constant 0 : index
    %c0_23 = arith.constant 0 : index
    %63 = vector.load %arg5[%c0_22, %c0_23] : memref<8x512xbf16, #tpu.memory_space<vmem>>, vector<8x512xbf16>
    tpu.vector_store %arg5[%c0_22, %c0_23], %62 {strides = array<i32>} : memref<8x512xbf16, #tpu.memory_space<vmem>>, vector<8x512xbf16>,
    return
  }
  func.func @transform_0(%arg0: i32) -> (i32, i32) {
    %c0_i32 = arith.constant 0 : i32
    %c0_i32_0 = arith.constant 0 : i32
    return %arg0, %c0_i32 : i32, i32
  }
  func.func @transform_1(%arg0: i32) -> (i32, i32) {
    %c0_i32 = arith.constant 0 : i32
    %c0_i32_0 = arith.constant 0 : i32
    %c0_i32_1 = arith.constant 0 : i32
    return %c0_i32, %c0_i32_0 : i32, i32
  }
  func.func @transform_2(%arg0: i32) -> (i32, i32) {
    %c0_i32 = arith.constant 0 : i32
    %c0_i32_0 = arith.constant 0 : i32
    %c0_i32_1 = arith.constant 0 : i32
    return %c0_i32, %c0_i32_0 : i32, i32
  }
  func.func @transform_3(%arg0: i32) -> (i32, i32) {
    %c0_i32 = arith.constant 0 : i32
    %c0_i32_0 = arith.constant 0 : i32
    %c0_i32_1 = arith.constant 0 : i32
    return %c0_i32, %c0_i32_0 : i32, i32
  }
  func.func @transform_4(%arg0: i32) -> (i32, i32) {
    %c0_i32 = arith.constant 0 : i32
    %c0_i32_0 = arith.constant 0 : i32
    return %arg0, %c0_i32 : i32, i32
  }
}

module attributes {stable_mosaic.version = 11 : i64} {
  func.func @_fused_kernel(%arg0: i32, %arg1: memref<32x1152xbf16, #tpu.memory_space<vmem>>, %arg2: memref<1152x512xbf16, #tpu.memory_space<vmem>>, %arg3: memref<1x512xf32, #tpu.memory_space<vmem>>, %arg4: memref<1x512xf32, #tpu.memory_space<vmem>>, %arg5: memref<32x512xbf16, #tpu.memory_space<vmem>>) attributes {dimension_semantics = [#tpu.dimension_semantics<parallel>], iteration_bounds = array<i64: 1>, scalar_prefetch = 0 : i64, scratch_operands = 0 : i64, tpu.core_type = #tpu.core_type<tc>, window_params = [{transform_indices = @transform_0, window_bounds = array<i64: 32, 1152>}, {pipeline_mode = #tpu.pipeline_mode<synchronous>, transform_indices = @transform_1, window_bounds = array<i64: 1152, 512>}, {pipeline_mode = #tpu.pipeline_mode<synchronous>, transform_indices = @transform_2, window_bounds = array<i64: 1, 512>}, {pipeline_mode = #tpu.pipeline_mode<synchronous>, transform_indices = @transform_3, window_bounds = array<i64: 1, 512>}, {transform_indices = @transform_4, window_bounds = array<i64: 32, 512>}]} {
    %c0 = arith.constant 0 : index
    %c0_0 = arith.constant 0 : index
    %0 = vector.load %arg1[%c0, %c0_0] : memref<32x1152xbf16, #tpu.memory_space<vmem>>, vector<32x1152xbf16>
    %c0_1 = arith.constant 0 : index
    %c0_2 = arith.constant 0 : index
    %1 = vector.load %arg2[%c0_1, %c0_2] : memref<1152x512xbf16, #tpu.memory_space<vmem>>, vector<1152x512xbf16>
    %cst = arith.constant dense<0.000000e+00> : vector<32x512xf32>
    %2 = tpu.matmul %0, %1, %cst {dimension_numbers = #tpu.dot_dimension_numbers<[1], [0], [0], [1], [0, 0, 1, 1], [], []>} : vector<32x1152xbf16>, vector<1152x512xbf16>, vector<32x512xf32> -> vector<32x512xf32>
    %cst_3 = arith.constant 0.000000e+00 : f32
    %3 = vector.broadcast %cst_3 : f32 to vector<1x128xf32>
    %cst_4 = arith.constant 0.000000e+00 : f32
    %4 = vector.broadcast %cst_4 : f32 to vector<1x128xf32>
    %5 = vector.extract_strided_slice %2 {offsets = [0, 0], sizes = [32, 128], strides = [1, 1]} : vector<32x512xf32> to vector<32x128xf32>
    %cst_5 = arith.constant dense<0.000000e+00> : vector<128xf32>
    %6 = vector.multi_reduction <add>, %5, %cst_5 [0] : vector<32x128xf32> to vector<128xf32>
    %7 = vector.shape_cast %6 : vector<128xf32> to vector<1x128xf32>
    %8 = arith.addf %3, %7 : vector<1x128xf32>
    %9 = arith.mulf %5, %5 : vector<32x128xf32>
    %cst_6 = arith.constant dense<0.000000e+00> : vector<128xf32>
    %10 = vector.multi_reduction <add>, %9, %cst_6 [0] : vector<32x128xf32> to vector<128xf32>
    %11 = vector.shape_cast %10 : vector<128xf32> to vector<1x128xf32>
    %12 = arith.addf %4, %11 : vector<1x128xf32>
    %13 = vector.extract_strided_slice %2 {offsets = [0, 128], sizes = [32, 128], strides = [1, 1]} : vector<32x512xf32> to vector<32x128xf32>
    %cst_7 = arith.constant dense<0.000000e+00> : vector<128xf32>
    %14 = vector.multi_reduction <add>, %13, %cst_7 [0] : vector<32x128xf32> to vector<128xf32>
    %15 = vector.shape_cast %14 : vector<128xf32> to vector<1x128xf32>
    %16 = arith.addf %8, %15 : vector<1x128xf32>
    %17 = arith.mulf %13, %13 : vector<32x128xf32>
    %cst_8 = arith.constant dense<0.000000e+00> : vector<128xf32>
    %18 = vector.multi_reduction <add>, %17, %cst_8 [0] : vector<32x128xf32> to vector<128xf32>
    %19 = vector.shape_cast %18 : vector<128xf32> to vector<1x128xf32>
    %20 = arith.addf %12, %19 : vector<1x128xf32>
    %21 = vector.extract_strided_slice %2 {offsets = [0, 256], sizes = [32, 128], strides = [1, 1]} : vector<32x512xf32> to vector<32x128xf32>
    %cst_9 = arith.constant dense<0.000000e+00> : vector<128xf32>
    %22 = vector.multi_reduction <add>, %21, %cst_9 [0] : vector<32x128xf32> to vector<128xf32>
    %23 = vector.shape_cast %22 : vector<128xf32> to vector<1x128xf32>
    %24 = arith.addf %16, %23 : vector<1x128xf32>
    %25 = arith.mulf %21, %21 : vector<32x128xf32>
    %cst_10 = arith.constant dense<0.000000e+00> : vector<128xf32>
    %26 = vector.multi_reduction <add>, %25, %cst_10 [0] : vector<32x128xf32> to vector<128xf32>
    %27 = vector.shape_cast %26 : vector<128xf32> to vector<1x128xf32>
    %28 = arith.addf %20, %27 : vector<1x128xf32>
    %29 = vector.extract_strided_slice %2 {offsets = [0, 384], sizes = [32, 128], strides = [1, 1]} : vector<32x512xf32> to vector<32x128xf32>
    %cst_11 = arith.constant dense<0.000000e+00> : vector<128xf32>
    %30 = vector.multi_reduction <add>, %29, %cst_11 [0] : vector<32x128xf32> to vector<128xf32>
    %31 = vector.shape_cast %30 : vector<128xf32> to vector<1x128xf32>
    %32 = arith.addf %24, %31 : vector<1x128xf32>
    %33 = arith.mulf %29, %29 : vector<32x128xf32>
    %cst_12 = arith.constant dense<0.000000e+00> : vector<128xf32>
    %34 = vector.multi_reduction <add>, %33, %cst_12 [0] : vector<32x128xf32> to vector<128xf32>
    %35 = vector.shape_cast %34 : vector<128xf32> to vector<1x128xf32>
    %36 = arith.addf %28, %35 : vector<1x128xf32>
    %cst_13 = arith.constant 1.280000e+02 : f32
    %37 = vector.broadcast %cst_13 : f32 to vector<1x128xf32>
    %38 = arith.divf %32, %37 : vector<1x128xf32>
    %cst_14 = arith.constant 1.280000e+02 : f32
    %39 = vector.broadcast %cst_14 : f32 to vector<1x128xf32>
    %40 = arith.divf %36, %39 : vector<1x128xf32>
    %41 = arith.mulf %38, %38 : vector<1x128xf32>
    %42 = arith.subf %40, %41 : vector<1x128xf32>
    %cst_15 = arith.constant 0.000000e+00 : f32
    %43 = vector.broadcast %cst_15 : f32 to vector<1x128xf32>
    %44 = arith.maximumf %42, %43 : vector<1x128xf32>
    %cst_16 = arith.constant 9.99999974E-6 : f32
    %45 = vector.broadcast %cst_16 : f32 to vector<1x128xf32>
    %46 = arith.addf %44, %45 : vector<1x128xf32>
    %47 = math.rsqrt %46 : vector<1x128xf32>
    %48 = tpu.concatenate %38, %38, %38, %38 in 1 : vector<1x128xf32>, vector<1x128xf32>, vector<1x128xf32>, vector<1x128xf32> -> vector<1x512xf32>
    %49 = tpu.concatenate %47, %47, %47, %47 in 1 : vector<1x128xf32>, vector<1x128xf32>, vector<1x128xf32>, vector<1x128xf32> -> vector<1x512xf32>
    %50 = vector.broadcast %48 : vector<1x512xf32> to vector<32x512xf32>
    %51 = arith.subf %2, %50 : vector<32x512xf32>
    %52 = vector.broadcast %49 : vector<1x512xf32> to vector<32x512xf32>
    %53 = arith.mulf %51, %52 : vector<32x512xf32>
    %c0_17 = arith.constant 0 : index
    %c0_18 = arith.constant 0 : index
    %54 = vector.load %arg3[%c0_17, %c0_18] : memref<1x512xf32, #tpu.memory_space<vmem>>, vector<1x512xf32>
    %55 = vector.broadcast %54 : vector<1x512xf32> to vector<32x512xf32>
    %56 = arith.mulf %53, %55 : vector<32x512xf32>
    %c0_19 = arith.constant 0 : index
    %c0_20 = arith.constant 0 : index
    %57 = vector.load %arg4[%c0_19, %c0_20] : memref<1x512xf32, #tpu.memory_space<vmem>>, vector<1x512xf32>
    %58 = vector.broadcast %57 : vector<1x512xf32> to vector<32x512xf32>
    %59 = arith.addf %56, %58 : vector<32x512xf32>
    %cst_21 = arith.constant 0.000000e+00 : f32
    %60 = vector.broadcast %cst_21 : f32 to vector<32x512xf32>
    %61 = arith.maximumf %59, %60 : vector<32x512xf32>
    %62 = arith.truncf %61 : vector<32x512xf32> to vector<32x512xbf16>
    %c0_22 = arith.constant 0 : index
    %c0_23 = arith.constant 0 : index
    %63 = vector.load %arg5[%c0_22, %c0_23] : memref<32x512xbf16, #tpu.memory_space<vmem>>, vector<32x512xbf16>
    tpu.vector_store %arg5[%c0_22, %c0_23], %62 {strides = array<i32>} : memref<32x512xbf16, #tpu.memory_space<vmem>>, vector<32x512xbf16>,
    return
  }
  func.func @transform_0(%arg0: i32) -> (i32, i32) {
    %c0_i32 = arith.constant 0 : i32
    %c0_i32_0 = arith.constant 0 : i32
    return %arg0, %c0_i32 : i32, i32
  }
  func.func @transform_1(%arg0: i32) -> (i32, i32) {
    %c0_i32 = arith.constant 0 : i32
    %c0_i32_0 = arith.constant 0 : i32
    %c0_i32_1 = arith.constant 0 : i32
    return %c0_i32, %c0_i32_0 : i32, i32
  }
  func.func @transform_2(%arg0: i32) -> (i32, i32) {
    %c0_i32 = arith.constant 0 : i32
    %c0_i32_0 = arith.constant 0 : i32
    %c0_i32_1 = arith.constant 0 : i32
    return %c0_i32, %c0_i32_0 : i32, i32
  }
  func.func @transform_3(%arg0: i32) -> (i32, i32) {
    %c0_i32 = arith.constant 0 : i32
    %c0_i32_0 = arith.constant 0 : i32
    %c0_i32_1 = arith.constant 0 : i32
    return %c0_i32, %c0_i32_0 : i32, i32
  }
  func.func @transform_4(%arg0: i32) -> (i32, i32) {
    %c0_i32 = arith.constant 0 : i32
    %c0_i32_0 = arith.constant 0 : i32
    return %arg0, %c0_i32 : i32, i32
  }
}

module attributes {stable_mosaic.version = 11 : i64} {
  func.func @_fused_kernel(%arg0: i32, %arg1: memref<64x576xbf16, #tpu.memory_space<vmem>>, %arg2: memref<576x512xbf16, #tpu.memory_space<vmem>>, %arg3: memref<64x512xf32, #tpu.memory_space<vmem>>) attributes {dimension_semantics = [#tpu.dimension_semantics<parallel>], iteration_bounds = array<i64: 2>, scalar_prefetch = 0 : i64, scratch_operands = 0 : i64, tpu.core_type = #tpu.core_type<tc>, window_params = [{transform_indices = @transform_0, window_bounds = array<i64: 64, 576>}, {pipeline_mode = #tpu.pipeline_mode<synchronous>, transform_indices = @transform_1, window_bounds = array<i64: 576, 512>}, {transform_indices = @transform_2, window_bounds = array<i64: 64, 512>}]} {
    %c0 = arith.constant 0 : index
    %c0_0 = arith.constant 0 : index
    %0 = vector.load %arg1[%c0, %c0_0] : memref<64x576xbf16, #tpu.memory_space<vmem>>, vector<64x576xbf16>
    %c0_1 = arith.constant 0 : index
    %c0_2 = arith.constant 0 : index
    %1 = vector.load %arg2[%c0_1, %c0_2] : memref<576x512xbf16, #tpu.memory_space<vmem>>, vector<576x512xbf16>
    %cst = arith.constant dense<0.000000e+00> : vector<64x512xf32>
    %2 = tpu.matmul %0, %1, %cst {dimension_numbers = #tpu.dot_dimension_numbers<[1], [0], [0], [1], [0, 0, 1, 1], [], []>} : vector<64x576xbf16>, vector<576x512xbf16>, vector<64x512xf32> -> vector<64x512xf32>
    %3 = math.tanh %2 : vector<64x512xf32>
    %c0_3 = arith.constant 0 : index
    %c0_4 = arith.constant 0 : index
    %4 = vector.load %arg3[%c0_3, %c0_4] : memref<64x512xf32, #tpu.memory_space<vmem>>, vector<64x512xf32>
    tpu.vector_store %arg3[%c0_3, %c0_4], %3 {strides = array<i32>} : memref<64x512xf32, #tpu.memory_space<vmem>>, vector<64x512xf32>,
    return
  }
  func.func @transform_0(%arg0: i32) -> (i32, i32) {
    %c0_i32 = arith.constant 0 : i32
    %c0_i32_0 = arith.constant 0 : i32
    return %arg0, %c0_i32 : i32, i32
  }
  func.func @transform_1(%arg0: i32) -> (i32, i32) {
    %c0_i32 = arith.constant 0 : i32
    %c0_i32_0 = arith.constant 0 : i32
    %c0_i32_1 = arith.constant 0 : i32
    return %c0_i32, %c0_i32_0 : i32, i32
  }
  func.func @transform_2(%arg0: i32) -> (i32, i32) {
    %c0_i32 = arith.constant 0 : i32
    %c0_i32_0 = arith.constant 0 : i32
    return %arg0, %c0_i32 : i32, i32
  }
}

</mosaic_0001>

<bundles_post_ra>
// kernel: gen_dt_forward.6
= control target key start
LH: loop header
LB: loop body
LE: loop exit
PB: predicated region body
PF: predicated region fallthrough
CT: control target
= control target key end

     0   :  { %s695_s9 = smov 0   ;;  %s774_s0 = inlined_call_operand.vmem [shape: bf16[128,256], index: 0, kind: input, shape index: {}]   ;;  %s775_s1 = inlined_call_operand.vmem [shape: bf16[256,128], index: 1, kind: input, shape index: {}]   ;;  %s776_s2 = inlined_call_operand.vmem [shape: bf16[128,128], index: 2, kind: output, shape index: {}]  }
   0x1 LB: > { %s504_s10 = sadd.s32 4294967295, %s678_s9   ;;  %p508_p0 = scmp.ge.s32.totalorder %s678_s9, 1  ;;  %s678_s9 = sphi %s695_s9, %s12_s9  }
   0x2   : > { %p114_p1 = scmp.lt.s32.totalorder %s678_s9, 3 }
   0x4   : > { %p115_p2 = pnand %p508_p0, %p114_p1 }
   0x5   : > { %v644_v0 = vld [vmem:[%s775_s1 + $0x40] sm:$0xff] (!%p115_p2)   ;;  %s509_s13 = sshll.u32 (!%p115_p2), %s504_s10, 3  ;;  %v646_v2 = vld [vmem:[%s775_s1 + $0x48] sm:$0xff] (!%p115_p2)   ;;  %v648_v4 = vld [vmem:[%s775_s1 + $0x50] sm:$0xff] (!%p115_p2)  }
   0x6   : > { %118 = sbr.rel (%p115_p2) target bundleno = 270 (0x10e), region = 28  ;;  %v645_v1 = vld [vmem:[%s775_s1] sm:$0xff] (!%p115_p2)   ;;  %580 = vmatprep.subr.bf16.mxu0 (!%p115_p2), %v644_v0  ;;  %620 = vmatprep.subr.bf16.mxu1 (!%p115_p2), %v644_v0  ;;  %v647_v3 = vld [vmem:[%s775_s1 + $0x8] sm:$0xff] (!%p115_p2)   ;;  %p138_p3 = scmp.lt.s32.totalorder (!%p115_p2), %s509_s13, 15  ;;  %v649_v5 = vld [vmem:[%s775_s1 + $0x10] sm:$0xff] (!%p115_p2)  }
   0x7   : > { %581 = vmatpush3.bf16.msra.mxu0 (!%p115_p2), %v645_v1  ;;  %628 = vmatpush3.bf16.msra.mxu1 (!%p115_p2), %v645_v1  ;;  %v650_v6 = vld [vmem:[%s775_s1 + $0x58] sm:$0xff] (!%p115_p2)   ;;  %v652_v8 = vld [vmem:[%s775_s1 + $0x60] sm:$0xff] (!%p115_p2)   ;;  %v654_v10 = vld [vmem:[%s775_s1 + $0x68] sm:$0xff] (!%p115_p2)  }
   0x8   : > { %582 = vmatprep.subr.bf16.mxu0 (!%p115_p2), %v646_v2  ;;  %621 = vmatprep.subr.bf16.mxu1 (!%p115_p2), %v646_v2  ;;  %v651_v7 = vld [vmem:[%s775_s1 + $0x18] sm:$0xff] (!%p115_p2)   ;;  %v653_v9 = vld [vmem:[%s775_s1 + $0x20] sm:$0xff] (!%p115_p2)   ;;  %v655_v13 = vld [vmem:[%s775_s1 + $0x28] sm:$0xff] (!%p115_p2)  }
   0x9   : > { %v656_v14 = vld [vmem:[%s775_s1 + $0x70] sm:$0xff] (!%p115_p2)   ;;  %v658_v16 = vld [vmem:[%s775_s1 + $0x78] sm:$0xff] (!%p115_p2)  }
   0xa   : > { %v657_v15 = vld [vmem:[%s775_s1 + $0x30] sm:$0xff] (!%p115_p2)   ;;  %v659_v17 = vld [vmem:[%s775_s1 + $0x38] sm:$0xff] (!%p115_p2)  }
   0xb   : > { %583 = vmatpush3.bf16.msra.mxu0 (!%p115_p2), %v647_v3  ;;  %629 = vmatpush3.bf16.msra.mxu1 (!%p115_p2), %v647_v3 }
   0xc   : > { %584 = vmatprep.subr.bf16.mxu0 (!%p115_p2), %v648_v4  ;;  %622 = vmatprep.subr.bf16.mxu1 (!%p115_p2), %v648_v4 }
   0xd   : > { %s778_s13 = smov (!%p138_p3, %s509_s13), 15 }
   0xe   : > { %s548_s28 = sshll.u32 %s778_s13, 3  ;;  %s513_s22 = sshll.u32 %s778_s13, 2 }
   0xf   : > { %585 = vmatpush3.bf16.msra.mxu0 %v649_v5  ;;  %630 = vmatpush3.bf16.msra.mxu1 %v649_v5  ;;  %s736_s5 = scalar_lea.vmem %s774_s0, %s548_s28  ;;  %s148_s25 = scalar_lea.vmem %s776_s2, %s513_s22 }
  0x10   : > { %586 = vmatprep.subr.bf16.mxu0 %v650_v6  ;;  %623 = vmatprep.subr.bf16.mxu1 %v650_v6  ;;  %v662_v11 = vld [vmem:[%s736_s5 + $0x4] ss:$8 sps:$4 sm:$0xff]   ;;  %v660_v18 = vld [vmem:[%s736_s5] ss:$8 sps:$4 sm:$0xff]   ;;  %v666_v20 = vld [vmem:[%s736_s5 + $0x14] ss:$8 sps:$4 sm:$0xff]  }
  0x11   : > { %v665_v12 = vld [vmem:[%s736_s5 + $0x24] ss:$8 sps:$4 sm:$0xff]   ;;  %359 = vmatprep.mubr.bf16.mxu0 %v662_v11  ;;  %v663_v19 = vld [vmem:[%s736_s5 + $0x20] ss:$8 sps:$4 sm:$0xff]   ;;  %v668_v21 = vld [vmem:[%s736_s5 + $0x34] ss:$8 sps:$4 sm:$0xff]  }
  0x12   : > { %375 = vmatprep.mubr.bf16.mxu1 %v665_v12  ;;  %v670_v22 = vld [vmem:[%s736_s5 + $0x10] ss:$8 sps:$4 sm:$0xff]  }
  0x13   : > { %587 = vmatpush3.bf16.msra.mxu0 %v651_v7  ;;  %631 = vmatpush3.bf16.msra.mxu1 %v651_v7  ;;  %v671_v23 = vld [vmem:[%s736_s5 + $0x30] ss:$8 sps:$4 sm:$0xff]  }
  0x14   : > { %588 = vmatprep.subr.bf16.mxu0 %v652_v8  ;;  %624 = vmatprep.subr.bf16.mxu1 %v652_v8 }
  0x17   : > { %589 = vmatpush3.bf16.msra.mxu0 %v653_v9  ;;  %632 = vmatpush3.bf16.msra.mxu1 %v653_v9 }
  0x18   : > { %590 = vmatprep.subr.bf16.mxu0 %v654_v10  ;;  %625 = vmatprep.subr.bf16.mxu1 %v654_v10 }
  0x1b   : > { %591 = vmatpush3.bf16.msra.mxu0 %v655_v13  ;;  %633 = vmatpush3.bf16.msra.mxu1 %v655_v13 }
  0x1c   : > { %592 = vmatprep.subr.bf16.mxu0 %v656_v14  ;;  %626 = vmatprep.subr.bf16.mxu1 %v656_v14 }
  0x1f   : > { %593 = vmatpush3.bf16.msra.mxu0 %v657_v15  ;;  %634 = vmatpush3.bf16.msra.mxu1 %v657_v15 }
  0x20   : > { %594 = vmatprep.subr.bf16.mxu0 %v658_v16  ;;  %627 = vmatprep.subr.bf16.mxu1 %v658_v16 }
  0x23   : > { %595 = vmatpush3.bf16.msra.mxu0 %v659_v17  ;;  %635 = vmatpush3.bf16.msra.mxu1 %v659_v17 }
  0x26   : > { %360 = vmatmul.mubr.bf16.vlgmr.msra.gmra.mrb[0].mxu0 %v660_v18  ;;  %376 = vmatmul.mubr.bf16.vlgmr.msra.gmra.mrb[0].mxu1 %v663_v19 }
  0x27   : > { %367 = vmatprep.mubr.bf16.mxu0 %v666_v20  ;;  %383 = vmatprep.mubr.bf16.mxu1 %v668_v21 }
  0x2e   : > { %368 = vmatmul.mubr.bf16.gmra.mrb[4].mxu0 %v670_v22  ;;  %384 = vmatmul.mubr.bf16.gmra.mrb[4].mxu1 %v671_v23 }
  0xf9   : > { %v596_v24 = vpop.f32.mrb[0].mxu0  ;;  %v608_v25 = vpop.f32.mrb[0].mxu1 }
  0xfa   : > { %v597_v26 = vpop.f32.mrb[1].mxu0  ;;  %v609_v27 = vpop.f32.mrb[1].mxu1 }
  0xfb   : > { %v598_v28 = vadd.f32 %v597_v26, %v596_v24  ;;  %v610_v29 = vadd.f32 %v609_v27, %v608_v25  ;;  %v599_v30 = vpop.f32.mrb[2].mxu0  ;;  %v611_v31 = vpop.f32.mrb[2].mxu1 }
  0xfc   : > { %v600_v32 = vpop.f32.mrb[3].mxu0  ;;  %v612_v33 = vpop.f32.mrb[3].mxu1 }
  0xfd   : > { %v392_v34 = vmul.f32 0.2, %v598_v28  ;;  %v396_v35 = vmul.f32 0.2, %v610_v29  ;;  %v601_v36 = vadd.f32 %v600_v32, %v599_v30  ;;  %v613_v37 = vadd.f32 %v612_v33, %v611_v31 }
  0xff   : > { %v393_v38 = vmul.f32 0.2, %v601_v36  ;;  %v397_v39 = vmul.f32 0.2, %v613_v37  ;;  %v400_v40 = vmax.f32 %v598_v28, %v392_v34  ;;  %v404_v41 = vmax.f32 %v610_v29, %v396_v35 }
 0x101   : > { %v401_v42 = vmax.f32 %v601_v36, %v393_v38  ;;  %v405_v43 = vmax.f32 %v613_v37, %v397_v39  ;;  %v602_v44 = vpop.f32.mrb[4].mxu0  ;;  %v614_v45 = vpop.f32.mrb[4].mxu1 }
 0x102   : > { %v603_v46 = vpop.f32.mrb[5].mxu0  ;;  %v615_v47 = vpop.f32.mrb[5].mxu1 }
 0x103   : > { %v560_v48 = vpack.c.bf16 %v401_v42, %v400_v40  ;;  %v570_v49 = vpack.c.bf16 %v405_v43, %v404_v41  ;;  %v604_v50 = vadd.f32 %v603_v46, %v602_v44  ;;  %v616_v51 = vadd.f32 %v615_v47, %v614_v45  ;;  %v605_v52 = vpop.f32.mrb[6].mxu0  ;;  %v617_v53 = vpop.f32.mrb[6].mxu1 }
 0x104   : > { %v606_v54 = vpop.f32.mrb[7].mxu0  ;;  %v618_v55 = vpop.f32.mrb[7].mxu1 }
 0x105   : > { %561 = vst [vmem:[%s148_s25] sm:$0xff] %v560_v48   ;;  %578 = vst [vmem:[%s148_s25 + $0x10] sm:$0xff] %v570_v49   ;;  %v394_v56 = vmul.f32 0.2, %v604_v50  ;;  %v398_v57 = vmul.f32 0.2, %v616_v51  ;;  %v607_v58 = vadd.f32 %v606_v54, %v605_v52  ;;  %v619_v59 = vadd.f32 %v618_v55, %v617_v53 }
 0x107   : > { %v395_v60 = vmul.f32 0.2, %v607_v58  ;;  %v399_v61 = vmul.f32 0.2, %v619_v59  ;;  %v402_v62 = vmax.f32 %v604_v50, %v394_v56  ;;  %v406_v63 = vmax.f32 %v616_v51, %v398_v57 }
 0x109   : > { %v403_v0 = vmax.f32 %v607_v58, %v395_v60  ;;  %v407_v1 = vmax.f32 %v619_v59, %v399_v61 }
 0x10b   : > { %v565_v2 = vpack.c.bf16 %v403_v0, %v402_v62  ;;  %v575_v3 = vpack.c.bf16 %v407_v1, %v406_v63 }
 0x10d   : > { %577 = vst [vmem:[%s148_s25 + $0x8] sm:$0xff] %v565_v2   ;;  %579 = vst [vmem:[%s148_s25 + $0x18] sm:$0xff] %v575_v3  }
 0x10e PF: > { %s12_s9 = sadd.s32 1, %s678_s9  }
 0x10f   : > { %p9_p4 = scmp.ge.s32.totalorder %s12_s9, 4  }
 0x111   :  { %11 = sbr.rel (!%p9_p4) target bundleno = 1 (0x1), region = 58 }

// kernel: gen_dt_forward.7
= control target key start
LH: loop header
LB: loop body
LE: loop exit
PB: predicated region body
PF: predicated region fallthrough
CT: control target
= control target key end

     0   :  { %s1472_s1 = inlined_call_operand.vmem [shape: bf16[1024,128], index: 1, kind: input, shape index: {}]   ;;  %s1473_s0 = inlined_call_operand.vmem [shape: bf16[32,1024], index: 0, kind: input, shape index: {}]   ;;  %s1474_s2 = inlined_call_operand.vmem [shape: f32[1,128], index: 2, kind: input, shape index: {}]   ;;  %s1475_s3 = inlined_call_operand.vmem [shape: f32[1,128], index: 3, kind: input, shape index: {}]   ;;  %s1476_s4 = inlined_call_operand.vmem [shape: bf16[32,128], index: 4, kind: output, shape index: {}]  }
   0x1   :  { %v1129_v0 = vld [vmem:[%s1472_s1 + $0x40] sm:$0xff]   ;;  %v1133_v4 = vld [vmem:[%s1472_s1 + $0x48] sm:$0xff]   ;;  %v1137_v8 = vld [vmem:[%s1472_s1 + $0x50] sm:$0xff]  }
   0x2   :  { %v1130_v1 = vld [vmem:[%s1472_s1 + $0xc0] sm:$0xff]   ;;  %1017 = vmatprep.subr.bf16.mxu0 %v1129_v0  ;;  %v1134_v5 = vld [vmem:[%s1472_s1 + $0xc8] sm:$0xff]   ;;  %v1138_v9 = vld [vmem:[%s1472_s1 + $0xd0] sm:$0xff]  }
   0x3   :  { %v1131_v2 = vld [vmem:[%s1472_s1] sm:$0xff]   ;;  %1045 = vmatprep.subr.bf16.mxu1 %v1130_v1  ;;  %v1135_v6 = vld [vmem:[%s1472_s1 + $0x8] sm:$0xff]   ;;  %v1139_v10 = vld [vmem:[%s1472_s1 + $0x10] sm:$0xff]  }
   0x4   :  { %v1132_v3 = vld [vmem:[%s1472_s1 + $0x80] sm:$0xff]   ;;  %1018 = vmatpush3.bf16.msra.mxu0 %v1131_v2  ;;  %v1136_v7 = vld [vmem:[%s1472_s1 + $0x88] sm:$0xff]   ;;  %v1140_v11 = vld [vmem:[%s1472_s1 + $0x90] sm:$0xff]  }
   0x5   :  { %1046 = vmatpush3.bf16.msra.mxu1 %v1132_v3  ;;  %1019 = vmatprep.subr.bf16.mxu0 %v1133_v4  ;;  %v1141_v12 = vld [vmem:[%s1472_s1 + $0x58] sm:$0xff]   ;;  %v1145_v16 = vld [vmem:[%s1472_s1 + $0x60] sm:$0xff]   ;;  %v1149_v20 = vld [vmem:[%s1472_s1 + $0x68] sm:$0xff]  }
   0x6   :  { %1047 = vmatprep.subr.bf16.mxu1 %v1134_v5  ;;  %v1142_v13 = vld [vmem:[%s1472_s1 + $0xd8] sm:$0xff]   ;;  %v1146_v17 = vld [vmem:[%s1472_s1 + $0xe0] sm:$0xff]   ;;  %v1150_v21 = vld [vmem:[%s1472_s1 + $0xe8] sm:$0xff]  }
   0x7   :  { %v1143_v14 = vld [vmem:[%s1472_s1 + $0x18] sm:$0xff]   ;;  %v1147_v18 = vld [vmem:[%s1472_s1 + $0x20] sm:$0xff]   ;;  %v1151_v22 = vld [vmem:[%s1472_s1 + $0x28] sm:$0xff]  }
   0x8   :  { %1020 = vmatpush3.bf16.msra.mxu0 %v1135_v6  ;;  %v1144_v15 = vld [vmem:[%s1472_s1 + $0x98] sm:$0xff]   ;;  %v1148_v19 = vld [vmem:[%s1472_s1 + $0xa0] sm:$0xff]   ;;  %v1152_v23 = vld [vmem:[%s1472_s1 + $0xa8] sm:$0xff]  }
   0x9   :  { %1048 = vmatpush3.bf16.msra.mxu1 %v1136_v7  ;;  %1021 = vmatprep.subr.bf16.mxu0 %v1137_v8  ;;  %v1153_v24 = vld [vmem:[%s1472_s1 + $0x70] sm:$0xff]   ;;  %v1157_v28 = vld [vmem:[%s1472_s1 + $0x78] sm:$0xff]   ;;  %v18_v32 = vld [vmem:[%s1473_s0] sm:$0xff] }
   0xa   :  { %1049 = vmatprep.subr.bf16.mxu1 %v1138_v9  ;;  %v1154_v25 = vld [vmem:[%s1472_s1 + $0xf0] sm:$0xff]   ;;  %v1158_v29 = vld [vmem:[%s1472_s1 + $0xf8] sm:$0xff]   ;;  %v22_v33 = vld [vmem:[%s1473_s0 + $0x20] sm:$0xff] }
   0xb   :  { %v1155_v26 = vld [vmem:[%s1472_s1 + $0x30] sm:$0xff]   ;;  %v1159_v30 = vld [vmem:[%s1472_s1 + $0x38] sm:$0xff]   ;;  %v19_v34 = vld [vmem:[%s1473_s0 + $0x8] sm:$0xff]  ;;  %v916_v35 = vcombine.low %v18_v32, %v22_v33  ;;  %v917_v36 = vcombine.high %v18_v32, %v22_v33 }
   0xc   :  { %1022 = vmatpush3.bf16.msra.mxu0 %v1139_v10  ;;  %v1156_v27 = vld [vmem:[%s1472_s1 + $0xb0] sm:$0xff]   ;;  %v1160_v31 = vld [vmem:[%s1472_s1 + $0xb8] sm:$0xff]   ;;  %v23_v37 = vld [vmem:[%s1473_s0 + $0x28] sm:$0xff] }
   0xd   :  { %1050 = vmatpush3.bf16.msra.mxu1 %v1140_v11  ;;  %1023 = vmatprep.subr.bf16.mxu0 %v1141_v12  ;;  %v918_v38 = vcombine.low %v19_v34, %v23_v37  ;;  %v919_v39 = vcombine.high %v19_v34, %v23_v37  ;;  %v1161_v40 = vld [vmem:[%s1472_s1 + $0x140] sm:$0xff]   ;;  %v1165_v44 = vld [vmem:[%s1472_s1 + $0x148] sm:$0xff]   ;;  %v1169_v48 = vld [vmem:[%s1472_s1 + $0x150] sm:$0xff]  }
   0xe   :  { %1051 = vmatprep.subr.bf16.mxu1 %v1142_v13  ;;  %658 = vmatprep.mubr.bf16.mxu0 %v917_v36  ;;  %v1162_v41 = vld [vmem:[%s1472_s1 + $0x1c0] sm:$0xff]   ;;  %v1166_v45 = vld [vmem:[%s1472_s1 + $0x1c8] sm:$0xff]   ;;  %v1170_v49 = vld [vmem:[%s1472_s1 + $0x1d0] sm:$0xff]  }
   0xf   :  { %707 = vmatprep.mubr.bf16.mxu1 %v919_v39  ;;  %v1163_v42 = vld [vmem:[%s1472_s1 + $0x100] sm:$0xff]   ;;  %v1167_v46 = vld [vmem:[%s1472_s1 + $0x108] sm:$0xff]   ;;  %v1171_v50 = vld [vmem:[%s1472_s1 + $0x110] sm:$0xff]  }
  0x10   :  { %1024 = vmatpush3.bf16.msra.mxu0 %v1143_v14  ;;  %v1164_v43 = vld [vmem:[%s1472_s1 + $0x180] sm:$0xff]   ;;  %v1168_v47 = vld [vmem:[%s1472_s1 + $0x188] sm:$0xff]   ;;  %v1172_v51 = vld [vmem:[%s1472_s1 + $0x190] sm:$0xff]  }
  0x11   :  { %1052 = vmatpush3.bf16.msra.mxu1 %v1144_v15  ;;  %1025 = vmatprep.subr.bf16.mxu0 %v1145_v16  ;;  %v1173_v52 = vld [vmem:[%s1472_s1 + $0x158] sm:$0xff]   ;;  %v1177_v56 = vld [vmem:[%s1472_s1 + $0x160] sm:$0xff]   ;;  %v27_v63 = vld [vmem:[%s1473_s0 + $0x48] sm:$0xff] }
  0x12   :  { %1053 = vmatprep.subr.bf16.mxu1 %v1146_v17  ;;  %v1174_v53 = vld [vmem:[%s1472_s1 + $0x1d8] sm:$0xff]   ;;  %v1178_v57 = vld [vmem:[%s1472_s1 + $0x1e0] sm:$0xff]   ;;  %v31_v0 = vld [vmem:[%s1473_s0 + $0x68] sm:$0xff] }
  0x13   :  { %v1175_v54 = vld [vmem:[%s1472_s1 + $0x118] sm:$0xff]   ;;  %v1179_v58 = vld [vmem:[%s1472_s1 + $0x120] sm:$0xff]   ;;  %v927_v2 = vcombine.high %v27_v63, %v31_v0  ;;  %v1181_v3 = vld [vmem:[%s1472_s1 + $0x168] sm:$0xff]   ;;  %v926_v4 = vcombine.low %v27_v63, %v31_v0 }
  0x14   :  { %1026 = vmatpush3.bf16.msra.mxu0 %v1147_v18  ;;  %v1176_v55 = vld [vmem:[%s1472_s1 + $0x198] sm:$0xff]   ;;  %v1180_v59 = vld [vmem:[%s1472_s1 + $0x1a0] sm:$0xff]   ;;  %v1182_v5 = vld [vmem:[%s1472_s1 + $0x1e8] sm:$0xff]  }
  0x15   :  { %1054 = vmatpush3.bf16.msra.mxu1 %v1148_v19  ;;  %1027 = vmatprep.subr.bf16.mxu0 %v1149_v20  ;;  %v26_v60 = vld [vmem:[%s1473_s0 + $0x40] sm:$0xff]  ;;  %v1183_v6 = vld [vmem:[%s1472_s1 + $0x128] sm:$0xff]   ;;  %v1185_v8 = vld [vmem:[%s1472_s1 + $0x170] sm:$0xff]  }
  0x16   :  { %1055 = vmatprep.subr.bf16.mxu1 %v1150_v21  ;;  %v30_v61 = vld [vmem:[%s1473_s0 + $0x60] sm:$0xff]  ;;  %v1184_v7 = vld [vmem:[%s1472_s1 + $0x1a8] sm:$0xff]   ;;  %v1186_v9 = vld [vmem:[%s1472_s1 + $0x1f0] sm:$0xff]  }
  0x17   :  { %v925_v62 = vcombine.high %v26_v60, %v30_v61  ;;  %v924_v1 = vcombine.low %v26_v60, %v30_v61  ;;  %v1187_v10 = vld [vmem:[%s1472_s1 + $0x130] sm:$0xff]   ;;  %v1189_v12 = vld [vmem:[%s1472_s1 + $0x178] sm:$0xff]  }
  0x18   :  { %1028 = vmatpush3.bf16.msra.mxu0 %v1151_v22  ;;  %v1188_v11 = vld [vmem:[%s1472_s1 + $0x1b0] sm:$0xff]   ;;  %v1190_v13 = vld [vmem:[%s1472_s1 + $0x1f8] sm:$0xff]  }
  0x19   :  { %1056 = vmatpush3.bf16.msra.mxu1 %v1152_v23  ;;  %1029 = vmatprep.subr.bf16.mxu0 %v1153_v24  ;;  %v1191_v14 = vld [vmem:[%s1472_s1 + $0x138] sm:$0xff]   ;;  %v20_v16 = vld [vmem:[%s1473_s0 + $0x10] sm:$0xff] }
  0x1a   :  { %1057 = vmatprep.subr.bf16.mxu1 %v1154_v25  ;;  %v1192_v15 = vld [vmem:[%s1472_s1 + $0x1b8] sm:$0xff]   ;;  %v24_v17 = vld [vmem:[%s1473_s0 + $0x30] sm:$0xff] }
  0x1b   :  { %v21_v18 = vld [vmem:[%s1473_s0 + $0x18] sm:$0xff]  ;;  %v920_v20 = vcombine.low %v20_v16, %v24_v17  ;;  %v921_v21 = vcombine.high %v20_v16, %v24_v17  ;;  %v28_v24 = vld [vmem:[%s1473_s0 + $0x50] sm:$0xff] }
  0x1c   :  { %1030 = vmatpush3.bf16.msra.mxu0 %v1155_v26  ;;  %v25_v19 = vld [vmem:[%s1473_s0 + $0x38] sm:$0xff]  ;;  %v32_v25 = vld [vmem:[%s1473_s0 + $0x70] sm:$0xff] }
  0x1d   :  { %1058 = vmatpush3.bf16.msra.mxu1 %v1156_v27  ;;  %1031 = vmatprep.subr.bf16.mxu0 %v1157_v28  ;;  %v922_v22 = vcombine.low %v21_v18, %v25_v19  ;;  %v923_v23 = vcombine.high %v21_v18, %v25_v19  ;;  %v29_v26 = vld [vmem:[%s1473_s0 + $0x58] sm:$0xff]  ;;  %v929_v27 = vcombine.high %v28_v24, %v32_v25 }
  0x1e   :  { %1059 = vmatprep.subr.bf16.mxu1 %v1158_v29  ;;  %v33_v28 = vld [vmem:[%s1473_s0 + $0x78] sm:$0xff] }
  0x1f   :  { %v931_v29 = vcombine.high %v29_v26, %v33_v28 }
  0x20   :  { %1032 = vmatpush3.bf16.msra.mxu0 %v1159_v30  ;;  %v928_v30 = vcombine.low %v28_v24, %v32_v25 }
  0x21   :  { %1060 = vmatpush3.bf16.msra.mxu1 %v1160_v31  ;;  %1073 = vmatprep.subr.bf16.mxu0 %v1161_v40  ;;  %v930_v31 = vcombine.low %v29_v26, %v33_v28 }
  0x22   :  { %1101 = vmatprep.subr.bf16.mxu1 %v1162_v41 }
  0x23   :  { %659 = vmatmul.mubr.bf16.vlgmr.msra.gmra.mrb[0].mxu0 %v916_v35 }
  0x24   :  { %708 = vmatmul.mubr.bf16.vlgmr.msra.gmra.mrb[0].mxu1 %v918_v38  ;;  %1074 = vmatpush3.bf16.msra.mxu0 %v1163_v42 }
  0x25   :  { %1102 = vmatpush3.bf16.msra.mxu1 %v1164_v43  ;;  %1075 = vmatprep.subr.bf16.mxu0 %v1165_v44 }
  0x26   :  { %1103 = vmatprep.subr.bf16.mxu1 %v1166_v45  ;;  %666 = vmatprep.mubr.bf16.mxu0 %v925_v62 }
  0x27   :  { %715 = vmatprep.mubr.bf16.mxu1 %v927_v2 }
  0x28   :  { %1076 = vmatpush3.bf16.msra.mxu0 %v1167_v46 }
  0x29   :  { %1104 = vmatpush3.bf16.msra.mxu1 %v1168_v47  ;;  %1077 = vmatprep.subr.bf16.mxu0 %v1169_v48 }
  0x2a   :  { %1105 = vmatprep.subr.bf16.mxu1 %v1170_v49 }
  0x2b   :  { %667 = vmatmul.mubr.bf16.gmra.mrb[4].mxu0 %v924_v1 }
  0x2c   :  { %1078 = vmatpush3.bf16.msra.mxu0 %v1171_v50  ;;  %716 = vmatmul.mubr.bf16.gmra.mrb[4].mxu1 %v926_v4 }
  0x2d   :  { %1106 = vmatpush3.bf16.msra.mxu1 %v1172_v51  ;;  %1079 = vmatprep.subr.bf16.mxu0 %v1173_v52 }
  0x2e   :  { %1107 = vmatprep.subr.bf16.mxu1 %v1174_v53  ;;  %756 = vmatprep.mubr.bf16.mxu0 %v921_v21 }
  0x2f   :  { %805 = vmatprep.mubr.bf16.mxu1 %v923_v23 }
  0x30   :  { %1080 = vmatpush3.bf16.msra.mxu0 %v1175_v54 }
  0x31   :  { %1108 = vmatpush3.bf16.msra.mxu1 %v1176_v55  ;;  %1081 = vmatprep.subr.bf16.mxu0 %v1177_v56 }
  0x32   :  { %1109 = vmatprep.subr.bf16.mxu1 %v1178_v57 }
  0x34   :  { %1082 = vmatpush3.bf16.msra.mxu0 %v1179_v58 }
  0x35   :  { %1110 = vmatpush3.bf16.msra.mxu1 %v1180_v59  ;;  %1083 = vmatprep.subr.bf16.mxu0 %v1181_v3 }
  0x36   :  { %1111 = vmatprep.subr.bf16.mxu1 %v1182_v5 }
  0x38   :  { %1084 = vmatpush3.bf16.msra.mxu0 %v1183_v6 }
  0x39   :  { %1112 = vmatpush3.bf16.msra.mxu1 %v1184_v7  ;;  %1085 = vmatprep.subr.bf16.mxu0 %v1185_v8 }
  0x3a   :  { %1113 = vmatprep.subr.bf16.mxu1 %v1186_v9 }
  0x3c   :  { %1086 = vmatpush3.bf16.msra.mxu0 %v1187_v10 }
  0x3d   :  { %1114 = vmatpush3.bf16.msra.mxu1 %v1188_v11  ;;  %1087 = vmatprep.subr.bf16.mxu0 %v1189_v12 }
  0x3e   :  { %1115 = vmatprep.subr.bf16.mxu1 %v1190_v13 }
  0x40   :  { %1088 = vmatpush3.bf16.msra.mxu0 %v1191_v14 }
  0x41   :  { %1116 = vmatpush3.bf16.msra.mxu1 %v1192_v15 }
  0x43   :  { %757 = vmatmul.mubr.bf16.vlgmr.msra.gmra.mrb[8].mxu0 %v920_v20 }
  0x44   :  { %806 = vmatmul.mubr.bf16.vlgmr.msra.gmra.mrb[8].mxu1 %v922_v22  ;;  %764 = vmatprep.mubr.bf16.mxu0 %v929_v27 }
  0x45   :  { %813 = vmatprep.mubr.bf16.mxu1 %v931_v29 }
  0x4b   :  { %765 = vmatmul.mubr.bf16.gmra.mrb[12].mxu0 %v928_v30 }
  0x4c   :  { %814 = vmatmul.mubr.bf16.gmra.mrb[12].mxu1 %v930_v31 }
  0xf6   :  { %v1033_v32 = vpop.f32.mrb[0].mxu0 }
  0xf7   :  { %v1061_v33 = vpop.f32.mrb[0].mxu1  ;;  %v1034_v34 = vpop.f32.mrb[1].mxu0 }
  0xf8   :  { %v1035_v35 = vadd.f32 %v1034_v34, %v1033_v32  ;;  %v1062_v36 = vpop.f32.mrb[1].mxu1  ;;  %v1036_v37 = vpop.f32.mrb[2].mxu0 }
  0xf9   :  { %v1063_v38 = vadd.f32 %v1062_v36, %v1061_v33  ;;  %v1064_v39 = vpop.f32.mrb[2].mxu1  ;;  %v1037_v40 = vpop.f32.mrb[3].mxu0 }
  0xfa   :  { %v1038_v41 = vadd.f32 %v1037_v40, %v1036_v37  ;;  %v1065_v42 = vpop.f32.mrb[3].mxu1 }
  0xfb   :  { %v710_v43 = vadd.f32 %v1063_v38, %v1035_v35  ;;  %v1066_v44 = vadd.f32 %v1065_v42, %v1064_v39 }
  0xfd   :  { %v713_v45 = vadd.f32 %v1066_v44, %v1038_v41 }
  0xfe   :  { %v1039_v46 = vpop.f32.mrb[4].mxu0 }
  0xff   :  { %v1067_v47 = vpop.f32.mrb[4].mxu1  ;;  %v1040_v48 = vpop.f32.mrb[5].mxu0 }
 0x100   :  { %v1041_v49 = vadd.f32 %v1040_v48, %v1039_v46  ;;  %v1068_v50 = vpop.f32.mrb[5].mxu1  ;;  %v1042_v51 = vpop.f32.mrb[6].mxu0 }
 0x101   :  { %v1069_v52 = vadd.f32 %v1068_v50, %v1067_v47  ;;  %v1070_v53 = vpop.f32.mrb[6].mxu1  ;;  %v1043_v54 = vpop.f32.mrb[7].mxu0 }
 0x102   :  { %v1044_v55 = vadd.f32 %v1043_v54, %v1042_v51  ;;  %v1071_v56 = vpop.f32.mrb[7].mxu1 }
 0x103   :  { %v718_v57 = vadd.f32 %v1069_v52, %v1041_v49  ;;  %v1072_v58 = vadd.f32 %v1071_v56, %v1070_v53 }
 0x105   :  { %v721_v59 = vadd.f32 %v1072_v58, %v1044_v55 }
 0x116   :  { %v1089_v60 = vpop.f32.mrb[8].mxu0 }
 0x117   :  { %v1117_v61 = vpop.f32.mrb[8].mxu1  ;;  %v1090_v62 = vpop.f32.mrb[9].mxu0 }
 0x118   :  { %v1118_v63 = vpop.f32.mrb[9].mxu1  ;;  %v1091_v0 = vadd.f32 %v1090_v62, %v1089_v60  ;;  %v1092_v2 = vpop.f32.mrb[10].mxu0 }
 0x119   :  { %v1119_v1 = vadd.f32 %v1118_v63, %v1117_v61  ;;  %v1120_v3 = vpop.f32.mrb[10].mxu1  ;;  %v1093_v4 = vpop.f32.mrb[11].mxu0  ;;  %v996_v61 = vld [vmem:[%s1474_s2] ss:$0 sm:$0xff] }
 0x11a   :  { %v1121_v5 = vpop.f32.mrb[11].mxu1  ;;  %v759_v6 = vadd.f32 %v1091_v0, %v710_v43  ;;  %v1094_v7 = vadd.f32 %v1093_v4, %v1092_v2  ;;  %v997_v2 = vld [vmem:[%s1475_s3] ss:$0 sm:$0xff] }
 0x11b   :  { %v1122_v8 = vadd.f32 %v1121_v5, %v1120_v3 }
 0x11c   :  { %v808_v9 = vadd.f32 %v1119_v1, %v759_v6  ;;  %v762_v10 = vadd.f32 %v1094_v7, %v713_v45 }
 0x11e   :  { %v811_v11 = vadd.f32 %v1122_v8, %v762_v10  ;;  %v1095_v12 = vpop.f32.mrb[12].mxu0  ;;  %v832_v14 = vmul.f32 %v808_v9, %v808_v9 }
 0x11f   :  { %v1123_v13 = vpop.f32.mrb[12].mxu1  ;;  %v1096_v15 = vpop.f32.mrb[13].mxu0 }
 0x120   :  { %v1124_v16 = vpop.f32.mrb[13].mxu1  ;;  %v822_v17 = vadd.f32 %v811_v11, %v808_v9  ;;  %v833_v18 = vmul.f32 %v811_v11, %v811_v11  ;;  %v1097_v19 = vadd.f32 %v1096_v15, %v1095_v12  ;;  %v1098_v21 = vpop.f32.mrb[14].mxu0 }
 0x121   :  { %v1125_v20 = vadd.f32 %v1124_v16, %v1123_v13  ;;  %v1126_v22 = vpop.f32.mrb[14].mxu1  ;;  %v1099_v23 = vpop.f32.mrb[15].mxu0 }
 0x122   :  { %v1127_v24 = vpop.f32.mrb[15].mxu1  ;;  %v836_v25 = vadd.f32 %v833_v18, %v832_v14  ;;  %v767_v26 = vadd.f32 %v1097_v19, %v718_v57  ;;  %v1100_v27 = vadd.f32 %v1099_v23, %v1098_v21 }
 0x123   :  { %v1128_v28 = vadd.f32 %v1127_v24, %v1126_v22 }
 0x124   :  { %v816_v29 = vadd.f32 %v1125_v20, %v767_v26  ;;  %v770_v30 = vadd.f32 %v1100_v27, %v721_v59 }
 0x126   :  { %v823_v31 = vadd.f32 %v822_v17, %v816_v29  ;;  %v834_v32 = vmul.f32 %v816_v29, %v816_v29  ;;  %v819_v33 = vadd.f32 %v1128_v28, %v770_v30 }
 0x128   :  { %v837_v34 = vadd.f32 %v836_v25, %v834_v32  ;;  %v824_v35 = vadd.f32 %v823_v31, %v819_v33  ;;  %v835_v36 = vmul.f32 %v819_v33, %v819_v33 }
 0x12a   :  { %v825_v37 = vrot.slane %v824_v35, 4  ;;  %v838_v38 = vadd.f32 %v837_v34, %v835_v36 }
 0x12c   :  { %v826_v39 = vadd.f32 %v825_v37, %v824_v35  ;;  %v839_v40 = vrot.slane %v838_v38, 4 }
 0x12e   :  { %v827_v41 = vrot.slane %v826_v39, 2  ;;  %v840_v42 = vadd.f32 %v839_v40, %v838_v38 }
 0x130   :  { %v828_v43 = vadd.f32 %v827_v41, %v826_v39  ;;  %v841_v44 = vrot.slane %v840_v42, 2 }
 0x132   :  { %v829_v45 = vrot.slane %v828_v43, 1  ;;  %v842_v46 = vadd.f32 %v841_v44, %v840_v42 }
 0x134   :  { %v830_v47 = vadd.f32 %v829_v45, %v828_v43  ;;  %v843_v48 = vrot.slane %v842_v46, 1 }
 0x136   :  { %v844_v49 = vadd.f32 %v843_v48, %v842_v46  ;;  %v847_v50 = vmul.f32 0.03125, %v830_v47 }
 0x138   :  { %v848_v51 = vmul.f32 0.03125, %v844_v49  ;;  %v849_v52 = vmul.f32 %v847_v50, %v847_v50  ;;  %v854_v53 = vsub.f32 %v808_v9, %v847_v50  ;;  %v855_v54 = vsub.f32 %v811_v11, %v847_v50 }
 0x139   :  { %v856_v55 = vsub.f32 %v816_v29, %v847_v50  ;;  %v857_v56 = vsub.f32 %v819_v33, %v847_v50 }
 0x13a   :  { %v850_v57 = vsub.f32 %v848_v51, %v849_v52 }
 0x13c   :  { %v851_v58 = vmax.f32 %v850_v57, 0.0 }
 0x13e   :  { %v852_v59 = vadd.f32 1e-05, %v851_v58 }
 0x140   :  { %1193 = vrsqrt.f32 %v852_v59 }
 0x14a   :  { %v1194_v60 = vpop.eup %1193 }
 0x14b   :  { %v858_v62 = vmul.f32 %v1194_v60, %v854_v53  ;;  %v859_v63 = vmul.f32 %v1194_v60, %v855_v54  ;;  %v860_v0 = vmul.f32 %v1194_v60, %v856_v55  ;;  %v861_v1 = vmul.f32 %v1194_v60, %v857_v56 }
 0x14d   :  { %v869_v3 = vmul.f32 %v996_v61, %v858_v62  ;;  %v870_v4 = vmul.f32 %v996_v61, %v859_v63  ;;  %v871_v5 = vmul.f32 %v996_v61, %v860_v0  ;;  %v872_v6 = vmul.f32 %v996_v61, %v861_v1 }
 0x14f   :  { %v880_v7 = vadd.f32 %v997_v2, %v869_v3  ;;  %v881_v8 = vadd.f32 %v997_v2, %v870_v4  ;;  %v882_v9 = vadd.f32 %v997_v2, %v871_v5  ;;  %v883_v10 = vadd.f32 %v997_v2, %v872_v6 }
 0x151   :  { %v884_v11 = vmul.f32 0.2, %v880_v7  ;;  %v885_v12 = vmul.f32 0.2, %v881_v8  ;;  %v886_v13 = vmul.f32 0.2, %v882_v9 }
 0x152   :  { %v887_v14 = vmul.f32 0.2, %v883_v10 }
 0x153   :  { %v888_v15 = vmax.f32 %v880_v7, %v884_v11  ;;  %v889_v16 = vmax.f32 %v881_v8, %v885_v12  ;;  %v890_v17 = vmax.f32 %v882_v9, %v886_v13 }
 0x154   :  { %v891_v18 = vmax.f32 %v883_v10, %v887_v14 }
 0x155   :  { %v1009_v19 = vpack.c.bf16 %v889_v16, %v888_v15 }
 0x156   :  { %v1014_v20 = vpack.c.bf16 %v891_v18, %v890_v17 }
 0x157   :  { %1010 = vst [vmem:[%s1476_s4] sm:$0xff] %v1009_v19  }
 0x158   :  { %1016 = vst [vmem:[%s1476_s4 + $0x8] sm:$0xff] %v1014_v20  }

// kernel: gen_dt_forward.8
= control target key start
LH: loop header
LB: loop body
LE: loop exit
PB: predicated region body
PF: predicated region fallthrough
CT: control target
= control target key end

     0   :  { %s3612_s1 = inlined_call_operand.vmem [shape: bf16[2048,256], index: 1, kind: input, shape index: {}]   ;;  %s3613_s0 = inlined_call_operand.vmem [shape: bf16[8,2048], index: 0, kind: input, shape index: {}]   ;;  %s3614_s2 = inlined_call_operand.vmem [shape: f32[1,256], index: 2, kind: input, shape index: {}]   ;;  %s3615_s3 = inlined_call_operand.vmem [shape: f32[1,256], index: 3, kind: input, shape index: {}]   ;;  %s3616_s4 = inlined_call_operand.vmem [shape: bf16[8,256], index: 4, kind: output, shape index: {}]  }
   0x1   :  { %v2339_v0 = vld [vmem:[%s3612_s1 + $0x4] ss:$8 sps:$4 sm:$0xff]   ;;  %v2343_v2 = vld [vmem:[%s3612_s1] ss:$8 sps:$4 sm:$0xff]   ;;  %v2345_v4 = vld [vmem:[%s3612_s1 + $0x14] ss:$8 sps:$4 sm:$0xff]  }
   0x2   :  { %v2341_v1 = vld [vmem:[%s3612_s1 + $0x404] ss:$8 sps:$4 sm:$0xff]   ;;  %1617 = vmatprep.subr.bf16.mxu1 %v2339_v0  ;;  %v2344_v3 = vld [vmem:[%s3612_s1 + $0x400] ss:$8 sps:$4 sm:$0xff]   ;;  %v2347_v5 = vld [vmem:[%s3612_s1 + $0x414] ss:$8 sps:$4 sm:$0xff]  }
   0x3   :  { %1781 = vmatprep.subr.bf16.mxu0 %v2341_v1  ;;  %1618 = vmatpush1.bf16.msra.mxu1 %v2343_v2  ;;  %v2349_v6 = vld [vmem:[%s3612_s1 + $0x10] ss:$8 sps:$4 sm:$0xff]   ;;  %v2351_v8 = vld [vmem:[%s3612_s1 + $0x24] ss:$8 sps:$4 sm:$0xff]   ;;  %v2355_v10 = vld [vmem:[%s3612_s1 + $0x20] ss:$8 sps:$4 sm:$0xff]  }
   0x4   :  { %1782 = vmatpush1.bf16.msra.mxu0 %v2344_v3  ;;  %1619 = vmatprep.subr.bf16.mxu1 %v2345_v4  ;;  %v2350_v7 = vld [vmem:[%s3612_s1 + $0x410] ss:$8 sps:$4 sm:$0xff]   ;;  %v2353_v9 = vld [vmem:[%s3612_s1 + $0x424] ss:$8 sps:$4 sm:$0xff]   ;;  %v2356_v11 = vld [vmem:[%s3612_s1 + $0x420] ss:$8 sps:$4 sm:$0xff]  }
   0x5   :  { %1783 = vmatprep.subr.bf16.mxu0 %v2347_v5  ;;  %v2357_v12 = vld [vmem:[%s3612_s1 + $0x34] ss:$8 sps:$4 sm:$0xff]   ;;  %v2361_v14 = vld [vmem:[%s3612_s1 + $0x30] ss:$8 sps:$4 sm:$0xff]   ;;  %v2363_v16 = vld [vmem:[%s3612_s1 + $0x44] ss:$8 sps:$4 sm:$0xff]  }
   0x6   :  { %v2359_v13 = vld [vmem:[%s3612_s1 + $0x434] ss:$8 sps:$4 sm:$0xff]   ;;  %v2362_v15 = vld [vmem:[%s3612_s1 + $0x430] ss:$8 sps:$4 sm:$0xff]   ;;  %v2365_v17 = vld [vmem:[%s3612_s1 + $0x444] ss:$8 sps:$4 sm:$0xff]  }
   0x7   :  { %1620 = vmatpush1.bf16.msra.mxu1 %v2349_v6  ;;  %v2367_v18 = vld [vmem:[%s3612_s1 + $0x40] ss:$8 sps:$4 sm:$0xff]   ;;  %v2369_v20 = vld [vmem:[%s3612_s1 + $0x54] ss:$8 sps:$4 sm:$0xff]   ;;  %v2373_v22 = vld [vmem:[%s3612_s1 + $0x50] ss:$8 sps:$4 sm:$0xff]  }
   0x8   :  { %1784 = vmatpush1.bf16.msra.mxu0 %v2350_v7  ;;  %1621 = vmatprep.subr.bf16.mxu1 %v2351_v8  ;;  %v2368_v19 = vld [vmem:[%s3612_s1 + $0x440] ss:$8 sps:$4 sm:$0xff]   ;;  %v2371_v21 = vld [vmem:[%s3612_s1 + $0x454] ss:$8 sps:$4 sm:$0xff]   ;;  %v2374_v23 = vld [vmem:[%s3612_s1 + $0x450] ss:$8 sps:$4 sm:$0xff]  }
   0x9   :  { %1785 = vmatprep.subr.bf16.mxu0 %v2353_v9  ;;  %v2375_v24 = vld [vmem:[%s3612_s1 + $0x64] ss:$8 sps:$4 sm:$0xff]   ;;  %v2379_v26 = vld [vmem:[%s3612_s1 + $0x60] ss:$8 sps:$4 sm:$0xff]   ;;  %v2381_v28 = vld [vmem:[%s3612_s1 + $0x74] ss:$8 sps:$4 sm:$0xff]  }
   0xa   :  { %v2377_v25 = vld [vmem:[%s3612_s1 + $0x464] ss:$8 sps:$4 sm:$0xff]   ;;  %v2380_v27 = vld [vmem:[%s3612_s1 + $0x460] ss:$8 sps:$4 sm:$0xff]   ;;  %v2383_v29 = vld [vmem:[%s3612_s1 + $0x474] ss:$8 sps:$4 sm:$0xff]  }
   0xb   :  { %1622 = vmatpush1.bf16.msra.mxu1 %v2355_v10  ;;  %v2385_v30 = vld [vmem:[%s3612_s1 + $0x70] ss:$8 sps:$4 sm:$0xff]   ;;  %v2387_v32 = vld [vmem:[%s3612_s1 + $0x84] ss:$8 sps:$4 sm:$0xff]   ;;  %v2391_v34 = vld [vmem:[%s3612_s1 + $0x80] ss:$8 sps:$4 sm:$0xff]  }
   0xc   :  { %1786 = vmatpush1.bf16.msra.mxu0 %v2356_v11  ;;  %1623 = vmatprep.subr.bf16.mxu1 %v2357_v12  ;;  %v2386_v31 = vld [vmem:[%s3612_s1 + $0x470] ss:$8 sps:$4 sm:$0xff]   ;;  %v2389_v33 = vld [vmem:[%s3612_s1 + $0x484] ss:$8 sps:$4 sm:$0xff]   ;;  %v2392_v35 = vld [vmem:[%s3612_s1 + $0x480] ss:$8 sps:$4 sm:$0xff]  }
   0xd   :  { %1787 = vmatprep.subr.bf16.mxu0 %v2359_v13  ;;  %v2393_v36 = vld [vmem:[%s3612_s1 + $0x94] ss:$8 sps:$4 sm:$0xff]   ;;  %v2397_v38 = vld [vmem:[%s3612_s1 + $0x90] ss:$8 sps:$4 sm:$0xff]   ;;  %v2399_v40 = vld [vmem:[%s3612_s1 + $0xa4] ss:$8 sps:$4 sm:$0xff]  }
   0xe   :  { %v2395_v37 = vld [vmem:[%s3612_s1 + $0x494] ss:$8 sps:$4 sm:$0xff]   ;;  %v2398_v39 = vld [vmem:[%s3612_s1 + $0x490] ss:$8 sps:$4 sm:$0xff]   ;;  %v2401_v41 = vld [vmem:[%s3612_s1 + $0x4a4] ss:$8 sps:$4 sm:$0xff]  }
   0xf   :  { %1624 = vmatpush1.bf16.msra.mxu1 %v2361_v14  ;;  %v2403_v42 = vld [vmem:[%s3612_s1 + $0xa0] ss:$8 sps:$4 sm:$0xff]   ;;  %v2405_v44 = vld [vmem:[%s3612_s1 + $0xb4] ss:$8 sps:$4 sm:$0xff]   ;;  %v2409_v47 = vld [vmem:[%s3612_s1 + $0xb0] ss:$8 sps:$4 sm:$0xff]  }
  0x10   :  { %1788 = vmatpush1.bf16.msra.mxu0 %v2362_v15  ;;  %1625 = vmatprep.subr.bf16.mxu1 %v2363_v16  ;;  %v2404_v43 = vld [vmem:[%s3612_s1 + $0x4a0] ss:$8 sps:$4 sm:$0xff]   ;;  %v2407_v45 = vld [vmem:[%s3612_s1 + $0x4b4] ss:$8 sps:$4 sm:$0xff]   ;;  %v2410_v49 = vld [vmem:[%s3612_s1 + $0x4b0] ss:$8 sps:$4 sm:$0xff]  }
  0x11   :  { %1789 = vmatprep.subr.bf16.mxu0 %v2365_v17  ;;  %v17_v46 = vld [vmem:[%s3613_s0] sm:$0xff]  ;;  %v2417_v56 = vld [vmem:[%s3612_s1 + $0xd4] ss:$8 sps:$4 sm:$0xff]   ;;  %v2421_v58 = vld [vmem:[%s3612_s1 + $0xd0] ss:$8 sps:$4 sm:$0xff]  }
  0x12   :  { %v2040_v48 = vcombine.high %v17_v46, %v17_v46  ;;  %v21_v50 = vld [vmem:[%s3613_s0 + $0x20] sm:$0xff]  ;;  %v2419_v57 = vld [vmem:[%s3612_s1 + $0x4d4] ss:$8 sps:$4 sm:$0xff]   ;;  %v2422_v59 = vld [vmem:[%s3612_s1 + $0x4d0] ss:$8 sps:$4 sm:$0xff]   ;;  %v2039_v6 = vcombine.low %v17_v46, %v17_v46 }
  0x13   :  { %1626 = vmatpush1.bf16.msra.mxu1 %v2367_v18  ;;  %v2411_v51 = vld [vmem:[%s3612_s1 + $0xc4] ss:$8 sps:$4 sm:$0xff]   ;;  %v2048_v53 = vcombine.high %v21_v50, %v21_v50  ;;  %v2415_v54 = vld [vmem:[%s3612_s1 + $0xc0] ss:$8 sps:$4 sm:$0xff]   ;;  %v2429_v0 = vld [vmem:[%s3612_s1 + $0xf4] ss:$8 sps:$4 sm:$0xff]   ;;  %v2047_v7 = vcombine.low %v21_v50, %v21_v50 }
  0x14   :  { %1790 = vmatpush1.bf16.msra.mxu0 %v2368_v19  ;;  %1627 = vmatprep.subr.bf16.mxu1 %v2369_v20  ;;  %v2413_v52 = vld [vmem:[%s3612_s1 + $0x4c4] ss:$8 sps:$4 sm:$0xff]   ;;  %v2416_v55 = vld [vmem:[%s3612_s1 + $0x4c0] ss:$8 sps:$4 sm:$0xff]   ;;  %v2431_v1 = vld [vmem:[%s3612_s1 + $0x4f4] ss:$8 sps:$4 sm:$0xff]  }
  0x15   :  { %1791 = vmatprep.subr.bf16.mxu0 %v2371_v21  ;;  %1649 = vmatprep.mubr.bf16.mxu1 %v2040_v48  ;;  %v2423_v60 = vld [vmem:[%s3612_s1 + $0xe4] ss:$8 sps:$4 sm:$0xff]   ;;  %v2427_v62 = vld [vmem:[%s3612_s1 + $0xe0] ss:$8 sps:$4 sm:$0xff]   ;;  %v2433_v2 = vld [vmem:[%s3612_s1 + $0xf0] ss:$8 sps:$4 sm:$0xff]  }
  0x16   :  { %1813 = vmatprep.mubr.bf16.mxu0 %v2048_v53  ;;  %v2425_v61 = vld [vmem:[%s3612_s1 + $0x4e4] ss:$8 sps:$4 sm:$0xff]   ;;  %v2428_v63 = vld [vmem:[%s3612_s1 + $0x4e0] ss:$8 sps:$4 sm:$0xff]   ;;  %v2434_v3 = vld [vmem:[%s3612_s1 + $0x4f0] ss:$8 sps:$4 sm:$0xff]  }
  0x17   :  { %1628 = vmatpush1.bf16.msra.mxu1 %v2373_v22  ;;  %v2439_v4 = vld [vmem:[%s3612_s1 + $0x104] ss:$8 sps:$4 sm:$0xff]   ;;  %v2437_v8 = vld [vmem:[%s3612_s1 + $0x100] ss:$8 sps:$4 sm:$0xff]   ;;  %v2447_v10 = vld [vmem:[%s3612_s1 + $0x114] ss:$8 sps:$4 sm:$0xff]  }
  0x18   :  { %1792 = vmatpush1.bf16.msra.mxu0 %v2374_v23  ;;  %1629 = vmatprep.subr.bf16.mxu1 %v2375_v24  ;;  %v2444_v5 = vld [vmem:[%s3612_s1 + $0x504] ss:$8 sps:$4 sm:$0xff]   ;;  %v2442_v9 = vld [vmem:[%s3612_s1 + $0x500] ss:$8 sps:$4 sm:$0xff]   ;;  %v2450_v11 = vld [vmem:[%s3612_s1 + $0x514] ss:$8 sps:$4 sm:$0xff]  }
  0x19   :  { %1793 = vmatprep.subr.bf16.mxu0 %v2377_v25  ;;  %v2445_v12 = vld [vmem:[%s3612_s1 + $0x110] ss:$8 sps:$4 sm:$0xff]   ;;  %v2453_v14 = vld [vmem:[%s3612_s1 + $0x124] ss:$8 sps:$4 sm:$0xff]   ;;  %v2451_v16 = vld [vmem:[%s3612_s1 + $0x120] ss:$8 sps:$4 sm:$0xff]  }
  0x1a   :  { %v2448_v13 = vld [vmem:[%s3612_s1 + $0x510] ss:$8 sps:$4 sm:$0xff]   ;;  %v2456_v15 = vld [vmem:[%s3612_s1 + $0x524] ss:$8 sps:$4 sm:$0xff]   ;;  %v2454_v17 = vld [vmem:[%s3612_s1 + $0x520] ss:$8 sps:$4 sm:$0xff]  }
  0x1b   :  { %1630 = vmatpush1.bf16.msra.mxu1 %v2379_v26  ;;  %v2459_v18 = vld [vmem:[%s3612_s1 + $0x134] ss:$8 sps:$4 sm:$0xff]   ;;  %v2457_v20 = vld [vmem:[%s3612_s1 + $0x130] ss:$8 sps:$4 sm:$0xff]   ;;  %v2465_v22 = vld [vmem:[%s3612_s1 + $0x144] ss:$8 sps:$4 sm:$0xff]  }
  0x1c   :  { %1794 = vmatpush1.bf16.msra.mxu0 %v2380_v27  ;;  %1631 = vmatprep.subr.bf16.mxu1 %v2381_v28  ;;  %v2462_v19 = vld [vmem:[%s3612_s1 + $0x534] ss:$8 sps:$4 sm:$0xff]   ;;  %v2460_v21 = vld [vmem:[%s3612_s1 + $0x530] ss:$8 sps:$4 sm:$0xff]   ;;  %v2468_v23 = vld [vmem:[%s3612_s1 + $0x544] ss:$8 sps:$4 sm:$0xff]  }
  0x1d   :  { %1795 = vmatprep.subr.bf16.mxu0 %v2383_v29  ;;  %v2463_v24 = vld [vmem:[%s3612_s1 + $0x140] ss:$8 sps:$4 sm:$0xff]   ;;  %v2471_v26 = vld [vmem:[%s3612_s1 + $0x154] ss:$8 sps:$4 sm:$0xff]   ;;  %v2469_v28 = vld [vmem:[%s3612_s1 + $0x150] ss:$8 sps:$4 sm:$0xff]  }
  0x1e   :  { %v2466_v25 = vld [vmem:[%s3612_s1 + $0x540] ss:$8 sps:$4 sm:$0xff]   ;;  %v2474_v27 = vld [vmem:[%s3612_s1 + $0x554] ss:$8 sps:$4 sm:$0xff]   ;;  %v2472_v29 = vld [vmem:[%s3612_s1 + $0x550] ss:$8 sps:$4 sm:$0xff]  }
  0x1f   :  { %1632 = vmatpush1.bf16.msra.mxu1 %v2385_v30  ;;  %v2477_v30 = vld [vmem:[%s3612_s1 + $0x164] ss:$8 sps:$4 sm:$0xff]   ;;  %v2495_v46 = vld [vmem:[%s3612_s1 + $0x194] ss:$8 sps:$4 sm:$0xff]   ;;  %v2493_v48 = vld [vmem:[%s3612_s1 + $0x190] ss:$8 sps:$4 sm:$0xff]  }
  0x20   :  { %1796 = vmatpush1.bf16.msra.mxu0 %v2386_v31  ;;  %1633 = vmatprep.subr.bf16.mxu1 %v2387_v32  ;;  %v2480_v31 = vld [vmem:[%s3612_s1 + $0x564] ss:$8 sps:$4 sm:$0xff]   ;;  %v2502_v53 = vld [vmem:[%s3612_s1 + $0x5a0] ss:$8 sps:$4 sm:$0xff]  }
  0x21   :  { %1797 = vmatprep.subr.bf16.mxu0 %v2389_v33  ;;  %v3047_v32 = vld [vmem:[%s3613_s0 + $0x8] sm:$0xff] }
  0x22   :  { %v2475_v33 = vld [vmem:[%s3612_s1 + $0x160] ss:$8 sps:$4 sm:$0xff]   ;;  %v2501_v50 = vld [vmem:[%s3612_s1 + $0x1a4] ss:$8 sps:$4 sm:$0xff]  }
  0x23   :  { %1634 = vmatpush1.bf16.msra.mxu1 %v2391_v34  ;;  %v2478_v34 = vld [vmem:[%s3612_s1 + $0x560] ss:$8 sps:$4 sm:$0xff]  }
  0x24   :  { %1798 = vmatpush1.bf16.msra.mxu0 %v2392_v35  ;;  %1635 = vmatprep.subr.bf16.mxu1 %v2393_v36  ;;  %v2042_v35 = vcombine.high %v3047_v32, %v3047_v32  ;;  %v3060_v36 = vld [vmem:[%s3613_s0 + $0x28] sm:$0xff] }
  0x25   :  { %1799 = vmatprep.subr.bf16.mxu0 %v2395_v37  ;;  %v2483_v37 = vld [vmem:[%s3612_s1 + $0x174] ss:$8 sps:$4 sm:$0xff]  }
  0x27   :  { %1636 = vmatpush1.bf16.msra.mxu1 %v2397_v38  ;;  %v2050_v38 = vcombine.high %v3060_v36, %v3060_v36 }
  0x28   :  { %1800 = vmatpush1.bf16.msra.mxu0 %v2398_v39  ;;  %1637 = vmatprep.subr.bf16.mxu1 %v2399_v40  ;;  %v2486_v39 = vld [vmem:[%s3612_s1 + $0x574] ss:$8 sps:$4 sm:$0xff]   ;;  %v2481_v40 = vld [vmem:[%s3612_s1 + $0x170] ss:$8 sps:$4 sm:$0xff]  }
  0x29   :  { %1801 = vmatprep.subr.bf16.mxu0 %v2401_v41  ;;  %v2484_v41 = vld [vmem:[%s3612_s1 + $0x570] ss:$8 sps:$4 sm:$0xff]  }
  0x2b   :  { %1638 = vmatpush1.bf16.msra.mxu1 %v2403_v42  ;;  %v2489_v42 = vld [vmem:[%s3612_s1 + $0x184] ss:$8 sps:$4 sm:$0xff]  }
  0x2c   :  { %1802 = vmatpush1.bf16.msra.mxu0 %v2404_v43  ;;  %1639 = vmatprep.subr.bf16.mxu1 %v2405_v44  ;;  %v2492_v43 = vld [vmem:[%s3612_s1 + $0x584] ss:$8 sps:$4 sm:$0xff]   ;;  %v2487_v44 = vld [vmem:[%s3612_s1 + $0x180] ss:$8 sps:$4 sm:$0xff]  }
  0x2d   :  { %1803 = vmatprep.subr.bf16.mxu0 %v2407_v45  ;;  %v2490_v45 = vld [vmem:[%s3612_s1 + $0x580] ss:$8 sps:$4 sm:$0xff]  }
  0x2f   :  { %1640 = vmatpush1.bf16.msra.mxu1 %v2409_v47  ;;  %v2498_v47 = vld [vmem:[%s3612_s1 + $0x594] ss:$8 sps:$4 sm:$0xff]  }
  0x30   :  { %1804 = vmatpush1.bf16.msra.mxu0 %v2410_v49  ;;  %1641 = vmatprep.subr.bf16.mxu1 %v2411_v51  ;;  %v2496_v49 = vld [vmem:[%s3612_s1 + $0x590] ss:$8 sps:$4 sm:$0xff]   ;;  %v2504_v51 = vld [vmem:[%s3612_s1 + $0x5a4] ss:$8 sps:$4 sm:$0xff]  }
  0x31   :  { %1805 = vmatprep.subr.bf16.mxu0 %v2413_v52  ;;  %v2499_v52 = vld [vmem:[%s3612_s1 + $0x1a0] ss:$8 sps:$4 sm:$0xff]  }
  0x33   :  { %1642 = vmatpush1.bf16.msra.mxu1 %v2415_v54  ;;  %v2507_v54 = vld [vmem:[%s3612_s1 + $0x1b4] ss:$8 sps:$4 sm:$0xff]  }
  0x34   :  { %1806 = vmatpush1.bf16.msra.mxu0 %v2416_v55  ;;  %1643 = vmatprep.subr.bf16.mxu1 %v2417_v56  ;;  %v2510_v55 = vld [vmem:[%s3612_s1 + $0x5b4] ss:$8 sps:$4 sm:$0xff]   ;;  %v2505_v56 = vld [vmem:[%s3612_s1 + $0x1b0] ss:$8 sps:$4 sm:$0xff]  }
  0x35   :  { %1807 = vmatprep.subr.bf16.mxu0 %v2419_v57  ;;  %v2508_v57 = vld [vmem:[%s3612_s1 + $0x5b0] ss:$8 sps:$4 sm:$0xff]  }
  0x37   :  { %1644 = vmatpush1.bf16.msra.mxu1 %v2421_v58  ;;  %v2513_v58 = vld [vmem:[%s3612_s1 + $0x1c4] ss:$8 sps:$4 sm:$0xff]  }
  0x38   :  { %1808 = vmatpush1.bf16.msra.mxu0 %v2422_v59  ;;  %1645 = vmatprep.subr.bf16.mxu1 %v2423_v60  ;;  %v2516_v59 = vld [vmem:[%s3612_s1 + $0x5c4] ss:$8 sps:$4 sm:$0xff]   ;;  %v2511_v60 = vld [vmem:[%s3612_s1 + $0x1c0] ss:$8 sps:$4 sm:$0xff]  }
  0x39   :  { %1809 = vmatprep.subr.bf16.mxu0 %v2425_v61  ;;  %v2514_v61 = vld [vmem:[%s3612_s1 + $0x5c0] ss:$8 sps:$4 sm:$0xff]  }
  0x3b   :  { %1646 = vmatpush1.bf16.msra.mxu1 %v2427_v62  ;;  %v2519_v62 = vld [vmem:[%s3612_s1 + $0x1d4] ss:$8 sps:$4 sm:$0xff]  }
  0x3c   :  { %1810 = vmatpush1.bf16.msra.mxu0 %v2428_v63  ;;  %1647 = vmatprep.subr.bf16.mxu1 %v2429_v0  ;;  %v2522_v63 = vld [vmem:[%s3612_s1 + $0x5d4] ss:$8 sps:$4 sm:$0xff]   ;;  %v2517_v0 = vld [vmem:[%s3612_s1 + $0x1d0] ss:$8 sps:$4 sm:$0xff]  }
  0x3d   :  { %1811 = vmatprep.subr.bf16.mxu0 %v2431_v1  ;;  %v2520_v1 = vld [vmem:[%s3612_s1 + $0x5d0] ss:$8 sps:$4 sm:$0xff]  }
  0x3f   :  { %1648 = vmatpush1.bf16.msra.mxu1 %v2433_v2  ;;  %v2525_v2 = vld [vmem:[%s3612_s1 + $0x1e4] ss:$8 sps:$4 sm:$0xff]  }
  0x40   :  { %1812 = vmatpush1.bf16.msra.mxu0 %v2434_v3  ;;  %1658 = vmatprep.subr.bf16.mxu1 %v2439_v4  ;;  %v2528_v3 = vld [vmem:[%s3612_s1 + $0x5e4] ss:$8 sps:$4 sm:$0xff]   ;;  %v2523_v4 = vld [vmem:[%s3612_s1 + $0x1e0] ss:$8 sps:$4 sm:$0xff]  }
  0x41   :  { %1822 = vmatprep.subr.bf16.mxu0 %v2444_v5  ;;  %v2526_v5 = vld [vmem:[%s3612_s1 + $0x5e0] ss:$8 sps:$4 sm:$0xff]  }
  0x42   :  { %1650 = vmatmul.mubr.bf16.vlgmr.msra.gmra.mrb[0].mxu1 %v2039_v6  ;;  %v2531_v6 = vld [vmem:[%s3612_s1 + $0x1f4] ss:$8 sps:$4 sm:$0xff]  }
  0x43   :  { %1814 = vmatmul.mubr.bf16.vlgmr.msra.gmra.mrb[0].mxu0 %v2047_v7  ;;  %1659 = vmatpush1.bf16.msra.mxu1 %v2437_v8  ;;  %v2534_v7 = vld [vmem:[%s3612_s1 + $0x5f4] ss:$8 sps:$4 sm:$0xff]   ;;  %v2529_v8 = vld [vmem:[%s3612_s1 + $0x1f0] ss:$8 sps:$4 sm:$0xff]  }
  0x44   :  { %1823 = vmatpush1.bf16.msra.mxu0 %v2442_v9  ;;  %1660 = vmatprep.subr.bf16.mxu1 %v2447_v10  ;;  %v2532_v9 = vld [vmem:[%s3612_s1 + $0x5f0] ss:$8 sps:$4 sm:$0xff]   ;;  %v2539_v10 = vld [vmem:[%s3612_s1 + $0x204] ss:$8 sps:$4 sm:$0xff]  }
  0x45   :  { %1824 = vmatprep.subr.bf16.mxu0 %v2450_v11  ;;  %1690 = vmatprep.mubr.bf16.mxu1 %v2042_v35  ;;  %v2544_v11 = vld [vmem:[%s3612_s1 + $0x604] ss:$8 sps:$4 sm:$0xff]   ;;  %v2566_v35 = vld [vmem:[%s3612_s1 + $0x640] ss:$8 sps:$4 sm:$0xff]  }
  0x46   :  { %1854 = vmatprep.mubr.bf16.mxu0 %v2050_v38  ;;  %v2569_v38 = vld [vmem:[%s3612_s1 + $0x250] ss:$8 sps:$4 sm:$0xff]  }
  0x47   :  { %1661 = vmatpush1.bf16.msra.mxu1 %v2445_v12  ;;  %v2041_v12 = vcombine.low %v3047_v32, %v3047_v32  ;;  %v2565_v32 = vld [vmem:[%s3612_s1 + $0x244] ss:$8 sps:$4 sm:$0xff]  }
  0x48   :  { %1825 = vmatpush1.bf16.msra.mxu0 %v2448_v13  ;;  %1662 = vmatprep.subr.bf16.mxu1 %v2453_v14  ;;  %v2537_v13 = vld [vmem:[%s3612_s1 + $0x200] ss:$8 sps:$4 sm:$0xff]   ;;  %v2049_v14 = vcombine.low %v3060_v36, %v3060_v36  ;;  %v2571_v36 = vld [vmem:[%s3612_s1 + $0x254] ss:$8 sps:$4 sm:$0xff]  }
  0x49   :  { %1826 = vmatprep.subr.bf16.mxu0 %v2456_v15  ;;  %v2542_v15 = vld [vmem:[%s3612_s1 + $0x600] ss:$8 sps:$4 sm:$0xff]  }
  0x4b   :  { %1663 = vmatpush1.bf16.msra.mxu1 %v2451_v16  ;;  %v2547_v16 = vld [vmem:[%s3612_s1 + $0x214] ss:$8 sps:$4 sm:$0xff]  }
  0x4c   :  { %1827 = vmatpush1.bf16.msra.mxu0 %v2454_v17  ;;  %1664 = vmatprep.subr.bf16.mxu1 %v2459_v18  ;;  %v2550_v17 = vld [vmem:[%s3612_s1 + $0x614] ss:$8 sps:$4 sm:$0xff]  }
  0x4d   :  { %1828 = vmatprep.subr.bf16.mxu0 %v2462_v19  ;;  %v3197_v18 = vld [vmem:[%s3613_s0 + $0x10] sm:$0xff] }
  0x4e   :  { %v2044_v19 = vcombine.high %v3197_v18, %v3197_v18 }
  0x4f   :  { %1665 = vmatpush1.bf16.msra.mxu1 %v2457_v20  ;;  %v3204_v20 = vld [vmem:[%s3613_s0 + $0x30] sm:$0xff] }
  0x50   :  { %1829 = vmatpush1.bf16.msra.mxu0 %v2460_v21  ;;  %1666 = vmatprep.subr.bf16.mxu1 %v2465_v22  ;;  %v2545_v21 = vld [vmem:[%s3612_s1 + $0x210] ss:$8 sps:$4 sm:$0xff]  }
  0x51   :  { %1830 = vmatprep.subr.bf16.mxu0 %v2468_v23  ;;  %v2548_v22 = vld [vmem:[%s3612_s1 + $0x610] ss:$8 sps:$4 sm:$0xff]   ;;  %v2052_v23 = vcombine.high %v3204_v20, %v3204_v20 }
  0x53   :  { %1667 = vmatpush1.bf16.msra.mxu1 %v2463_v24  ;;  %v2553_v24 = vld [vmem:[%s3612_s1 + $0x224] ss:$8 sps:$4 sm:$0xff]  }
  0x54   :  { %1831 = vmatpush1.bf16.msra.mxu0 %v2466_v25  ;;  %1668 = vmatprep.subr.bf16.mxu1 %v2471_v26  ;;  %v2556_v25 = vld [vmem:[%s3612_s1 + $0x624] ss:$8 sps:$4 sm:$0xff]   ;;  %v2551_v26 = vld [vmem:[%s3612_s1 + $0x220] ss:$8 sps:$4 sm:$0xff]  }
  0x55   :  { %1832 = vmatprep.subr.bf16.mxu0 %v2474_v27  ;;  %v2554_v27 = vld [vmem:[%s3612_s1 + $0x620] ss:$8 sps:$4 sm:$0xff]  }
  0x57   :  { %1669 = vmatpush1.bf16.msra.mxu1 %v2469_v28  ;;  %v2559_v28 = vld [vmem:[%s3612_s1 + $0x234] ss:$8 sps:$4 sm:$0xff]  }
  0x58   :  { %1833 = vmatpush1.bf16.msra.mxu0 %v2472_v29  ;;  %1670 = vmatprep.subr.bf16.mxu1 %v2477_v30  ;;  %v2562_v29 = vld [vmem:[%s3612_s1 + $0x634] ss:$8 sps:$4 sm:$0xff]   ;;  %v2557_v30 = vld [vmem:[%s3612_s1 + $0x230] ss:$8 sps:$4 sm:$0xff]  }
  0x59   :  { %1834 = vmatprep.subr.bf16.mxu0 %v2480_v31  ;;  %v2560_v31 = vld [vmem:[%s3612_s1 + $0x630] ss:$8 sps:$4 sm:$0xff]  }
  0x5b   :  { %1671 = vmatpush1.bf16.msra.mxu1 %v2475_v33  ;;  %v2568_v33 = vld [vmem:[%s3612_s1 + $0x644] ss:$8 sps:$4 sm:$0xff]  }
  0x5c   :  { %1835 = vmatpush1.bf16.msra.mxu0 %v2478_v34  ;;  %1672 = vmatprep.subr.bf16.mxu1 %v2483_v37  ;;  %v2563_v34 = vld [vmem:[%s3612_s1 + $0x240] ss:$8 sps:$4 sm:$0xff]   ;;  %v2574_v37 = vld [vmem:[%s3612_s1 + $0x654] ss:$8 sps:$4 sm:$0xff]  }
  0x5d   :  { %1836 = vmatprep.subr.bf16.mxu0 %v2486_v39  ;;  %v2572_v39 = vld [vmem:[%s3612_s1 + $0x650] ss:$8 sps:$4 sm:$0xff]  }
  0x5f   :  { %1673 = vmatpush1.bf16.msra.mxu1 %v2481_v40  ;;  %v2577_v40 = vld [vmem:[%s3612_s1 + $0x264] ss:$8 sps:$4 sm:$0xff]  }
  0x60   :  { %1837 = vmatpush1.bf16.msra.mxu0 %v2484_v41  ;;  %1674 = vmatprep.subr.bf16.mxu1 %v2489_v42  ;;  %v2580_v41 = vld [vmem:[%s3612_s1 + $0x664] ss:$8 sps:$4 sm:$0xff]   ;;  %v2575_v42 = vld [vmem:[%s3612_s1 + $0x260] ss:$8 sps:$4 sm:$0xff]  }
  0x61   :  { %1838 = vmatprep.subr.bf16.mxu0 %v2492_v43  ;;  %v2578_v43 = vld [vmem:[%s3612_s1 + $0x660] ss:$8 sps:$4 sm:$0xff]  }
  0x63   :  { %1675 = vmatpush1.bf16.msra.mxu1 %v2487_v44  ;;  %v2583_v44 = vld [vmem:[%s3612_s1 + $0x274] ss:$8 sps:$4 sm:$0xff]  }
  0x64   :  { %1839 = vmatpush1.bf16.msra.mxu0 %v2490_v45  ;;  %1676 = vmatprep.subr.bf16.mxu1 %v2495_v46  ;;  %v2586_v45 = vld [vmem:[%s3612_s1 + $0x674] ss:$8 sps:$4 sm:$0xff]   ;;  %v2581_v46 = vld [vmem:[%s3612_s1 + $0x270] ss:$8 sps:$4 sm:$0xff]  }
  0x65   :  { %1840 = vmatprep.subr.bf16.mxu0 %v2498_v47  ;;  %v2584_v47 = vld [vmem:[%s3612_s1 + $0x670] ss:$8 sps:$4 sm:$0xff]  }
  0x67   :  { %1677 = vmatpush1.bf16.msra.mxu1 %v2493_v48  ;;  %v2589_v48 = vld [vmem:[%s3612_s1 + $0x284] ss:$8 sps:$4 sm:$0xff]  }
  0x68   :  { %1841 = vmatpush1.bf16.msra.mxu0 %v2496_v49  ;;  %1678 = vmatprep.subr.bf16.mxu1 %v2501_v50  ;;  %v2592_v49 = vld [vmem:[%s3612_s1 + $0x684] ss:$8 sps:$4 sm:$0xff]   ;;  %v2587_v50 = vld [vmem:[%s3612_s1 + $0x280] ss:$8 sps:$4 sm:$0xff]  }
  0x69   :  { %1842 = vmatprep.subr.bf16.mxu0 %v2504_v51  ;;  %v2590_v51 = vld [vmem:[%s3612_s1 + $0x680] ss:$8 sps:$4 sm:$0xff]  }
  0x6b   :  { %1679 = vmatpush1.bf16.msra.mxu1 %v2499_v52  ;;  %v2595_v52 = vld [vmem:[%s3612_s1 + $0x294] ss:$8 sps:$4 sm:$0xff]  }
  0x6c   :  { %1843 = vmatpush1.bf16.msra.mxu0 %v2502_v53  ;;  %1680 = vmatprep.subr.bf16.mxu1 %v2507_v54  ;;  %v2598_v53 = vld [vmem:[%s3612_s1 + $0x694] ss:$8 sps:$4 sm:$0xff]   ;;  %v2593_v54 = vld [vmem:[%s3612_s1 + $0x290] ss:$8 sps:$4 sm:$0xff]  }
  0x6d   :  { %1844 = vmatprep.subr.bf16.mxu0 %v2510_v55  ;;  %v2596_v55 = vld [vmem:[%s3612_s1 + $0x690] ss:$8 sps:$4 sm:$0xff]  }
  0x6f   :  { %1681 = vmatpush1.bf16.msra.mxu1 %v2505_v56  ;;  %v2601_v56 = vld [vmem:[%s3612_s1 + $0x2a4] ss:$8 sps:$4 sm:$0xff]  }
  0x70   :  { %1845 = vmatpush1.bf16.msra.mxu0 %v2508_v57  ;;  %1682 = vmatprep.subr.bf16.mxu1 %v2513_v58  ;;  %v2604_v57 = vld [vmem:[%s3612_s1 + $0x6a4] ss:$8 sps:$4 sm:$0xff]   ;;  %v2599_v58 = vld [vmem:[%s3612_s1 + $0x2a0] ss:$8 sps:$4 sm:$0xff]  }
  0x71   :  { %1846 = vmatprep.subr.bf16.mxu0 %v2516_v59  ;;  %v2602_v59 = vld [vmem:[%s3612_s1 + $0x6a0] ss:$8 sps:$4 sm:$0xff]  }
  0x73   :  { %1683 = vmatpush1.bf16.msra.mxu1 %v2511_v60  ;;  %v2607_v60 = vld [vmem:[%s3612_s1 + $0x2b4] ss:$8 sps:$4 sm:$0xff]  }
  0x74   :  { %1847 = vmatpush1.bf16.msra.mxu0 %v2514_v61  ;;  %1684 = vmatprep.subr.bf16.mxu1 %v2519_v62  ;;  %v2610_v61 = vld [vmem:[%s3612_s1 + $0x6b4] ss:$8 sps:$4 sm:$0xff]   ;;  %v2605_v62 = vld [vmem:[%s3612_s1 + $0x2b0] ss:$8 sps:$4 sm:$0xff]  }
  0x75   :  { %1848 = vmatprep.subr.bf16.mxu0 %v2522_v63  ;;  %v2608_v63 = vld [vmem:[%s3612_s1 + $0x6b0] ss:$8 sps:$4 sm:$0xff]  }
  0x77   :  { %1685 = vmatpush1.bf16.msra.mxu1 %v2517_v0  ;;  %v2613_v0 = vld [vmem:[%s3612_s1 + $0x2c4] ss:$8 sps:$4 sm:$0xff]  }
  0x78   :  { %1849 = vmatpush1.bf16.msra.mxu0 %v2520_v1  ;;  %1686 = vmatprep.subr.bf16.mxu1 %v2525_v2  ;;  %v2616_v1 = vld [vmem:[%s3612_s1 + $0x6c4] ss:$8 sps:$4 sm:$0xff]   ;;  %v2611_v2 = vld [vmem:[%s3612_s1 + $0x2c0] ss:$8 sps:$4 sm:$0xff]  }
  0x79   :  { %1850 = vmatprep.subr.bf16.mxu0 %v2528_v3  ;;  %v2614_v3 = vld [vmem:[%s3612_s1 + $0x6c0] ss:$8 sps:$4 sm:$0xff]  }
  0x7b   :  { %1687 = vmatpush1.bf16.msra.mxu1 %v2523_v4  ;;  %v2619_v4 = vld [vmem:[%s3612_s1 + $0x2d4] ss:$8 sps:$4 sm:$0xff]  }
  0x7c   :  { %1851 = vmatpush1.bf16.msra.mxu0 %v2526_v5  ;;  %1688 = vmatprep.subr.bf16.mxu1 %v2531_v6  ;;  %v2622_v5 = vld [vmem:[%s3612_s1 + $0x6d4] ss:$8 sps:$4 sm:$0xff]   ;;  %v2617_v6 = vld [vmem:[%s3612_s1 + $0x2d0] ss:$8 sps:$4 sm:$0xff]  }
  0x7d   :  { %1852 = vmatprep.subr.bf16.mxu0 %v2534_v7  ;;  %v2620_v7 = vld [vmem:[%s3612_s1 + $0x6d0] ss:$8 sps:$4 sm:$0xff]  }
  0x7f   :  { %1689 = vmatpush1.bf16.msra.mxu1 %v2529_v8  ;;  %v2625_v8 = vld [vmem:[%s3612_s1 + $0x2e4] ss:$8 sps:$4 sm:$0xff]  }
  0x80   :  { %1853 = vmatpush1.bf16.msra.mxu0 %v2532_v9  ;;  %1699 = vmatprep.subr.bf16.mxu1 %v2539_v10  ;;  %v2628_v9 = vld [vmem:[%s3612_s1 + $0x6e4] ss:$8 sps:$4 sm:$0xff]   ;;  %v2623_v10 = vld [vmem:[%s3612_s1 + $0x2e0] ss:$8 sps:$4 sm:$0xff]  }
  0x81   :  { %1863 = vmatprep.subr.bf16.mxu0 %v2544_v11  ;;  %v2626_v11 = vld [vmem:[%s3612_s1 + $0x6e0] ss:$8 sps:$4 sm:$0xff]  }
  0x82   :  { %1691 = vmatmul.mubr.bf16.vlgmr.msra.gmra.mrb[0].mxu1 %v2041_v12  ;;  %v2631_v12 = vld [vmem:[%s3612_s1 + $0x2f4] ss:$8 sps:$4 sm:$0xff]  }
  0x83   :  { %1855 = vmatmul.mubr.bf16.vlgmr.msra.gmra.mrb[0].mxu0 %v2049_v14  ;;  %1700 = vmatpush1.bf16.msra.mxu1 %v2537_v13  ;;  %v2634_v13 = vld [vmem:[%s3612_s1 + $0x6f4] ss:$8 sps:$4 sm:$0xff]   ;;  %v2629_v14 = vld [vmem:[%s3612_s1 + $0x2f0] ss:$8 sps:$4 sm:$0xff]  }
  0x84   :  { %1864 = vmatpush1.bf16.msra.mxu0 %v2542_v15  ;;  %1701 = vmatprep.subr.bf16.mxu1 %v2547_v16  ;;  %v2632_v15 = vld [vmem:[%s3612_s1 + $0x6f0] ss:$8 sps:$4 sm:$0xff]   ;;  %v2639_v16 = vld [vmem:[%s3612_s1 + $0x304] ss:$8 sps:$4 sm:$0xff]  }
  0x85   :  { %1865 = vmatprep.subr.bf16.mxu0 %v2550_v17  ;;  %1731 = vmatprep.mubr.bf16.mxu1 %v2044_v19  ;;  %v2644_v17 = vld [vmem:[%s3612_s1 + $0x704] ss:$8 sps:$4 sm:$0xff]   ;;  %v2043_v19 = vcombine.low %v3197_v18, %v3197_v18  ;;  %v2642_v18 = vld [vmem:[%s3612_s1 + $0x700] ss:$8 sps:$4 sm:$0xff]  }
  0x86   :  { %1895 = vmatprep.mubr.bf16.mxu0 %v2052_v23  ;;  %v3400_v23 = vld [vmem:[%s3613_s0 + $0x38] sm:$0xff] }
  0x87   :  { %1702 = vmatpush1.bf16.msra.mxu1 %v2545_v21  ;;  %v2051_v21 = vcombine.low %v3204_v20, %v3204_v20  ;;  %v2647_v20 = vld [vmem:[%s3612_s1 + $0x314] ss:$8 sps:$4 sm:$0xff]  }
  0x88   :  { %1866 = vmatpush1.bf16.msra.mxu0 %v2548_v22  ;;  %1703 = vmatprep.subr.bf16.mxu1 %v2553_v24  ;;  %v3395_v22 = vld [vmem:[%s3613_s0 + $0x18] sm:$0xff]  ;;  %v2637_v24 = vld [vmem:[%s3612_s1 + $0x300] ss:$8 sps:$4 sm:$0xff]  }
  0x89   :  { %1867 = vmatprep.subr.bf16.mxu0 %v2556_v25  ;;  %v2650_v25 = vld [vmem:[%s3612_s1 + $0x714] ss:$8 sps:$4 sm:$0xff]  }
  0x8b   :  { %1704 = vmatpush1.bf16.msra.mxu1 %v2551_v26  ;;  %v2046_v26 = vcombine.high %v3395_v22, %v3395_v22 }
  0x8c   :  { %1868 = vmatpush1.bf16.msra.mxu0 %v2554_v27  ;;  %1705 = vmatprep.subr.bf16.mxu1 %v2559_v28  ;;  %v2054_v27 = vcombine.high %v3400_v23, %v3400_v23  ;;  %v2645_v28 = vld [vmem:[%s3612_s1 + $0x310] ss:$8 sps:$4 sm:$0xff]  }
  0x8d   :  { %1869 = vmatprep.subr.bf16.mxu0 %v2562_v29  ;;  %v2648_v29 = vld [vmem:[%s3612_s1 + $0x710] ss:$8 sps:$4 sm:$0xff]  }
  0x8f   :  { %1706 = vmatpush1.bf16.msra.mxu1 %v2557_v30  ;;  %v2653_v30 = vld [vmem:[%s3612_s1 + $0x324] ss:$8 sps:$4 sm:$0xff]  }
  0x90   :  { %1870 = vmatpush1.bf16.msra.mxu0 %v2560_v31  ;;  %1707 = vmatprep.subr.bf16.mxu1 %v2565_v32  ;;  %v2656_v31 = vld [vmem:[%s3612_s1 + $0x724] ss:$8 sps:$4 sm:$0xff]   ;;  %v2651_v32 = vld [vmem:[%s3612_s1 + $0x320] ss:$8 sps:$4 sm:$0xff]  }
  0x91   :  { %1871 = vmatprep.subr.bf16.mxu0 %v2568_v33  ;;  %v2654_v33 = vld [vmem:[%s3612_s1 + $0x720] ss:$8 sps:$4 sm:$0xff]  }
  0x93   :  { %1708 = vmatpush1.bf16.msra.mxu1 %v2563_v34  ;;  %v2659_v34 = vld [vmem:[%s3612_s1 + $0x334] ss:$8 sps:$4 sm:$0xff]  }
  0x94   :  { %1872 = vmatpush1.bf16.msra.mxu0 %v2566_v35  ;;  %1709 = vmatprep.subr.bf16.mxu1 %v2571_v36  ;;  %v2662_v35 = vld [vmem:[%s3612_s1 + $0x734] ss:$8 sps:$4 sm:$0xff]   ;;  %v2657_v36 = vld [vmem:[%s3612_s1 + $0x330] ss:$8 sps:$4 sm:$0xff]  }
  0x95   :  { %1873 = vmatprep.subr.bf16.mxu0 %v2574_v37  ;;  %v2660_v37 = vld [vmem:[%s3612_s1 + $0x730] ss:$8 sps:$4 sm:$0xff]  }
  0x97   :  { %1710 = vmatpush1.bf16.msra.mxu1 %v2569_v38  ;;  %v2665_v38 = vld [vmem:[%s3612_s1 + $0x344] ss:$8 sps:$4 sm:$0xff]  }
  0x98   :  { %1874 = vmatpush1.bf16.msra.mxu0 %v2572_v39  ;;  %1711 = vmatprep.subr.bf16.mxu1 %v2577_v40  ;;  %v2668_v39 = vld [vmem:[%s3612_s1 + $0x744] ss:$8 sps:$4 sm:$0xff]   ;;  %v2663_v40 = vld [vmem:[%s3612_s1 + $0x340] ss:$8 sps:$4 sm:$0xff]  }
  0x99   :  { %1875 = vmatprep.subr.bf16.mxu0 %v2580_v41  ;;  %v2666_v41 = vld [vmem:[%s3612_s1 + $0x740] ss:$8 sps:$4 sm:$0xff]  }
  0x9b   :  { %1712 = vmatpush1.bf16.msra.mxu1 %v2575_v42  ;;  %v2671_v42 = vld [vmem:[%s3612_s1 + $0x354] ss:$8 sps:$4 sm:$0xff]  }
  0x9c   :  { %1876 = vmatpush1.bf16.msra.mxu0 %v2578_v43  ;;  %1713 = vmatprep.subr.bf16.mxu1 %v2583_v44  ;;  %v2674_v43 = vld [vmem:[%s3612_s1 + $0x754] ss:$8 sps:$4 sm:$0xff]   ;;  %v2669_v44 = vld [vmem:[%s3612_s1 + $0x350] ss:$8 sps:$4 sm:$0xff]  }
  0x9d   :  { %1877 = vmatprep.subr.bf16.mxu0 %v2586_v45  ;;  %v2672_v45 = vld [vmem:[%s3612_s1 + $0x750] ss:$8 sps:$4 sm:$0xff]  }
  0x9f   :  { %1714 = vmatpush1.bf16.msra.mxu1 %v2581_v46  ;;  %v2677_v46 = vld [vmem:[%s3612_s1 + $0x364] ss:$8 sps:$4 sm:$0xff]  }
  0xa0   :  { %1878 = vmatpush1.bf16.msra.mxu0 %v2584_v47  ;;  %1715 = vmatprep.subr.bf16.mxu1 %v2589_v48  ;;  %v2680_v47 = vld [vmem:[%s3612_s1 + $0x764] ss:$8 sps:$4 sm:$0xff]   ;;  %v2675_v48 = vld [vmem:[%s3612_s1 + $0x360] ss:$8 sps:$4 sm:$0xff]  }
  0xa1   :  { %1879 = vmatprep.subr.bf16.mxu0 %v2592_v49  ;;  %v2678_v49 = vld [vmem:[%s3612_s1 + $0x760] ss:$8 sps:$4 sm:$0xff]  }
  0xa3   :  { %1716 = vmatpush1.bf16.msra.mxu1 %v2587_v50  ;;  %v2683_v50 = vld [vmem:[%s3612_s1 + $0x374] ss:$8 sps:$4 sm:$0xff]  }
  0xa4   :  { %1880 = vmatpush1.bf16.msra.mxu0 %v2590_v51  ;;  %1717 = vmatprep.subr.bf16.mxu1 %v2595_v52  ;;  %v2686_v51 = vld [vmem:[%s3612_s1 + $0x774] ss:$8 sps:$4 sm:$0xff]   ;;  %v2681_v52 = vld [vmem:[%s3612_s1 + $0x370] ss:$8 sps:$4 sm:$0xff]  }
  0xa5   :  { %1881 = vmatprep.subr.bf16.mxu0 %v2598_v53  ;;  %v2684_v53 = vld [vmem:[%s3612_s1 + $0x770] ss:$8 sps:$4 sm:$0xff]  }
  0xa7   :  { %1718 = vmatpush1.bf16.msra.mxu1 %v2593_v54  ;;  %v2689_v54 = vld [vmem:[%s3612_s1 + $0x384] ss:$8 sps:$4 sm:$0xff]  }
  0xa8   :  { %1882 = vmatpush1.bf16.msra.mxu0 %v2596_v55  ;;  %1719 = vmatprep.subr.bf16.mxu1 %v2601_v56  ;;  %v2692_v55 = vld [vmem:[%s3612_s1 + $0x784] ss:$8 sps:$4 sm:$0xff]   ;;  %v2687_v56 = vld [vmem:[%s3612_s1 + $0x380] ss:$8 sps:$4 sm:$0xff]  }
  0xa9   :  { %1883 = vmatprep.subr.bf16.mxu0 %v2604_v57  ;;  %v2690_v57 = vld [vmem:[%s3612_s1 + $0x780] ss:$8 sps:$4 sm:$0xff]  }
  0xab   :  { %1720 = vmatpush1.bf16.msra.mxu1 %v2599_v58  ;;  %v2695_v58 = vld [vmem:[%s3612_s1 + $0x394] ss:$8 sps:$4 sm:$0xff]  }
  0xac   :  { %1884 = vmatpush1.bf16.msra.mxu0 %v2602_v59  ;;  %1721 = vmatprep.subr.bf16.mxu1 %v2607_v60  ;;  %v2698_v59 = vld [vmem:[%s3612_s1 + $0x794] ss:$8 sps:$4 sm:$0xff]   ;;  %v2693_v60 = vld [vmem:[%s3612_s1 + $0x390] ss:$8 sps:$4 sm:$0xff]  }
  0xad   :  { %1885 = vmatprep.subr.bf16.mxu0 %v2610_v61  ;;  %v2696_v61 = vld [vmem:[%s3612_s1 + $0x790] ss:$8 sps:$4 sm:$0xff]  }
  0xaf   :  { %1722 = vmatpush1.bf16.msra.mxu1 %v2605_v62  ;;  %v2701_v62 = vld [vmem:[%s3612_s1 + $0x3a4] ss:$8 sps:$4 sm:$0xff]  }
  0xb0   :  { %1886 = vmatpush1.bf16.msra.mxu0 %v2608_v63  ;;  %1723 = vmatprep.subr.bf16.mxu1 %v2613_v0  ;;  %v2704_v63 = vld [vmem:[%s3612_s1 + $0x7a4] ss:$8 sps:$4 sm:$0xff]   ;;  %v2699_v0 = vld [vmem:[%s3612_s1 + $0x3a0] ss:$8 sps:$4 sm:$0xff]  }
  0xb1   :  { %1887 = vmatprep.subr.bf16.mxu0 %v2616_v1  ;;  %v2702_v1 = vld [vmem:[%s3612_s1 + $0x7a0] ss:$8 sps:$4 sm:$0xff]  }
  0xb3   :  { %1724 = vmatpush1.bf16.msra.mxu1 %v2611_v2  ;;  %v2707_v2 = vld [vmem:[%s3612_s1 + $0x3b4] ss:$8 sps:$4 sm:$0xff]  }
  0xb4   :  { %1888 = vmatpush1.bf16.msra.mxu0 %v2614_v3  ;;  %1725 = vmatprep.subr.bf16.mxu1 %v2619_v4  ;;  %v2710_v3 = vld [vmem:[%s3612_s1 + $0x7b4] ss:$8 sps:$4 sm:$0xff]   ;;  %v2705_v4 = vld [vmem:[%s3612_s1 + $0x3b0] ss:$8 sps:$4 sm:$0xff]  }
  0xb5   :  { %1889 = vmatprep.subr.bf16.mxu0 %v2622_v5  ;;  %v2708_v5 = vld [vmem:[%s3612_s1 + $0x7b0] ss:$8 sps:$4 sm:$0xff]  }
  0xb7   :  { %1726 = vmatpush1.bf16.msra.mxu1 %v2617_v6  ;;  %v2713_v6 = vld [vmem:[%s3612_s1 + $0x3c4] ss:$8 sps:$4 sm:$0xff]  }
  0xb8   :  { %1890 = vmatpush1.bf16.msra.mxu0 %v2620_v7  ;;  %1727 = vmatprep.subr.bf16.mxu1 %v2625_v8  ;;  %v2716_v7 = vld [vmem:[%s3612_s1 + $0x7c4] ss:$8 sps:$4 sm:$0xff]   ;;  %v2711_v8 = vld [vmem:[%s3612_s1 + $0x3c0] ss:$8 sps:$4 sm:$0xff]  }
  0xb9   :  { %1891 = vmatprep.subr.bf16.mxu0 %v2628_v9  ;;  %v2714_v9 = vld [vmem:[%s3612_s1 + $0x7c0] ss:$8 sps:$4 sm:$0xff]  }
  0xbb   :  { %1728 = vmatpush1.bf16.msra.mxu1 %v2623_v10  ;;  %v2719_v10 = vld [vmem:[%s3612_s1 + $0x3d4] ss:$8 sps:$4 sm:$0xff]  }
  0xbc   :  { %1892 = vmatpush1.bf16.msra.mxu0 %v2626_v11  ;;  %1729 = vmatprep.subr.bf16.mxu1 %v2631_v12  ;;  %v2722_v11 = vld [vmem:[%s3612_s1 + $0x7d4] ss:$8 sps:$4 sm:$0xff]   ;;  %v2717_v12 = vld [vmem:[%s3612_s1 + $0x3d0] ss:$8 sps:$4 sm:$0xff]  }
  0xbd   :  { %1893 = vmatprep.subr.bf16.mxu0 %v2634_v13  ;;  %v2720_v13 = vld [vmem:[%s3612_s1 + $0x7d0] ss:$8 sps:$4 sm:$0xff]  }
  0xbf   :  { %1730 = vmatpush1.bf16.msra.mxu1 %v2629_v14  ;;  %v2725_v14 = vld [vmem:[%s3612_s1 + $0x3e4] ss:$8 sps:$4 sm:$0xff]  }
  0xc0   :  { %1894 = vmatpush1.bf16.msra.mxu0 %v2632_v15  ;;  %1740 = vmatprep.subr.bf16.mxu1 %v2639_v16  ;;  %v2728_v15 = vld [vmem:[%s3612_s1 + $0x7e4] ss:$8 sps:$4 sm:$0xff]   ;;  %v2723_v16 = vld [vmem:[%s3612_s1 + $0x3e0] ss:$8 sps:$4 sm:$0xff]  }
  0xc1   :  { %1904 = vmatprep.subr.bf16.mxu0 %v2644_v17  ;;  %v2726_v17 = vld [vmem:[%s3612_s1 + $0x7e0] ss:$8 sps:$4 sm:$0xff]  }
  0xc2   :  { %1732 = vmatmul.mubr.bf16.vlgmr.msra.gmra.mrb[0].mxu1 %v2043_v19  ;;  %v2731_v19 = vld [vmem:[%s3612_s1 + $0x3f4] ss:$8 sps:$4 sm:$0xff]  }
  0xc3   :  { %1896 = vmatmul.mubr.bf16.vlgmr.msra.gmra.mrb[0].mxu0 %v2051_v21  ;;  %1741 = vmatpush1.bf16.msra.mxu1 %v2637_v24  ;;  %v2734_v21 = vld [vmem:[%s3612_s1 + $0x7f4] ss:$8 sps:$4 sm:$0xff]   ;;  %v2729_v24 = vld [vmem:[%s3612_s1 + $0x3f0] ss:$8 sps:$4 sm:$0xff]  }
  0xc4   :  { %1905 = vmatpush1.bf16.msra.mxu0 %v2642_v18  ;;  %1742 = vmatprep.subr.bf16.mxu1 %v2647_v20  ;;  %v2732_v18 = vld [vmem:[%s3612_s1 + $0x7f0] ss:$8 sps:$4 sm:$0xff]   ;;  %v2045_v20 = vcombine.low %v3395_v22, %v3395_v22 }
  0xc5   :  { %1906 = vmatprep.subr.bf16.mxu0 %v2650_v25  ;;  %1772 = vmatprep.mubr.bf16.mxu1 %v2046_v26  ;;  %v2053_v25 = vcombine.low %v3400_v23, %v3400_v23 }
  0xc6   :  { %1936 = vmatprep.mubr.bf16.mxu0 %v2054_v27 }
  0xc7   :  { %1743 = vmatpush1.bf16.msra.mxu1 %v2645_v28 }
  0xc8   :  { %1907 = vmatpush1.bf16.msra.mxu0 %v2648_v29  ;;  %1744 = vmatprep.subr.bf16.mxu1 %v2653_v30 }
  0xc9   :  { %1908 = vmatprep.subr.bf16.mxu0 %v2656_v31 }
  0xcb   :  { %1745 = vmatpush1.bf16.msra.mxu1 %v2651_v32 }
  0xcc   :  { %1909 = vmatpush1.bf16.msra.mxu0 %v2654_v33  ;;  %1746 = vmatprep.subr.bf16.mxu1 %v2659_v34 }
  0xcd   :  { %1910 = vmatprep.subr.bf16.mxu0 %v2662_v35 }
  0xcf   :  { %1747 = vmatpush1.bf16.msra.mxu1 %v2657_v36 }
  0xd0   :  { %1911 = vmatpush1.bf16.msra.mxu0 %v2660_v37  ;;  %1748 = vmatprep.subr.bf16.mxu1 %v2665_v38 }
  0xd1   :  { %1912 = vmatprep.subr.bf16.mxu0 %v2668_v39 }
  0xd3   :  { %1749 = vmatpush1.bf16.msra.mxu1 %v2663_v40 }
  0xd4   :  { %1913 = vmatpush1.bf16.msra.mxu0 %v2666_v41  ;;  %1750 = vmatprep.subr.bf16.mxu1 %v2671_v42 }
  0xd5   :  { %1914 = vmatprep.subr.bf16.mxu0 %v2674_v43 }
  0xd7   :  { %1751 = vmatpush1.bf16.msra.mxu1 %v2669_v44 }
  0xd8   :  { %1915 = vmatpush1.bf16.msra.mxu0 %v2672_v45  ;;  %1752 = vmatprep.subr.bf16.mxu1 %v2677_v46 }
  0xd9   :  { %1916 = vmatprep.subr.bf16.mxu0 %v2680_v47 }
  0xdb   :  { %1753 = vmatpush1.bf16.msra.mxu1 %v2675_v48 }
  0xdc   :  { %1917 = vmatpush1.bf16.msra.mxu0 %v2678_v49  ;;  %1754 = vmatprep.subr.bf16.mxu1 %v2683_v50 }
  0xdd   :  { %1918 = vmatprep.subr.bf16.mxu0 %v2686_v51 }
  0xdf   :  { %1755 = vmatpush1.bf16.msra.mxu1 %v2681_v52 }
  0xe0   :  { %1919 = vmatpush1.bf16.msra.mxu0 %v2684_v53  ;;  %1756 = vmatprep.subr.bf16.mxu1 %v2689_v54 }
  0xe1   :  { %1920 = vmatprep.subr.bf16.mxu0 %v2692_v55 }
  0xe3   :  { %1757 = vmatpush1.bf16.msra.mxu1 %v2687_v56 }
  0xe4   :  { %1921 = vmatpush1.bf16.msra.mxu0 %v2690_v57  ;;  %1758 = vmatprep.subr.bf16.mxu1 %v2695_v58 }
  0xe5   :  { %1922 = vmatprep.subr.bf16.mxu0 %v2698_v59 }
  0xe7   :  { %1759 = vmatpush1.bf16.msra.mxu1 %v2693_v60 }
  0xe8   :  { %1923 = vmatpush1.bf16.msra.mxu0 %v2696_v61  ;;  %1760 = vmatprep.subr.bf16.mxu1 %v2701_v62 }
  0xe9   :  { %1924 = vmatprep.subr.bf16.mxu0 %v2704_v63 }
  0xeb   :  { %1761 = vmatpush1.bf16.msra.mxu1 %v2699_v0 }
  0xec   :  { %1925 = vmatpush1.bf16.msra.mxu0 %v2702_v1  ;;  %1762 = vmatprep.subr.bf16.mxu1 %v2707_v2 }
  0xed   :  { %1926 = vmatprep.subr.bf16.mxu0 %v2710_v3 }
  0xef   :  { %1763 = vmatpush1.bf16.msra.mxu1 %v2705_v4 }
  0xf0   :  { %1927 = vmatpush1.bf16.msra.mxu0 %v2708_v5  ;;  %1764 = vmatprep.subr.bf16.mxu1 %v2713_v6  ;;  %v1996_v5 = vlaneseq }
  0xf1   :  { %1928 = vmatprep.subr.bf16.mxu0 %v2716_v7 }
  0xf3   :  { %1765 = vmatpush1.bf16.msra.mxu1 %v2711_v8 }
  0xf4   :  { %1929 = vmatpush1.bf16.msra.mxu0 %v2714_v9  ;;  %1766 = vmatprep.subr.bf16.mxu1 %v2719_v10  ;;  %v1997_v9 = vshrl.u32 %v1996_v5, 7 }
  0xf5   :  { %1930 = vmatprep.subr.bf16.mxu0 %v2722_v11  ;;  %v1994_v11 = vld [vmem:[%s3614_s2] sm:$0x3] }
  0xf6   :  { %v1998_v10 = vsub.s32 0, %v1997_v9 }
  0xf7   :  { %1767 = vmatpush1.bf16.msra.mxu1 %v2717_v12  ;;  %v2002_v12 = vsub.s32 1, %v1997_v9 }
  0xf8   :  { %1931 = vmatpush1.bf16.msra.mxu0 %v2720_v13  ;;  %1768 = vmatprep.subr.bf16.mxu1 %v2725_v14  ;;  %v2008_v13 = vld [vmem:[%s3615_s3] sm:$0x3] }
  0xf9   :  { %1932 = vmatprep.subr.bf16.mxu0 %v2728_v15  ;;  %v1999_v15 = vrot.slane %v1994_v11, %v1998_v10 }
  0xfb   :  { %1769 = vmatpush1.bf16.msra.mxu1 %v2723_v16 }
  0xfc   :  { %1933 = vmatpush1.bf16.msra.mxu0 %v2726_v17  ;;  %1770 = vmatprep.subr.bf16.mxu1 %v2731_v19  ;;  %v2003_v19 = vrot.slane %v1994_v11, %v2002_v12 }
  0xfd   :  { %1934 = vmatprep.subr.bf16.mxu0 %v2734_v21 }
  0xff   :  { %1771 = vmatpush1.bf16.msra.mxu1 %v2729_v24 }
 0x100   :  { %1935 = vmatpush1.bf16.msra.mxu0 %v2732_v18  ;;  %v2013_v18 = vrot.slane %v2008_v13, %v1998_v10 }
 0x102   :  { %1773 = vmatmul.mubr.bf16.vlgmr.msra.gmra.mrb[0].mxu1 %v2045_v20 }
 0x103   :  { %1937 = vmatmul.mubr.bf16.vlgmr.msra.gmra.mrb[0].mxu0 %v2053_v25  ;;  %v2017_v25 = vrot.slane %v2008_v13, %v2002_v12 }
 0x1d5   :  { %v1774_v26 = vpop.f32.mrb[0].mxu1 }
 0x1d6   :  { %v1938_v27 = vpop.f32.mrb[0].mxu0  ;;  %v1776_v29 = vpop.f32.mrb[1].mxu1 }
 0x1d7   :  { %v3596_v28 = vadd.f32 %v1938_v27, %v1774_v26  ;;  %v1940_v30 = vpop.f32.mrb[1].mxu0  ;;  %v1778_v32 = vpop.f32.mrb[2].mxu1 }
 0x1d8   :  { %v2314_v31 = vadd.f32 %v1940_v30, %v1776_v29  ;;  %v1942_v33 = vpop.f32.mrb[2].mxu0  ;;  %v1779_v35 = vpop.f32.mrb[3].mxu1 }
 0x1d9   :  { %v1945_v34 = vrot.slane %v3596_v28, 4  ;;  %v1959_v22 = vmul.f32 %v3596_v28, %v3596_v28  ;;  %v1943_v23 = vpop.f32.mrb[3].mxu0 }
 0x1da   :  { %v1951_v36 = vrot.slane %v2314_v31, 4  ;;  %v1960_v37 = vmul.f32 %v2314_v31, %v2314_v31 }
 0x1db   :  { %v1946_v38 = vadd.f32 %v3596_v28, %v1945_v34  ;;  %v1961_v39 = vrot.slane %v1959_v22, 4 }
 0x1dc   :  { %v1952_v40 = vadd.f32 %v2314_v31, %v1951_v36  ;;  %v1967_v41 = vrot.slane %v1960_v37, 4 }
 0x1dd   :  { %v1947_v42 = vrot.slane %v1946_v38, 2  ;;  %v1962_v43 = vadd.f32 %v1961_v39, %v1959_v22 }
 0x1de   :  { %v1953_v44 = vrot.slane %v1952_v40, 2  ;;  %v1968_v45 = vadd.f32 %v1967_v41, %v1960_v37 }
 0x1df   :  { %v1948_v46 = vadd.f32 %v1947_v42, %v1946_v38  ;;  %v1963_v47 = vrot.slane %v1962_v43, 2 }
 0x1e0   :  { %v1954_v48 = vadd.f32 %v1953_v44, %v1952_v40  ;;  %v1969_v49 = vrot.slane %v1968_v45, 2 }
 0x1e1   :  { %v1949_v50 = vrot.slane %v1948_v46, 1  ;;  %v1964_v51 = vadd.f32 %v1963_v47, %v1962_v43 }
 0x1e2   :  { %v1955_v52 = vrot.slane %v1954_v48, 1  ;;  %v1970_v53 = vadd.f32 %v1969_v49, %v1968_v45 }
 0x1e3   :  { %v1950_v54 = vadd.f32 %v1949_v50, %v1948_v46  ;;  %v1965_v55 = vrot.slane %v1964_v51, 1 }
 0x1e4   :  { %v1956_v56 = vadd.f32 %v1955_v52, %v1954_v48  ;;  %v1971_v57 = vrot.slane %v1970_v53, 1 }
 0x1e5   :  { %v1966_v58 = vadd.f32 %v1965_v55, %v1964_v51  ;;  %v1976_v59 = vmul.f32 0.125, %v1950_v54 }
 0x1e6   :  { %v1972_v60 = vadd.f32 %v1971_v57, %v1970_v53  ;;  %v1977_v61 = vmul.f32 0.125, %v1956_v56 }
 0x1e7   :  { %v1978_v62 = vmul.f32 0.125, %v1966_v58  ;;  %v1980_v63 = vmul.f32 %v1976_v59, %v1976_v59  ;;  %v1990_v14 = vsub.f32 %v3596_v28, %v1976_v59 }
 0x1e8   :  { %v1979_v0 = vmul.f32 0.125, %v1972_v60  ;;  %v1981_v1 = vmul.f32 %v1977_v61, %v1977_v61  ;;  %v1991_v17 = vsub.f32 %v2314_v31, %v1977_v61 }
 0x1e9   :  { %v1982_v2 = vsub.f32 %v1978_v62, %v1980_v63 }
 0x1ea   :  { %v1983_v3 = vsub.f32 %v1979_v0, %v1981_v1 }
 0x1eb   :  { %v1984_v4 = vmax.f32 %v1982_v2, 0.0 }
 0x1ec   :  { %v1985_v6 = vmax.f32 %v1983_v3, 0.0 }
 0x1ed   :  { %v1986_v7 = vadd.f32 1e-05, %v1984_v4 }
 0x1ee   :  { %v1987_v8 = vadd.f32 1e-05, %v1985_v6 }
 0x1ef   :  { %2739 = vrsqrt.f32 %v1986_v7 }
 0x1f0   :  { %2741 = vrsqrt.f32 %v1987_v8 }
 0x1f9   :  { %v2740_v16 = vpop.eup %2739 }
 0x1fa   :  { %v2742_v21 = vpop.eup %2741  ;;  %v1992_v24 = vmul.f32 %v2740_v16, %v1990_v14 }
 0x1fb   :  { %v1993_v20 = vmul.f32 %v2742_v21, %v1991_v17 }
 0x1fc   :  { %v2006_v26 = vmul.f32 %v1999_v15, %v1992_v24 }
 0x1fd   :  { %v2007_v27 = vmul.f32 %v2003_v19, %v1993_v20 }
 0x1fe   :  { %v2020_v29 = vadd.f32 %v2013_v18, %v2006_v26 }
 0x1ff   :  { %v2021_v30 = vadd.f32 %v2017_v25, %v2007_v27 }
 0x200   :  { %v2022_v32 = vmul.f32 0.2, %v2020_v29 }
 0x201   :  { %v2023_v33 = vmul.f32 0.2, %v2021_v30 }
 0x202   :  { %v2024_v34 = vmax.f32 %v2020_v29, %v2022_v32 }
 0x203   :  { %v2025_v22 = vmax.f32 %v2021_v30, %v2023_v33 }
 0x205   :  { %v2312_v35 = vpack.c.bf16 %v2025_v22, %v2024_v34 }
 0x207   :  { %2034 = vst [vmem:[%s3616_s4] sm:$0xff] %v2312_v35 }

// kernel: gen_dt_forward.9
= control target key start
LH: loop header
LB: loop body
LE: loop exit
PB: predicated region body
PF: predicated region fallthrough
CT: control target
= control target key end

     0   :  { %s7859_s1 = inlined_call_operand.vmem [shape: bf16[2304,512], index: 1, kind: input, shape index: {}]   ;;  %s7860_s0 = inlined_call_operand.vmem [shape: bf16[8,2304], index: 0, kind: input, shape index: {}]   ;;  %s7861_s2 = inlined_call_operand.vmem [shape: f32[1,512], index: 2, kind: input, shape index: {}]   ;;  %s7862_s3 = inlined_call_operand.vmem [shape: f32[1,512], index: 3, kind: input, shape index: {}]   ;;  %s7863_s4 = inlined_call_operand.vmem [shape: bf16[8,512], index: 4, kind: output, shape index: {}]  }
   0x1   :  { %v5107_v0 = vld [vmem:[%s7859_s1 + $0x4] ss:$16 sps:$4 sm:$0xff]   ;;  %v5109_v1 = vld [vmem:[%s7859_s1 + $0xc] ss:$16 sps:$4 sm:$0xff]   ;;  %v5111_v2 = vld [vmem:[%s7859_s1] ss:$16 sps:$4 sm:$0xff]  }
   0x2   :  { %3545 = vmatprep.subr.bf16.mxu0 %v5107_v0  ;;  %v5112_v3 = vld [vmem:[%s7859_s1 + $0x8] ss:$16 sps:$4 sm:$0xff]   ;;  %3914 = vmatprep.subr.bf16.mxu1 %v5109_v1  ;;  %v5113_v4 = vld [vmem:[%s7859_s1 + $0x24] ss:$16 sps:$4 sm:$0xff]   ;;  %v5115_v5 = vld [vmem:[%s7859_s1 + $0x2c] ss:$16 sps:$4 sm:$0xff]  }
   0x3   :  { %3546 = vmatpush1.bf16.msra.mxu0 %v5111_v2  ;;  %3915 = vmatpush1.bf16.msra.mxu1 %v5112_v3  ;;  %v5117_v6 = vld [vmem:[%s7859_s1 + $0x20] ss:$16 sps:$4 sm:$0xff]   ;;  %v5118_v7 = vld [vmem:[%s7859_s1 + $0x28] ss:$16 sps:$4 sm:$0xff]   ;;  %v5119_v8 = vld [vmem:[%s7859_s1 + $0x44] ss:$16 sps:$4 sm:$0xff]  }
   0x4   :  { %3547 = vmatprep.subr.bf16.mxu0 %v5113_v4  ;;  %3916 = vmatprep.subr.bf16.mxu1 %v5115_v5  ;;  %v5121_v9 = vld [vmem:[%s7859_s1 + $0x4c] ss:$16 sps:$4 sm:$0xff]   ;;  %v5123_v10 = vld [vmem:[%s7859_s1 + $0x40] ss:$16 sps:$4 sm:$0xff]   ;;  %v5124_v11 = vld [vmem:[%s7859_s1 + $0x48] ss:$16 sps:$4 sm:$0xff]  }
   0x5   :  { %v5125_v12 = vld [vmem:[%s7859_s1 + $0x64] ss:$16 sps:$4 sm:$0xff]   ;;  %v5127_v13 = vld [vmem:[%s7859_s1 + $0x6c] ss:$16 sps:$4 sm:$0xff]   ;;  %v5129_v14 = vld [vmem:[%s7859_s1 + $0x60] ss:$16 sps:$4 sm:$0xff]  }
   0x6   :  { %v5130_v15 = vld [vmem:[%s7859_s1 + $0x68] ss:$16 sps:$4 sm:$0xff]   ;;  %v5131_v16 = vld [vmem:[%s7859_s1 + $0x84] ss:$16 sps:$4 sm:$0xff]   ;;  %v5133_v17 = vld [vmem:[%s7859_s1 + $0x8c] ss:$16 sps:$4 sm:$0xff]  }
   0x7   :  { %3548 = vmatpush1.bf16.msra.mxu0 %v5117_v6  ;;  %3917 = vmatpush1.bf16.msra.mxu1 %v5118_v7  ;;  %v5135_v18 = vld [vmem:[%s7859_s1 + $0x80] ss:$16 sps:$4 sm:$0xff]   ;;  %v5136_v19 = vld [vmem:[%s7859_s1 + $0x88] ss:$16 sps:$4 sm:$0xff]   ;;  %v5137_v20 = vld [vmem:[%s7859_s1 + $0xa4] ss:$16 sps:$4 sm:$0xff]  }
   0x8   :  { %3549 = vmatprep.subr.bf16.mxu0 %v5119_v8  ;;  %3918 = vmatprep.subr.bf16.mxu1 %v5121_v9  ;;  %v5139_v21 = vld [vmem:[%s7859_s1 + $0xac] ss:$16 sps:$4 sm:$0xff]   ;;  %v5141_v22 = vld [vmem:[%s7859_s1 + $0xa0] ss:$16 sps:$4 sm:$0xff]   ;;  %v5142_v23 = vld [vmem:[%s7859_s1 + $0xa8] ss:$16 sps:$4 sm:$0xff]  }
   0x9   :  { %v5143_v24 = vld [vmem:[%s7859_s1 + $0xc4] ss:$16 sps:$4 sm:$0xff]   ;;  %v5145_v25 = vld [vmem:[%s7859_s1 + $0xcc] ss:$16 sps:$4 sm:$0xff]   ;;  %v5147_v26 = vld [vmem:[%s7859_s1 + $0xc0] ss:$16 sps:$4 sm:$0xff]  }
   0xa   :  { %v5148_v27 = vld [vmem:[%s7859_s1 + $0xc8] ss:$16 sps:$4 sm:$0xff]   ;;  %v5149_v28 = vld [vmem:[%s7859_s1 + $0xe4] ss:$16 sps:$4 sm:$0xff]   ;;  %v5151_v29 = vld [vmem:[%s7859_s1 + $0xec] ss:$16 sps:$4 sm:$0xff]  }
   0xb   :  { %3550 = vmatpush1.bf16.msra.mxu0 %v5123_v10  ;;  %3919 = vmatpush1.bf16.msra.mxu1 %v5124_v11  ;;  %v5153_v30 = vld [vmem:[%s7859_s1 + $0xe0] ss:$16 sps:$4 sm:$0xff]   ;;  %v5154_v31 = vld [vmem:[%s7859_s1 + $0xe8] ss:$16 sps:$4 sm:$0xff]   ;;  %v5155_v32 = vld [vmem:[%s7859_s1 + $0x104] ss:$16 sps:$4 sm:$0xff]  }
   0xc   :  { %3551 = vmatprep.subr.bf16.mxu0 %v5125_v12  ;;  %3920 = vmatprep.subr.bf16.mxu1 %v5127_v13  ;;  %v5157_v33 = vld [vmem:[%s7859_s1 + $0x10c] ss:$16 sps:$4 sm:$0xff]   ;;  %v5159_v34 = vld [vmem:[%s7859_s1 + $0x100] ss:$16 sps:$4 sm:$0xff]   ;;  %v5160_v35 = vld [vmem:[%s7859_s1 + $0x108] ss:$16 sps:$4 sm:$0xff]  }
   0xd   :  { %v5161_v36 = vld [vmem:[%s7859_s1 + $0x124] ss:$16 sps:$4 sm:$0xff]   ;;  %v5163_v37 = vld [vmem:[%s7859_s1 + $0x12c] ss:$16 sps:$4 sm:$0xff]   ;;  %v5165_v38 = vld [vmem:[%s7859_s1 + $0x120] ss:$16 sps:$4 sm:$0xff]  }
   0xe   :  { %v5166_v39 = vld [vmem:[%s7859_s1 + $0x128] ss:$16 sps:$4 sm:$0xff]   ;;  %v5167_v40 = vld [vmem:[%s7859_s1 + $0x144] ss:$16 sps:$4 sm:$0xff]   ;;  %v5169_v41 = vld [vmem:[%s7859_s1 + $0x14c] ss:$16 sps:$4 sm:$0xff]  }
   0xf   :  { %3552 = vmatpush1.bf16.msra.mxu0 %v5129_v14  ;;  %3921 = vmatpush1.bf16.msra.mxu1 %v5130_v15  ;;  %v5171_v42 = vld [vmem:[%s7859_s1 + $0x140] ss:$16 sps:$4 sm:$0xff]   ;;  %v5172_v43 = vld [vmem:[%s7859_s1 + $0x148] ss:$16 sps:$4 sm:$0xff]   ;;  %v5173_v44 = vld [vmem:[%s7859_s1 + $0x164] ss:$16 sps:$4 sm:$0xff]  }
  0x10   :  { %3553 = vmatprep.subr.bf16.mxu0 %v5131_v16  ;;  %3922 = vmatprep.subr.bf16.mxu1 %v5133_v17  ;;  %v5175_v45 = vld [vmem:[%s7859_s1 + $0x16c] ss:$16 sps:$4 sm:$0xff]   ;;  %v17_v46 = vld [vmem:[%s7860_s0] sm:$0xff]  ;;  %v5178_v49 = vld [vmem:[%s7859_s1 + $0x168] ss:$16 sps:$4 sm:$0xff]  }
  0x11   :  { %v5177_v47 = vld [vmem:[%s7859_s1 + $0x160] ss:$16 sps:$4 sm:$0xff]   ;;  %v4446_v48 = vcombine.high %v17_v46, %v17_v46  ;;  %v5179_v50 = vld [vmem:[%s7859_s1 + $0x184] ss:$16 sps:$4 sm:$0xff]   ;;  %v5181_v51 = vld [vmem:[%s7859_s1 + $0x18c] ss:$16 sps:$4 sm:$0xff]   ;;  %v4445_v4 = vcombine.low %v17_v46, %v17_v46 }
  0x12   :  { %v5183_v52 = vld [vmem:[%s7859_s1 + $0x180] ss:$16 sps:$4 sm:$0xff]   ;;  %v5184_v53 = vld [vmem:[%s7859_s1 + $0x188] ss:$16 sps:$4 sm:$0xff]   ;;  %v5185_v54 = vld [vmem:[%s7859_s1 + $0x1a4] ss:$16 sps:$4 sm:$0xff]  }
  0x13   :  { %3554 = vmatpush1.bf16.msra.mxu0 %v5135_v18  ;;  %3923 = vmatpush1.bf16.msra.mxu1 %v5136_v19  ;;  %v5187_v55 = vld [vmem:[%s7859_s1 + $0x1ac] ss:$16 sps:$4 sm:$0xff]   ;;  %v5189_v56 = vld [vmem:[%s7859_s1 + $0x1a0] ss:$16 sps:$4 sm:$0xff]   ;;  %v5190_v57 = vld [vmem:[%s7859_s1 + $0x1a8] ss:$16 sps:$4 sm:$0xff]  }
  0x14   :  { %3555 = vmatprep.subr.bf16.mxu0 %v5137_v20  ;;  %3924 = vmatprep.subr.bf16.mxu1 %v5139_v21  ;;  %v5191_v58 = vld [vmem:[%s7859_s1 + $0x1c4] ss:$16 sps:$4 sm:$0xff]   ;;  %v5193_v59 = vld [vmem:[%s7859_s1 + $0x1cc] ss:$16 sps:$4 sm:$0xff]   ;;  %v5195_v60 = vld [vmem:[%s7859_s1 + $0x1c0] ss:$16 sps:$4 sm:$0xff]  }
  0x15   :  { %3577 = vmatprep.mubr.bf16.mxu0 %v4446_v48  ;;  %3946 = vmatprep.mubr.bf16.mxu1 %v4446_v48  ;;  %v5196_v61 = vld [vmem:[%s7859_s1 + $0x1c8] ss:$16 sps:$4 sm:$0xff]   ;;  %v5197_v62 = vld [vmem:[%s7859_s1 + $0x1e4] ss:$16 sps:$4 sm:$0xff]   ;;  %v5199_v63 = vld [vmem:[%s7859_s1 + $0x1ec] ss:$16 sps:$4 sm:$0xff]  }
  0x16   :  { %v5201_v0 = vld [vmem:[%s7859_s1 + $0x1e0] ss:$16 sps:$4 sm:$0xff]   ;;  %v5202_v1 = vld [vmem:[%s7859_s1 + $0x1e8] ss:$16 sps:$4 sm:$0xff]   ;;  %v5207_v2 = vld [vmem:[%s7859_s1 + $0x204] ss:$16 sps:$4 sm:$0xff]  }
  0x17   :  { %3556 = vmatpush1.bf16.msra.mxu0 %v5141_v22  ;;  %3925 = vmatpush1.bf16.msra.mxu1 %v5142_v23  ;;  %v5210_v3 = vld [vmem:[%s7859_s1 + $0x20c] ss:$16 sps:$4 sm:$0xff]   ;;  %v5205_v5 = vld [vmem:[%s7859_s1 + $0x200] ss:$16 sps:$4 sm:$0xff]   ;;  %v5208_v6 = vld [vmem:[%s7859_s1 + $0x208] ss:$16 sps:$4 sm:$0xff]  }
  0x18   :  { %3557 = vmatprep.subr.bf16.mxu0 %v5143_v24  ;;  %3926 = vmatprep.subr.bf16.mxu1 %v5145_v25  ;;  %v5213_v7 = vld [vmem:[%s7859_s1 + $0x224] ss:$16 sps:$4 sm:$0xff]   ;;  %v5216_v8 = vld [vmem:[%s7859_s1 + $0x22c] ss:$16 sps:$4 sm:$0xff]   ;;  %v5211_v9 = vld [vmem:[%s7859_s1 + $0x220] ss:$16 sps:$4 sm:$0xff]  }
  0x19   :  { %v5214_v10 = vld [vmem:[%s7859_s1 + $0x228] ss:$16 sps:$4 sm:$0xff]   ;;  %v5219_v11 = vld [vmem:[%s7859_s1 + $0x244] ss:$16 sps:$4 sm:$0xff]   ;;  %v5222_v12 = vld [vmem:[%s7859_s1 + $0x24c] ss:$16 sps:$4 sm:$0xff]  }
  0x1a   :  { %v5217_v13 = vld [vmem:[%s7859_s1 + $0x240] ss:$16 sps:$4 sm:$0xff]   ;;  %v5220_v14 = vld [vmem:[%s7859_s1 + $0x248] ss:$16 sps:$4 sm:$0xff]   ;;  %v5225_v15 = vld [vmem:[%s7859_s1 + $0x264] ss:$16 sps:$4 sm:$0xff]  }
  0x1b   :  { %3558 = vmatpush1.bf16.msra.mxu0 %v5147_v26  ;;  %3927 = vmatpush1.bf16.msra.mxu1 %v5148_v27  ;;  %v5228_v16 = vld [vmem:[%s7859_s1 + $0x26c] ss:$16 sps:$4 sm:$0xff]   ;;  %v5223_v17 = vld [vmem:[%s7859_s1 + $0x260] ss:$16 sps:$4 sm:$0xff]   ;;  %v5226_v18 = vld [vmem:[%s7859_s1 + $0x268] ss:$16 sps:$4 sm:$0xff]  }
  0x1c   :  { %3559 = vmatprep.subr.bf16.mxu0 %v5149_v28  ;;  %3928 = vmatprep.subr.bf16.mxu1 %v5151_v29  ;;  %v5231_v19 = vld [vmem:[%s7859_s1 + $0x284] ss:$16 sps:$4 sm:$0xff]   ;;  %v5234_v20 = vld [vmem:[%s7859_s1 + $0x28c] ss:$16 sps:$4 sm:$0xff]   ;;  %v5229_v21 = vld [vmem:[%s7859_s1 + $0x280] ss:$16 sps:$4 sm:$0xff]  }
  0x1d   :  { %v5232_v22 = vld [vmem:[%s7859_s1 + $0x288] ss:$16 sps:$4 sm:$0xff]   ;;  %v5237_v23 = vld [vmem:[%s7859_s1 + $0x2a4] ss:$16 sps:$4 sm:$0xff]   ;;  %v5240_v24 = vld [vmem:[%s7859_s1 + $0x2ac] ss:$16 sps:$4 sm:$0xff]  }
  0x1e   :  { %v5235_v25 = vld [vmem:[%s7859_s1 + $0x2a0] ss:$16 sps:$4 sm:$0xff]   ;;  %v5238_v26 = vld [vmem:[%s7859_s1 + $0x2a8] ss:$16 sps:$4 sm:$0xff]   ;;  %v5243_v27 = vld [vmem:[%s7859_s1 + $0x2c4] ss:$16 sps:$4 sm:$0xff]  }
  0x1f   :  { %3560 = vmatpush1.bf16.msra.mxu0 %v5153_v30  ;;  %3929 = vmatpush1.bf16.msra.mxu1 %v5154_v31  ;;  %v5246_v28 = vld [vmem:[%s7859_s1 + $0x2cc] ss:$16 sps:$4 sm:$0xff]   ;;  %v5241_v31 = vld [vmem:[%s7859_s1 + $0x2c0] ss:$16 sps:$4 sm:$0xff]   ;;  %v5268_v48 = vld [vmem:[%s7859_s1 + $0x348] ss:$16 sps:$4 sm:$0xff]  }
  0x20   :  { %3561 = vmatprep.subr.bf16.mxu0 %v5155_v32  ;;  %3930 = vmatprep.subr.bf16.mxu1 %v5157_v33  ;;  %v6292_v29 = vld [vmem:[%s7860_s0 + $0x8] sm:$0xff]  ;;  %v5249_v33 = vld [vmem:[%s7859_s1 + $0x2e4] ss:$16 sps:$4 sm:$0xff]  }
  0x21   :  { %v4448_v30 = vcombine.high %v6292_v29, %v6292_v29  ;;  %v5244_v32 = vld [vmem:[%s7859_s1 + $0x2c8] ss:$16 sps:$4 sm:$0xff]   ;;  %v5270_v46 = vld [vmem:[%s7859_s1 + $0x34c] ss:$16 sps:$4 sm:$0xff]  }
  0x23   :  { %3562 = vmatpush1.bf16.msra.mxu0 %v5159_v34  ;;  %3931 = vmatpush1.bf16.msra.mxu1 %v5160_v35  ;;  %v5252_v34 = vld [vmem:[%s7859_s1 + $0x2ec] ss:$16 sps:$4 sm:$0xff]   ;;  %v5247_v35 = vld [vmem:[%s7859_s1 + $0x2e0] ss:$16 sps:$4 sm:$0xff]  }
  0x24   :  { %3563 = vmatprep.subr.bf16.mxu0 %v5161_v36  ;;  %3932 = vmatprep.subr.bf16.mxu1 %v5163_v37  ;;  %v5250_v36 = vld [vmem:[%s7859_s1 + $0x2e8] ss:$16 sps:$4 sm:$0xff]   ;;  %v5255_v37 = vld [vmem:[%s7859_s1 + $0x304] ss:$16 sps:$4 sm:$0xff]  }
  0x27   :  { %3564 = vmatpush1.bf16.msra.mxu0 %v5165_v38  ;;  %3933 = vmatpush1.bf16.msra.mxu1 %v5166_v39  ;;  %v5258_v38 = vld [vmem:[%s7859_s1 + $0x30c] ss:$16 sps:$4 sm:$0xff]   ;;  %v5253_v39 = vld [vmem:[%s7859_s1 + $0x300] ss:$16 sps:$4 sm:$0xff]  }
  0x28   :  { %3565 = vmatprep.subr.bf16.mxu0 %v5167_v40  ;;  %3934 = vmatprep.subr.bf16.mxu1 %v5169_v41  ;;  %v5256_v40 = vld [vmem:[%s7859_s1 + $0x308] ss:$16 sps:$4 sm:$0xff]   ;;  %v5261_v41 = vld [vmem:[%s7859_s1 + $0x324] ss:$16 sps:$4 sm:$0xff]  }
  0x2b   :  { %3566 = vmatpush1.bf16.msra.mxu0 %v5171_v42  ;;  %3935 = vmatpush1.bf16.msra.mxu1 %v5172_v43  ;;  %v5264_v42 = vld [vmem:[%s7859_s1 + $0x32c] ss:$16 sps:$4 sm:$0xff]   ;;  %v5259_v43 = vld [vmem:[%s7859_s1 + $0x320] ss:$16 sps:$4 sm:$0xff]  }
  0x2c   :  { %3567 = vmatprep.subr.bf16.mxu0 %v5173_v44  ;;  %3936 = vmatprep.subr.bf16.mxu1 %v5175_v45  ;;  %v5262_v44 = vld [vmem:[%s7859_s1 + $0x328] ss:$16 sps:$4 sm:$0xff]   ;;  %v5267_v45 = vld [vmem:[%s7859_s1 + $0x344] ss:$16 sps:$4 sm:$0xff]  }
  0x2f   :  { %3568 = vmatpush1.bf16.msra.mxu0 %v5177_v47  ;;  %3937 = vmatpush1.bf16.msra.mxu1 %v5178_v49  ;;  %v5265_v47 = vld [vmem:[%s7859_s1 + $0x340] ss:$16 sps:$4 sm:$0xff]   ;;  %v5273_v49 = vld [vmem:[%s7859_s1 + $0x364] ss:$16 sps:$4 sm:$0xff]  }
  0x30   :  { %3569 = vmatprep.subr.bf16.mxu0 %v5179_v50  ;;  %3938 = vmatprep.subr.bf16.mxu1 %v5181_v51  ;;  %v5276_v50 = vld [vmem:[%s7859_s1 + $0x36c] ss:$16 sps:$4 sm:$0xff]   ;;  %v5271_v51 = vld [vmem:[%s7859_s1 + $0x360] ss:$16 sps:$4 sm:$0xff]  }
  0x33   :  { %3570 = vmatpush1.bf16.msra.mxu0 %v5183_v52  ;;  %3939 = vmatpush1.bf16.msra.mxu1 %v5184_v53  ;;  %v5274_v52 = vld [vmem:[%s7859_s1 + $0x368] ss:$16 sps:$4 sm:$0xff]   ;;  %v5279_v53 = vld [vmem:[%s7859_s1 + $0x384] ss:$16 sps:$4 sm:$0xff]  }
  0x34   :  { %3571 = vmatprep.subr.bf16.mxu0 %v5185_v54  ;;  %3940 = vmatprep.subr.bf16.mxu1 %v5187_v55  ;;  %v5282_v54 = vld [vmem:[%s7859_s1 + $0x38c] ss:$16 sps:$4 sm:$0xff]   ;;  %v5277_v55 = vld [vmem:[%s7859_s1 + $0x380] ss:$16 sps:$4 sm:$0xff]  }
  0x37   :  { %3572 = vmatpush1.bf16.msra.mxu0 %v5189_v56  ;;  %3941 = vmatpush1.bf16.msra.mxu1 %v5190_v57  ;;  %v5280_v56 = vld [vmem:[%s7859_s1 + $0x388] ss:$16 sps:$4 sm:$0xff]   ;;  %v5285_v57 = vld [vmem:[%s7859_s1 + $0x3a4] ss:$16 sps:$4 sm:$0xff]  }
  0x38   :  { %3573 = vmatprep.subr.bf16.mxu0 %v5191_v58  ;;  %3942 = vmatprep.subr.bf16.mxu1 %v5193_v59  ;;  %v5288_v58 = vld [vmem:[%s7859_s1 + $0x3ac] ss:$16 sps:$4 sm:$0xff]   ;;  %v5283_v59 = vld [vmem:[%s7859_s1 + $0x3a0] ss:$16 sps:$4 sm:$0xff]  }
  0x3b   :  { %3574 = vmatpush1.bf16.msra.mxu0 %v5195_v60  ;;  %3943 = vmatpush1.bf16.msra.mxu1 %v5196_v61  ;;  %v5286_v60 = vld [vmem:[%s7859_s1 + $0x3a8] ss:$16 sps:$4 sm:$0xff]   ;;  %v5291_v61 = vld [vmem:[%s7859_s1 + $0x3c4] ss:$16 sps:$4 sm:$0xff]  }
  0x3c   :  { %3575 = vmatprep.subr.bf16.mxu0 %v5197_v62  ;;  %3944 = vmatprep.subr.bf16.mxu1 %v5199_v63  ;;  %v5294_v62 = vld [vmem:[%s7859_s1 + $0x3cc] ss:$16 sps:$4 sm:$0xff]   ;;  %v5289_v63 = vld [vmem:[%s7859_s1 + $0x3c0] ss:$16 sps:$4 sm:$0xff]  }
  0x3f   :  { %3576 = vmatpush1.bf16.msra.mxu0 %v5201_v0  ;;  %3945 = vmatpush1.bf16.msra.mxu1 %v5202_v1  ;;  %v5292_v0 = vld [vmem:[%s7859_s1 + $0x3c8] ss:$16 sps:$4 sm:$0xff]   ;;  %v5297_v1 = vld [vmem:[%s7859_s1 + $0x3e4] ss:$16 sps:$4 sm:$0xff]  }
  0x40   :  { %3586 = vmatprep.subr.bf16.mxu0 %v5207_v2  ;;  %3955 = vmatprep.subr.bf16.mxu1 %v5210_v3  ;;  %v5300_v2 = vld [vmem:[%s7859_s1 + $0x3ec] ss:$16 sps:$4 sm:$0xff]   ;;  %v5295_v3 = vld [vmem:[%s7859_s1 + $0x3e0] ss:$16 sps:$4 sm:$0xff]  }
  0x42   :  { %3578 = vmatmul.mubr.bf16.vlgmr.msra.gmra.mrb[0].mxu0 %v4445_v4  ;;  %3947 = vmatmul.mubr.bf16.vlgmr.msra.gmra.mrb[0].mxu1 %v4445_v4  ;;  %v5298_v4 = vld [vmem:[%s7859_s1 + $0x3e8] ss:$16 sps:$4 sm:$0xff]  }
  0x43   :  { %3587 = vmatpush1.bf16.msra.mxu0 %v5205_v5  ;;  %3956 = vmatpush1.bf16.msra.mxu1 %v5208_v6  ;;  %v5305_v5 = vld [vmem:[%s7859_s1 + $0x404] ss:$16 sps:$4 sm:$0xff]   ;;  %v5308_v6 = vld [vmem:[%s7859_s1 + $0x40c] ss:$16 sps:$4 sm:$0xff]  }
  0x44   :  { %3588 = vmatprep.subr.bf16.mxu0 %v5213_v7  ;;  %3957 = vmatprep.subr.bf16.mxu1 %v5216_v8  ;;  %v4447_v7 = vcombine.low %v6292_v29, %v6292_v29  ;;  %v5303_v8 = vld [vmem:[%s7859_s1 + $0x400] ss:$16 sps:$4 sm:$0xff]   ;;  %v5338_v29 = vld [vmem:[%s7859_s1 + $0x4ac] ss:$16 sps:$4 sm:$0xff]  }
  0x45   :  { %3618 = vmatprep.mubr.bf16.mxu0 %v4448_v30  ;;  %3987 = vmatprep.mubr.bf16.mxu1 %v4448_v30  ;;  %v5333_v30 = vld [vmem:[%s7859_s1 + $0x4a0] ss:$16 sps:$4 sm:$0xff]  }
  0x47   :  { %3589 = vmatpush1.bf16.msra.mxu0 %v5211_v9  ;;  %3958 = vmatpush1.bf16.msra.mxu1 %v5214_v10  ;;  %v5306_v9 = vld [vmem:[%s7859_s1 + $0x408] ss:$16 sps:$4 sm:$0xff]   ;;  %v5311_v10 = vld [vmem:[%s7859_s1 + $0x424] ss:$16 sps:$4 sm:$0xff]  }
  0x48   :  { %3590 = vmatprep.subr.bf16.mxu0 %v5219_v11  ;;  %3959 = vmatprep.subr.bf16.mxu1 %v5222_v12  ;;  %v6430_v11 = vld [vmem:[%s7860_s0 + $0x10] sm:$0xff]  ;;  %v5314_v12 = vld [vmem:[%s7859_s1 + $0x42c] ss:$16 sps:$4 sm:$0xff]  }
  0x4b   :  { %3591 = vmatpush1.bf16.msra.mxu0 %v5217_v13  ;;  %3960 = vmatpush1.bf16.msra.mxu1 %v5220_v14  ;;  %v4450_v13 = vcombine.high %v6430_v11, %v6430_v11  ;;  %v5309_v14 = vld [vmem:[%s7859_s1 + $0x420] ss:$16 sps:$4 sm:$0xff]  }
  0x4c   :  { %3592 = vmatprep.subr.bf16.mxu0 %v5225_v15  ;;  %3961 = vmatprep.subr.bf16.mxu1 %v5228_v16  ;;  %v5312_v15 = vld [vmem:[%s7859_s1 + $0x428] ss:$16 sps:$4 sm:$0xff]   ;;  %v5317_v16 = vld [vmem:[%s7859_s1 + $0x444] ss:$16 sps:$4 sm:$0xff]  }
  0x4f   :  { %3593 = vmatpush1.bf16.msra.mxu0 %v5223_v17  ;;  %3962 = vmatpush1.bf16.msra.mxu1 %v5226_v18  ;;  %v5320_v17 = vld [vmem:[%s7859_s1 + $0x44c] ss:$16 sps:$4 sm:$0xff]   ;;  %v5315_v18 = vld [vmem:[%s7859_s1 + $0x440] ss:$16 sps:$4 sm:$0xff]  }
  0x50   :  { %3594 = vmatprep.subr.bf16.mxu0 %v5231_v19  ;;  %3963 = vmatprep.subr.bf16.mxu1 %v5234_v20  ;;  %v5318_v19 = vld [vmem:[%s7859_s1 + $0x448] ss:$16 sps:$4 sm:$0xff]   ;;  %v5323_v20 = vld [vmem:[%s7859_s1 + $0x464] ss:$16 sps:$4 sm:$0xff]  }
  0x53   :  { %3595 = vmatpush1.bf16.msra.mxu0 %v5229_v21  ;;  %3964 = vmatpush1.bf16.msra.mxu1 %v5232_v22  ;;  %v5326_v21 = vld [vmem:[%s7859_s1 + $0x46c] ss:$16 sps:$4 sm:$0xff]   ;;  %v5321_v22 = vld [vmem:[%s7859_s1 + $0x460] ss:$16 sps:$4 sm:$0xff]  }
  0x54   :  { %3596 = vmatprep.subr.bf16.mxu0 %v5237_v23  ;;  %3965 = vmatprep.subr.bf16.mxu1 %v5240_v24  ;;  %v5324_v23 = vld [vmem:[%s7859_s1 + $0x468] ss:$16 sps:$4 sm:$0xff]   ;;  %v5329_v24 = vld [vmem:[%s7859_s1 + $0x484] ss:$16 sps:$4 sm:$0xff]  }
  0x57   :  { %3597 = vmatpush1.bf16.msra.mxu0 %v5235_v25  ;;  %3966 = vmatpush1.bf16.msra.mxu1 %v5238_v26  ;;  %v5332_v25 = vld [vmem:[%s7859_s1 + $0x48c] ss:$16 sps:$4 sm:$0xff]   ;;  %v5327_v26 = vld [vmem:[%s7859_s1 + $0x480] ss:$16 sps:$4 sm:$0xff]  }
  0x58   :  { %3598 = vmatprep.subr.bf16.mxu0 %v5243_v27  ;;  %3967 = vmatprep.subr.bf16.mxu1 %v5246_v28  ;;  %v5330_v27 = vld [vmem:[%s7859_s1 + $0x488] ss:$16 sps:$4 sm:$0xff]   ;;  %v5335_v28 = vld [vmem:[%s7859_s1 + $0x4a4] ss:$16 sps:$4 sm:$0xff]  }
  0x5b   :  { %3599 = vmatpush1.bf16.msra.mxu0 %v5241_v31  ;;  %3968 = vmatpush1.bf16.msra.mxu1 %v5244_v32  ;;  %v5336_v31 = vld [vmem:[%s7859_s1 + $0x4a8] ss:$16 sps:$4 sm:$0xff]   ;;  %v5341_v32 = vld [vmem:[%s7859_s1 + $0x4c4] ss:$16 sps:$4 sm:$0xff]  }
  0x5c   :  { %3600 = vmatprep.subr.bf16.mxu0 %v5249_v33  ;;  %3969 = vmatprep.subr.bf16.mxu1 %v5252_v34  ;;  %v5344_v33 = vld [vmem:[%s7859_s1 + $0x4cc] ss:$16 sps:$4 sm:$0xff]   ;;  %v5339_v34 = vld [vmem:[%s7859_s1 + $0x4c0] ss:$16 sps:$4 sm:$0xff]  }
  0x5f   :  { %3601 = vmatpush1.bf16.msra.mxu0 %v5247_v35  ;;  %3970 = vmatpush1.bf16.msra.mxu1 %v5250_v36  ;;  %v5342_v35 = vld [vmem:[%s7859_s1 + $0x4c8] ss:$16 sps:$4 sm:$0xff]   ;;  %v5347_v36 = vld [vmem:[%s7859_s1 + $0x4e4] ss:$16 sps:$4 sm:$0xff]  }
  0x60   :  { %3602 = vmatprep.subr.bf16.mxu0 %v5255_v37  ;;  %3971 = vmatprep.subr.bf16.mxu1 %v5258_v38  ;;  %v5350_v37 = vld [vmem:[%s7859_s1 + $0x4ec] ss:$16 sps:$4 sm:$0xff]   ;;  %v5345_v38 = vld [vmem:[%s7859_s1 + $0x4e0] ss:$16 sps:$4 sm:$0xff]  }
  0x63   :  { %3603 = vmatpush1.bf16.msra.mxu0 %v5253_v39  ;;  %3972 = vmatpush1.bf16.msra.mxu1 %v5256_v40  ;;  %v5348_v39 = vld [vmem:[%s7859_s1 + $0x4e8] ss:$16 sps:$4 sm:$0xff]   ;;  %v5353_v40 = vld [vmem:[%s7859_s1 + $0x504] ss:$16 sps:$4 sm:$0xff]  }
  0x64   :  { %3604 = vmatprep.subr.bf16.mxu0 %v5261_v41  ;;  %3973 = vmatprep.subr.bf16.mxu1 %v5264_v42  ;;  %v5356_v41 = vld [vmem:[%s7859_s1 + $0x50c] ss:$16 sps:$4 sm:$0xff]   ;;  %v5351_v42 = vld [vmem:[%s7859_s1 + $0x500] ss:$16 sps:$4 sm:$0xff]  }
  0x67   :  { %3605 = vmatpush1.bf16.msra.mxu0 %v5259_v43  ;;  %3974 = vmatpush1.bf16.msra.mxu1 %v5262_v44  ;;  %v5354_v43 = vld [vmem:[%s7859_s1 + $0x508] ss:$16 sps:$4 sm:$0xff]   ;;  %v5359_v44 = vld [vmem:[%s7859_s1 + $0x524] ss:$16 sps:$4 sm:$0xff]  }
  0x68   :  { %3606 = vmatprep.subr.bf16.mxu0 %v5267_v45  ;;  %3975 = vmatprep.subr.bf16.mxu1 %v5270_v46  ;;  %v5362_v45 = vld [vmem:[%s7859_s1 + $0x52c] ss:$16 sps:$4 sm:$0xff]   ;;  %v5357_v46 = vld [vmem:[%s7859_s1 + $0x520] ss:$16 sps:$4 sm:$0xff]  }
  0x6b   :  { %3607 = vmatpush1.bf16.msra.mxu0 %v5265_v47  ;;  %3976 = vmatpush1.bf16.msra.mxu1 %v5268_v48  ;;  %v5360_v47 = vld [vmem:[%s7859_s1 + $0x528] ss:$16 sps:$4 sm:$0xff]   ;;  %v5365_v48 = vld [vmem:[%s7859_s1 + $0x544] ss:$16 sps:$4 sm:$0xff]  }
  0x6c   :  { %3608 = vmatprep.subr.bf16.mxu0 %v5273_v49  ;;  %3977 = vmatprep.subr.bf16.mxu1 %v5276_v50  ;;  %v5368_v49 = vld [vmem:[%s7859_s1 + $0x54c] ss:$16 sps:$4 sm:$0xff]   ;;  %v5363_v50 = vld [vmem:[%s7859_s1 + $0x540] ss:$16 sps:$4 sm:$0xff]  }
  0x6f   :  { %3609 = vmatpush1.bf16.msra.mxu0 %v5271_v51  ;;  %3978 = vmatpush1.bf16.msra.mxu1 %v5274_v52  ;;  %v5366_v51 = vld [vmem:[%s7859_s1 + $0x548] ss:$16 sps:$4 sm:$0xff]   ;;  %v5371_v52 = vld [vmem:[%s7859_s1 + $0x564] ss:$16 sps:$4 sm:$0xff]  }
  0x70   :  { %3610 = vmatprep.subr.bf16.mxu0 %v5279_v53  ;;  %3979 = vmatprep.subr.bf16.mxu1 %v5282_v54  ;;  %v5374_v53 = vld [vmem:[%s7859_s1 + $0x56c] ss:$16 sps:$4 sm:$0xff]   ;;  %v5369_v54 = vld [vmem:[%s7859_s1 + $0x560] ss:$16 sps:$4 sm:$0xff]  }
  0x73   :  { %3611 = vmatpush1.bf16.msra.mxu0 %v5277_v55  ;;  %3980 = vmatpush1.bf16.msra.mxu1 %v5280_v56  ;;  %v5372_v55 = vld [vmem:[%s7859_s1 + $0x568] ss:$16 sps:$4 sm:$0xff]   ;;  %v5377_v56 = vld [vmem:[%s7859_s1 + $0x584] ss:$16 sps:$4 sm:$0xff]  }
  0x74   :  { %3612 = vmatprep.subr.bf16.mxu0 %v5285_v57  ;;  %3981 = vmatprep.subr.bf16.mxu1 %v5288_v58  ;;  %v5380_v57 = vld [vmem:[%s7859_s1 + $0x58c] ss:$16 sps:$4 sm:$0xff]   ;;  %v5375_v58 = vld [vmem:[%s7859_s1 + $0x580] ss:$16 sps:$4 sm:$0xff]  }
  0x77   :  { %3613 = vmatpush1.bf16.msra.mxu0 %v5283_v59  ;;  %3982 = vmatpush1.bf16.msra.mxu1 %v5286_v60  ;;  %v5378_v59 = vld [vmem:[%s7859_s1 + $0x588] ss:$16 sps:$4 sm:$0xff]   ;;  %v5383_v60 = vld [vmem:[%s7859_s1 + $0x5a4] ss:$16 sps:$4 sm:$0xff]  }
  0x78   :  { %3614 = vmatprep.subr.bf16.mxu0 %v5291_v61  ;;  %3983 = vmatprep.subr.bf16.mxu1 %v5294_v62  ;;  %v5386_v61 = vld [vmem:[%s7859_s1 + $0x5ac] ss:$16 sps:$4 sm:$0xff]   ;;  %v5381_v62 = vld [vmem:[%s7859_s1 + $0x5a0] ss:$16 sps:$4 sm:$0xff]  }
  0x7b   :  { %3615 = vmatpush1.bf16.msra.mxu0 %v5289_v63  ;;  %3984 = vmatpush1.bf16.msra.mxu1 %v5292_v0  ;;  %v5384_v63 = vld [vmem:[%s7859_s1 + $0x5a8] ss:$16 sps:$4 sm:$0xff]   ;;  %v5389_v0 = vld [vmem:[%s7859_s1 + $0x5c4] ss:$16 sps:$4 sm:$0xff]  }
  0x7c   :  { %3616 = vmatprep.subr.bf16.mxu0 %v5297_v1  ;;  %3985 = vmatprep.subr.bf16.mxu1 %v5300_v2  ;;  %v5392_v1 = vld [vmem:[%s7859_s1 + $0x5cc] ss:$16 sps:$4 sm:$0xff]   ;;  %v5387_v2 = vld [vmem:[%s7859_s1 + $0x5c0] ss:$16 sps:$4 sm:$0xff]  }
  0x7f   :  { %3617 = vmatpush1.bf16.msra.mxu0 %v5295_v3  ;;  %3986 = vmatpush1.bf16.msra.mxu1 %v5298_v4  ;;  %v5390_v3 = vld [vmem:[%s7859_s1 + $0x5c8] ss:$16 sps:$4 sm:$0xff]   ;;  %v5395_v4 = vld [vmem:[%s7859_s1 + $0x5e4] ss:$16 sps:$4 sm:$0xff]  }
  0x80   :  { %3627 = vmatprep.subr.bf16.mxu0 %v5305_v5  ;;  %3996 = vmatprep.subr.bf16.mxu1 %v5308_v6  ;;  %v5398_v5 = vld [vmem:[%s7859_s1 + $0x5ec] ss:$16 sps:$4 sm:$0xff]   ;;  %v5393_v6 = vld [vmem:[%s7859_s1 + $0x5e0] ss:$16 sps:$4 sm:$0xff]  }
  0x82   :  { %3619 = vmatmul.mubr.bf16.vlgmr.msra.gmra.mrb[0].mxu0 %v4447_v7  ;;  %3988 = vmatmul.mubr.bf16.vlgmr.msra.gmra.mrb[0].mxu1 %v4447_v7  ;;  %v5396_v7 = vld [vmem:[%s7859_s1 + $0x5e8] ss:$16 sps:$4 sm:$0xff]  }
  0x83   :  { %3628 = vmatpush1.bf16.msra.mxu0 %v5303_v8  ;;  %3997 = vmatpush1.bf16.msra.mxu1 %v5306_v9  ;;  %v5403_v8 = vld [vmem:[%s7859_s1 + $0x604] ss:$16 sps:$4 sm:$0xff]   ;;  %v5406_v9 = vld [vmem:[%s7859_s1 + $0x60c] ss:$16 sps:$4 sm:$0xff]  }
  0x84   :  { %3629 = vmatprep.subr.bf16.mxu0 %v5311_v10  ;;  %3998 = vmatprep.subr.bf16.mxu1 %v5314_v12  ;;  %v5401_v10 = vld [vmem:[%s7859_s1 + $0x600] ss:$16 sps:$4 sm:$0xff]   ;;  %v4449_v12 = vcombine.low %v6430_v11, %v6430_v11  ;;  %v5412_v11 = vld [vmem:[%s7859_s1 + $0x62c] ss:$16 sps:$4 sm:$0xff]  }
  0x85   :  { %3659 = vmatprep.mubr.bf16.mxu0 %v4450_v13  ;;  %4028 = vmatprep.mubr.bf16.mxu1 %v4450_v13  ;;  %v5404_v13 = vld [vmem:[%s7859_s1 + $0x608] ss:$16 sps:$4 sm:$0xff]  }
  0x87   :  { %3630 = vmatpush1.bf16.msra.mxu0 %v5309_v14  ;;  %3999 = vmatpush1.bf16.msra.mxu1 %v5312_v15  ;;  %v6628_v14 = vld [vmem:[%s7860_s0 + $0x18] sm:$0xff]  ;;  %v5409_v15 = vld [vmem:[%s7859_s1 + $0x624] ss:$16 sps:$4 sm:$0xff]  }
  0x88   :  { %3631 = vmatprep.subr.bf16.mxu0 %v5317_v16  ;;  %4000 = vmatprep.subr.bf16.mxu1 %v5320_v17  ;;  %v4452_v16 = vcombine.high %v6628_v14, %v6628_v14  ;;  %v5407_v17 = vld [vmem:[%s7859_s1 + $0x620] ss:$16 sps:$4 sm:$0xff]  }
  0x8b   :  { %3632 = vmatpush1.bf16.msra.mxu0 %v5315_v18  ;;  %4001 = vmatpush1.bf16.msra.mxu1 %v5318_v19  ;;  %v5410_v18 = vld [vmem:[%s7859_s1 + $0x628] ss:$16 sps:$4 sm:$0xff]   ;;  %v5415_v19 = vld [vmem:[%s7859_s1 + $0x644] ss:$16 sps:$4 sm:$0xff]  }
  0x8c   :  { %3633 = vmatprep.subr.bf16.mxu0 %v5323_v20  ;;  %4002 = vmatprep.subr.bf16.mxu1 %v5326_v21  ;;  %v5418_v20 = vld [vmem:[%s7859_s1 + $0x64c] ss:$16 sps:$4 sm:$0xff]   ;;  %v5413_v21 = vld [vmem:[%s7859_s1 + $0x640] ss:$16 sps:$4 sm:$0xff]  }
  0x8f   :  { %3634 = vmatpush1.bf16.msra.mxu0 %v5321_v22  ;;  %4003 = vmatpush1.bf16.msra.mxu1 %v5324_v23  ;;  %v5416_v22 = vld [vmem:[%s7859_s1 + $0x648] ss:$16 sps:$4 sm:$0xff]   ;;  %v5421_v23 = vld [vmem:[%s7859_s1 + $0x664] ss:$16 sps:$4 sm:$0xff]  }
  0x90   :  { %3635 = vmatprep.subr.bf16.mxu0 %v5329_v24  ;;  %4004 = vmatprep.subr.bf16.mxu1 %v5332_v25  ;;  %v5424_v24 = vld [vmem:[%s7859_s1 + $0x66c] ss:$16 sps:$4 sm:$0xff]   ;;  %v5419_v25 = vld [vmem:[%s7859_s1 + $0x660] ss:$16 sps:$4 sm:$0xff]  }
  0x93   :  { %3636 = vmatpush1.bf16.msra.mxu0 %v5327_v26  ;;  %4005 = vmatpush1.bf16.msra.mxu1 %v5330_v27  ;;  %v5422_v26 = vld [vmem:[%s7859_s1 + $0x668] ss:$16 sps:$4 sm:$0xff]   ;;  %v5427_v27 = vld [vmem:[%s7859_s1 + $0x684] ss:$16 sps:$4 sm:$0xff]  }
  0x94   :  { %3637 = vmatprep.subr.bf16.mxu0 %v5335_v28  ;;  %4006 = vmatprep.subr.bf16.mxu1 %v5338_v29  ;;  %v5430_v28 = vld [vmem:[%s7859_s1 + $0x68c] ss:$16 sps:$4 sm:$0xff]   ;;  %v5425_v29 = vld [vmem:[%s7859_s1 + $0x680] ss:$16 sps:$4 sm:$0xff]  }
  0x97   :  { %3638 = vmatpush1.bf16.msra.mxu0 %v5333_v30  ;;  %4007 = vmatpush1.bf16.msra.mxu1 %v5336_v31  ;;  %v5428_v30 = vld [vmem:[%s7859_s1 + $0x688] ss:$16 sps:$4 sm:$0xff]   ;;  %v5433_v31 = vld [vmem:[%s7859_s1 + $0x6a4] ss:$16 sps:$4 sm:$0xff]  }
  0x98   :  { %3639 = vmatprep.subr.bf16.mxu0 %v5341_v32  ;;  %4008 = vmatprep.subr.bf16.mxu1 %v5344_v33  ;;  %v5436_v32 = vld [vmem:[%s7859_s1 + $0x6ac] ss:$16 sps:$4 sm:$0xff]   ;;  %v5431_v33 = vld [vmem:[%s7859_s1 + $0x6a0] ss:$16 sps:$4 sm:$0xff]  }
  0x9b   :  { %3640 = vmatpush1.bf16.msra.mxu0 %v5339_v34  ;;  %4009 = vmatpush1.bf16.msra.mxu1 %v5342_v35  ;;  %v5434_v34 = vld [vmem:[%s7859_s1 + $0x6a8] ss:$16 sps:$4 sm:$0xff]   ;;  %v5439_v35 = vld [vmem:[%s7859_s1 + $0x6c4] ss:$16 sps:$4 sm:$0xff]  }
  0x9c   :  { %3641 = vmatprep.subr.bf16.mxu0 %v5347_v36  ;;  %4010 = vmatprep.subr.bf16.mxu1 %v5350_v37  ;;  %v5442_v36 = vld [vmem:[%s7859_s1 + $0x6cc] ss:$16 sps:$4 sm:$0xff]   ;;  %v5437_v37 = vld [vmem:[%s7859_s1 + $0x6c0] ss:$16 sps:$4 sm:$0xff]  }
  0x9f   :  { %3642 = vmatpush1.bf16.msra.mxu0 %v5345_v38  ;;  %4011 = vmatpush1.bf16.msra.mxu1 %v5348_v39  ;;  %v5440_v38 = vld [vmem:[%s7859_s1 + $0x6c8] ss:$16 sps:$4 sm:$0xff]   ;;  %v5445_v39 = vld [vmem:[%s7859_s1 + $0x6e4] ss:$16 sps:$4 sm:$0xff]  }
  0xa0   :  { %3643 = vmatprep.subr.bf16.mxu0 %v5353_v40  ;;  %4012 = vmatprep.subr.bf16.mxu1 %v5356_v41  ;;  %v5448_v40 = vld [vmem:[%s7859_s1 + $0x6ec] ss:$16 sps:$4 sm:$0xff]   ;;  %v5443_v41 = vld [vmem:[%s7859_s1 + $0x6e0] ss:$16 sps:$4 sm:$0xff]  }
  0xa3   :  { %3644 = vmatpush1.bf16.msra.mxu0 %v5351_v42  ;;  %4013 = vmatpush1.bf16.msra.mxu1 %v5354_v43  ;;  %v5446_v42 = vld [vmem:[%s7859_s1 + $0x6e8] ss:$16 sps:$4 sm:$0xff]   ;;  %v5451_v43 = vld [vmem:[%s7859_s1 + $0x704] ss:$16 sps:$4 sm:$0xff]  }
  0xa4   :  { %3645 = vmatprep.subr.bf16.mxu0 %v5359_v44  ;;  %4014 = vmatprep.subr.bf16.mxu1 %v5362_v45  ;;  %v5454_v44 = vld [vmem:[%s7859_s1 + $0x70c] ss:$16 sps:$4 sm:$0xff]   ;;  %v5449_v45 = vld [vmem:[%s7859_s1 + $0x700] ss:$16 sps:$4 sm:$0xff]  }
  0xa7   :  { %3646 = vmatpush1.bf16.msra.mxu0 %v5357_v46  ;;  %4015 = vmatpush1.bf16.msra.mxu1 %v5360_v47  ;;  %v5452_v46 = vld [vmem:[%s7859_s1 + $0x708] ss:$16 sps:$4 sm:$0xff]   ;;  %v5457_v47 = vld [vmem:[%s7859_s1 + $0x724] ss:$16 sps:$4 sm:$0xff]  }
  0xa8   :  { %3647 = vmatprep.subr.bf16.mxu0 %v5365_v48  ;;  %4016 = vmatprep.subr.bf16.mxu1 %v5368_v49  ;;  %v5460_v48 = vld [vmem:[%s7859_s1 + $0x72c] ss:$16 sps:$4 sm:$0xff]   ;;  %v5455_v49 = vld [vmem:[%s7859_s1 + $0x720] ss:$16 sps:$4 sm:$0xff]  }
  0xab   :  { %3648 = vmatpush1.bf16.msra.mxu0 %v5363_v50  ;;  %4017 = vmatpush1.bf16.msra.mxu1 %v5366_v51  ;;  %v5458_v50 = vld [vmem:[%s7859_s1 + $0x728] ss:$16 sps:$4 sm:$0xff]   ;;  %v5463_v51 = vld [vmem:[%s7859_s1 + $0x744] ss:$16 sps:$4 sm:$0xff]  }
  0xac   :  { %3649 = vmatprep.subr.bf16.mxu0 %v5371_v52  ;;  %4018 = vmatprep.subr.bf16.mxu1 %v5374_v53  ;;  %v5466_v52 = vld [vmem:[%s7859_s1 + $0x74c] ss:$16 sps:$4 sm:$0xff]   ;;  %v5461_v53 = vld [vmem:[%s7859_s1 + $0x740] ss:$16 sps:$4 sm:$0xff]  }
  0xaf   :  { %3650 = vmatpush1.bf16.msra.mxu0 %v5369_v54  ;;  %4019 = vmatpush1.bf16.msra.mxu1 %v5372_v55  ;;  %v5464_v54 = vld [vmem:[%s7859_s1 + $0x748] ss:$16 sps:$4 sm:$0xff]   ;;  %v5469_v55 = vld [vmem:[%s7859_s1 + $0x764] ss:$16 sps:$4 sm:$0xff]  }
  0xb0   :  { %3651 = vmatprep.subr.bf16.mxu0 %v5377_v56  ;;  %4020 = vmatprep.subr.bf16.mxu1 %v5380_v57  ;;  %v5472_v56 = vld [vmem:[%s7859_s1 + $0x76c] ss:$16 sps:$4 sm:$0xff]   ;;  %v5467_v57 = vld [vmem:[%s7859_s1 + $0x760] ss:$16 sps:$4 sm:$0xff]  }
  0xb3   :  { %3652 = vmatpush1.bf16.msra.mxu0 %v5375_v58  ;;  %4021 = vmatpush1.bf16.msra.mxu1 %v5378_v59  ;;  %v5470_v58 = vld [vmem:[%s7859_s1 + $0x768] ss:$16 sps:$4 sm:$0xff]   ;;  %v5475_v59 = vld [vmem:[%s7859_s1 + $0x784] ss:$16 sps:$4 sm:$0xff]  }
  0xb4   :  { %3653 = vmatprep.subr.bf16.mxu0 %v5383_v60  ;;  %4022 = vmatprep.subr.bf16.mxu1 %v5386_v61  ;;  %v5478_v60 = vld [vmem:[%s7859_s1 + $0x78c] ss:$16 sps:$4 sm:$0xff]   ;;  %v5473_v61 = vld [vmem:[%s7859_s1 + $0x780] ss:$16 sps:$4 sm:$0xff]  }
  0xb7   :  { %3654 = vmatpush1.bf16.msra.mxu0 %v5381_v62  ;;  %4023 = vmatpush1.bf16.msra.mxu1 %v5384_v63  ;;  %v5476_v62 = vld [vmem:[%s7859_s1 + $0x788] ss:$16 sps:$4 sm:$0xff]   ;;  %v5481_v63 = vld [vmem:[%s7859_s1 + $0x7a4] ss:$16 sps:$4 sm:$0xff]  }
  0xb8   :  { %3655 = vmatprep.subr.bf16.mxu0 %v5389_v0  ;;  %4024 = vmatprep.subr.bf16.mxu1 %v5392_v1  ;;  %v5484_v0 = vld [vmem:[%s7859_s1 + $0x7ac] ss:$16 sps:$4 sm:$0xff]   ;;  %v5479_v1 = vld [vmem:[%s7859_s1 + $0x7a0] ss:$16 sps:$4 sm:$0xff]  }
  0xbb   :  { %3656 = vmatpush1.bf16.msra.mxu0 %v5387_v2  ;;  %4025 = vmatpush1.bf16.msra.mxu1 %v5390_v3  ;;  %v5482_v2 = vld [vmem:[%s7859_s1 + $0x7a8] ss:$16 sps:$4 sm:$0xff]   ;;  %v5487_v3 = vld [vmem:[%s7859_s1 + $0x7c4] ss:$16 sps:$4 sm:$0xff]  }
  0xbc   :  { %3657 = vmatprep.subr.bf16.mxu0 %v5395_v4  ;;  %4026 = vmatprep.subr.bf16.mxu1 %v5398_v5  ;;  %v5490_v4 = vld [vmem:[%s7859_s1 + $0x7cc] ss:$16 sps:$4 sm:$0xff]   ;;  %v5485_v5 = vld [vmem:[%s7859_s1 + $0x7c0] ss:$16 sps:$4 sm:$0xff]  }
  0xbf   :  { %3658 = vmatpush1.bf16.msra.mxu0 %v5393_v6  ;;  %4027 = vmatpush1.bf16.msra.mxu1 %v5396_v7  ;;  %v5488_v6 = vld [vmem:[%s7859_s1 + $0x7c8] ss:$16 sps:$4 sm:$0xff]   ;;  %v5493_v7 = vld [vmem:[%s7859_s1 + $0x7e4] ss:$16 sps:$4 sm:$0xff]  }
  0xc0   :  { %3668 = vmatprep.subr.bf16.mxu0 %v5403_v8  ;;  %4037 = vmatprep.subr.bf16.mxu1 %v5406_v9  ;;  %v5496_v8 = vld [vmem:[%s7859_s1 + $0x7ec] ss:$16 sps:$4 sm:$0xff]   ;;  %v5491_v9 = vld [vmem:[%s7859_s1 + $0x7e0] ss:$16 sps:$4 sm:$0xff]  }
  0xc2   :  { %3660 = vmatmul.mubr.bf16.vlgmr.msra.gmra.mrb[0].mxu0 %v4449_v12  ;;  %4029 = vmatmul.mubr.bf16.vlgmr.msra.gmra.mrb[0].mxu1 %v4449_v12  ;;  %v5501_v12 = vld [vmem:[%s7859_s1 + $0x804] ss:$16 sps:$4 sm:$0xff]  }
  0xc3   :  { %3669 = vmatpush1.bf16.msra.mxu0 %v5401_v10  ;;  %4038 = vmatpush1.bf16.msra.mxu1 %v5404_v13  ;;  %v5494_v10 = vld [vmem:[%s7859_s1 + $0x7e8] ss:$16 sps:$4 sm:$0xff]   ;;  %v5504_v13 = vld [vmem:[%s7859_s1 + $0x80c] ss:$16 sps:$4 sm:$0xff]  }
  0xc4   :  { %3670 = vmatprep.subr.bf16.mxu0 %v5409_v15  ;;  %4039 = vmatprep.subr.bf16.mxu1 %v5412_v11  ;;  %v5499_v15 = vld [vmem:[%s7859_s1 + $0x800] ss:$16 sps:$4 sm:$0xff]   ;;  %v4451_v11 = vcombine.low %v6628_v14, %v6628_v14  ;;  %v5510_v14 = vld [vmem:[%s7859_s1 + $0x82c] ss:$16 sps:$4 sm:$0xff]  }
  0xc5   :  { %3700 = vmatprep.mubr.bf16.mxu0 %v4452_v16  ;;  %4069 = vmatprep.mubr.bf16.mxu1 %v4452_v16  ;;  %v6826_v16 = vld [vmem:[%s7860_s0 + $0x20] sm:$0xff] }
  0xc7   :  { %3671 = vmatpush1.bf16.msra.mxu0 %v5407_v17  ;;  %4040 = vmatpush1.bf16.msra.mxu1 %v5410_v18  ;;  %v5502_v17 = vld [vmem:[%s7859_s1 + $0x808] ss:$16 sps:$4 sm:$0xff]   ;;  %v5507_v18 = vld [vmem:[%s7859_s1 + $0x824] ss:$16 sps:$4 sm:$0xff]  }
  0xc8   :  { %3672 = vmatprep.subr.bf16.mxu0 %v5415_v19  ;;  %4041 = vmatprep.subr.bf16.mxu1 %v5418_v20  ;;  %v4454_v19 = vcombine.high %v6826_v16, %v6826_v16  ;;  %v5505_v20 = vld [vmem:[%s7859_s1 + $0x820] ss:$16 sps:$4 sm:$0xff]  }
  0xcb   :  { %3673 = vmatpush1.bf16.msra.mxu0 %v5413_v21  ;;  %4042 = vmatpush1.bf16.msra.mxu1 %v5416_v22  ;;  %v5508_v21 = vld [vmem:[%s7859_s1 + $0x828] ss:$16 sps:$4 sm:$0xff]   ;;  %v5513_v22 = vld [vmem:[%s7859_s1 + $0x844] ss:$16 sps:$4 sm:$0xff]  }
  0xcc   :  { %3674 = vmatprep.subr.bf16.mxu0 %v5421_v23  ;;  %4043 = vmatprep.subr.bf16.mxu1 %v5424_v24  ;;  %v5516_v23 = vld [vmem:[%s7859_s1 + $0x84c] ss:$16 sps:$4 sm:$0xff]   ;;  %v5511_v24 = vld [vmem:[%s7859_s1 + $0x840] ss:$16 sps:$4 sm:$0xff]  }
  0xcf   :  { %3675 = vmatpush1.bf16.msra.mxu0 %v5419_v25  ;;  %4044 = vmatpush1.bf16.msra.mxu1 %v5422_v26  ;;  %v5514_v25 = vld [vmem:[%s7859_s1 + $0x848] ss:$16 sps:$4 sm:$0xff]   ;;  %v5519_v26 = vld [vmem:[%s7859_s1 + $0x864] ss:$16 sps:$4 sm:$0xff]  }
  0xd0   :  { %3676 = vmatprep.subr.bf16.mxu0 %v5427_v27  ;;  %4045 = vmatprep.subr.bf16.mxu1 %v5430_v28  ;;  %v5522_v27 = vld [vmem:[%s7859_s1 + $0x86c] ss:$16 sps:$4 sm:$0xff]   ;;  %v5517_v28 = vld [vmem:[%s7859_s1 + $0x860] ss:$16 sps:$4 sm:$0xff]  }
  0xd3   :  { %3677 = vmatpush1.bf16.msra.mxu0 %v5425_v29  ;;  %4046 = vmatpush1.bf16.msra.mxu1 %v5428_v30  ;;  %v5520_v29 = vld [vmem:[%s7859_s1 + $0x868] ss:$16 sps:$4 sm:$0xff]   ;;  %v5525_v30 = vld [vmem:[%s7859_s1 + $0x884] ss:$16 sps:$4 sm:$0xff]  }
  0xd4   :  { %3678 = vmatprep.subr.bf16.mxu0 %v5433_v31  ;;  %4047 = vmatprep.subr.bf16.mxu1 %v5436_v32  ;;  %v5528_v31 = vld [vmem:[%s7859_s1 + $0x88c] ss:$16 sps:$4 sm:$0xff]   ;;  %v5523_v32 = vld [vmem:[%s7859_s1 + $0x880] ss:$16 sps:$4 sm:$0xff]  }
  0xd7   :  { %3679 = vmatpush1.bf16.msra.mxu0 %v5431_v33  ;;  %4048 = vmatpush1.bf16.msra.mxu1 %v5434_v34  ;;  %v5526_v33 = vld [vmem:[%s7859_s1 + $0x888] ss:$16 sps:$4 sm:$0xff]   ;;  %v5531_v34 = vld [vmem:[%s7859_s1 + $0x8a4] ss:$16 sps:$4 sm:$0xff]  }
  0xd8   :  { %3680 = vmatprep.subr.bf16.mxu0 %v5439_v35  ;;  %4049 = vmatprep.subr.bf16.mxu1 %v5442_v36  ;;  %v5534_v35 = vld [vmem:[%s7859_s1 + $0x8ac] ss:$16 sps:$4 sm:$0xff]   ;;  %v5529_v36 = vld [vmem:[%s7859_s1 + $0x8a0] ss:$16 sps:$4 sm:$0xff]  }
  0xdb   :  { %3681 = vmatpush1.bf16.msra.mxu0 %v5437_v37  ;;  %4050 = vmatpush1.bf16.msra.mxu1 %v5440_v38  ;;  %v5532_v37 = vld [vmem:[%s7859_s1 + $0x8a8] ss:$16 sps:$4 sm:$0xff]   ;;  %v5537_v38 = vld [vmem:[%s7859_s1 + $0x8c4] ss:$16 sps:$4 sm:$0xff]  }
  0xdc   :  { %3682 = vmatprep.subr.bf16.mxu0 %v5445_v39  ;;  %4051 = vmatprep.subr.bf16.mxu1 %v5448_v40  ;;  %v5540_v39 = vld [vmem:[%s7859_s1 + $0x8cc] ss:$16 sps:$4 sm:$0xff]   ;;  %v5535_v40 = vld [vmem:[%s7859_s1 + $0x8c0] ss:$16 sps:$4 sm:$0xff]  }
  0xdf   :  { %3683 = vmatpush1.bf16.msra.mxu0 %v5443_v41  ;;  %4052 = vmatpush1.bf16.msra.mxu1 %v5446_v42  ;;  %v5538_v41 = vld [vmem:[%s7859_s1 + $0x8c8] ss:$16 sps:$4 sm:$0xff]   ;;  %v5543_v42 = vld [vmem:[%s7859_s1 + $0x8e4] ss:$16 sps:$4 sm:$0xff]  }
  0xe0   :  { %3684 = vmatprep.subr.bf16.mxu0 %v5451_v43  ;;  %4053 = vmatprep.subr.bf16.mxu1 %v5454_v44  ;;  %v5546_v43 = vld [vmem:[%s7859_s1 + $0x8ec] ss:$16 sps:$4 sm:$0xff]   ;;  %v5541_v44 = vld [vmem:[%s7859_s1 + $0x8e0] ss:$16 sps:$4 sm:$0xff]  }
  0xe3   :  { %3685 = vmatpush1.bf16.msra.mxu0 %v5449_v45  ;;  %4054 = vmatpush1.bf16.msra.mxu1 %v5452_v46  ;;  %v5544_v45 = vld [vmem:[%s7859_s1 + $0x8e8] ss:$16 sps:$4 sm:$0xff]   ;;  %v5549_v46 = vld [vmem:[%s7859_s1 + $0x904] ss:$16 sps:$4 sm:$0xff]  }
  0xe4   :  { %3686 = vmatprep.subr.bf16.mxu0 %v5457_v47  ;;  %4055 = vmatprep.subr.bf16.mxu1 %v5460_v48  ;;  %v5552_v47 = vld [vmem:[%s7859_s1 + $0x90c] ss:$16 sps:$4 sm:$0xff]   ;;  %v5547_v48 = vld [vmem:[%s7859_s1 + $0x900] ss:$16 sps:$4 sm:$0xff]  }
  0xe7   :  { %3687 = vmatpush1.bf16.msra.mxu0 %v5455_v49  ;;  %4056 = vmatpush1.bf16.msra.mxu1 %v5458_v50  ;;  %v5550_v49 = vld [vmem:[%s7859_s1 + $0x908] ss:$16 sps:$4 sm:$0xff]   ;;  %v5555_v50 = vld [vmem:[%s7859_s1 + $0x924] ss:$16 sps:$4 sm:$0xff]  }
  0xe8   :  { %3688 = vmatprep.subr.bf16.mxu0 %v5463_v51  ;;  %4057 = vmatprep.subr.bf16.mxu1 %v5466_v52  ;;  %v5558_v51 = vld [vmem:[%s7859_s1 + $0x92c] ss:$16 sps:$4 sm:$0xff]   ;;  %v5553_v52 = vld [vmem:[%s7859_s1 + $0x920] ss:$16 sps:$4 sm:$0xff]  }
  0xeb   :  { %3689 = vmatpush1.bf16.msra.mxu0 %v5461_v53  ;;  %4058 = vmatpush1.bf16.msra.mxu1 %v5464_v54  ;;  %v5556_v53 = vld [vmem:[%s7859_s1 + $0x928] ss:$16 sps:$4 sm:$0xff]   ;;  %v5561_v54 = vld [vmem:[%s7859_s1 + $0x944] ss:$16 sps:$4 sm:$0xff]  }
  0xec   :  { %3690 = vmatprep.subr.bf16.mxu0 %v5469_v55  ;;  %4059 = vmatprep.subr.bf16.mxu1 %v5472_v56  ;;  %v5564_v55 = vld [vmem:[%s7859_s1 + $0x94c] ss:$16 sps:$4 sm:$0xff]   ;;  %v5559_v56 = vld [vmem:[%s7859_s1 + $0x940] ss:$16 sps:$4 sm:$0xff]  }
  0xef   :  { %3691 = vmatpush1.bf16.msra.mxu0 %v5467_v57  ;;  %4060 = vmatpush1.bf16.msra.mxu1 %v5470_v58  ;;  %v5562_v57 = vld [vmem:[%s7859_s1 + $0x948] ss:$16 sps:$4 sm:$0xff]   ;;  %v5567_v58 = vld [vmem:[%s7859_s1 + $0x964] ss:$16 sps:$4 sm:$0xff]  }
  0xf0   :  { %3692 = vmatprep.subr.bf16.mxu0 %v5475_v59  ;;  %4061 = vmatprep.subr.bf16.mxu1 %v5478_v60  ;;  %v5570_v59 = vld [vmem:[%s7859_s1 + $0x96c] ss:$16 sps:$4 sm:$0xff]   ;;  %v5565_v60 = vld [vmem:[%s7859_s1 + $0x960] ss:$16 sps:$4 sm:$0xff]  }
  0xf3   :  { %3693 = vmatpush1.bf16.msra.mxu0 %v5473_v61  ;;  %4062 = vmatpush1.bf16.msra.mxu1 %v5476_v62  ;;  %v5568_v61 = vld [vmem:[%s7859_s1 + $0x968] ss:$16 sps:$4 sm:$0xff]   ;;  %v5573_v62 = vld [vmem:[%s7859_s1 + $0x984] ss:$16 sps:$4 sm:$0xff]  }
  0xf4   :  { %3694 = vmatprep.subr.bf16.mxu0 %v5481_v63  ;;  %4063 = vmatprep.subr.bf16.mxu1 %v5484_v0  ;;  %v5576_v63 = vld [vmem:[%s7859_s1 + $0x98c] ss:$16 sps:$4 sm:$0xff]   ;;  %v5571_v0 = vld [vmem:[%s7859_s1 + $0x980] ss:$16 sps:$4 sm:$0xff]  }
  0xf7   :  { %3695 = vmatpush1.bf16.msra.mxu0 %v5479_v1  ;;  %4064 = vmatpush1.bf16.msra.mxu1 %v5482_v2  ;;  %v5574_v1 = vld [vmem:[%s7859_s1 + $0x988] ss:$16 sps:$4 sm:$0xff]   ;;  %v5579_v2 = vld [vmem:[%s7859_s1 + $0x9a4] ss:$16 sps:$4 sm:$0xff]  }
  0xf8   :  { %3696 = vmatprep.subr.bf16.mxu0 %v5487_v3  ;;  %4065 = vmatprep.subr.bf16.mxu1 %v5490_v4  ;;  %v5582_v3 = vld [vmem:[%s7859_s1 + $0x9ac] ss:$16 sps:$4 sm:$0xff]   ;;  %v5577_v4 = vld [vmem:[%s7859_s1 + $0x9a0] ss:$16 sps:$4 sm:$0xff]  }
  0xfb   :  { %3697 = vmatpush1.bf16.msra.mxu0 %v5485_v5  ;;  %4066 = vmatpush1.bf16.msra.mxu1 %v5488_v6  ;;  %v5580_v5 = vld [vmem:[%s7859_s1 + $0x9a8] ss:$16 sps:$4 sm:$0xff]   ;;  %v5585_v6 = vld [vmem:[%s7859_s1 + $0x9c4] ss:$16 sps:$4 sm:$0xff]  }
  0xfc   :  { %3698 = vmatprep.subr.bf16.mxu0 %v5493_v7  ;;  %4067 = vmatprep.subr.bf16.mxu1 %v5496_v8  ;;  %v5588_v7 = vld [vmem:[%s7859_s1 + $0x9cc] ss:$16 sps:$4 sm:$0xff]   ;;  %v5583_v8 = vld [vmem:[%s7859_s1 + $0x9c0] ss:$16 sps:$4 sm:$0xff]  }
  0xff   :  { %3699 = vmatpush1.bf16.msra.mxu0 %v5491_v9  ;;  %4068 = vmatpush1.bf16.msra.mxu1 %v5494_v10  ;;  %v5586_v9 = vld [vmem:[%s7859_s1 + $0x9c8] ss:$16 sps:$4 sm:$0xff]   ;;  %v5591_v10 = vld [vmem:[%s7859_s1 + $0x9e4] ss:$16 sps:$4 sm:$0xff]  }
 0x100   :  { %3709 = vmatprep.subr.bf16.mxu0 %v5501_v12  ;;  %4078 = vmatprep.subr.bf16.mxu1 %v5504_v13  ;;  %v5594_v12 = vld [vmem:[%s7859_s1 + $0x9ec] ss:$16 sps:$4 sm:$0xff]   ;;  %v5589_v13 = vld [vmem:[%s7859_s1 + $0x9e0] ss:$16 sps:$4 sm:$0xff]  }
 0x102   :  { %3701 = vmatmul.mubr.bf16.vlgmr.msra.gmra.mrb[0].mxu0 %v4451_v11  ;;  %4070 = vmatmul.mubr.bf16.vlgmr.msra.gmra.mrb[0].mxu1 %v4451_v11  ;;  %v5599_v11 = vld [vmem:[%s7859_s1 + $0xa04] ss:$16 sps:$4 sm:$0xff]  }
 0x103   :  { %3710 = vmatpush1.bf16.msra.mxu0 %v5499_v15  ;;  %4079 = vmatpush1.bf16.msra.mxu1 %v5502_v17  ;;  %v5592_v15 = vld [vmem:[%s7859_s1 + $0x9e8] ss:$16 sps:$4 sm:$0xff]   ;;  %v5602_v17 = vld [vmem:[%s7859_s1 + $0xa0c] ss:$16 sps:$4 sm:$0xff]  }
 0x104   :  { %3711 = vmatprep.subr.bf16.mxu0 %v5507_v18  ;;  %4080 = vmatprep.subr.bf16.mxu1 %v5510_v14  ;;  %v7022_v18 = vld [vmem:[%s7860_s0 + $0x28] sm:$0xff]  ;;  %v4453_v14 = vcombine.low %v6826_v16, %v6826_v16 }
 0x105   :  { %3741 = vmatprep.mubr.bf16.mxu0 %v4454_v19  ;;  %4110 = vmatprep.mubr.bf16.mxu1 %v4454_v19  ;;  %v5597_v19 = vld [vmem:[%s7859_s1 + $0xa00] ss:$16 sps:$4 sm:$0xff]   ;;  %v5608_v16 = vld [vmem:[%s7859_s1 + $0xa2c] ss:$16 sps:$4 sm:$0xff]  }
 0x107   :  { %3712 = vmatpush1.bf16.msra.mxu0 %v5505_v20  ;;  %4081 = vmatpush1.bf16.msra.mxu1 %v5508_v21  ;;  %v5600_v20 = vld [vmem:[%s7859_s1 + $0xa08] ss:$16 sps:$4 sm:$0xff]   ;;  %v5605_v21 = vld [vmem:[%s7859_s1 + $0xa24] ss:$16 sps:$4 sm:$0xff]  }
 0x108   :  { %3713 = vmatprep.subr.bf16.mxu0 %v5513_v22  ;;  %4082 = vmatprep.subr.bf16.mxu1 %v5516_v23  ;;  %v4456_v22 = vcombine.high %v7022_v18, %v7022_v18  ;;  %v5603_v23 = vld [vmem:[%s7859_s1 + $0xa20] ss:$16 sps:$4 sm:$0xff]  }
 0x10b   :  { %3714 = vmatpush1.bf16.msra.mxu0 %v5511_v24  ;;  %4083 = vmatpush1.bf16.msra.mxu1 %v5514_v25  ;;  %v5606_v24 = vld [vmem:[%s7859_s1 + $0xa28] ss:$16 sps:$4 sm:$0xff]   ;;  %v5611_v25 = vld [vmem:[%s7859_s1 + $0xa44] ss:$16 sps:$4 sm:$0xff]  }
 0x10c   :  { %3715 = vmatprep.subr.bf16.mxu0 %v5519_v26  ;;  %4084 = vmatprep.subr.bf16.mxu1 %v5522_v27  ;;  %v5614_v26 = vld [vmem:[%s7859_s1 + $0xa4c] ss:$16 sps:$4 sm:$0xff]   ;;  %v5609_v27 = vld [vmem:[%s7859_s1 + $0xa40] ss:$16 sps:$4 sm:$0xff]  }
 0x10f   :  { %3716 = vmatpush1.bf16.msra.mxu0 %v5517_v28  ;;  %4085 = vmatpush1.bf16.msra.mxu1 %v5520_v29  ;;  %v5612_v28 = vld [vmem:[%s7859_s1 + $0xa48] ss:$16 sps:$4 sm:$0xff]   ;;  %v5617_v29 = vld [vmem:[%s7859_s1 + $0xa64] ss:$16 sps:$4 sm:$0xff]  }
 0x110   :  { %3717 = vmatprep.subr.bf16.mxu0 %v5525_v30  ;;  %4086 = vmatprep.subr.bf16.mxu1 %v5528_v31  ;;  %v5620_v30 = vld [vmem:[%s7859_s1 + $0xa6c] ss:$16 sps:$4 sm:$0xff]   ;;  %v5615_v31 = vld [vmem:[%s7859_s1 + $0xa60] ss:$16 sps:$4 sm:$0xff]  }
 0x113   :  { %3718 = vmatpush1.bf16.msra.mxu0 %v5523_v32  ;;  %4087 = vmatpush1.bf16.msra.mxu1 %v5526_v33  ;;  %v5618_v32 = vld [vmem:[%s7859_s1 + $0xa68] ss:$16 sps:$4 sm:$0xff]   ;;  %v5623_v33 = vld [vmem:[%s7859_s1 + $0xa84] ss:$16 sps:$4 sm:$0xff]  }
 0x114   :  { %3719 = vmatprep.subr.bf16.mxu0 %v5531_v34  ;;  %4088 = vmatprep.subr.bf16.mxu1 %v5534_v35  ;;  %v5626_v34 = vld [vmem:[%s7859_s1 + $0xa8c] ss:$16 sps:$4 sm:$0xff]   ;;  %v5621_v35 = vld [vmem:[%s7859_s1 + $0xa80] ss:$16 sps:$4 sm:$0xff]  }
 0x117   :  { %3720 = vmatpush1.bf16.msra.mxu0 %v5529_v36  ;;  %4089 = vmatpush1.bf16.msra.mxu1 %v5532_v37  ;;  %v5624_v36 = vld [vmem:[%s7859_s1 + $0xa88] ss:$16 sps:$4 sm:$0xff]   ;;  %v5629_v37 = vld [vmem:[%s7859_s1 + $0xaa4] ss:$16 sps:$4 sm:$0xff]  }
 0x118   :  { %3721 = vmatprep.subr.bf16.mxu0 %v5537_v38  ;;  %4090 = vmatprep.subr.bf16.mxu1 %v5540_v39  ;;  %v5632_v38 = vld [vmem:[%s7859_s1 + $0xaac] ss:$16 sps:$4 sm:$0xff]   ;;  %v5627_v39 = vld [vmem:[%s7859_s1 + $0xaa0] ss:$16 sps:$4 sm:$0xff]  }
 0x11b   :  { %3722 = vmatpush1.bf16.msra.mxu0 %v5535_v40  ;;  %4091 = vmatpush1.bf16.msra.mxu1 %v5538_v41  ;;  %v5630_v40 = vld [vmem:[%s7859_s1 + $0xaa8] ss:$16 sps:$4 sm:$0xff]   ;;  %v5635_v41 = vld [vmem:[%s7859_s1 + $0xac4] ss:$16 sps:$4 sm:$0xff]  }
 0x11c   :  { %3723 = vmatprep.subr.bf16.mxu0 %v5543_v42  ;;  %4092 = vmatprep.subr.bf16.mxu1 %v5546_v43  ;;  %v5638_v42 = vld [vmem:[%s7859_s1 + $0xacc] ss:$16 sps:$4 sm:$0xff]   ;;  %v5633_v43 = vld [vmem:[%s7859_s1 + $0xac0] ss:$16 sps:$4 sm:$0xff]  }
 0x11f   :  { %3724 = vmatpush1.bf16.msra.mxu0 %v5541_v44  ;;  %4093 = vmatpush1.bf16.msra.mxu1 %v5544_v45  ;;  %v5636_v44 = vld [vmem:[%s7859_s1 + $0xac8] ss:$16 sps:$4 sm:$0xff]   ;;  %v5641_v45 = vld [vmem:[%s7859_s1 + $0xae4] ss:$16 sps:$4 sm:$0xff]  }
 0x120   :  { %3725 = vmatprep.subr.bf16.mxu0 %v5549_v46  ;;  %4094 = vmatprep.subr.bf16.mxu1 %v5552_v47  ;;  %v5644_v46 = vld [vmem:[%s7859_s1 + $0xaec] ss:$16 sps:$4 sm:$0xff]   ;;  %v5639_v47 = vld [vmem:[%s7859_s1 + $0xae0] ss:$16 sps:$4 sm:$0xff]  }
 0x123   :  { %3726 = vmatpush1.bf16.msra.mxu0 %v5547_v48  ;;  %4095 = vmatpush1.bf16.msra.mxu1 %v5550_v49  ;;  %v5642_v48 = vld [vmem:[%s7859_s1 + $0xae8] ss:$16 sps:$4 sm:$0xff]   ;;  %v5647_v49 = vld [vmem:[%s7859_s1 + $0xb04] ss:$16 sps:$4 sm:$0xff]  }
 0x124   :  { %3727 = vmatprep.subr.bf16.mxu0 %v5555_v50  ;;  %4096 = vmatprep.subr.bf16.mxu1 %v5558_v51  ;;  %v5650_v50 = vld [vmem:[%s7859_s1 + $0xb0c] ss:$16 sps:$4 sm:$0xff]   ;;  %v5645_v51 = vld [vmem:[%s7859_s1 + $0xb00] ss:$16 sps:$4 sm:$0xff]  }
 0x127   :  { %3728 = vmatpush1.bf16.msra.mxu0 %v5553_v52  ;;  %4097 = vmatpush1.bf16.msra.mxu1 %v5556_v53  ;;  %v5648_v52 = vld [vmem:[%s7859_s1 + $0xb08] ss:$16 sps:$4 sm:$0xff]   ;;  %v5653_v53 = vld [vmem:[%s7859_s1 + $0xb24] ss:$16 sps:$4 sm:$0xff]  }
 0x128   :  { %3729 = vmatprep.subr.bf16.mxu0 %v5561_v54  ;;  %4098 = vmatprep.subr.bf16.mxu1 %v5564_v55  ;;  %v5656_v54 = vld [vmem:[%s7859_s1 + $0xb2c] ss:$16 sps:$4 sm:$0xff]   ;;  %v5651_v55 = vld [vmem:[%s7859_s1 + $0xb20] ss:$16 sps:$4 sm:$0xff]  }
 0x12b   :  { %3730 = vmatpush1.bf16.msra.mxu0 %v5559_v56  ;;  %4099 = vmatpush1.bf16.msra.mxu1 %v5562_v57  ;;  %v5654_v56 = vld [vmem:[%s7859_s1 + $0xb28] ss:$16 sps:$4 sm:$0xff]   ;;  %v5659_v57 = vld [vmem:[%s7859_s1 + $0xb44] ss:$16 sps:$4 sm:$0xff]  }
 0x12c   :  { %3731 = vmatprep.subr.bf16.mxu0 %v5567_v58  ;;  %4100 = vmatprep.subr.bf16.mxu1 %v5570_v59  ;;  %v5662_v58 = vld [vmem:[%s7859_s1 + $0xb4c] ss:$16 sps:$4 sm:$0xff]   ;;  %v5657_v59 = vld [vmem:[%s7859_s1 + $0xb40] ss:$16 sps:$4 sm:$0xff]  }
 0x12f   :  { %3732 = vmatpush1.bf16.msra.mxu0 %v5565_v60  ;;  %4101 = vmatpush1.bf16.msra.mxu1 %v5568_v61  ;;  %v5660_v60 = vld [vmem:[%s7859_s1 + $0xb48] ss:$16 sps:$4 sm:$0xff]   ;;  %v5665_v61 = vld [vmem:[%s7859_s1 + $0xb64] ss:$16 sps:$4 sm:$0xff]  }
 0x130   :  { %3733 = vmatprep.subr.bf16.mxu0 %v5573_v62  ;;  %4102 = vmatprep.subr.bf16.mxu1 %v5576_v63  ;;  %v5668_v62 = vld [vmem:[%s7859_s1 + $0xb6c] ss:$16 sps:$4 sm:$0xff]   ;;  %v5663_v63 = vld [vmem:[%s7859_s1 + $0xb60] ss:$16 sps:$4 sm:$0xff]  }
 0x133   :  { %3734 = vmatpush1.bf16.msra.mxu0 %v5571_v0  ;;  %4103 = vmatpush1.bf16.msra.mxu1 %v5574_v1  ;;  %v5666_v0 = vld [vmem:[%s7859_s1 + $0xb68] ss:$16 sps:$4 sm:$0xff]   ;;  %v5671_v1 = vld [vmem:[%s7859_s1 + $0xb84] ss:$16 sps:$4 sm:$0xff]  }
 0x134   :  { %3735 = vmatprep.subr.bf16.mxu0 %v5579_v2  ;;  %4104 = vmatprep.subr.bf16.mxu1 %v5582_v3  ;;  %v5674_v2 = vld [vmem:[%s7859_s1 + $0xb8c] ss:$16 sps:$4 sm:$0xff]   ;;  %v5669_v3 = vld [vmem:[%s7859_s1 + $0xb80] ss:$16 sps:$4 sm:$0xff]  }
 0x137   :  { %3736 = vmatpush1.bf16.msra.mxu0 %v5577_v4  ;;  %4105 = vmatpush1.bf16.msra.mxu1 %v5580_v5  ;;  %v5672_v4 = vld [vmem:[%s7859_s1 + $0xb88] ss:$16 sps:$4 sm:$0xff]   ;;  %v5677_v5 = vld [vmem:[%s7859_s1 + $0xba4] ss:$16 sps:$4 sm:$0xff]  }
 0x138   :  { %3737 = vmatprep.subr.bf16.mxu0 %v5585_v6  ;;  %4106 = vmatprep.subr.bf16.mxu1 %v5588_v7  ;;  %v5680_v6 = vld [vmem:[%s7859_s1 + $0xbac] ss:$16 sps:$4 sm:$0xff]   ;;  %v5675_v7 = vld [vmem:[%s7859_s1 + $0xba0] ss:$16 sps:$4 sm:$0xff]  }
 0x13b   :  { %3738 = vmatpush1.bf16.msra.mxu0 %v5583_v8  ;;  %4107 = vmatpush1.bf16.msra.mxu1 %v5586_v9  ;;  %v5678_v8 = vld [vmem:[%s7859_s1 + $0xba8] ss:$16 sps:$4 sm:$0xff]   ;;  %v5683_v9 = vld [vmem:[%s7859_s1 + $0xbc4] ss:$16 sps:$4 sm:$0xff]  }
 0x13c   :  { %3739 = vmatprep.subr.bf16.mxu0 %v5591_v10  ;;  %4108 = vmatprep.subr.bf16.mxu1 %v5594_v12  ;;  %v5686_v10 = vld [vmem:[%s7859_s1 + $0xbcc] ss:$16 sps:$4 sm:$0xff]   ;;  %v5681_v12 = vld [vmem:[%s7859_s1 + $0xbc0] ss:$16 sps:$4 sm:$0xff]  }
 0x13f   :  { %3740 = vmatpush1.bf16.msra.mxu0 %v5589_v13  ;;  %4109 = vmatpush1.bf16.msra.mxu1 %v5592_v15  ;;  %v5684_v13 = vld [vmem:[%s7859_s1 + $0xbc8] ss:$16 sps:$4 sm:$0xff]   ;;  %v5689_v15 = vld [vmem:[%s7859_s1 + $0xbe4] ss:$16 sps:$4 sm:$0xff]  }
 0x140   :  { %3750 = vmatprep.subr.bf16.mxu0 %v5599_v11  ;;  %4119 = vmatprep.subr.bf16.mxu1 %v5602_v17  ;;  %v5692_v11 = vld [vmem:[%s7859_s1 + $0xbec] ss:$16 sps:$4 sm:$0xff]   ;;  %v5687_v17 = vld [vmem:[%s7859_s1 + $0xbe0] ss:$16 sps:$4 sm:$0xff]  }
 0x142   :  { %3742 = vmatmul.mubr.bf16.vlgmr.msra.gmra.mrb[0].mxu0 %v4453_v14  ;;  %4111 = vmatmul.mubr.bf16.vlgmr.msra.gmra.mrb[0].mxu1 %v4453_v14  ;;  %v5690_v14 = vld [vmem:[%s7859_s1 + $0xbe8] ss:$16 sps:$4 sm:$0xff]  }
 0x143   :  { %3751 = vmatpush1.bf16.msra.mxu0 %v5597_v19  ;;  %4120 = vmatpush1.bf16.msra.mxu1 %v5600_v20  ;;  %v5697_v19 = vld [vmem:[%s7859_s1 + $0xc04] ss:$16 sps:$4 sm:$0xff]   ;;  %v5700_v20 = vld [vmem:[%s7859_s1 + $0xc0c] ss:$16 sps:$4 sm:$0xff]  }
 0x144   :  { %3752 = vmatprep.subr.bf16.mxu0 %v5605_v21  ;;  %4121 = vmatprep.subr.bf16.mxu1 %v5608_v16  ;;  %v4455_v21 = vcombine.low %v7022_v18, %v7022_v18  ;;  %v7225_v16 = vld [vmem:[%s7860_s0 + $0x30] sm:$0xff] }
 0x145   :  { %3782 = vmatprep.mubr.bf16.mxu0 %v4456_v22  ;;  %4151 = vmatprep.mubr.bf16.mxu1 %v4456_v22  ;;  %v5695_v22 = vld [vmem:[%s7859_s1 + $0xc00] ss:$16 sps:$4 sm:$0xff]   ;;  %v5703_v18 = vld [vmem:[%s7859_s1 + $0xc24] ss:$16 sps:$4 sm:$0xff]  }
 0x147   :  { %3753 = vmatpush1.bf16.msra.mxu0 %v5603_v23  ;;  %4122 = vmatpush1.bf16.msra.mxu1 %v5606_v24  ;;  %v5698_v23 = vld [vmem:[%s7859_s1 + $0xc08] ss:$16 sps:$4 sm:$0xff]   ;;  %v5706_v24 = vld [vmem:[%s7859_s1 + $0xc2c] ss:$16 sps:$4 sm:$0xff]  }
 0x148   :  { %3754 = vmatprep.subr.bf16.mxu0 %v5611_v25  ;;  %4123 = vmatprep.subr.bf16.mxu1 %v5614_v26  ;;  %v4458_v25 = vcombine.high %v7225_v16, %v7225_v16  ;;  %v5701_v26 = vld [vmem:[%s7859_s1 + $0xc20] ss:$16 sps:$4 sm:$0xff]  }
 0x14b   :  { %3755 = vmatpush1.bf16.msra.mxu0 %v5609_v27  ;;  %4124 = vmatpush1.bf16.msra.mxu1 %v5612_v28  ;;  %v5704_v27 = vld [vmem:[%s7859_s1 + $0xc28] ss:$16 sps:$4 sm:$0xff]   ;;  %v5709_v28 = vld [vmem:[%s7859_s1 + $0xc44] ss:$16 sps:$4 sm:$0xff]  }
 0x14c   :  { %3756 = vmatprep.subr.bf16.mxu0 %v5617_v29  ;;  %4125 = vmatprep.subr.bf16.mxu1 %v5620_v30  ;;  %v5712_v29 = vld [vmem:[%s7859_s1 + $0xc4c] ss:$16 sps:$4 sm:$0xff]   ;;  %v5707_v30 = vld [vmem:[%s7859_s1 + $0xc40] ss:$16 sps:$4 sm:$0xff]  }
 0x14f   :  { %3757 = vmatpush1.bf16.msra.mxu0 %v5615_v31  ;;  %4126 = vmatpush1.bf16.msra.mxu1 %v5618_v32  ;;  %v5710_v31 = vld [vmem:[%s7859_s1 + $0xc48] ss:$16 sps:$4 sm:$0xff]   ;;  %v5715_v32 = vld [vmem:[%s7859_s1 + $0xc64] ss:$16 sps:$4 sm:$0xff]  }
 0x150   :  { %3758 = vmatprep.subr.bf16.mxu0 %v5623_v33  ;;  %4127 = vmatprep.subr.bf16.mxu1 %v5626_v34  ;;  %v5718_v33 = vld [vmem:[%s7859_s1 + $0xc6c] ss:$16 sps:$4 sm:$0xff]   ;;  %v5713_v34 = vld [vmem:[%s7859_s1 + $0xc60] ss:$16 sps:$4 sm:$0xff]  }
 0x153   :  { %3759 = vmatpush1.bf16.msra.mxu0 %v5621_v35  ;;  %4128 = vmatpush1.bf16.msra.mxu1 %v5624_v36  ;;  %v5716_v35 = vld [vmem:[%s7859_s1 + $0xc68] ss:$16 sps:$4 sm:$0xff]   ;;  %v5721_v36 = vld [vmem:[%s7859_s1 + $0xc84] ss:$16 sps:$4 sm:$0xff]  }
 0x154   :  { %3760 = vmatprep.subr.bf16.mxu0 %v5629_v37  ;;  %4129 = vmatprep.subr.bf16.mxu1 %v5632_v38  ;;  %v5724_v37 = vld [vmem:[%s7859_s1 + $0xc8c] ss:$16 sps:$4 sm:$0xff]   ;;  %v5719_v38 = vld [vmem:[%s7859_s1 + $0xc80] ss:$16 sps:$4 sm:$0xff]  }
 0x157   :  { %3761 = vmatpush1.bf16.msra.mxu0 %v5627_v39  ;;  %4130 = vmatpush1.bf16.msra.mxu1 %v5630_v40  ;;  %v5722_v39 = vld [vmem:[%s7859_s1 + $0xc88] ss:$16 sps:$4 sm:$0xff]   ;;  %v5727_v40 = vld [vmem:[%s7859_s1 + $0xca4] ss:$16 sps:$4 sm:$0xff]  }
 0x158   :  { %3762 = vmatprep.subr.bf16.mxu0 %v5635_v41  ;;  %4131 = vmatprep.subr.bf16.mxu1 %v5638_v42  ;;  %v5730_v41 = vld [vmem:[%s7859_s1 + $0xcac] ss:$16 sps:$4 sm:$0xff]   ;;  %v5725_v42 = vld [vmem:[%s7859_s1 + $0xca0] ss:$16 sps:$4 sm:$0xff]  }
 0x15b   :  { %3763 = vmatpush1.bf16.msra.mxu0 %v5633_v43  ;;  %4132 = vmatpush1.bf16.msra.mxu1 %v5636_v44  ;;  %v5728_v43 = vld [vmem:[%s7859_s1 + $0xca8] ss:$16 sps:$4 sm:$0xff]   ;;  %v5733_v44 = vld [vmem:[%s7859_s1 + $0xcc4] ss:$16 sps:$4 sm:$0xff]  }
 0x15c   :  { %3764 = vmatprep.subr.bf16.mxu0 %v5641_v45  ;;  %4133 = vmatprep.subr.bf16.mxu1 %v5644_v46  ;;  %v5736_v45 = vld [vmem:[%s7859_s1 + $0xccc] ss:$16 sps:$4 sm:$0xff]   ;;  %v5731_v46 = vld [vmem:[%s7859_s1 + $0xcc0] ss:$16 sps:$4 sm:$0xff]  }
 0x15f   :  { %3765 = vmatpush1.bf16.msra.mxu0 %v5639_v47  ;;  %4134 = vmatpush1.bf16.msra.mxu1 %v5642_v48  ;;  %v5734_v47 = vld [vmem:[%s7859_s1 + $0xcc8] ss:$16 sps:$4 sm:$0xff]   ;;  %v5739_v48 = vld [vmem:[%s7859_s1 + $0xce4] ss:$16 sps:$4 sm:$0xff]  }
 0x160   :  { %3766 = vmatprep.subr.bf16.mxu0 %v5647_v49  ;;  %4135 = vmatprep.subr.bf16.mxu1 %v5650_v50  ;;  %v5742_v49 = vld [vmem:[%s7859_s1 + $0xcec] ss:$16 sps:$4 sm:$0xff]   ;;  %v5737_v50 = vld [vmem:[%s7859_s1 + $0xce0] ss:$16 sps:$4 sm:$0xff]  }
 0x163   :  { %3767 = vmatpush1.bf16.msra.mxu0 %v5645_v51  ;;  %4136 = vmatpush1.bf16.msra.mxu1 %v5648_v52  ;;  %v5740_v51 = vld [vmem:[%s7859_s1 + $0xce8] ss:$16 sps:$4 sm:$0xff]   ;;  %v5745_v52 = vld [vmem:[%s7859_s1 + $0xd04] ss:$16 sps:$4 sm:$0xff]  }
 0x164   :  { %3768 = vmatprep.subr.bf16.mxu0 %v5653_v53  ;;  %4137 = vmatprep.subr.bf16.mxu1 %v5656_v54  ;;  %v5748_v53 = vld [vmem:[%s7859_s1 + $0xd0c] ss:$16 sps:$4 sm:$0xff]   ;;  %v5743_v54 = vld [vmem:[%s7859_s1 + $0xd00] ss:$16 sps:$4 sm:$0xff]  }
 0x167   :  { %3769 = vmatpush1.bf16.msra.mxu0 %v5651_v55  ;;  %4138 = vmatpush1.bf16.msra.mxu1 %v5654_v56  ;;  %v5746_v55 = vld [vmem:[%s7859_s1 + $0xd08] ss:$16 sps:$4 sm:$0xff]   ;;  %v5751_v56 = vld [vmem:[%s7859_s1 + $0xd24] ss:$16 sps:$4 sm:$0xff]  }
 0x168   :  { %3770 = vmatprep.subr.bf16.mxu0 %v5659_v57  ;;  %4139 = vmatprep.subr.bf16.mxu1 %v5662_v58  ;;  %v5754_v57 = vld [vmem:[%s7859_s1 + $0xd2c] ss:$16 sps:$4 sm:$0xff]   ;;  %v5749_v58 = vld [vmem:[%s7859_s1 + $0xd20] ss:$16 sps:$4 sm:$0xff]  }
 0x16b   :  { %3771 = vmatpush1.bf16.msra.mxu0 %v5657_v59  ;;  %4140 = vmatpush1.bf16.msra.mxu1 %v5660_v60  ;;  %v5752_v59 = vld [vmem:[%s7859_s1 + $0xd28] ss:$16 sps:$4 sm:$0xff]   ;;  %v5757_v60 = vld [vmem:[%s7859_s1 + $0xd44] ss:$16 sps:$4 sm:$0xff]  }
 0x16c   :  { %3772 = vmatprep.subr.bf16.mxu0 %v5665_v61  ;;  %4141 = vmatprep.subr.bf16.mxu1 %v5668_v62  ;;  %v5760_v61 = vld [vmem:[%s7859_s1 + $0xd4c] ss:$16 sps:$4 sm:$0xff]   ;;  %v5755_v62 = vld [vmem:[%s7859_s1 + $0xd40] ss:$16 sps:$4 sm:$0xff]  }
 0x16f   :  { %3773 = vmatpush1.bf16.msra.mxu0 %v5663_v63  ;;  %4142 = vmatpush1.bf16.msra.mxu1 %v5666_v0  ;;  %v5758_v63 = vld [vmem:[%s7859_s1 + $0xd48] ss:$16 sps:$4 sm:$0xff]   ;;  %v5763_v0 = vld [vmem:[%s7859_s1 + $0xd64] ss:$16 sps:$4 sm:$0xff]  }
 0x170   :  { %3774 = vmatprep.subr.bf16.mxu0 %v5671_v1  ;;  %4143 = vmatprep.subr.bf16.mxu1 %v5674_v2  ;;  %v5766_v1 = vld [vmem:[%s7859_s1 + $0xd6c] ss:$16 sps:$4 sm:$0xff]   ;;  %v5761_v2 = vld [vmem:[%s7859_s1 + $0xd60] ss:$16 sps:$4 sm:$0xff]  }
 0x173   :  { %3775 = vmatpush1.bf16.msra.mxu0 %v5669_v3  ;;  %4144 = vmatpush1.bf16.msra.mxu1 %v5672_v4  ;;  %v5764_v3 = vld [vmem:[%s7859_s1 + $0xd68] ss:$16 sps:$4 sm:$0xff]   ;;  %v5769_v4 = vld [vmem:[%s7859_s1 + $0xd84] ss:$16 sps:$4 sm:$0xff]  }
 0x174   :  { %3776 = vmatprep.subr.bf16.mxu0 %v5677_v5  ;;  %4145 = vmatprep.subr.bf16.mxu1 %v5680_v6  ;;  %v5772_v5 = vld [vmem:[%s7859_s1 + $0xd8c] ss:$16 sps:$4 sm:$0xff]   ;;  %v5767_v6 = vld [vmem:[%s7859_s1 + $0xd80] ss:$16 sps:$4 sm:$0xff]  }
 0x177   :  { %3777 = vmatpush1.bf16.msra.mxu0 %v5675_v7  ;;  %4146 = vmatpush1.bf16.msra.mxu1 %v5678_v8  ;;  %v5770_v7 = vld [vmem:[%s7859_s1 + $0xd88] ss:$16 sps:$4 sm:$0xff]   ;;  %v5775_v8 = vld [vmem:[%s7859_s1 + $0xda4] ss:$16 sps:$4 sm:$0xff]  }
 0x178   :  { %3778 = vmatprep.subr.bf16.mxu0 %v5683_v9  ;;  %4147 = vmatprep.subr.bf16.mxu1 %v5686_v10  ;;  %v5778_v9 = vld [vmem:[%s7859_s1 + $0xdac] ss:$16 sps:$4 sm:$0xff]   ;;  %v5773_v10 = vld [vmem:[%s7859_s1 + $0xda0] ss:$16 sps:$4 sm:$0xff]  }
 0x17b   :  { %3779 = vmatpush1.bf16.msra.mxu0 %v5681_v12  ;;  %4148 = vmatpush1.bf16.msra.mxu1 %v5684_v13  ;;  %v5776_v12 = vld [vmem:[%s7859_s1 + $0xda8] ss:$16 sps:$4 sm:$0xff]   ;;  %v5781_v13 = vld [vmem:[%s7859_s1 + $0xdc4] ss:$16 sps:$4 sm:$0xff]  }
 0x17c   :  { %3780 = vmatprep.subr.bf16.mxu0 %v5689_v15  ;;  %4149 = vmatprep.subr.bf16.mxu1 %v5692_v11  ;;  %v5784_v15 = vld [vmem:[%s7859_s1 + $0xdcc] ss:$16 sps:$4 sm:$0xff]   ;;  %v5779_v11 = vld [vmem:[%s7859_s1 + $0xdc0] ss:$16 sps:$4 sm:$0xff]  }
 0x17f   :  { %3781 = vmatpush1.bf16.msra.mxu0 %v5687_v17  ;;  %4150 = vmatpush1.bf16.msra.mxu1 %v5690_v14  ;;  %v5782_v17 = vld [vmem:[%s7859_s1 + $0xdc8] ss:$16 sps:$4 sm:$0xff]   ;;  %v5787_v14 = vld [vmem:[%s7859_s1 + $0xde4] ss:$16 sps:$4 sm:$0xff]  }
 0x180   :  { %3791 = vmatprep.subr.bf16.mxu0 %v5697_v19  ;;  %4160 = vmatprep.subr.bf16.mxu1 %v5700_v20  ;;  %v5790_v19 = vld [vmem:[%s7859_s1 + $0xdec] ss:$16 sps:$4 sm:$0xff]   ;;  %v5785_v20 = vld [vmem:[%s7859_s1 + $0xde0] ss:$16 sps:$4 sm:$0xff]  }
 0x182   :  { %3783 = vmatmul.mubr.bf16.vlgmr.msra.gmra.mrb[0].mxu0 %v4455_v21  ;;  %4152 = vmatmul.mubr.bf16.vlgmr.msra.gmra.mrb[0].mxu1 %v4455_v21  ;;  %v5788_v21 = vld [vmem:[%s7859_s1 + $0xde8] ss:$16 sps:$4 sm:$0xff]  }
 0x183   :  { %3792 = vmatpush1.bf16.msra.mxu0 %v5695_v22  ;;  %4161 = vmatpush1.bf16.msra.mxu1 %v5698_v23  ;;  %v5795_v22 = vld [vmem:[%s7859_s1 + $0xe04] ss:$16 sps:$4 sm:$0xff]   ;;  %v5798_v23 = vld [vmem:[%s7859_s1 + $0xe0c] ss:$16 sps:$4 sm:$0xff]  }
 0x184   :  { %3793 = vmatprep.subr.bf16.mxu0 %v5703_v18  ;;  %4162 = vmatprep.subr.bf16.mxu1 %v5706_v24  ;;  %v4457_v18 = vcombine.low %v7225_v16, %v7225_v16  ;;  %v7426_v24 = vld [vmem:[%s7860_s0 + $0x38] sm:$0xff]  ;;  %v5801_v16 = vld [vmem:[%s7859_s1 + $0xe24] ss:$16 sps:$4 sm:$0xff]  }
 0x185   :  { %3823 = vmatprep.mubr.bf16.mxu0 %v4458_v25  ;;  %4192 = vmatprep.mubr.bf16.mxu1 %v4458_v25  ;;  %v5793_v25 = vld [vmem:[%s7859_s1 + $0xe00] ss:$16 sps:$4 sm:$0xff]  }
 0x187   :  { %3794 = vmatpush1.bf16.msra.mxu0 %v5701_v26  ;;  %4163 = vmatpush1.bf16.msra.mxu1 %v5704_v27  ;;  %v5796_v26 = vld [vmem:[%s7859_s1 + $0xe08] ss:$16 sps:$4 sm:$0xff]   ;;  %v5804_v27 = vld [vmem:[%s7859_s1 + $0xe2c] ss:$16 sps:$4 sm:$0xff]  }
 0x188   :  { %3795 = vmatprep.subr.bf16.mxu0 %v5709_v28  ;;  %4164 = vmatprep.subr.bf16.mxu1 %v5712_v29  ;;  %v4460_v28 = vcombine.high %v7426_v24, %v7426_v24  ;;  %v5799_v29 = vld [vmem:[%s7859_s1 + $0xe20] ss:$16 sps:$4 sm:$0xff]  }
 0x18b   :  { %3796 = vmatpush1.bf16.msra.mxu0 %v5707_v30  ;;  %4165 = vmatpush1.bf16.msra.mxu1 %v5710_v31  ;;  %v5802_v30 = vld [vmem:[%s7859_s1 + $0xe28] ss:$16 sps:$4 sm:$0xff]   ;;  %v5807_v31 = vld [vmem:[%s7859_s1 + $0xe44] ss:$16 sps:$4 sm:$0xff]  }
 0x18c   :  { %3797 = vmatprep.subr.bf16.mxu0 %v5715_v32  ;;  %4166 = vmatprep.subr.bf16.mxu1 %v5718_v33  ;;  %v5810_v32 = vld [vmem:[%s7859_s1 + $0xe4c] ss:$16 sps:$4 sm:$0xff]   ;;  %v5805_v33 = vld [vmem:[%s7859_s1 + $0xe40] ss:$16 sps:$4 sm:$0xff]  }
 0x18f   :  { %3798 = vmatpush1.bf16.msra.mxu0 %v5713_v34  ;;  %4167 = vmatpush1.bf16.msra.mxu1 %v5716_v35  ;;  %v5808_v34 = vld [vmem:[%s7859_s1 + $0xe48] ss:$16 sps:$4 sm:$0xff]   ;;  %v5813_v35 = vld [vmem:[%s7859_s1 + $0xe64] ss:$16 sps:$4 sm:$0xff]  }
 0x190   :  { %3799 = vmatprep.subr.bf16.mxu0 %v5721_v36  ;;  %4168 = vmatprep.subr.bf16.mxu1 %v5724_v37  ;;  %v5816_v36 = vld [vmem:[%s7859_s1 + $0xe6c] ss:$16 sps:$4 sm:$0xff]   ;;  %v5811_v37 = vld [vmem:[%s7859_s1 + $0xe60] ss:$16 sps:$4 sm:$0xff]  }
 0x193   :  { %3800 = vmatpush1.bf16.msra.mxu0 %v5719_v38  ;;  %4169 = vmatpush1.bf16.msra.mxu1 %v5722_v39  ;;  %v5814_v38 = vld [vmem:[%s7859_s1 + $0xe68] ss:$16 sps:$4 sm:$0xff]   ;;  %v5819_v39 = vld [vmem:[%s7859_s1 + $0xe84] ss:$16 sps:$4 sm:$0xff]  }
 0x194   :  { %3801 = vmatprep.subr.bf16.mxu0 %v5727_v40  ;;  %4170 = vmatprep.subr.bf16.mxu1 %v5730_v41  ;;  %v5822_v40 = vld [vmem:[%s7859_s1 + $0xe8c] ss:$16 sps:$4 sm:$0xff]   ;;  %v5817_v41 = vld [vmem:[%s7859_s1 + $0xe80] ss:$16 sps:$4 sm:$0xff]  }
 0x197   :  { %3802 = vmatpush1.bf16.msra.mxu0 %v5725_v42  ;;  %4171 = vmatpush1.bf16.msra.mxu1 %v5728_v43  ;;  %v5820_v42 = vld [vmem:[%s7859_s1 + $0xe88] ss:$16 sps:$4 sm:$0xff]   ;;  %v5825_v43 = vld [vmem:[%s7859_s1 + $0xea4] ss:$16 sps:$4 sm:$0xff]  }
 0x198   :  { %3803 = vmatprep.subr.bf16.mxu0 %v5733_v44  ;;  %4172 = vmatprep.subr.bf16.mxu1 %v5736_v45  ;;  %v5828_v44 = vld [vmem:[%s7859_s1 + $0xeac] ss:$16 sps:$4 sm:$0xff]   ;;  %v5823_v45 = vld [vmem:[%s7859_s1 + $0xea0] ss:$16 sps:$4 sm:$0xff]  }
 0x19b   :  { %3804 = vmatpush1.bf16.msra.mxu0 %v5731_v46  ;;  %4173 = vmatpush1.bf16.msra.mxu1 %v5734_v47  ;;  %v5826_v46 = vld [vmem:[%s7859_s1 + $0xea8] ss:$16 sps:$4 sm:$0xff]   ;;  %v5831_v47 = vld [vmem:[%s7859_s1 + $0xec4] ss:$16 sps:$4 sm:$0xff]  }
 0x19c   :  { %3805 = vmatprep.subr.bf16.mxu0 %v5739_v48  ;;  %4174 = vmatprep.subr.bf16.mxu1 %v5742_v49  ;;  %v5834_v48 = vld [vmem:[%s7859_s1 + $0xecc] ss:$16 sps:$4 sm:$0xff]   ;;  %v5829_v49 = vld [vmem:[%s7859_s1 + $0xec0] ss:$16 sps:$4 sm:$0xff]  }
 0x19f   :  { %3806 = vmatpush1.bf16.msra.mxu0 %v5737_v50  ;;  %4175 = vmatpush1.bf16.msra.mxu1 %v5740_v51  ;;  %v5832_v50 = vld [vmem:[%s7859_s1 + $0xec8] ss:$16 sps:$4 sm:$0xff]   ;;  %v5837_v51 = vld [vmem:[%s7859_s1 + $0xee4] ss:$16 sps:$4 sm:$0xff]  }
 0x1a0   :  { %3807 = vmatprep.subr.bf16.mxu0 %v5745_v52  ;;  %4176 = vmatprep.subr.bf16.mxu1 %v5748_v53  ;;  %v5840_v52 = vld [vmem:[%s7859_s1 + $0xeec] ss:$16 sps:$4 sm:$0xff]   ;;  %v5835_v53 = vld [vmem:[%s7859_s1 + $0xee0] ss:$16 sps:$4 sm:$0xff]  }
 0x1a3   :  { %3808 = vmatpush1.bf16.msra.mxu0 %v5743_v54  ;;  %4177 = vmatpush1.bf16.msra.mxu1 %v5746_v55  ;;  %v5838_v54 = vld [vmem:[%s7859_s1 + $0xee8] ss:$16 sps:$4 sm:$0xff]   ;;  %v5843_v55 = vld [vmem:[%s7859_s1 + $0xf04] ss:$16 sps:$4 sm:$0xff]  }
 0x1a4   :  { %3809 = vmatprep.subr.bf16.mxu0 %v5751_v56  ;;  %4178 = vmatprep.subr.bf16.mxu1 %v5754_v57  ;;  %v5846_v56 = vld [vmem:[%s7859_s1 + $0xf0c] ss:$16 sps:$4 sm:$0xff]   ;;  %v5841_v57 = vld [vmem:[%s7859_s1 + $0xf00] ss:$16 sps:$4 sm:$0xff]  }
 0x1a7   :  { %3810 = vmatpush1.bf16.msra.mxu0 %v5749_v58  ;;  %4179 = vmatpush1.bf16.msra.mxu1 %v5752_v59  ;;  %v5844_v58 = vld [vmem:[%s7859_s1 + $0xf08] ss:$16 sps:$4 sm:$0xff]   ;;  %v5849_v59 = vld [vmem:[%s7859_s1 + $0xf24] ss:$16 sps:$4 sm:$0xff]  }
 0x1a8   :  { %3811 = vmatprep.subr.bf16.mxu0 %v5757_v60  ;;  %4180 = vmatprep.subr.bf16.mxu1 %v5760_v61  ;;  %v5852_v60 = vld [vmem:[%s7859_s1 + $0xf2c] ss:$16 sps:$4 sm:$0xff]   ;;  %v5847_v61 = vld [vmem:[%s7859_s1 + $0xf20] ss:$16 sps:$4 sm:$0xff]  }
 0x1ab   :  { %3812 = vmatpush1.bf16.msra.mxu0 %v5755_v62  ;;  %4181 = vmatpush1.bf16.msra.mxu1 %v5758_v63  ;;  %v5850_v62 = vld [vmem:[%s7859_s1 + $0xf28] ss:$16 sps:$4 sm:$0xff]   ;;  %v5855_v63 = vld [vmem:[%s7859_s1 + $0xf44] ss:$16 sps:$4 sm:$0xff]  }
 0x1ac   :  { %3813 = vmatprep.subr.bf16.mxu0 %v5763_v0  ;;  %4182 = vmatprep.subr.bf16.mxu1 %v5766_v1  ;;  %v5858_v0 = vld [vmem:[%s7859_s1 + $0xf4c] ss:$16 sps:$4 sm:$0xff]   ;;  %v5853_v1 = vld [vmem:[%s7859_s1 + $0xf40] ss:$16 sps:$4 sm:$0xff]  }
 0x1af   :  { %3814 = vmatpush1.bf16.msra.mxu0 %v5761_v2  ;;  %4183 = vmatpush1.bf16.msra.mxu1 %v5764_v3  ;;  %v5856_v2 = vld [vmem:[%s7859_s1 + $0xf48] ss:$16 sps:$4 sm:$0xff]   ;;  %v5861_v3 = vld [vmem:[%s7859_s1 + $0xf64] ss:$16 sps:$4 sm:$0xff]  }
 0x1b0   :  { %3815 = vmatprep.subr.bf16.mxu0 %v5769_v4  ;;  %4184 = vmatprep.subr.bf16.mxu1 %v5772_v5  ;;  %v5864_v4 = vld [vmem:[%s7859_s1 + $0xf6c] ss:$16 sps:$4 sm:$0xff]   ;;  %v5859_v5 = vld [vmem:[%s7859_s1 + $0xf60] ss:$16 sps:$4 sm:$0xff]  }
 0x1b3   :  { %3816 = vmatpush1.bf16.msra.mxu0 %v5767_v6  ;;  %4185 = vmatpush1.bf16.msra.mxu1 %v5770_v7  ;;  %v5862_v6 = vld [vmem:[%s7859_s1 + $0xf68] ss:$16 sps:$4 sm:$0xff]   ;;  %v5867_v7 = vld [vmem:[%s7859_s1 + $0xf84] ss:$16 sps:$4 sm:$0xff]  }
 0x1b4   :  { %3817 = vmatprep.subr.bf16.mxu0 %v5775_v8  ;;  %4186 = vmatprep.subr.bf16.mxu1 %v5778_v9  ;;  %v5870_v8 = vld [vmem:[%s7859_s1 + $0xf8c] ss:$16 sps:$4 sm:$0xff]   ;;  %v5865_v9 = vld [vmem:[%s7859_s1 + $0xf80] ss:$16 sps:$4 sm:$0xff]  }
 0x1b7   :  { %3818 = vmatpush1.bf16.msra.mxu0 %v5773_v10  ;;  %4187 = vmatpush1.bf16.msra.mxu1 %v5776_v12  ;;  %v5868_v10 = vld [vmem:[%s7859_s1 + $0xf88] ss:$16 sps:$4 sm:$0xff]   ;;  %v5873_v12 = vld [vmem:[%s7859_s1 + $0xfa4] ss:$16 sps:$4 sm:$0xff]  }
 0x1b8   :  { %3819 = vmatprep.subr.bf16.mxu0 %v5781_v13  ;;  %4188 = vmatprep.subr.bf16.mxu1 %v5784_v15  ;;  %v5876_v13 = vld [vmem:[%s7859_s1 + $0xfac] ss:$16 sps:$4 sm:$0xff]   ;;  %v5871_v15 = vld [vmem:[%s7859_s1 + $0xfa0] ss:$16 sps:$4 sm:$0xff]  }
 0x1bb   :  { %3820 = vmatpush1.bf16.msra.mxu0 %v5779_v11  ;;  %4189 = vmatpush1.bf16.msra.mxu1 %v5782_v17  ;;  %v5874_v11 = vld [vmem:[%s7859_s1 + $0xfa8] ss:$16 sps:$4 sm:$0xff]   ;;  %v5879_v17 = vld [vmem:[%s7859_s1 + $0xfc4] ss:$16 sps:$4 sm:$0xff]  }
 0x1bc   :  { %3821 = vmatprep.subr.bf16.mxu0 %v5787_v14  ;;  %4190 = vmatprep.subr.bf16.mxu1 %v5790_v19  ;;  %v5882_v14 = vld [vmem:[%s7859_s1 + $0xfcc] ss:$16 sps:$4 sm:$0xff]   ;;  %v5877_v19 = vld [vmem:[%s7859_s1 + $0xfc0] ss:$16 sps:$4 sm:$0xff]  }
 0x1bf   :  { %3822 = vmatpush1.bf16.msra.mxu0 %v5785_v20  ;;  %4191 = vmatpush1.bf16.msra.mxu1 %v5788_v21  ;;  %v5880_v20 = vld [vmem:[%s7859_s1 + $0xfc8] ss:$16 sps:$4 sm:$0xff]   ;;  %v5885_v21 = vld [vmem:[%s7859_s1 + $0xfe4] ss:$16 sps:$4 sm:$0xff]  }
 0x1c0   :  { %3832 = vmatprep.subr.bf16.mxu0 %v5795_v22  ;;  %4201 = vmatprep.subr.bf16.mxu1 %v5798_v23  ;;  %v5888_v22 = vld [vmem:[%s7859_s1 + $0xfec] ss:$16 sps:$4 sm:$0xff]   ;;  %v5883_v23 = vld [vmem:[%s7859_s1 + $0xfe0] ss:$16 sps:$4 sm:$0xff]  }
 0x1c2   :  { %3824 = vmatmul.mubr.bf16.vlgmr.msra.gmra.mrb[0].mxu0 %v4457_v18  ;;  %4193 = vmatmul.mubr.bf16.vlgmr.msra.gmra.mrb[0].mxu1 %v4457_v18  ;;  %v5886_v18 = vld [vmem:[%s7859_s1 + $0xfe8] ss:$16 sps:$4 sm:$0xff]  }
 0x1c3   :  { %3833 = vmatpush1.bf16.msra.mxu0 %v5793_v25  ;;  %4202 = vmatpush1.bf16.msra.mxu1 %v5796_v26  ;;  %v5893_v25 = vld [vmem:[%s7859_s1 + $0x1004] ss:$16 sps:$4 sm:$0xff]   ;;  %v5896_v26 = vld [vmem:[%s7859_s1 + $0x100c] ss:$16 sps:$4 sm:$0xff]  }
 0x1c4   :  { %3834 = vmatprep.subr.bf16.mxu0 %v5801_v16  ;;  %4203 = vmatprep.subr.bf16.mxu1 %v5804_v27  ;;  %v4459_v16 = vcombine.low %v7426_v24, %v7426_v24  ;;  %v7627_v27 = vld [vmem:[%s7860_s0 + $0x40] sm:$0xff] }
 0x1c5   :  { %3864 = vmatprep.mubr.bf16.mxu0 %v4460_v28  ;;  %4233 = vmatprep.mubr.bf16.mxu1 %v4460_v28  ;;  %v5891_v28 = vld [vmem:[%s7859_s1 + $0x1000] ss:$16 sps:$4 sm:$0xff]   ;;  %v5899_v24 = vld [vmem:[%s7859_s1 + $0x1024] ss:$16 sps:$4 sm:$0xff]  }
 0x1c7   :  { %3835 = vmatpush1.bf16.msra.mxu0 %v5799_v29  ;;  %4204 = vmatpush1.bf16.msra.mxu1 %v5802_v30  ;;  %v5894_v29 = vld [vmem:[%s7859_s1 + $0x1008] ss:$16 sps:$4 sm:$0xff]   ;;  %v5902_v30 = vld [vmem:[%s7859_s1 + $0x102c] ss:$16 sps:$4 sm:$0xff]  }
 0x1c8   :  { %3836 = vmatprep.subr.bf16.mxu0 %v5807_v31  ;;  %4205 = vmatprep.subr.bf16.mxu1 %v5810_v32  ;;  %v4462_v31 = vcombine.high %v7627_v27, %v7627_v27  ;;  %v5897_v32 = vld [vmem:[%s7859_s1 + $0x1020] ss:$16 sps:$4 sm:$0xff]  }
 0x1cb   :  { %3837 = vmatpush1.bf16.msra.mxu0 %v5805_v33  ;;  %4206 = vmatpush1.bf16.msra.mxu1 %v5808_v34  ;;  %v5900_v33 = vld [vmem:[%s7859_s1 + $0x1028] ss:$16 sps:$4 sm:$0xff]   ;;  %v5905_v34 = vld [vmem:[%s7859_s1 + $0x1044] ss:$16 sps:$4 sm:$0xff]  }
 0x1cc   :  { %3838 = vmatprep.subr.bf16.mxu0 %v5813_v35  ;;  %4207 = vmatprep.subr.bf16.mxu1 %v5816_v36  ;;  %v5908_v35 = vld [vmem:[%s7859_s1 + $0x104c] ss:$16 sps:$4 sm:$0xff]   ;;  %v5903_v36 = vld [vmem:[%s7859_s1 + $0x1040] ss:$16 sps:$4 sm:$0xff]  }
 0x1cf   :  { %3839 = vmatpush1.bf16.msra.mxu0 %v5811_v37  ;;  %4208 = vmatpush1.bf16.msra.mxu1 %v5814_v38  ;;  %v5906_v37 = vld [vmem:[%s7859_s1 + $0x1048] ss:$16 sps:$4 sm:$0xff]   ;;  %v5911_v38 = vld [vmem:[%s7859_s1 + $0x1064] ss:$16 sps:$4 sm:$0xff]  }
 0x1d0   :  { %3840 = vmatprep.subr.bf16.mxu0 %v5819_v39  ;;  %4209 = vmatprep.subr.bf16.mxu1 %v5822_v40  ;;  %v5914_v39 = vld [vmem:[%s7859_s1 + $0x106c] ss:$16 sps:$4 sm:$0xff]   ;;  %v5909_v40 = vld [vmem:[%s7859_s1 + $0x1060] ss:$16 sps:$4 sm:$0xff]  }
 0x1d3   :  { %3841 = vmatpush1.bf16.msra.mxu0 %v5817_v41  ;;  %4210 = vmatpush1.bf16.msra.mxu1 %v5820_v42  ;;  %v5912_v41 = vld [vmem:[%s7859_s1 + $0x1068] ss:$16 sps:$4 sm:$0xff]   ;;  %v5917_v42 = vld [vmem:[%s7859_s1 + $0x1084] ss:$16 sps:$4 sm:$0xff]  }
 0x1d4   :  { %3842 = vmatprep.subr.bf16.mxu0 %v5825_v43  ;;  %4211 = vmatprep.subr.bf16.mxu1 %v5828_v44  ;;  %v5920_v43 = vld [vmem:[%s7859_s1 + $0x108c] ss:$16 sps:$4 sm:$0xff]   ;;  %v5915_v44 = vld [vmem:[%s7859_s1 + $0x1080] ss:$16 sps:$4 sm:$0xff]  }
 0x1d7   :  { %3843 = vmatpush1.bf16.msra.mxu0 %v5823_v45  ;;  %4212 = vmatpush1.bf16.msra.mxu1 %v5826_v46  ;;  %v5918_v45 = vld [vmem:[%s7859_s1 + $0x1088] ss:$16 sps:$4 sm:$0xff]   ;;  %v5923_v46 = vld [vmem:[%s7859_s1 + $0x10a4] ss:$16 sps:$4 sm:$0xff]  }
 0x1d8   :  { %3844 = vmatprep.subr.bf16.mxu0 %v5831_v47  ;;  %4213 = vmatprep.subr.bf16.mxu1 %v5834_v48  ;;  %v5926_v47 = vld [vmem:[%s7859_s1 + $0x10ac] ss:$16 sps:$4 sm:$0xff]   ;;  %v5921_v48 = vld [vmem:[%s7859_s1 + $0x10a0] ss:$16 sps:$4 sm:$0xff]  }
 0x1db   :  { %3845 = vmatpush1.bf16.msra.mxu0 %v5829_v49  ;;  %4214 = vmatpush1.bf16.msra.mxu1 %v5832_v50  ;;  %v5924_v49 = vld [vmem:[%s7859_s1 + $0x10a8] ss:$16 sps:$4 sm:$0xff]   ;;  %v5929_v50 = vld [vmem:[%s7859_s1 + $0x10c4] ss:$16 sps:$4 sm:$0xff]  }
 0x1dc   :  { %3846 = vmatprep.subr.bf16.mxu0 %v5837_v51  ;;  %4215 = vmatprep.subr.bf16.mxu1 %v5840_v52  ;;  %v5932_v51 = vld [vmem:[%s7859_s1 + $0x10cc] ss:$16 sps:$4 sm:$0xff]   ;;  %v5927_v52 = vld [vmem:[%s7859_s1 + $0x10c0] ss:$16 sps:$4 sm:$0xff]  }
 0x1df   :  { %3847 = vmatpush1.bf16.msra.mxu0 %v5835_v53  ;;  %4216 = vmatpush1.bf16.msra.mxu1 %v5838_v54  ;;  %v5930_v53 = vld [vmem:[%s7859_s1 + $0x10c8] ss:$16 sps:$4 sm:$0xff]   ;;  %v5935_v54 = vld [vmem:[%s7859_s1 + $0x10e4] ss:$16 sps:$4 sm:$0xff]  }
 0x1e0   :  { %3848 = vmatprep.subr.bf16.mxu0 %v5843_v55  ;;  %4217 = vmatprep.subr.bf16.mxu1 %v5846_v56  ;;  %v5938_v55 = vld [vmem:[%s7859_s1 + $0x10ec] ss:$16 sps:$4 sm:$0xff]   ;;  %v5933_v56 = vld [vmem:[%s7859_s1 + $0x10e0] ss:$16 sps:$4 sm:$0xff]  }
 0x1e3   :  { %3849 = vmatpush1.bf16.msra.mxu0 %v5841_v57  ;;  %4218 = vmatpush1.bf16.msra.mxu1 %v5844_v58  ;;  %v5936_v57 = vld [vmem:[%s7859_s1 + $0x10e8] ss:$16 sps:$4 sm:$0xff]   ;;  %v5941_v58 = vld [vmem:[%s7859_s1 + $0x1104] ss:$16 sps:$4 sm:$0xff]  }
 0x1e4   :  { %3850 = vmatprep.subr.bf16.mxu0 %v5849_v59  ;;  %4219 = vmatprep.subr.bf16.mxu1 %v5852_v60  ;;  %v5944_v59 = vld [vmem:[%s7859_s1 + $0x110c] ss:$16 sps:$4 sm:$0xff]   ;;  %v5939_v60 = vld [vmem:[%s7859_s1 + $0x1100] ss:$16 sps:$4 sm:$0xff]  }
 0x1e7   :  { %3851 = vmatpush1.bf16.msra.mxu0 %v5847_v61  ;;  %4220 = vmatpush1.bf16.msra.mxu1 %v5850_v62  ;;  %v5942_v61 = vld [vmem:[%s7859_s1 + $0x1108] ss:$16 sps:$4 sm:$0xff]   ;;  %v5947_v62 = vld [vmem:[%s7859_s1 + $0x1124] ss:$16 sps:$4 sm:$0xff]  }
 0x1e8   :  { %3852 = vmatprep.subr.bf16.mxu0 %v5855_v63  ;;  %4221 = vmatprep.subr.bf16.mxu1 %v5858_v0  ;;  %v5950_v63 = vld [vmem:[%s7859_s1 + $0x112c] ss:$16 sps:$4 sm:$0xff]   ;;  %v5945_v0 = vld [vmem:[%s7859_s1 + $0x1120] ss:$16 sps:$4 sm:$0xff]  }
 0x1eb   :  { %3853 = vmatpush1.bf16.msra.mxu0 %v5853_v1  ;;  %4222 = vmatpush1.bf16.msra.mxu1 %v5856_v2  ;;  %v5948_v1 = vld [vmem:[%s7859_s1 + $0x1128] ss:$16 sps:$4 sm:$0xff]   ;;  %v5953_v2 = vld [vmem:[%s7859_s1 + $0x1144] ss:$16 sps:$4 sm:$0xff]  }
 0x1ec   :  { %3854 = vmatprep.subr.bf16.mxu0 %v5861_v3  ;;  %4223 = vmatprep.subr.bf16.mxu1 %v5864_v4  ;;  %v5956_v3 = vld [vmem:[%s7859_s1 + $0x114c] ss:$16 sps:$4 sm:$0xff]   ;;  %v5951_v4 = vld [vmem:[%s7859_s1 + $0x1140] ss:$16 sps:$4 sm:$0xff]  }
 0x1ef   :  { %3855 = vmatpush1.bf16.msra.mxu0 %v5859_v5  ;;  %4224 = vmatpush1.bf16.msra.mxu1 %v5862_v6  ;;  %v5954_v5 = vld [vmem:[%s7859_s1 + $0x1148] ss:$16 sps:$4 sm:$0xff]   ;;  %v5959_v6 = vld [vmem:[%s7859_s1 + $0x1164] ss:$16 sps:$4 sm:$0xff]  }
 0x1f0   :  { %3856 = vmatprep.subr.bf16.mxu0 %v5867_v7  ;;  %4225 = vmatprep.subr.bf16.mxu1 %v5870_v8  ;;  %v5962_v7 = vld [vmem:[%s7859_s1 + $0x116c] ss:$16 sps:$4 sm:$0xff]   ;;  %v5957_v8 = vld [vmem:[%s7859_s1 + $0x1160] ss:$16 sps:$4 sm:$0xff]  }
 0x1f3   :  { %3857 = vmatpush1.bf16.msra.mxu0 %v5865_v9  ;;  %4226 = vmatpush1.bf16.msra.mxu1 %v5868_v10  ;;  %v5960_v9 = vld [vmem:[%s7859_s1 + $0x1168] ss:$16 sps:$4 sm:$0xff]   ;;  %v5965_v10 = vld [vmem:[%s7859_s1 + $0x1184] ss:$16 sps:$4 sm:$0xff]  }
 0x1f4   :  { %3858 = vmatprep.subr.bf16.mxu0 %v5873_v12  ;;  %4227 = vmatprep.subr.bf16.mxu1 %v5876_v13  ;;  %v5968_v12 = vld [vmem:[%s7859_s1 + $0x118c] ss:$16 sps:$4 sm:$0xff]   ;;  %v5963_v13 = vld [vmem:[%s7859_s1 + $0x1180] ss:$16 sps:$4 sm:$0xff]  }
 0x1f7   :  { %3859 = vmatpush1.bf16.msra.mxu0 %v5871_v15  ;;  %4228 = vmatpush1.bf16.msra.mxu1 %v5874_v11  ;;  %v5966_v15 = vld [vmem:[%s7859_s1 + $0x1188] ss:$16 sps:$4 sm:$0xff]   ;;  %v5971_v11 = vld [vmem:[%s7859_s1 + $0x11a4] ss:$16 sps:$4 sm:$0xff]  }
 0x1f8   :  { %3860 = vmatprep.subr.bf16.mxu0 %v5879_v17  ;;  %4229 = vmatprep.subr.bf16.mxu1 %v5882_v14  ;;  %v5974_v17 = vld [vmem:[%s7859_s1 + $0x11ac] ss:$16 sps:$4 sm:$0xff]   ;;  %v5969_v14 = vld [vmem:[%s7859_s1 + $0x11a0] ss:$16 sps:$4 sm:$0xff]  }
 0x1fb   :  { %3861 = vmatpush1.bf16.msra.mxu0 %v5877_v19  ;;  %4230 = vmatpush1.bf16.msra.mxu1 %v5880_v20  ;;  %v5972_v19 = vld [vmem:[%s7859_s1 + $0x11a8] ss:$16 sps:$4 sm:$0xff]   ;;  %v5977_v20 = vld [vmem:[%s7859_s1 + $0x11c4] ss:$16 sps:$4 sm:$0xff]  }
 0x1fc   :  { %3862 = vmatprep.subr.bf16.mxu0 %v5885_v21  ;;  %4231 = vmatprep.subr.bf16.mxu1 %v5888_v22  ;;  %v5980_v21 = vld [vmem:[%s7859_s1 + $0x11cc] ss:$16 sps:$4 sm:$0xff]   ;;  %v5975_v22 = vld [vmem:[%s7859_s1 + $0x11c0] ss:$16 sps:$4 sm:$0xff]  }
 0x1ff   :  { %3863 = vmatpush1.bf16.msra.mxu0 %v5883_v23  ;;  %4232 = vmatpush1.bf16.msra.mxu1 %v5886_v18  ;;  %v5978_v23 = vld [vmem:[%s7859_s1 + $0x11c8] ss:$16 sps:$4 sm:$0xff]   ;;  %v5983_v18 = vld [vmem:[%s7859_s1 + $0x11e4] ss:$16 sps:$4 sm:$0xff]  }
 0x200   :  { %3873 = vmatprep.subr.bf16.mxu0 %v5893_v25  ;;  %4242 = vmatprep.subr.bf16.mxu1 %v5896_v26  ;;  %v5986_v25 = vld [vmem:[%s7859_s1 + $0x11ec] ss:$16 sps:$4 sm:$0xff]   ;;  %v5981_v26 = vld [vmem:[%s7859_s1 + $0x11e0] ss:$16 sps:$4 sm:$0xff]  }
 0x202   :  { %3865 = vmatmul.mubr.bf16.vlgmr.msra.gmra.mrb[0].mxu0 %v4459_v16  ;;  %4234 = vmatmul.mubr.bf16.vlgmr.msra.gmra.mrb[0].mxu1 %v4459_v16  ;;  %v5984_v16 = vld [vmem:[%s7859_s1 + $0x11e8] ss:$16 sps:$4 sm:$0xff]  }
 0x203   :  { %3874 = vmatpush1.bf16.msra.mxu0 %v5891_v28  ;;  %4243 = vmatpush1.bf16.msra.mxu1 %v5894_v29  ;;  %v4461_v28 = vcombine.low %v7627_v27, %v7627_v27 }
 0x204   :  { %3875 = vmatprep.subr.bf16.mxu0 %v5899_v24  ;;  %4244 = vmatprep.subr.bf16.mxu1 %v5902_v30 }
 0x205   :  { %3905 = vmatprep.mubr.bf16.mxu0 %v4462_v31  ;;  %4274 = vmatprep.mubr.bf16.mxu1 %v4462_v31 }
 0x207   :  { %3876 = vmatpush1.bf16.msra.mxu0 %v5897_v32  ;;  %4245 = vmatpush1.bf16.msra.mxu1 %v5900_v33 }
 0x208   :  { %3877 = vmatprep.subr.bf16.mxu0 %v5905_v34  ;;  %4246 = vmatprep.subr.bf16.mxu1 %v5908_v35 }
 0x20b   :  { %3878 = vmatpush1.bf16.msra.mxu0 %v5903_v36  ;;  %4247 = vmatpush1.bf16.msra.mxu1 %v5906_v37 }
 0x20c   :  { %3879 = vmatprep.subr.bf16.mxu0 %v5911_v38  ;;  %4248 = vmatprep.subr.bf16.mxu1 %v5914_v39 }
 0x20f   :  { %3880 = vmatpush1.bf16.msra.mxu0 %v5909_v40  ;;  %4249 = vmatpush1.bf16.msra.mxu1 %v5912_v41 }
 0x210   :  { %3881 = vmatprep.subr.bf16.mxu0 %v5917_v42  ;;  %4250 = vmatprep.subr.bf16.mxu1 %v5920_v43 }
 0x213   :  { %3882 = vmatpush1.bf16.msra.mxu0 %v5915_v44  ;;  %4251 = vmatpush1.bf16.msra.mxu1 %v5918_v45 }
 0x214   :  { %3883 = vmatprep.subr.bf16.mxu0 %v5923_v46  ;;  %4252 = vmatprep.subr.bf16.mxu1 %v5926_v47 }
 0x217   :  { %3884 = vmatpush1.bf16.msra.mxu0 %v5921_v48  ;;  %4253 = vmatpush1.bf16.msra.mxu1 %v5924_v49 }
 0x218   :  { %3885 = vmatprep.subr.bf16.mxu0 %v5929_v50  ;;  %4254 = vmatprep.subr.bf16.mxu1 %v5932_v51 }
 0x21b   :  { %3886 = vmatpush1.bf16.msra.mxu0 %v5927_v52  ;;  %4255 = vmatpush1.bf16.msra.mxu1 %v5930_v53 }
 0x21c   :  { %3887 = vmatprep.subr.bf16.mxu0 %v5935_v54  ;;  %4256 = vmatprep.subr.bf16.mxu1 %v5938_v55 }
 0x21f   :  { %3888 = vmatpush1.bf16.msra.mxu0 %v5933_v56  ;;  %4257 = vmatpush1.bf16.msra.mxu1 %v5936_v57 }
 0x220   :  { %3889 = vmatprep.subr.bf16.mxu0 %v5941_v58  ;;  %4258 = vmatprep.subr.bf16.mxu1 %v5944_v59 }
 0x223   :  { %3890 = vmatpush1.bf16.msra.mxu0 %v5939_v60  ;;  %4259 = vmatpush1.bf16.msra.mxu1 %v5942_v61 }
 0x224   :  { %3891 = vmatprep.subr.bf16.mxu0 %v5947_v62  ;;  %4260 = vmatprep.subr.bf16.mxu1 %v5950_v63 }
 0x227   :  { %3892 = vmatpush1.bf16.msra.mxu0 %v5945_v0  ;;  %4261 = vmatpush1.bf16.msra.mxu1 %v5948_v1 }
 0x228   :  { %3893 = vmatprep.subr.bf16.mxu0 %v5953_v2  ;;  %4262 = vmatprep.subr.bf16.mxu1 %v5956_v3 }
 0x22b   :  { %3894 = vmatpush1.bf16.msra.mxu0 %v5951_v4  ;;  %4263 = vmatpush1.bf16.msra.mxu1 %v5954_v5 }
 0x22c   :  { %3895 = vmatprep.subr.bf16.mxu0 %v5959_v6  ;;  %4264 = vmatprep.subr.bf16.mxu1 %v5962_v7  ;;  %v4351_v6 = vlaneseq }
 0x22f   :  { %3896 = vmatpush1.bf16.msra.mxu0 %v5957_v8  ;;  %4265 = vmatpush1.bf16.msra.mxu1 %v5960_v9 }
 0x230   :  { %3897 = vmatprep.subr.bf16.mxu0 %v5965_v10  ;;  %4266 = vmatprep.subr.bf16.mxu1 %v5968_v12 }
 0x233   :  { %3898 = vmatpush1.bf16.msra.mxu0 %v5963_v13  ;;  %4267 = vmatpush1.bf16.msra.mxu1 %v5966_v15 }
 0x234   :  { %3899 = vmatprep.subr.bf16.mxu0 %v5971_v11  ;;  %4268 = vmatprep.subr.bf16.mxu1 %v5974_v17 }
 0x237   :  { %3900 = vmatpush1.bf16.msra.mxu0 %v5969_v14  ;;  %4269 = vmatpush1.bf16.msra.mxu1 %v5972_v19 }
 0x238   :  { %3901 = vmatprep.subr.bf16.mxu0 %v5977_v20  ;;  %4270 = vmatprep.subr.bf16.mxu1 %v5980_v21  ;;  %v4352_v20 = vshrl.u32 %v4351_v6, 7 }
 0x23b   :  { %3902 = vmatpush1.bf16.msra.mxu0 %v5975_v22  ;;  %4271 = vmatpush1.bf16.msra.mxu1 %v5978_v23 }
 0x23c   :  { %3903 = vmatprep.subr.bf16.mxu0 %v5983_v18  ;;  %4272 = vmatprep.subr.bf16.mxu1 %v5986_v25 }
 0x23f   :  { %3904 = vmatpush1.bf16.msra.mxu0 %v5981_v26  ;;  %4273 = vmatpush1.bf16.msra.mxu1 %v5984_v16 }
 0x242   :  { %3906 = vmatmul.mubr.bf16.vlgmr.msra.gmra.mrb[0].mxu0 %v4461_v28  ;;  %4275 = vmatmul.mubr.bf16.vlgmr.msra.gmra.mrb[0].mxu1 %v4461_v28 }
 0x315   :  { %v7819_v29 = vpop.f32.mrb[0].mxu0  ;;  %v7821_v24 = vpop.f32.mrb[0].mxu1 }
 0x316   :  { %v4283_v30 = vrot.slane %v7819_v29, 4  ;;  %v4290_v31 = vmul.f32 %v7819_v29, %v7819_v29  ;;  %v4313_v32 = vrot.slane %v7821_v24, 4  ;;  %v4320_v33 = vmul.f32 %v7821_v24, %v7821_v24  ;;  %v7829_v34 = vpop.f32.mrb[1].mxu0  ;;  %v7831_v27 = vpop.f32.mrb[1].mxu1 }
 0x317   :  { %v4298_v35 = vrot.slane %v7829_v34, 4  ;;  %v4305_v36 = vmul.f32 %v7829_v34, %v7829_v34  ;;  %v4328_v37 = vrot.slane %v7831_v27, 4  ;;  %v4335_v38 = vmul.f32 %v7831_v27, %v7831_v27  ;;  %v3911_v39 = vpop.f32.mrb[2].mxu0  ;;  %v4280_v40 = vpop.f32.mrb[2].mxu1 }
 0x318   :  { %v4284_v41 = vadd.f32 %v4283_v30, %v7819_v29  ;;  %v4291_v42 = vrot.slane %v4290_v31, 4  ;;  %v4314_v43 = vadd.f32 %v4313_v32, %v7821_v24  ;;  %v4321_v44 = vrot.slane %v4320_v33, 4  ;;  %v3912_v45 = vpop.f32.mrb[3].mxu0  ;;  %v4281_v46 = vpop.f32.mrb[3].mxu1 }
 0x319   :  { %v4299_v47 = vadd.f32 %v4298_v35, %v7829_v34  ;;  %v4306_v48 = vrot.slane %v4305_v36, 4  ;;  %v4329_v49 = vadd.f32 %v4328_v37, %v7831_v27  ;;  %v4336_v50 = vrot.slane %v4335_v38, 4 }
 0x31a   :  { %v4285_v51 = vrot.slane %v4284_v41, 2  ;;  %v4292_v52 = vadd.f32 %v4291_v42, %v4290_v31  ;;  %v4315_v53 = vrot.slane %v4314_v43, 2  ;;  %v4322_v54 = vadd.f32 %v4321_v44, %v4320_v33 }
 0x31b   :  { %v4300_v55 = vrot.slane %v4299_v47, 2  ;;  %v4307_v56 = vadd.f32 %v4306_v48, %v4305_v36  ;;  %v4330_v57 = vrot.slane %v4329_v49, 2  ;;  %v4337_v58 = vadd.f32 %v4336_v50, %v4335_v38 }
 0x31c   :  { %v4286_v59 = vadd.f32 %v4285_v51, %v4284_v41  ;;  %v4293_v60 = vrot.slane %v4292_v52, 2  ;;  %v4316_v61 = vadd.f32 %v4315_v53, %v4314_v43  ;;  %v4323_v62 = vrot.slane %v4322_v54, 2 }
 0x31d   :  { %v4301_v63 = vadd.f32 %v4300_v55, %v4299_v47  ;;  %v4308_v0 = vrot.slane %v4307_v56, 2  ;;  %v4331_v1 = vadd.f32 %v4330_v57, %v4329_v49  ;;  %v4338_v2 = vrot.slane %v4337_v58, 2  ;;  %v4367_v47 = vld [vmem:[%s7861_s2] sm:$0xf] }
 0x31e   :  { %v4287_v3 = vrot.slane %v4286_v59, 1  ;;  %v4294_v4 = vadd.f32 %v4293_v60, %v4292_v52  ;;  %v4324_v5 = vadd.f32 %v4323_v62, %v4322_v54  ;;  %v4317_v7 = vrot.slane %v4316_v61, 1 }
 0x31f   :  { %v4302_v8 = vrot.slane %v4301_v63, 1  ;;  %v4309_v9 = vadd.f32 %v4308_v0, %v4307_v56  ;;  %v4339_v10 = vadd.f32 %v4338_v2, %v4337_v58  ;;  %v4332_v14 = vrot.slane %v4331_v1, 1 }
 0x320   :  { %v4288_v12 = vadd.f32 %v4287_v3, %v4286_v59  ;;  %v4295_v13 = vrot.slane %v4294_v4, 1  ;;  %v4325_v15 = vrot.slane %v4324_v5, 1  ;;  %v4318_v21 = vadd.f32 %v4317_v7, %v4316_v61 }
 0x321   :  { %v4303_v11 = vadd.f32 %v4302_v8, %v4301_v63  ;;  %v4310_v17 = vrot.slane %v4309_v9, 1  ;;  %v4340_v18 = vrot.slane %v4339_v10, 1  ;;  %v4333_v28 = vadd.f32 %v4332_v14, %v4331_v1 }
 0x322   :  { %v4296_v19 = vadd.f32 %v4295_v13, %v4294_v4  ;;  %v4326_v25 = vadd.f32 %v4325_v15, %v4324_v5  ;;  %v4353_v33 = vsub.s32 0, %v4352_v20  ;;  %v4375_v48 = vsub.s32 1, %v4352_v20 }
 0x323   :  { %v4304_v22 = vadd.f32 %v4303_v11, %v4288_v12  ;;  %v4311_v23 = vadd.f32 %v4310_v17, %v4309_v9  ;;  %v4341_v32 = vadd.f32 %v4340_v18, %v4339_v10  ;;  %v4379_v49 = vsub.s32 2, %v4352_v20 }
 0x324   :  { %v4383_v50 = vsub.s32 3, %v4352_v20 }
 0x325   :  { %v4312_v26 = vadd.f32 %v4311_v23, %v4296_v19  ;;  %v4319_v16 = vadd.f32 %v4318_v21, %v4304_v22  ;;  %v4380_v53 = vrot.slane %v4367_v47, %v4379_v49 }
 0x327   :  { %v4327_v30 = vadd.f32 %v4326_v25, %v4312_v26  ;;  %v4334_v31 = vadd.f32 %v4333_v28, %v4319_v16 }
 0x329   :  { %v4342_v35 = vadd.f32 %v4341_v32, %v4327_v30  ;;  %v4344_v36 = vmul.f32 0.03125, %v4334_v31 }
 0x32b   :  { %v4345_v37 = vmul.f32 0.03125, %v4342_v35  ;;  %v4346_v38 = vmul.f32 %v4344_v36, %v4344_v36  ;;  %v4354_v39 = vrot.slane %v4344_v36, %v4353_v33 }
 0x32d   :  { %v4347_v40 = vsub.f32 %v4345_v37, %v4346_v38  ;;  %v4355_v41 = vsub.f32 %v7819_v29, %v4354_v39  ;;  %v4356_v42 = vsub.f32 %v7829_v34, %v4354_v39  ;;  %v4357_v43 = vsub.f32 %v7821_v24, %v4354_v39  ;;  %v4393_v29 = vld [vmem:[%s7862_s3] sm:$0xf] }
 0x32e   :  { %v4358_v44 = vsub.f32 %v7831_v27, %v4354_v39  ;;  %v4372_v34 = vrot.slane %v4367_v47, %v4353_v33  ;;  %v4376_v24 = vrot.slane %v4367_v47, %v4375_v48  ;;  %v4384_v27 = vrot.slane %v4367_v47, %v4383_v50 }
 0x32f   :  { %v4348_v45 = vmax.f32 %v4347_v40, 0.0  ;;  %v4398_v54 = vrot.slane %v4393_v29, %v4353_v33  ;;  %v4402_v55 = vrot.slane %v4393_v29, %v4375_v48  ;;  %v4406_v56 = vrot.slane %v4393_v29, %v4379_v49 }
 0x330   :  { %v4410_v57 = vrot.slane %v4393_v29, %v4383_v50 }
 0x331   :  { %v4349_v46 = vadd.f32 1e-05, %v4348_v45 }
 0x333   :  { %5989 = vrsqrt.f32 %v4349_v46 }
 0x33d   :  { %v5990_v51 = vpop.eup %5989 }
 0x33e   :  { %v4362_v52 = vrot.slane %v5990_v51, %v4353_v33 }
 0x340   :  { %v4363_v58 = vmul.f32 %v4362_v52, %v4355_v41  ;;  %v4364_v59 = vmul.f32 %v4362_v52, %v4356_v42  ;;  %v4365_v60 = vmul.f32 %v4362_v52, %v4357_v43  ;;  %v4366_v61 = vmul.f32 %v4362_v52, %v4358_v44 }
 0x342   :  { %v4389_v62 = vmul.f32 %v4372_v34, %v4363_v58  ;;  %v4390_v63 = vmul.f32 %v4376_v24, %v4364_v59  ;;  %v4391_v0 = vmul.f32 %v4380_v53, %v4365_v60  ;;  %v4392_v1 = vmul.f32 %v4384_v27, %v4366_v61 }
 0x344   :  { %v4415_v2 = vadd.f32 %v4398_v54, %v4389_v62  ;;  %v4416_v3 = vadd.f32 %v4402_v55, %v4390_v63  ;;  %v4417_v4 = vadd.f32 %v4406_v56, %v4391_v0  ;;  %v4418_v5 = vadd.f32 %v4410_v57, %v4392_v1 }
 0x346   :  { %v4419_v6 = vmax.f32 %v4415_v2, 0.0  ;;  %v4420_v7 = vmax.f32 %v4416_v3, 0.0  ;;  %v4421_v8 = vmax.f32 %v4417_v4, 0.0  ;;  %v4422_v9 = vmax.f32 %v4418_v5, 0.0 }
 0x348   :  { %v5041_v10 = vpack.c.bf16 %v4420_v7, %v4419_v6  ;;  %v5042_v12 = vpack.c.bf16 %v4422_v9, %v4421_v8 }
 0x34a   :  { %4439 = vst [vmem:[%s7863_s4] sm:$0xff] %v5041_v10  ;;  %4440 = vst [vmem:[%s7863_s4 + $0x8] sm:$0xff] %v5042_v12 }

// kernel: gen_dt_forward.10
= control target key start
LH: loop header
LB: loop body
LE: loop exit
PB: predicated region body
PF: predicated region fallthrough
CT: control target
= control target key end

     0   :  { %s4602_s1 = inlined_call_operand.vmem [shape: bf16[1152,512], index: 1, kind: input, shape index: {}]   ;;  %s4603_s0 = inlined_call_operand.vmem [shape: bf16[32,1152], index: 0, kind: input, shape index: {}]   ;;  %s4604_s2 = inlined_call_operand.vmem [shape: f32[1,512], index: 2, kind: input, shape index: {}]   ;;  %s4605_s3 = inlined_call_operand.vmem [shape: f32[1,512], index: 3, kind: input, shape index: {}]   ;;  %s4606_s4 = inlined_call_operand.vmem [shape: bf16[32,512], index: 4, kind: output, shape index: {}]  }
   0x1   :  { %v3071_v0 = vld [vmem:[%s4602_s1 + $0x4] ss:$16 sps:$4 sm:$0xff]   ;;  %v3073_v1 = vld [vmem:[%s4602_s1 + $0xc] ss:$16 sps:$4 sm:$0xff]   ;;  %v3075_v2 = vld [vmem:[%s4602_s1] ss:$16 sps:$4 sm:$0xff]  }
   0x2   :  { %1858 = vmatprep.subr.bf16.mxu0 %v3071_v0  ;;  %v3076_v3 = vld [vmem:[%s4602_s1 + $0x8] ss:$16 sps:$4 sm:$0xff]   ;;  %2123 = vmatprep.subr.bf16.mxu1 %v3073_v1  ;;  %v3077_v4 = vld [vmem:[%s4602_s1 + $0x24] ss:$16 sps:$4 sm:$0xff]   ;;  %v3079_v5 = vld [vmem:[%s4602_s1 + $0x2c] ss:$16 sps:$4 sm:$0xff]  }
   0x3   :  { %1859 = vmatpush1.bf16.msra.mxu0 %v3075_v2  ;;  %2124 = vmatpush1.bf16.msra.mxu1 %v3076_v3  ;;  %v3081_v6 = vld [vmem:[%s4602_s1 + $0x20] ss:$16 sps:$4 sm:$0xff]   ;;  %v3082_v7 = vld [vmem:[%s4602_s1 + $0x28] ss:$16 sps:$4 sm:$0xff]   ;;  %v3083_v8 = vld [vmem:[%s4602_s1 + $0x44] ss:$16 sps:$4 sm:$0xff]  }
   0x4   :  { %1860 = vmatprep.subr.bf16.mxu0 %v3077_v4  ;;  %2125 = vmatprep.subr.bf16.mxu1 %v3079_v5  ;;  %v3085_v9 = vld [vmem:[%s4602_s1 + $0x4c] ss:$16 sps:$4 sm:$0xff]   ;;  %v3087_v10 = vld [vmem:[%s4602_s1 + $0x40] ss:$16 sps:$4 sm:$0xff]   ;;  %v3088_v11 = vld [vmem:[%s4602_s1 + $0x48] ss:$16 sps:$4 sm:$0xff]  }
   0x5   :  { %v3089_v12 = vld [vmem:[%s4602_s1 + $0x64] ss:$16 sps:$4 sm:$0xff]   ;;  %v3091_v13 = vld [vmem:[%s4602_s1 + $0x6c] ss:$16 sps:$4 sm:$0xff]   ;;  %v3093_v14 = vld [vmem:[%s4602_s1 + $0x60] ss:$16 sps:$4 sm:$0xff]  }
   0x6   :  { %v3094_v15 = vld [vmem:[%s4602_s1 + $0x68] ss:$16 sps:$4 sm:$0xff]   ;;  %v3095_v16 = vld [vmem:[%s4602_s1 + $0x84] ss:$16 sps:$4 sm:$0xff]   ;;  %v3097_v17 = vld [vmem:[%s4602_s1 + $0x8c] ss:$16 sps:$4 sm:$0xff]  }
   0x7   :  { %1861 = vmatpush1.bf16.msra.mxu0 %v3081_v6  ;;  %2126 = vmatpush1.bf16.msra.mxu1 %v3082_v7  ;;  %v3099_v18 = vld [vmem:[%s4602_s1 + $0x80] ss:$16 sps:$4 sm:$0xff]   ;;  %v3100_v19 = vld [vmem:[%s4602_s1 + $0x88] ss:$16 sps:$4 sm:$0xff]   ;;  %v3101_v20 = vld [vmem:[%s4602_s1 + $0xa4] ss:$16 sps:$4 sm:$0xff]  }
   0x8   :  { %1862 = vmatprep.subr.bf16.mxu0 %v3083_v8  ;;  %2127 = vmatprep.subr.bf16.mxu1 %v3085_v9  ;;  %v3103_v21 = vld [vmem:[%s4602_s1 + $0xac] ss:$16 sps:$4 sm:$0xff]   ;;  %v3105_v22 = vld [vmem:[%s4602_s1 + $0xa0] ss:$16 sps:$4 sm:$0xff]   ;;  %v3106_v23 = vld [vmem:[%s4602_s1 + $0xa8] ss:$16 sps:$4 sm:$0xff]  }
   0x9   :  { %v3107_v24 = vld [vmem:[%s4602_s1 + $0xc4] ss:$16 sps:$4 sm:$0xff]   ;;  %v3109_v25 = vld [vmem:[%s4602_s1 + $0xcc] ss:$16 sps:$4 sm:$0xff]   ;;  %v3111_v26 = vld [vmem:[%s4602_s1 + $0xc0] ss:$16 sps:$4 sm:$0xff]  }
   0xa   :  { %v3112_v27 = vld [vmem:[%s4602_s1 + $0xc8] ss:$16 sps:$4 sm:$0xff]   ;;  %v3113_v28 = vld [vmem:[%s4602_s1 + $0xe4] ss:$16 sps:$4 sm:$0xff]   ;;  %v3115_v29 = vld [vmem:[%s4602_s1 + $0xec] ss:$16 sps:$4 sm:$0xff]  }
   0xb   :  { %1863 = vmatpush1.bf16.msra.mxu0 %v3087_v10  ;;  %2128 = vmatpush1.bf16.msra.mxu1 %v3088_v11  ;;  %v3117_v30 = vld [vmem:[%s4602_s1 + $0xe0] ss:$16 sps:$4 sm:$0xff]   ;;  %v3118_v31 = vld [vmem:[%s4602_s1 + $0xe8] ss:$16 sps:$4 sm:$0xff]   ;;  %v3119_v32 = vld [vmem:[%s4602_s1 + $0x104] ss:$16 sps:$4 sm:$0xff]  }
   0xc   :  { %1864 = vmatprep.subr.bf16.mxu0 %v3089_v12  ;;  %2129 = vmatprep.subr.bf16.mxu1 %v3091_v13  ;;  %v3121_v33 = vld [vmem:[%s4602_s1 + $0x10c] ss:$16 sps:$4 sm:$0xff]   ;;  %v3123_v34 = vld [vmem:[%s4602_s1 + $0x100] ss:$16 sps:$4 sm:$0xff]   ;;  %v3124_v35 = vld [vmem:[%s4602_s1 + $0x108] ss:$16 sps:$4 sm:$0xff]  }
   0xd   :  { %v3125_v36 = vld [vmem:[%s4602_s1 + $0x124] ss:$16 sps:$4 sm:$0xff]   ;;  %v3127_v37 = vld [vmem:[%s4602_s1 + $0x12c] ss:$16 sps:$4 sm:$0xff]   ;;  %v3129_v38 = vld [vmem:[%s4602_s1 + $0x120] ss:$16 sps:$4 sm:$0xff]  }
   0xe   :  { %v3130_v39 = vld [vmem:[%s4602_s1 + $0x128] ss:$16 sps:$4 sm:$0xff]   ;;  %v3131_v40 = vld [vmem:[%s4602_s1 + $0x144] ss:$16 sps:$4 sm:$0xff]   ;;  %v3133_v41 = vld [vmem:[%s4602_s1 + $0x14c] ss:$16 sps:$4 sm:$0xff]  }
   0xf   :  { %1865 = vmatpush1.bf16.msra.mxu0 %v3093_v14  ;;  %2130 = vmatpush1.bf16.msra.mxu1 %v3094_v15  ;;  %v3135_v42 = vld [vmem:[%s4602_s1 + $0x140] ss:$16 sps:$4 sm:$0xff]   ;;  %v3136_v43 = vld [vmem:[%s4602_s1 + $0x148] ss:$16 sps:$4 sm:$0xff]   ;;  %v3137_v44 = vld [vmem:[%s4602_s1 + $0x164] ss:$16 sps:$4 sm:$0xff]  }
  0x10   :  { %1866 = vmatprep.subr.bf16.mxu0 %v3095_v16  ;;  %2131 = vmatprep.subr.bf16.mxu1 %v3097_v17  ;;  %v3139_v45 = vld [vmem:[%s4602_s1 + $0x16c] ss:$16 sps:$4 sm:$0xff]   ;;  %v3141_v46 = vld [vmem:[%s4602_s1 + $0x160] ss:$16 sps:$4 sm:$0xff]   ;;  %v3142_v47 = vld [vmem:[%s4602_s1 + $0x168] ss:$16 sps:$4 sm:$0xff]  }
  0x11   :  { %v3169_v48 = vld [vmem:[%s4603_s0 + $0x4] ss:$36 sps:$4 sm:$0xff]   ;;  %v3145_v50 = vld [vmem:[%s4602_s1 + $0x18c] ss:$16 sps:$4 sm:$0xff]   ;;  %v3147_v51 = vld [vmem:[%s4602_s1 + $0x180] ss:$16 sps:$4 sm:$0xff]  }
  0x12   :  { %v3143_v49 = vld [vmem:[%s4602_s1 + $0x184] ss:$16 sps:$4 sm:$0xff]   ;;  %1890 = vmatprep.mubr.bf16.mxu0 %v3169_v48  ;;  %2155 = vmatprep.mubr.bf16.mxu1 %v3169_v48  ;;  %v3148_v52 = vld [vmem:[%s4602_s1 + $0x188] ss:$16 sps:$4 sm:$0xff]   ;;  %v3151_v54 = vld [vmem:[%s4602_s1 + $0x1ac] ss:$16 sps:$4 sm:$0xff]  }
  0x13   :  { %1867 = vmatpush1.bf16.msra.mxu0 %v3099_v18  ;;  %2132 = vmatpush1.bf16.msra.mxu1 %v3100_v19  ;;  %v3149_v53 = vld [vmem:[%s4602_s1 + $0x1a4] ss:$16 sps:$4 sm:$0xff]   ;;  %v3153_v55 = vld [vmem:[%s4602_s1 + $0x1a0] ss:$16 sps:$4 sm:$0xff]   ;;  %v3154_v56 = vld [vmem:[%s4602_s1 + $0x1a8] ss:$16 sps:$4 sm:$0xff]  }
  0x14   :  { %1868 = vmatprep.subr.bf16.mxu0 %v3101_v20  ;;  %2133 = vmatprep.subr.bf16.mxu1 %v3103_v21  ;;  %v3155_v57 = vld [vmem:[%s4602_s1 + $0x1c4] ss:$16 sps:$4 sm:$0xff]   ;;  %v3157_v58 = vld [vmem:[%s4602_s1 + $0x1cc] ss:$16 sps:$4 sm:$0xff]   ;;  %v3159_v59 = vld [vmem:[%s4602_s1 + $0x1c0] ss:$16 sps:$4 sm:$0xff]  }
  0x15   :  { %v3160_v60 = vld [vmem:[%s4602_s1 + $0x1c8] ss:$16 sps:$4 sm:$0xff]   ;;  %v3161_v61 = vld [vmem:[%s4602_s1 + $0x1e4] ss:$16 sps:$4 sm:$0xff]   ;;  %v3163_v62 = vld [vmem:[%s4602_s1 + $0x1ec] ss:$16 sps:$4 sm:$0xff]  }
  0x16   :  { %v3165_v63 = vld [vmem:[%s4602_s1 + $0x1e0] ss:$16 sps:$4 sm:$0xff]   ;;  %v3166_v0 = vld [vmem:[%s4602_s1 + $0x1e8] ss:$16 sps:$4 sm:$0xff]   ;;  %v3172_v1 = vld [vmem:[%s4602_s1 + $0x204] ss:$16 sps:$4 sm:$0xff]  }
  0x17   :  { %1869 = vmatpush1.bf16.msra.mxu0 %v3105_v22  ;;  %2134 = vmatpush1.bf16.msra.mxu1 %v3106_v23  ;;  %v3175_v2 = vld [vmem:[%s4602_s1 + $0x20c] ss:$16 sps:$4 sm:$0xff]   ;;  %v3167_v3 = vld [vmem:[%s4603_s0] ss:$36 sps:$4 sm:$0xff]   ;;  %v3173_v5 = vld [vmem:[%s4602_s1 + $0x208] ss:$16 sps:$4 sm:$0xff]  }
  0x18   :  { %1870 = vmatprep.subr.bf16.mxu0 %v3107_v24  ;;  %2135 = vmatprep.subr.bf16.mxu1 %v3109_v25  ;;  %v3170_v4 = vld [vmem:[%s4602_s1 + $0x200] ss:$16 sps:$4 sm:$0xff]   ;;  %v3178_v6 = vld [vmem:[%s4602_s1 + $0x224] ss:$16 sps:$4 sm:$0xff]   ;;  %v3181_v7 = vld [vmem:[%s4602_s1 + $0x22c] ss:$16 sps:$4 sm:$0xff]  }
  0x19   :  { %v3176_v8 = vld [vmem:[%s4602_s1 + $0x220] ss:$16 sps:$4 sm:$0xff]   ;;  %v3179_v9 = vld [vmem:[%s4602_s1 + $0x228] ss:$16 sps:$4 sm:$0xff]   ;;  %v3184_v10 = vld [vmem:[%s4602_s1 + $0x244] ss:$16 sps:$4 sm:$0xff]  }
  0x1a   :  { %v3187_v11 = vld [vmem:[%s4602_s1 + $0x24c] ss:$16 sps:$4 sm:$0xff]   ;;  %v3182_v12 = vld [vmem:[%s4602_s1 + $0x240] ss:$16 sps:$4 sm:$0xff]   ;;  %v3185_v13 = vld [vmem:[%s4602_s1 + $0x248] ss:$16 sps:$4 sm:$0xff]  }
  0x1b   :  { %1871 = vmatpush1.bf16.msra.mxu0 %v3111_v26  ;;  %2136 = vmatpush1.bf16.msra.mxu1 %v3112_v27  ;;  %v3190_v14 = vld [vmem:[%s4602_s1 + $0x264] ss:$16 sps:$4 sm:$0xff]   ;;  %v3193_v15 = vld [vmem:[%s4602_s1 + $0x26c] ss:$16 sps:$4 sm:$0xff]   ;;  %v3188_v16 = vld [vmem:[%s4602_s1 + $0x260] ss:$16 sps:$4 sm:$0xff]  }
  0x1c   :  { %1872 = vmatprep.subr.bf16.mxu0 %v3113_v28  ;;  %2137 = vmatprep.subr.bf16.mxu1 %v3115_v29  ;;  %v3191_v17 = vld [vmem:[%s4602_s1 + $0x268] ss:$16 sps:$4 sm:$0xff]   ;;  %v3196_v18 = vld [vmem:[%s4602_s1 + $0x284] ss:$16 sps:$4 sm:$0xff]   ;;  %v3199_v19 = vld [vmem:[%s4602_s1 + $0x28c] ss:$16 sps:$4 sm:$0xff]  }
  0x1d   :  { %v3194_v20 = vld [vmem:[%s4602_s1 + $0x280] ss:$16 sps:$4 sm:$0xff]   ;;  %v3197_v21 = vld [vmem:[%s4602_s1 + $0x288] ss:$16 sps:$4 sm:$0xff]   ;;  %v3202_v22 = vld [vmem:[%s4602_s1 + $0x2a4] ss:$16 sps:$4 sm:$0xff]  }
  0x1e   :  { %v3205_v23 = vld [vmem:[%s4602_s1 + $0x2ac] ss:$16 sps:$4 sm:$0xff]   ;;  %v3200_v25 = vld [vmem:[%s4602_s1 + $0x2a0] ss:$16 sps:$4 sm:$0xff]   ;;  %v3203_v26 = vld [vmem:[%s4602_s1 + $0x2a8] ss:$16 sps:$4 sm:$0xff]  }
  0x1f   :  { %1873 = vmatpush1.bf16.msra.mxu0 %v3117_v30  ;;  %2138 = vmatpush1.bf16.msra.mxu1 %v3118_v31  ;;  %v3254_v24 = vld [vmem:[%s4603_s0 + $0x4c] ss:$36 sps:$4 sm:$0xff]   ;;  %v3208_v27 = vld [vmem:[%s4602_s1 + $0x2c4] ss:$16 sps:$4 sm:$0xff]   ;;  %v3209_v31 = vld [vmem:[%s4602_s1 + $0x2c8] ss:$16 sps:$4 sm:$0xff]  }
  0x20   :  { %1874 = vmatprep.subr.bf16.mxu0 %v3119_v32  ;;  %2139 = vmatprep.subr.bf16.mxu1 %v3121_v33  ;;  %v3211_v28 = vld [vmem:[%s4602_s1 + $0x2cc] ss:$16 sps:$4 sm:$0xff]   ;;  %v3206_v30 = vld [vmem:[%s4602_s1 + $0x2c0] ss:$16 sps:$4 sm:$0xff]   ;;  %v3214_v32 = vld [vmem:[%s4602_s1 + $0x2e4] ss:$16 sps:$4 sm:$0xff]  }
  0x21   :  { %v3262_v29 = vld [vmem:[%s4603_s0 + $0x48] ss:$36 sps:$4 sm:$0xff]  }
  0x22   :  { %v3217_v33 = vld [vmem:[%s4602_s1 + $0x2ec] ss:$16 sps:$4 sm:$0xff]   ;;  %v3233_v48 = vld [vmem:[%s4602_s1 + $0x348] ss:$16 sps:$4 sm:$0xff]  }
  0x23   :  { %1875 = vmatpush1.bf16.msra.mxu0 %v3123_v34  ;;  %2140 = vmatpush1.bf16.msra.mxu1 %v3124_v35  ;;  %v3271_v34 = vld [vmem:[%s4603_s0 + $0xc] ss:$36 sps:$4 sm:$0xff]  }
  0x24   :  { %1876 = vmatprep.subr.bf16.mxu0 %v3125_v36  ;;  %2141 = vmatprep.subr.bf16.mxu1 %v3127_v37  ;;  %v3212_v35 = vld [vmem:[%s4602_s1 + $0x2e0] ss:$16 sps:$4 sm:$0xff]   ;;  %v3215_v36 = vld [vmem:[%s4602_s1 + $0x2e8] ss:$16 sps:$4 sm:$0xff]   ;;  %v3220_v37 = vld [vmem:[%s4602_s1 + $0x304] ss:$16 sps:$4 sm:$0xff]  }
  0x27   :  { %1877 = vmatpush1.bf16.msra.mxu0 %v3129_v38  ;;  %2142 = vmatpush1.bf16.msra.mxu1 %v3130_v39  ;;  %v3223_v38 = vld [vmem:[%s4602_s1 + $0x30c] ss:$16 sps:$4 sm:$0xff]   ;;  %v3218_v39 = vld [vmem:[%s4602_s1 + $0x300] ss:$16 sps:$4 sm:$0xff]  }
  0x28   :  { %1878 = vmatprep.subr.bf16.mxu0 %v3131_v40  ;;  %2143 = vmatprep.subr.bf16.mxu1 %v3133_v41  ;;  %v3221_v40 = vld [vmem:[%s4602_s1 + $0x308] ss:$16 sps:$4 sm:$0xff]   ;;  %v3226_v41 = vld [vmem:[%s4602_s1 + $0x324] ss:$16 sps:$4 sm:$0xff]  }
  0x2b   :  { %1879 = vmatpush1.bf16.msra.mxu0 %v3135_v42  ;;  %2144 = vmatpush1.bf16.msra.mxu1 %v3136_v43  ;;  %v3229_v42 = vld [vmem:[%s4602_s1 + $0x32c] ss:$16 sps:$4 sm:$0xff]   ;;  %v3224_v43 = vld [vmem:[%s4602_s1 + $0x320] ss:$16 sps:$4 sm:$0xff]  }
  0x2c   :  { %1880 = vmatprep.subr.bf16.mxu0 %v3137_v44  ;;  %2145 = vmatprep.subr.bf16.mxu1 %v3139_v45  ;;  %v3227_v44 = vld [vmem:[%s4602_s1 + $0x328] ss:$16 sps:$4 sm:$0xff]   ;;  %v3232_v45 = vld [vmem:[%s4602_s1 + $0x344] ss:$16 sps:$4 sm:$0xff]  }
  0x2f   :  { %1881 = vmatpush1.bf16.msra.mxu0 %v3141_v46  ;;  %2146 = vmatpush1.bf16.msra.mxu1 %v3142_v47  ;;  %v3235_v46 = vld [vmem:[%s4602_s1 + $0x34c] ss:$16 sps:$4 sm:$0xff]   ;;  %v3230_v47 = vld [vmem:[%s4602_s1 + $0x340] ss:$16 sps:$4 sm:$0xff]  }
  0x30   :  { %1882 = vmatprep.subr.bf16.mxu0 %v3143_v49  ;;  %2147 = vmatprep.subr.bf16.mxu1 %v3145_v50  ;;  %v3238_v49 = vld [vmem:[%s4602_s1 + $0x364] ss:$16 sps:$4 sm:$0xff]   ;;  %v3241_v50 = vld [vmem:[%s4602_s1 + $0x36c] ss:$16 sps:$4 sm:$0xff]  }
  0x33   :  { %1883 = vmatpush1.bf16.msra.mxu0 %v3147_v51  ;;  %2148 = vmatpush1.bf16.msra.mxu1 %v3148_v52  ;;  %v3236_v51 = vld [vmem:[%s4602_s1 + $0x360] ss:$16 sps:$4 sm:$0xff]   ;;  %v3239_v52 = vld [vmem:[%s4602_s1 + $0x368] ss:$16 sps:$4 sm:$0xff]  }
  0x34   :  { %1884 = vmatprep.subr.bf16.mxu0 %v3149_v53  ;;  %2149 = vmatprep.subr.bf16.mxu1 %v3151_v54  ;;  %v3244_v53 = vld [vmem:[%s4602_s1 + $0x384] ss:$16 sps:$4 sm:$0xff]   ;;  %v3247_v54 = vld [vmem:[%s4602_s1 + $0x38c] ss:$16 sps:$4 sm:$0xff]  }
  0x37   :  { %1885 = vmatpush1.bf16.msra.mxu0 %v3153_v55  ;;  %2150 = vmatpush1.bf16.msra.mxu1 %v3154_v56  ;;  %v3242_v55 = vld [vmem:[%s4602_s1 + $0x380] ss:$16 sps:$4 sm:$0xff]   ;;  %v3245_v56 = vld [vmem:[%s4602_s1 + $0x388] ss:$16 sps:$4 sm:$0xff]  }
  0x38   :  { %1886 = vmatprep.subr.bf16.mxu0 %v3155_v57  ;;  %2151 = vmatprep.subr.bf16.mxu1 %v3157_v58  ;;  %v3250_v57 = vld [vmem:[%s4602_s1 + $0x3a4] ss:$16 sps:$4 sm:$0xff]   ;;  %v3253_v58 = vld [vmem:[%s4602_s1 + $0x3ac] ss:$16 sps:$4 sm:$0xff]  }
  0x3b   :  { %1887 = vmatpush1.bf16.msra.mxu0 %v3159_v59  ;;  %2152 = vmatpush1.bf16.msra.mxu1 %v3160_v60  ;;  %v3248_v59 = vld [vmem:[%s4602_s1 + $0x3a0] ss:$16 sps:$4 sm:$0xff]   ;;  %v3251_v60 = vld [vmem:[%s4602_s1 + $0x3a8] ss:$16 sps:$4 sm:$0xff]  }
  0x3c   :  { %1888 = vmatprep.subr.bf16.mxu0 %v3161_v61  ;;  %2153 = vmatprep.subr.bf16.mxu1 %v3163_v62  ;;  %v3258_v61 = vld [vmem:[%s4602_s1 + $0x3c4] ss:$16 sps:$4 sm:$0xff]   ;;  %v3261_v62 = vld [vmem:[%s4602_s1 + $0x3cc] ss:$16 sps:$4 sm:$0xff]  }
  0x3f   :  { %1889 = vmatpush1.bf16.msra.mxu0 %v3165_v63  ;;  %2154 = vmatpush1.bf16.msra.mxu1 %v3166_v0  ;;  %v3256_v63 = vld [vmem:[%s4602_s1 + $0x3c0] ss:$16 sps:$4 sm:$0xff]   ;;  %v3259_v0 = vld [vmem:[%s4602_s1 + $0x3c8] ss:$16 sps:$4 sm:$0xff]  }
  0x40   :  { %1911 = vmatprep.subr.bf16.mxu0 %v3172_v1  ;;  %2176 = vmatprep.subr.bf16.mxu1 %v3175_v2  ;;  %v3265_v1 = vld [vmem:[%s4602_s1 + $0x3e4] ss:$16 sps:$4 sm:$0xff]   ;;  %v3268_v2 = vld [vmem:[%s4602_s1 + $0x3ec] ss:$16 sps:$4 sm:$0xff]  }
  0x42   :  { %1891 = vmatmul.mubr.bf16.vlgmr.msra.gmra.mrb[0].mxu0 %v3167_v3  ;;  %2156 = vmatmul.mubr.bf16.vlgmr.msra.gmra.mrb[0].mxu1 %v3167_v3  ;;  %v3263_v3 = vld [vmem:[%s4602_s1 + $0x3e0] ss:$16 sps:$4 sm:$0xff]  }
  0x43   :  { %1912 = vmatpush1.bf16.msra.mxu0 %v3170_v4  ;;  %2177 = vmatpush1.bf16.msra.mxu1 %v3173_v5  ;;  %v3266_v4 = vld [vmem:[%s4602_s1 + $0x3e8] ss:$16 sps:$4 sm:$0xff]   ;;  %v3274_v5 = vld [vmem:[%s4602_s1 + $0x404] ss:$16 sps:$4 sm:$0xff]  }
  0x44   :  { %1913 = vmatprep.subr.bf16.mxu0 %v3178_v6  ;;  %2178 = vmatprep.subr.bf16.mxu1 %v3181_v7  ;;  %v3277_v6 = vld [vmem:[%s4602_s1 + $0x40c] ss:$16 sps:$4 sm:$0xff]  }
  0x45   :  { %1900 = vmatprep.mubr.bf16.mxu0 %v3254_v24  ;;  %2165 = vmatprep.mubr.bf16.mxu1 %v3254_v24  ;;  %v3269_v7 = vld [vmem:[%s4603_s0 + $0x8] ss:$36 sps:$4 sm:$0xff]  }
  0x46   :  { %v3293_v24 = vld [vmem:[%s4602_s1 + $0x468] ss:$16 sps:$4 sm:$0xff]  }
  0x47   :  { %1914 = vmatpush1.bf16.msra.mxu0 %v3176_v8  ;;  %2179 = vmatpush1.bf16.msra.mxu1 %v3179_v9  ;;  %v3272_v8 = vld [vmem:[%s4602_s1 + $0x400] ss:$16 sps:$4 sm:$0xff]   ;;  %v3275_v9 = vld [vmem:[%s4602_s1 + $0x408] ss:$16 sps:$4 sm:$0xff]  }
  0x48   :  { %1915 = vmatprep.subr.bf16.mxu0 %v3184_v10  ;;  %2180 = vmatprep.subr.bf16.mxu1 %v3187_v11  ;;  %v3280_v10 = vld [vmem:[%s4602_s1 + $0x424] ss:$16 sps:$4 sm:$0xff]   ;;  %v3283_v11 = vld [vmem:[%s4602_s1 + $0x42c] ss:$16 sps:$4 sm:$0xff]  }
  0x4a   :  { %1901 = vmatmul.mubr.bf16.gmra.mrb[4].mxu0 %v3262_v29  ;;  %2166 = vmatmul.mubr.bf16.gmra.mrb[4].mxu1 %v3262_v29  ;;  %v3304_v29 = vld [vmem:[%s4602_s1 + $0x4a4] ss:$16 sps:$4 sm:$0xff]  }
  0x4b   :  { %1916 = vmatpush1.bf16.msra.mxu0 %v3182_v12  ;;  %2181 = vmatpush1.bf16.msra.mxu1 %v3185_v13  ;;  %v3356_v12 = vld [vmem:[%s4603_s0 + $0x54] ss:$36 sps:$4 sm:$0xff]   ;;  %v3278_v13 = vld [vmem:[%s4602_s1 + $0x420] ss:$16 sps:$4 sm:$0xff]  }
  0x4c   :  { %1917 = vmatprep.subr.bf16.mxu0 %v3190_v14  ;;  %2182 = vmatprep.subr.bf16.mxu1 %v3193_v15  ;;  %v3281_v14 = vld [vmem:[%s4602_s1 + $0x428] ss:$16 sps:$4 sm:$0xff]   ;;  %v3286_v15 = vld [vmem:[%s4602_s1 + $0x444] ss:$16 sps:$4 sm:$0xff]  }
  0x4d   :  { %1943 = vmatprep.mubr.bf16.mxu0 %v3271_v34  ;;  %2208 = vmatprep.mubr.bf16.mxu1 %v3271_v34  ;;  %v3313_v34 = vld [vmem:[%s4602_s1 + $0x4cc] ss:$16 sps:$4 sm:$0xff]  }
  0x4f   :  { %1918 = vmatpush1.bf16.msra.mxu0 %v3188_v16  ;;  %2183 = vmatpush1.bf16.msra.mxu1 %v3191_v17  ;;  %v3289_v16 = vld [vmem:[%s4602_s1 + $0x44c] ss:$16 sps:$4 sm:$0xff]   ;;  %v3284_v17 = vld [vmem:[%s4602_s1 + $0x440] ss:$16 sps:$4 sm:$0xff]  }
  0x50   :  { %1919 = vmatprep.subr.bf16.mxu0 %v3196_v18  ;;  %2184 = vmatprep.subr.bf16.mxu1 %v3199_v19  ;;  %v3287_v18 = vld [vmem:[%s4602_s1 + $0x448] ss:$16 sps:$4 sm:$0xff]   ;;  %v3364_v19 = vld [vmem:[%s4603_s0 + $0x50] ss:$36 sps:$4 sm:$0xff]  }
  0x53   :  { %1920 = vmatpush1.bf16.msra.mxu0 %v3194_v20  ;;  %2185 = vmatpush1.bf16.msra.mxu1 %v3197_v21  ;;  %v3292_v20 = vld [vmem:[%s4602_s1 + $0x464] ss:$16 sps:$4 sm:$0xff]   ;;  %v3295_v21 = vld [vmem:[%s4602_s1 + $0x46c] ss:$16 sps:$4 sm:$0xff]  }
  0x54   :  { %1921 = vmatprep.subr.bf16.mxu0 %v3202_v22  ;;  %2186 = vmatprep.subr.bf16.mxu1 %v3205_v23  ;;  %v3373_v22 = vld [vmem:[%s4603_s0 + $0x14] ss:$36 sps:$4 sm:$0xff]   ;;  %v3290_v23 = vld [vmem:[%s4602_s1 + $0x460] ss:$16 sps:$4 sm:$0xff]  }
  0x57   :  { %1922 = vmatpush1.bf16.msra.mxu0 %v3200_v25  ;;  %2187 = vmatpush1.bf16.msra.mxu1 %v3203_v26  ;;  %v3298_v25 = vld [vmem:[%s4602_s1 + $0x484] ss:$16 sps:$4 sm:$0xff]   ;;  %v3301_v26 = vld [vmem:[%s4602_s1 + $0x48c] ss:$16 sps:$4 sm:$0xff]  }
  0x58   :  { %1923 = vmatprep.subr.bf16.mxu0 %v3208_v27  ;;  %2188 = vmatprep.subr.bf16.mxu1 %v3211_v28  ;;  %v3296_v27 = vld [vmem:[%s4602_s1 + $0x480] ss:$16 sps:$4 sm:$0xff]   ;;  %v3299_v28 = vld [vmem:[%s4602_s1 + $0x488] ss:$16 sps:$4 sm:$0xff]  }
  0x5b   :  { %1924 = vmatpush1.bf16.msra.mxu0 %v3206_v30  ;;  %2189 = vmatpush1.bf16.msra.mxu1 %v3209_v31  ;;  %v3307_v30 = vld [vmem:[%s4602_s1 + $0x4ac] ss:$16 sps:$4 sm:$0xff]   ;;  %v3302_v31 = vld [vmem:[%s4602_s1 + $0x4a0] ss:$16 sps:$4 sm:$0xff]  }
  0x5c   :  { %1925 = vmatprep.subr.bf16.mxu0 %v3214_v32  ;;  %2190 = vmatprep.subr.bf16.mxu1 %v3217_v33  ;;  %v3305_v32 = vld [vmem:[%s4602_s1 + $0x4a8] ss:$16 sps:$4 sm:$0xff]   ;;  %v3310_v33 = vld [vmem:[%s4602_s1 + $0x4c4] ss:$16 sps:$4 sm:$0xff]  }
  0x5f   :  { %1926 = vmatpush1.bf16.msra.mxu0 %v3212_v35  ;;  %2191 = vmatpush1.bf16.msra.mxu1 %v3215_v36  ;;  %v3308_v35 = vld [vmem:[%s4602_s1 + $0x4c0] ss:$16 sps:$4 sm:$0xff]   ;;  %v3311_v36 = vld [vmem:[%s4602_s1 + $0x4c8] ss:$16 sps:$4 sm:$0xff]  }
  0x60   :  { %1927 = vmatprep.subr.bf16.mxu0 %v3220_v37  ;;  %2192 = vmatprep.subr.bf16.mxu1 %v3223_v38  ;;  %v3316_v37 = vld [vmem:[%s4602_s1 + $0x4e4] ss:$16 sps:$4 sm:$0xff]   ;;  %v3319_v38 = vld [vmem:[%s4602_s1 + $0x4ec] ss:$16 sps:$4 sm:$0xff]  }
  0x63   :  { %1928 = vmatpush1.bf16.msra.mxu0 %v3218_v39  ;;  %2193 = vmatpush1.bf16.msra.mxu1 %v3221_v40  ;;  %v3314_v39 = vld [vmem:[%s4602_s1 + $0x4e0] ss:$16 sps:$4 sm:$0xff]   ;;  %v3317_v40 = vld [vmem:[%s4602_s1 + $0x4e8] ss:$16 sps:$4 sm:$0xff]  }
  0x64   :  { %1929 = vmatprep.subr.bf16.mxu0 %v3226_v41  ;;  %2194 = vmatprep.subr.bf16.mxu1 %v3229_v42  ;;  %v3322_v41 = vld [vmem:[%s4602_s1 + $0x504] ss:$16 sps:$4 sm:$0xff]   ;;  %v3325_v42 = vld [vmem:[%s4602_s1 + $0x50c] ss:$16 sps:$4 sm:$0xff]  }
  0x67   :  { %1930 = vmatpush1.bf16.msra.mxu0 %v3224_v43  ;;  %2195 = vmatpush1.bf16.msra.mxu1 %v3227_v44  ;;  %v3320_v43 = vld [vmem:[%s4602_s1 + $0x500] ss:$16 sps:$4 sm:$0xff]   ;;  %v3323_v44 = vld [vmem:[%s4602_s1 + $0x508] ss:$16 sps:$4 sm:$0xff]  }
  0x68   :  { %1931 = vmatprep.subr.bf16.mxu0 %v3232_v45  ;;  %2196 = vmatprep.subr.bf16.mxu1 %v3235_v46  ;;  %v3328_v45 = vld [vmem:[%s4602_s1 + $0x524] ss:$16 sps:$4 sm:$0xff]   ;;  %v3331_v46 = vld [vmem:[%s4602_s1 + $0x52c] ss:$16 sps:$4 sm:$0xff]  }
  0x6b   :  { %1932 = vmatpush1.bf16.msra.mxu0 %v3230_v47  ;;  %2197 = vmatpush1.bf16.msra.mxu1 %v3233_v48  ;;  %v3326_v47 = vld [vmem:[%s4602_s1 + $0x520] ss:$16 sps:$4 sm:$0xff]   ;;  %v3329_v48 = vld [vmem:[%s4602_s1 + $0x528] ss:$16 sps:$4 sm:$0xff]  }
  0x6c   :  { %1933 = vmatprep.subr.bf16.mxu0 %v3238_v49  ;;  %2198 = vmatprep.subr.bf16.mxu1 %v3241_v50  ;;  %v3334_v49 = vld [vmem:[%s4602_s1 + $0x544] ss:$16 sps:$4 sm:$0xff]   ;;  %v3337_v50 = vld [vmem:[%s4602_s1 + $0x54c] ss:$16 sps:$4 sm:$0xff]  }
  0x6f   :  { %1934 = vmatpush1.bf16.msra.mxu0 %v3236_v51  ;;  %2199 = vmatpush1.bf16.msra.mxu1 %v3239_v52  ;;  %v3332_v51 = vld [vmem:[%s4602_s1 + $0x540] ss:$16 sps:$4 sm:$0xff]   ;;  %v3335_v52 = vld [vmem:[%s4602_s1 + $0x548] ss:$16 sps:$4 sm:$0xff]  }
  0x70   :  { %1935 = vmatprep.subr.bf16.mxu0 %v3244_v53  ;;  %2200 = vmatprep.subr.bf16.mxu1 %v3247_v54  ;;  %v3340_v53 = vld [vmem:[%s4602_s1 + $0x564] ss:$16 sps:$4 sm:$0xff]   ;;  %v3343_v54 = vld [vmem:[%s4602_s1 + $0x56c] ss:$16 sps:$4 sm:$0xff]  }
  0x73   :  { %1936 = vmatpush1.bf16.msra.mxu0 %v3242_v55  ;;  %2201 = vmatpush1.bf16.msra.mxu1 %v3245_v56  ;;  %v3338_v55 = vld [vmem:[%s4602_s1 + $0x560] ss:$16 sps:$4 sm:$0xff]   ;;  %v3341_v56 = vld [vmem:[%s4602_s1 + $0x568] ss:$16 sps:$4 sm:$0xff]  }
  0x74   :  { %1937 = vmatprep.subr.bf16.mxu0 %v3250_v57  ;;  %2202 = vmatprep.subr.bf16.mxu1 %v3253_v58  ;;  %v3346_v57 = vld [vmem:[%s4602_s1 + $0x584] ss:$16 sps:$4 sm:$0xff]   ;;  %v3349_v58 = vld [vmem:[%s4602_s1 + $0x58c] ss:$16 sps:$4 sm:$0xff]  }
  0x77   :  { %1938 = vmatpush1.bf16.msra.mxu0 %v3248_v59  ;;  %2203 = vmatpush1.bf16.msra.mxu1 %v3251_v60  ;;  %v3344_v59 = vld [vmem:[%s4602_s1 + $0x580] ss:$16 sps:$4 sm:$0xff]   ;;  %v3347_v60 = vld [vmem:[%s4602_s1 + $0x588] ss:$16 sps:$4 sm:$0xff]  }
  0x78   :  { %1939 = vmatprep.subr.bf16.mxu0 %v3258_v61  ;;  %2204 = vmatprep.subr.bf16.mxu1 %v3261_v62  ;;  %v3352_v61 = vld [vmem:[%s4602_s1 + $0x5a4] ss:$16 sps:$4 sm:$0xff]   ;;  %v3355_v62 = vld [vmem:[%s4602_s1 + $0x5ac] ss:$16 sps:$4 sm:$0xff]  }
  0x7b   :  { %1940 = vmatpush1.bf16.msra.mxu0 %v3256_v63  ;;  %2205 = vmatpush1.bf16.msra.mxu1 %v3259_v0  ;;  %v3350_v63 = vld [vmem:[%s4602_s1 + $0x5a0] ss:$16 sps:$4 sm:$0xff]   ;;  %v3353_v0 = vld [vmem:[%s4602_s1 + $0x5a8] ss:$16 sps:$4 sm:$0xff]  }
  0x7c   :  { %1941 = vmatprep.subr.bf16.mxu0 %v3265_v1  ;;  %2206 = vmatprep.subr.bf16.mxu1 %v3268_v2  ;;  %v3360_v1 = vld [vmem:[%s4602_s1 + $0x5c4] ss:$16 sps:$4 sm:$0xff]   ;;  %v3363_v2 = vld [vmem:[%s4602_s1 + $0x5cc] ss:$16 sps:$4 sm:$0xff]  }
  0x7f   :  { %1942 = vmatpush1.bf16.msra.mxu0 %v3263_v3  ;;  %2207 = vmatpush1.bf16.msra.mxu1 %v3266_v4  ;;  %v3358_v3 = vld [vmem:[%s4602_s1 + $0x5c0] ss:$16 sps:$4 sm:$0xff]   ;;  %v3361_v4 = vld [vmem:[%s4602_s1 + $0x5c8] ss:$16 sps:$4 sm:$0xff]  }
  0x80   :  { %1964 = vmatprep.subr.bf16.mxu0 %v3274_v5  ;;  %2229 = vmatprep.subr.bf16.mxu1 %v3277_v6  ;;  %v3367_v5 = vld [vmem:[%s4602_s1 + $0x5e4] ss:$16 sps:$4 sm:$0xff]   ;;  %v3370_v6 = vld [vmem:[%s4602_s1 + $0x5ec] ss:$16 sps:$4 sm:$0xff]  }
  0x82   :  { %1944 = vmatmul.mubr.bf16.vlgmr.msra.gmra.mrb[0].mxu0 %v3269_v7  ;;  %2209 = vmatmul.mubr.bf16.vlgmr.msra.gmra.mrb[0].mxu1 %v3269_v7  ;;  %v3365_v7 = vld [vmem:[%s4602_s1 + $0x5e0] ss:$16 sps:$4 sm:$0xff]  }
  0x83   :  { %1965 = vmatpush1.bf16.msra.mxu0 %v3272_v8  ;;  %2230 = vmatpush1.bf16.msra.mxu1 %v3275_v9  ;;  %v3368_v8 = vld [vmem:[%s4602_s1 + $0x5e8] ss:$16 sps:$4 sm:$0xff]   ;;  %v3376_v9 = vld [vmem:[%s4602_s1 + $0x604] ss:$16 sps:$4 sm:$0xff]  }
  0x84   :  { %1966 = vmatprep.subr.bf16.mxu0 %v3280_v10  ;;  %2231 = vmatprep.subr.bf16.mxu1 %v3283_v11  ;;  %v3379_v10 = vld [vmem:[%s4602_s1 + $0x60c] ss:$16 sps:$4 sm:$0xff]   ;;  %v3371_v11 = vld [vmem:[%s4603_s0 + $0x10] ss:$36 sps:$4 sm:$0xff]  }
  0x85   :  { %1953 = vmatprep.mubr.bf16.mxu0 %v3356_v12  ;;  %2218 = vmatprep.mubr.bf16.mxu1 %v3356_v12  ;;  %v3374_v12 = vld [vmem:[%s4602_s1 + $0x600] ss:$16 sps:$4 sm:$0xff]  }
  0x87   :  { %1967 = vmatpush1.bf16.msra.mxu0 %v3278_v13  ;;  %2232 = vmatpush1.bf16.msra.mxu1 %v3281_v14  ;;  %v3377_v13 = vld [vmem:[%s4602_s1 + $0x608] ss:$16 sps:$4 sm:$0xff]   ;;  %v3382_v14 = vld [vmem:[%s4602_s1 + $0x624] ss:$16 sps:$4 sm:$0xff]  }
  0x88   :  { %1968 = vmatprep.subr.bf16.mxu0 %v3286_v15  ;;  %2233 = vmatprep.subr.bf16.mxu1 %v3289_v16  ;;  %v3385_v15 = vld [vmem:[%s4602_s1 + $0x62c] ss:$16 sps:$4 sm:$0xff]  }
  0x89   :  { %v3458_v16 = vld [vmem:[%s4603_s0 + $0x5c] ss:$36 sps:$4 sm:$0xff]  }
  0x8a   :  { %1954 = vmatmul.mubr.bf16.gmra.mrb[4].mxu0 %v3364_v19  ;;  %2219 = vmatmul.mubr.bf16.gmra.mrb[4].mxu1 %v3364_v19  ;;  %v3388_v19 = vld [vmem:[%s4602_s1 + $0x644] ss:$16 sps:$4 sm:$0xff]  }
  0x8b   :  { %1969 = vmatpush1.bf16.msra.mxu0 %v3284_v17  ;;  %2234 = vmatpush1.bf16.msra.mxu1 %v3287_v18  ;;  %v3380_v17 = vld [vmem:[%s4602_s1 + $0x620] ss:$16 sps:$4 sm:$0xff]   ;;  %v3383_v18 = vld [vmem:[%s4602_s1 + $0x628] ss:$16 sps:$4 sm:$0xff]  }
  0x8c   :  { %1970 = vmatprep.subr.bf16.mxu0 %v3292_v20  ;;  %2235 = vmatprep.subr.bf16.mxu1 %v3295_v21  ;;  %v3391_v20 = vld [vmem:[%s4602_s1 + $0x64c] ss:$16 sps:$4 sm:$0xff]   ;;  %v3386_v21 = vld [vmem:[%s4602_s1 + $0x640] ss:$16 sps:$4 sm:$0xff]  }
  0x8d   :  { %1996 = vmatprep.mubr.bf16.mxu0 %v3373_v22  ;;  %2261 = vmatprep.mubr.bf16.mxu1 %v3373_v22  ;;  %v3389_v22 = vld [vmem:[%s4602_s1 + $0x648] ss:$16 sps:$4 sm:$0xff]  }
  0x8f   :  { %1971 = vmatpush1.bf16.msra.mxu0 %v3290_v23  ;;  %2236 = vmatpush1.bf16.msra.mxu1 %v3293_v24  ;;  %v3466_v23 = vld [vmem:[%s4603_s0 + $0x58] ss:$36 sps:$4 sm:$0xff]   ;;  %v3394_v24 = vld [vmem:[%s4602_s1 + $0x664] ss:$16 sps:$4 sm:$0xff]  }
  0x90   :  { %1972 = vmatprep.subr.bf16.mxu0 %v3298_v25  ;;  %2237 = vmatprep.subr.bf16.mxu1 %v3301_v26  ;;  %v3397_v25 = vld [vmem:[%s4602_s1 + $0x66c] ss:$16 sps:$4 sm:$0xff]  }
  0x91   :  { %v3475_v26 = vld [vmem:[%s4603_s0 + $0x1c] ss:$36 sps:$4 sm:$0xff]  }
  0x93   :  { %1973 = vmatpush1.bf16.msra.mxu0 %v3296_v27  ;;  %2238 = vmatpush1.bf16.msra.mxu1 %v3299_v28  ;;  %v3392_v27 = vld [vmem:[%s4602_s1 + $0x660] ss:$16 sps:$4 sm:$0xff]   ;;  %v3395_v28 = vld [vmem:[%s4602_s1 + $0x668] ss:$16 sps:$4 sm:$0xff]  }
  0x94   :  { %1974 = vmatprep.subr.bf16.mxu0 %v3304_v29  ;;  %2239 = vmatprep.subr.bf16.mxu1 %v3307_v30  ;;  %v3400_v29 = vld [vmem:[%s4602_s1 + $0x684] ss:$16 sps:$4 sm:$0xff]   ;;  %v3403_v30 = vld [vmem:[%s4602_s1 + $0x68c] ss:$16 sps:$4 sm:$0xff]  }
  0x97   :  { %1975 = vmatpush1.bf16.msra.mxu0 %v3302_v31  ;;  %2240 = vmatpush1.bf16.msra.mxu1 %v3305_v32  ;;  %v3398_v31 = vld [vmem:[%s4602_s1 + $0x680] ss:$16 sps:$4 sm:$0xff]   ;;  %v3401_v32 = vld [vmem:[%s4602_s1 + $0x688] ss:$16 sps:$4 sm:$0xff]  }
  0x98   :  { %1976 = vmatprep.subr.bf16.mxu0 %v3310_v33  ;;  %2241 = vmatprep.subr.bf16.mxu1 %v3313_v34  ;;  %v3406_v33 = vld [vmem:[%s4602_s1 + $0x6a4] ss:$16 sps:$4 sm:$0xff]   ;;  %v3409_v34 = vld [vmem:[%s4602_s1 + $0x6ac] ss:$16 sps:$4 sm:$0xff]  }
  0x9b   :  { %1977 = vmatpush1.bf16.msra.mxu0 %v3308_v35  ;;  %2242 = vmatpush1.bf16.msra.mxu1 %v3311_v36  ;;  %v3404_v35 = vld [vmem:[%s4602_s1 + $0x6a0] ss:$16 sps:$4 sm:$0xff]   ;;  %v3407_v36 = vld [vmem:[%s4602_s1 + $0x6a8] ss:$16 sps:$4 sm:$0xff]  }
  0x9c   :  { %1978 = vmatprep.subr.bf16.mxu0 %v3316_v37  ;;  %2243 = vmatprep.subr.bf16.mxu1 %v3319_v38  ;;  %v3412_v37 = vld [vmem:[%s4602_s1 + $0x6c4] ss:$16 sps:$4 sm:$0xff]   ;;  %v3415_v38 = vld [vmem:[%s4602_s1 + $0x6cc] ss:$16 sps:$4 sm:$0xff]  }
  0x9f   :  { %1979 = vmatpush1.bf16.msra.mxu0 %v3314_v39  ;;  %2244 = vmatpush1.bf16.msra.mxu1 %v3317_v40  ;;  %v3410_v39 = vld [vmem:[%s4602_s1 + $0x6c0] ss:$16 sps:$4 sm:$0xff]   ;;  %v3413_v40 = vld [vmem:[%s4602_s1 + $0x6c8] ss:$16 sps:$4 sm:$0xff]  }
  0xa0   :  { %1980 = vmatprep.subr.bf16.mxu0 %v3322_v41  ;;  %2245 = vmatprep.subr.bf16.mxu1 %v3325_v42  ;;  %v3418_v41 = vld [vmem:[%s4602_s1 + $0x6e4] ss:$16 sps:$4 sm:$0xff]   ;;  %v3421_v42 = vld [vmem:[%s4602_s1 + $0x6ec] ss:$16 sps:$4 sm:$0xff]  }
  0xa3   :  { %1981 = vmatpush1.bf16.msra.mxu0 %v3320_v43  ;;  %2246 = vmatpush1.bf16.msra.mxu1 %v3323_v44  ;;  %v3416_v43 = vld [vmem:[%s4602_s1 + $0x6e0] ss:$16 sps:$4 sm:$0xff]   ;;  %v3419_v44 = vld [vmem:[%s4602_s1 + $0x6e8] ss:$16 sps:$4 sm:$0xff]  }
  0xa4   :  { %1982 = vmatprep.subr.bf16.mxu0 %v3328_v45  ;;  %2247 = vmatprep.subr.bf16.mxu1 %v3331_v46  ;;  %v3424_v45 = vld [vmem:[%s4602_s1 + $0x704] ss:$16 sps:$4 sm:$0xff]   ;;  %v3427_v46 = vld [vmem:[%s4602_s1 + $0x70c] ss:$16 sps:$4 sm:$0xff]  }
  0xa7   :  { %1983 = vmatpush1.bf16.msra.mxu0 %v3326_v47  ;;  %2248 = vmatpush1.bf16.msra.mxu1 %v3329_v48  ;;  %v3422_v47 = vld [vmem:[%s4602_s1 + $0x700] ss:$16 sps:$4 sm:$0xff]   ;;  %v3425_v48 = vld [vmem:[%s4602_s1 + $0x708] ss:$16 sps:$4 sm:$0xff]  }
  0xa8   :  { %1984 = vmatprep.subr.bf16.mxu0 %v3334_v49  ;;  %2249 = vmatprep.subr.bf16.mxu1 %v3337_v50  ;;  %v3430_v49 = vld [vmem:[%s4602_s1 + $0x724] ss:$16 sps:$4 sm:$0xff]   ;;  %v3433_v50 = vld [vmem:[%s4602_s1 + $0x72c] ss:$16 sps:$4 sm:$0xff]  }
  0xab   :  { %1985 = vmatpush1.bf16.msra.mxu0 %v3332_v51  ;;  %2250 = vmatpush1.bf16.msra.mxu1 %v3335_v52  ;;  %v3428_v51 = vld [vmem:[%s4602_s1 + $0x720] ss:$16 sps:$4 sm:$0xff]   ;;  %v3431_v52 = vld [vmem:[%s4602_s1 + $0x728] ss:$16 sps:$4 sm:$0xff]  }
  0xac   :  { %1986 = vmatprep.subr.bf16.mxu0 %v3340_v53  ;;  %2251 = vmatprep.subr.bf16.mxu1 %v3343_v54  ;;  %v3436_v53 = vld [vmem:[%s4602_s1 + $0x744] ss:$16 sps:$4 sm:$0xff]   ;;  %v3439_v54 = vld [vmem:[%s4602_s1 + $0x74c] ss:$16 sps:$4 sm:$0xff]  }
  0xaf   :  { %1987 = vmatpush1.bf16.msra.mxu0 %v3338_v55  ;;  %2252 = vmatpush1.bf16.msra.mxu1 %v3341_v56  ;;  %v3434_v55 = vld [vmem:[%s4602_s1 + $0x740] ss:$16 sps:$4 sm:$0xff]   ;;  %v3437_v56 = vld [vmem:[%s4602_s1 + $0x748] ss:$16 sps:$4 sm:$0xff]  }
  0xb0   :  { %1988 = vmatprep.subr.bf16.mxu0 %v3346_v57  ;;  %2253 = vmatprep.subr.bf16.mxu1 %v3349_v58  ;;  %v3442_v57 = vld [vmem:[%s4602_s1 + $0x764] ss:$16 sps:$4 sm:$0xff]   ;;  %v3445_v58 = vld [vmem:[%s4602_s1 + $0x76c] ss:$16 sps:$4 sm:$0xff]  }
  0xb3   :  { %1989 = vmatpush1.bf16.msra.mxu0 %v3344_v59  ;;  %2254 = vmatpush1.bf16.msra.mxu1 %v3347_v60  ;;  %v3440_v59 = vld [vmem:[%s4602_s1 + $0x760] ss:$16 sps:$4 sm:$0xff]   ;;  %v3443_v60 = vld [vmem:[%s4602_s1 + $0x768] ss:$16 sps:$4 sm:$0xff]  }
  0xb4   :  { %1990 = vmatprep.subr.bf16.mxu0 %v3352_v61  ;;  %2255 = vmatprep.subr.bf16.mxu1 %v3355_v62  ;;  %v3448_v61 = vld [vmem:[%s4602_s1 + $0x784] ss:$16 sps:$4 sm:$0xff]   ;;  %v3451_v62 = vld [vmem:[%s4602_s1 + $0x78c] ss:$16 sps:$4 sm:$0xff]  }
  0xb7   :  { %1991 = vmatpush1.bf16.msra.mxu0 %v3350_v63  ;;  %2256 = vmatpush1.bf16.msra.mxu1 %v3353_v0  ;;  %v3446_v63 = vld [vmem:[%s4602_s1 + $0x780] ss:$16 sps:$4 sm:$0xff]   ;;  %v3449_v0 = vld [vmem:[%s4602_s1 + $0x788] ss:$16 sps:$4 sm:$0xff]  }
  0xb8   :  { %1992 = vmatprep.subr.bf16.mxu0 %v3360_v1  ;;  %2257 = vmatprep.subr.bf16.mxu1 %v3363_v2  ;;  %v3454_v1 = vld [vmem:[%s4602_s1 + $0x7a4] ss:$16 sps:$4 sm:$0xff]   ;;  %v3457_v2 = vld [vmem:[%s4602_s1 + $0x7ac] ss:$16 sps:$4 sm:$0xff]  }
  0xbb   :  { %1993 = vmatpush1.bf16.msra.mxu0 %v3358_v3  ;;  %2258 = vmatpush1.bf16.msra.mxu1 %v3361_v4  ;;  %v3452_v3 = vld [vmem:[%s4602_s1 + $0x7a0] ss:$16 sps:$4 sm:$0xff]   ;;  %v3455_v4 = vld [vmem:[%s4602_s1 + $0x7a8] ss:$16 sps:$4 sm:$0xff]  }
  0xbc   :  { %1994 = vmatprep.subr.bf16.mxu0 %v3367_v5  ;;  %2259 = vmatprep.subr.bf16.mxu1 %v3370_v6  ;;  %v3462_v5 = vld [vmem:[%s4602_s1 + $0x7c4] ss:$16 sps:$4 sm:$0xff]   ;;  %v3465_v6 = vld [vmem:[%s4602_s1 + $0x7cc] ss:$16 sps:$4 sm:$0xff]  }
  0xbf   :  { %1995 = vmatpush1.bf16.msra.mxu0 %v3365_v7  ;;  %2260 = vmatpush1.bf16.msra.mxu1 %v3368_v8  ;;  %v3460_v7 = vld [vmem:[%s4602_s1 + $0x7c0] ss:$16 sps:$4 sm:$0xff]   ;;  %v3463_v8 = vld [vmem:[%s4602_s1 + $0x7c8] ss:$16 sps:$4 sm:$0xff]  }
  0xc0   :  { %2017 = vmatprep.subr.bf16.mxu0 %v3376_v9  ;;  %2282 = vmatprep.subr.bf16.mxu1 %v3379_v10  ;;  %v3469_v9 = vld [vmem:[%s4602_s1 + $0x7e4] ss:$16 sps:$4 sm:$0xff]   ;;  %v3472_v10 = vld [vmem:[%s4602_s1 + $0x7ec] ss:$16 sps:$4 sm:$0xff]  }
  0xc2   :  { %1997 = vmatmul.mubr.bf16.vlgmr.msra.gmra.mrb[0].mxu0 %v3371_v11  ;;  %2262 = vmatmul.mubr.bf16.vlgmr.msra.gmra.mrb[0].mxu1 %v3371_v11  ;;  %v3467_v11 = vld [vmem:[%s4602_s1 + $0x7e0] ss:$16 sps:$4 sm:$0xff]  }
  0xc3   :  { %2018 = vmatpush1.bf16.msra.mxu0 %v3374_v12  ;;  %2283 = vmatpush1.bf16.msra.mxu1 %v3377_v13  ;;  %v3470_v12 = vld [vmem:[%s4602_s1 + $0x7e8] ss:$16 sps:$4 sm:$0xff]   ;;  %v3478_v13 = vld [vmem:[%s4602_s1 + $0x804] ss:$16 sps:$4 sm:$0xff]  }
  0xc4   :  { %2019 = vmatprep.subr.bf16.mxu0 %v3382_v14  ;;  %2284 = vmatprep.subr.bf16.mxu1 %v3385_v15  ;;  %v3481_v14 = vld [vmem:[%s4602_s1 + $0x80c] ss:$16 sps:$4 sm:$0xff]  }
  0xc5   :  { %2006 = vmatprep.mubr.bf16.mxu0 %v3458_v16  ;;  %2271 = vmatprep.mubr.bf16.mxu1 %v3458_v16  ;;  %v3473_v15 = vld [vmem:[%s4603_s0 + $0x18] ss:$36 sps:$4 sm:$0xff]   ;;  %v3476_v16 = vld [vmem:[%s4602_s1 + $0x800] ss:$16 sps:$4 sm:$0xff]  }
  0xc7   :  { %2020 = vmatpush1.bf16.msra.mxu0 %v3380_v17  ;;  %2285 = vmatpush1.bf16.msra.mxu1 %v3383_v18  ;;  %v3479_v17 = vld [vmem:[%s4602_s1 + $0x808] ss:$16 sps:$4 sm:$0xff]   ;;  %v3484_v18 = vld [vmem:[%s4602_s1 + $0x824] ss:$16 sps:$4 sm:$0xff]  }
  0xc8   :  { %2021 = vmatprep.subr.bf16.mxu0 %v3388_v19  ;;  %2286 = vmatprep.subr.bf16.mxu1 %v3391_v20  ;;  %v3487_v19 = vld [vmem:[%s4602_s1 + $0x82c] ss:$16 sps:$4 sm:$0xff]   ;;  %v3512_v20 = vld [vmem:[%s4603_s0 + $0x64] ss:$36 sps:$4 sm:$0xff]  }
  0xca   :  { %2007 = vmatmul.mubr.bf16.gmra.mrb[4].mxu0 %v3466_v23  ;;  %2272 = vmatmul.mubr.bf16.gmra.mrb[4].mxu1 %v3466_v23  ;;  %v3490_v23 = vld [vmem:[%s4602_s1 + $0x844] ss:$16 sps:$4 sm:$0xff]  }
  0xcb   :  { %2022 = vmatpush1.bf16.msra.mxu0 %v3386_v21  ;;  %2287 = vmatpush1.bf16.msra.mxu1 %v3389_v22  ;;  %v3482_v21 = vld [vmem:[%s4602_s1 + $0x820] ss:$16 sps:$4 sm:$0xff]   ;;  %v3485_v22 = vld [vmem:[%s4602_s1 + $0x828] ss:$16 sps:$4 sm:$0xff]  }
  0xcc   :  { %2023 = vmatprep.subr.bf16.mxu0 %v3394_v24  ;;  %2288 = vmatprep.subr.bf16.mxu1 %v3397_v25  ;;  %v3493_v24 = vld [vmem:[%s4602_s1 + $0x84c] ss:$16 sps:$4 sm:$0xff]   ;;  %v3514_v25 = vld [vmem:[%s4603_s0 + $0x60] ss:$36 sps:$4 sm:$0xff]  }
  0xcd   :  { %2049 = vmatprep.mubr.bf16.mxu0 %v3475_v26  ;;  %2314 = vmatprep.mubr.bf16.mxu1 %v3475_v26  ;;  %v3488_v26 = vld [vmem:[%s4602_s1 + $0x840] ss:$16 sps:$4 sm:$0xff]  }
  0xcf   :  { %2024 = vmatpush1.bf16.msra.mxu0 %v3392_v27  ;;  %2289 = vmatpush1.bf16.msra.mxu1 %v3395_v28  ;;  %v3491_v27 = vld [vmem:[%s4602_s1 + $0x848] ss:$16 sps:$4 sm:$0xff]   ;;  %v3496_v28 = vld [vmem:[%s4602_s1 + $0x864] ss:$16 sps:$4 sm:$0xff]  }
  0xd0   :  { %2025 = vmatprep.subr.bf16.mxu0 %v3400_v29  ;;  %2290 = vmatprep.subr.bf16.mxu1 %v3403_v30  ;;  %v3499_v29 = vld [vmem:[%s4602_s1 + $0x86c] ss:$16 sps:$4 sm:$0xff]   ;;  %v3494_v30 = vld [vmem:[%s4602_s1 + $0x860] ss:$16 sps:$4 sm:$0xff]  }
  0xd3   :  { %2026 = vmatpush1.bf16.msra.mxu0 %v3398_v31  ;;  %2291 = vmatpush1.bf16.msra.mxu1 %v3401_v32  ;;  %v3497_v31 = vld [vmem:[%s4602_s1 + $0x868] ss:$16 sps:$4 sm:$0xff]   ;;  %v3502_v32 = vld [vmem:[%s4602_s1 + $0x884] ss:$16 sps:$4 sm:$0xff]  }
  0xd4   :  { %2027 = vmatprep.subr.bf16.mxu0 %v3406_v33  ;;  %2292 = vmatprep.subr.bf16.mxu1 %v3409_v34  ;;  %v3505_v33 = vld [vmem:[%s4602_s1 + $0x88c] ss:$16 sps:$4 sm:$0xff]   ;;  %v3531_v34 = vmov 0  }
  0xd7   :  { %2028 = vmatpush1.bf16.msra.mxu0 %v3404_v35  ;;  %2293 = vmatpush1.bf16.msra.mxu1 %v3407_v36  ;;  %v3500_v35 = vld [vmem:[%s4602_s1 + $0x880] ss:$16 sps:$4 sm:$0xff]   ;;  %v3503_v36 = vld [vmem:[%s4602_s1 + $0x888] ss:$16 sps:$4 sm:$0xff]  }
  0xd8   :  { %2029 = vmatprep.subr.bf16.mxu0 %v3412_v37  ;;  %2294 = vmatprep.subr.bf16.mxu1 %v3415_v38  ;;  %v3508_v37 = vld [vmem:[%s4602_s1 + $0x8a4] ss:$16 sps:$4 sm:$0xff]   ;;  %v3511_v38 = vld [vmem:[%s4602_s1 + $0x8ac] ss:$16 sps:$4 sm:$0xff]  }
  0xdb   :  { %2030 = vmatpush1.bf16.msra.mxu0 %v3410_v39  ;;  %2295 = vmatpush1.bf16.msra.mxu1 %v3413_v40  ;;  %v3506_v39 = vld [vmem:[%s4602_s1 + $0x8a0] ss:$16 sps:$4 sm:$0xff]   ;;  %v3509_v40 = vld [vmem:[%s4602_s1 + $0x8a8] ss:$16 sps:$4 sm:$0xff]  }
  0xdc   :  { %2031 = vmatprep.subr.bf16.mxu0 %v3418_v41  ;;  %2296 = vmatprep.subr.bf16.mxu1 %v3421_v42  ;;  %v3517_v41 = vld [vmem:[%s4602_s1 + $0x8c4] ss:$16 sps:$4 sm:$0xff]   ;;  %v3520_v42 = vld [vmem:[%s4602_s1 + $0x8cc] ss:$16 sps:$4 sm:$0xff]  }
  0xdf   :  { %2032 = vmatpush1.bf16.msra.mxu0 %v3416_v43  ;;  %2297 = vmatpush1.bf16.msra.mxu1 %v3419_v44  ;;  %v3515_v43 = vld [vmem:[%s4602_s1 + $0x8c0] ss:$16 sps:$4 sm:$0xff]   ;;  %v3518_v44 = vld [vmem:[%s4602_s1 + $0x8c8] ss:$16 sps:$4 sm:$0xff]  }
  0xe0   :  { %2033 = vmatprep.subr.bf16.mxu0 %v3424_v45  ;;  %2298 = vmatprep.subr.bf16.mxu1 %v3427_v46  ;;  %v3523_v45 = vld [vmem:[%s4602_s1 + $0x8e4] ss:$16 sps:$4 sm:$0xff]   ;;  %v3526_v46 = vld [vmem:[%s4602_s1 + $0x8ec] ss:$16 sps:$4 sm:$0xff]  }
  0xe3   :  { %2034 = vmatpush1.bf16.msra.mxu0 %v3422_v47  ;;  %2299 = vmatpush1.bf16.msra.mxu1 %v3425_v48  ;;  %v3521_v47 = vld [vmem:[%s4602_s1 + $0x8e0] ss:$16 sps:$4 sm:$0xff]   ;;  %v3524_v48 = vld [vmem:[%s4602_s1 + $0x8e8] ss:$16 sps:$4 sm:$0xff]  }
  0xe4   :  { %2035 = vmatprep.subr.bf16.mxu0 %v3430_v49  ;;  %2300 = vmatprep.subr.bf16.mxu1 %v3433_v50  ;;  %v3527_v49 = vld [vmem:[%s4603_s0 + $0x20] ss:$36 sps:$4 sm:$0xff]   ;;  %v3528_v50 = vld [vmem:[%s4603_s0 + $0x68] ss:$36 sps:$4 sm:$0xff]  }
  0xe7   :  { %2036 = vmatpush1.bf16.msra.mxu0 %v3428_v51  ;;  %2301 = vmatpush1.bf16.msra.mxu1 %v3431_v52 }
  0xe8   :  { %2037 = vmatprep.subr.bf16.mxu0 %v3436_v53  ;;  %2302 = vmatprep.subr.bf16.mxu1 %v3439_v54 }
  0xeb   :  { %2038 = vmatpush1.bf16.msra.mxu0 %v3434_v55  ;;  %2303 = vmatpush1.bf16.msra.mxu1 %v3437_v56 }
  0xec   :  { %2039 = vmatprep.subr.bf16.mxu0 %v3442_v57  ;;  %2304 = vmatprep.subr.bf16.mxu1 %v3445_v58 }
  0xef   :  { %2040 = vmatpush1.bf16.msra.mxu0 %v3440_v59  ;;  %2305 = vmatpush1.bf16.msra.mxu1 %v3443_v60 }
  0xf0   :  { %2041 = vmatprep.subr.bf16.mxu0 %v3448_v61  ;;  %2306 = vmatprep.subr.bf16.mxu1 %v3451_v62 }
  0xf3   :  { %2042 = vmatpush1.bf16.msra.mxu0 %v3446_v63  ;;  %2307 = vmatpush1.bf16.msra.mxu1 %v3449_v0 }
  0xf4   :  { %2043 = vmatprep.subr.bf16.mxu0 %v3454_v1  ;;  %2308 = vmatprep.subr.bf16.mxu1 %v3457_v2 }
  0xf7   :  { %2044 = vmatpush1.bf16.msra.mxu0 %v3452_v3  ;;  %2309 = vmatpush1.bf16.msra.mxu1 %v3455_v4 }
  0xf8   :  { %2045 = vmatprep.subr.bf16.mxu0 %v3462_v5  ;;  %2310 = vmatprep.subr.bf16.mxu1 %v3465_v6 }
  0xfb   :  { %2046 = vmatpush1.bf16.msra.mxu0 %v3460_v7  ;;  %2311 = vmatpush1.bf16.msra.mxu1 %v3463_v8 }
  0xfc   :  { %2047 = vmatprep.subr.bf16.mxu0 %v3469_v9  ;;  %2312 = vmatprep.subr.bf16.mxu1 %v3472_v10 }
  0xff   :  { %2048 = vmatpush1.bf16.msra.mxu0 %v3467_v11  ;;  %2313 = vmatpush1.bf16.msra.mxu1 %v3470_v12 }
 0x100   :  { %2070 = vmatprep.subr.bf16.mxu0 %v3478_v13  ;;  %2335 = vmatprep.subr.bf16.mxu1 %v3481_v14  ;;  %v2492_v13 = vlaneseq }
 0x102   :  { %2050 = vmatmul.mubr.bf16.vlgmr.msra.gmra.mrb[0].mxu0 %v3473_v15  ;;  %2315 = vmatmul.mubr.bf16.vlgmr.msra.gmra.mrb[0].mxu1 %v3473_v15 }
 0x103   :  { %2071 = vmatpush1.bf16.msra.mxu0 %v3476_v16  ;;  %2336 = vmatpush1.bf16.msra.mxu1 %v3479_v17 }
 0x104   :  { %2072 = vmatprep.subr.bf16.mxu0 %v3484_v18  ;;  %2337 = vmatprep.subr.bf16.mxu1 %v3487_v19 }
 0x105   :  { %2059 = vmatprep.mubr.bf16.mxu0 %v3512_v20  ;;  %2324 = vmatprep.mubr.bf16.mxu1 %v3512_v20 }
 0x107   :  { %2073 = vmatpush1.bf16.msra.mxu0 %v3482_v21  ;;  %2338 = vmatpush1.bf16.msra.mxu1 %v3485_v22 }
 0x108   :  { %2074 = vmatprep.subr.bf16.mxu0 %v3490_v23  ;;  %2339 = vmatprep.subr.bf16.mxu1 %v3493_v24 }
 0x10a   :  { %2060 = vmatmul.mubr.bf16.gmra.mrb[4].mxu0 %v3514_v25  ;;  %2325 = vmatmul.mubr.bf16.gmra.mrb[4].mxu1 %v3514_v25 }
 0x10b   :  { %2075 = vmatpush1.bf16.msra.mxu0 %v3488_v26  ;;  %2340 = vmatpush1.bf16.msra.mxu1 %v3491_v27 }
 0x10c   :  { %2076 = vmatprep.subr.bf16.mxu0 %v3496_v28  ;;  %2341 = vmatprep.subr.bf16.mxu1 %v3499_v29 }
 0x10d   :  { %2102 = vmatprep.mubr.bf16.mxu0 %v3531_v34  ;;  %2367 = vmatprep.mubr.bf16.mxu1 %v3531_v34 }
 0x10f   :  { %2077 = vmatpush1.bf16.msra.mxu0 %v3494_v30  ;;  %2342 = vmatpush1.bf16.msra.mxu1 %v3497_v31 }
 0x110   :  { %2078 = vmatprep.subr.bf16.mxu0 %v3502_v32  ;;  %2343 = vmatprep.subr.bf16.mxu1 %v3505_v33 }
 0x113   :  { %2079 = vmatpush1.bf16.msra.mxu0 %v3500_v35  ;;  %2344 = vmatpush1.bf16.msra.mxu1 %v3503_v36 }
 0x114   :  { %2080 = vmatprep.subr.bf16.mxu0 %v3508_v37  ;;  %2345 = vmatprep.subr.bf16.mxu1 %v3511_v38 }
 0x117   :  { %2081 = vmatpush1.bf16.msra.mxu0 %v3506_v39  ;;  %2346 = vmatpush1.bf16.msra.mxu1 %v3509_v40 }
 0x118   :  { %2082 = vmatprep.subr.bf16.mxu0 %v3517_v41  ;;  %2347 = vmatprep.subr.bf16.mxu1 %v3520_v42 }
 0x11b   :  { %2083 = vmatpush1.bf16.msra.mxu0 %v3515_v43  ;;  %2348 = vmatpush1.bf16.msra.mxu1 %v3518_v44 }
 0x11c   :  { %2084 = vmatprep.subr.bf16.mxu0 %v3523_v45  ;;  %2349 = vmatprep.subr.bf16.mxu1 %v3526_v46 }
 0x11f   :  { %2085 = vmatpush1.bf16.msra.mxu0 %v3521_v47  ;;  %2350 = vmatpush1.bf16.msra.mxu1 %v3524_v48 }
 0x122   :  { %2103 = vmatmul.mubr.bf16.vlgmr.msra.gmra.mrb[0].mxu0 %v3527_v49  ;;  %2368 = vmatmul.mubr.bf16.vlgmr.msra.gmra.mrb[0].mxu1 %v3527_v49 }
 0x123   :  { %2112 = vmatprep.mubr.bf16.mxu0 %v3531_v34  ;;  %2377 = vmatprep.mubr.bf16.mxu1 %v3531_v34 }
 0x12a   :  { %2113 = vmatmul.mubr.bf16.gmra.mrb[4].mxu0 %v3528_v50  ;;  %2378 = vmatmul.mubr.bf16.gmra.mrb[4].mxu1 %v3528_v50 }
 0x1f5   :  { %v4475_v51 = vpop.f32.mrb[0].mxu0  ;;  %v4477_v52 = vpop.f32.mrb[0].mxu1 }
 0x1f6   :  { %v4479_v53 = vpop.f32.mrb[1].mxu0  ;;  %v4481_v54 = vpop.f32.mrb[1].mxu1  ;;  %v2398_v55 = vmul.f32 %v4475_v51, %v4475_v51  ;;  %v2446_v56 = vmul.f32 %v4477_v52, %v4477_v52 }
 0x1f7   :  { %v2422_v57 = vmul.f32 %v4479_v53, %v4479_v53  ;;  %v2470_v58 = vmul.f32 %v4481_v54, %v4481_v54  ;;  %v4491_v59 = vpop.f32.mrb[2].mxu0  ;;  %v4493_v60 = vpop.f32.mrb[2].mxu1 }
 0x1f8   :  { %v2388_v61 = vadd.f32 %v4491_v59, %v4475_v51  ;;  %v2399_v62 = vmul.f32 %v4491_v59, %v4491_v59  ;;  %v2436_v63 = vadd.f32 %v4493_v60, %v4477_v52  ;;  %v2447_v0 = vmul.f32 %v4493_v60, %v4493_v60  ;;  %v4503_v1 = vpop.f32.mrb[3].mxu0  ;;  %v4505_v2 = vpop.f32.mrb[3].mxu1 }
 0x1f9   :  { %v2412_v3 = vadd.f32 %v4503_v1, %v4479_v53  ;;  %v2423_v4 = vmul.f32 %v4503_v1, %v4503_v1  ;;  %v2460_v5 = vadd.f32 %v4505_v2, %v4481_v54  ;;  %v2471_v6 = vmul.f32 %v4505_v2, %v4505_v2 }
 0x1fa   :  { %v2402_v7 = vadd.f32 %v2399_v62, %v2398_v55  ;;  %v2450_v8 = vadd.f32 %v2447_v0, %v2446_v56 }
 0x1fb   :  { %v2426_v9 = vadd.f32 %v2423_v4, %v2422_v57  ;;  %v2474_v10 = vadd.f32 %v2471_v6, %v2470_v58 }
 0x1fd   :  { %v4515_v11 = vpop.f32.mrb[4].mxu0  ;;  %v4517_v12 = vpop.f32.mrb[4].mxu1 }
 0x1fe   :  { %v2389_v14 = vadd.f32 %v2388_v61, %v4515_v11  ;;  %v2400_v15 = vmul.f32 %v4515_v11, %v4515_v11  ;;  %v2437_v16 = vadd.f32 %v2436_v63, %v4517_v12  ;;  %v2448_v17 = vmul.f32 %v4517_v12, %v4517_v12  ;;  %v4525_v18 = vpop.f32.mrb[5].mxu0  ;;  %v4527_v19 = vpop.f32.mrb[5].mxu1 }
 0x1ff   :  { %v2413_v20 = vadd.f32 %v2412_v3, %v4525_v18  ;;  %v2424_v21 = vmul.f32 %v4525_v18, %v4525_v18  ;;  %v2461_v22 = vadd.f32 %v2460_v5, %v4527_v19  ;;  %v2472_v23 = vmul.f32 %v4527_v19, %v4527_v19  ;;  %v4535_v24 = vpop.f32.mrb[6].mxu0  ;;  %v4537_v25 = vpop.f32.mrb[6].mxu1 }
 0x200   :  { %v2403_v26 = vadd.f32 %v2402_v7, %v2400_v15  ;;  %v2451_v27 = vadd.f32 %v2450_v8, %v2448_v17  ;;  %v2390_v28 = vadd.f32 %v2389_v14, %v4535_v24  ;;  %v2401_v29 = vmul.f32 %v4535_v24, %v4535_v24  ;;  %v4542_v30 = vpop.f32.mrb[7].mxu0  ;;  %v4544_v31 = vpop.f32.mrb[7].mxu1 }
 0x201   :  { %v2427_v32 = vadd.f32 %v2426_v9, %v2424_v21  ;;  %v2475_v33 = vadd.f32 %v2474_v10, %v2472_v23  ;;  %v2438_v34 = vadd.f32 %v2437_v16, %v4537_v25  ;;  %v2449_v35 = vmul.f32 %v4537_v25, %v4537_v25 }
 0x202   :  { %v2391_v36 = vrot.slane %v2390_v28, 4  ;;  %v2404_v37 = vadd.f32 %v2403_v26, %v2401_v29  ;;  %v2414_v38 = vadd.f32 %v2413_v20, %v4542_v30  ;;  %v2425_v39 = vmul.f32 %v4542_v30, %v4542_v30 }
 0x203   :  { %v2439_v40 = vrot.slane %v2438_v34, 4  ;;  %v2452_v41 = vadd.f32 %v2451_v27, %v2449_v35  ;;  %v2462_v42 = vadd.f32 %v2461_v22, %v4544_v31  ;;  %v2473_v43 = vmul.f32 %v4544_v31, %v4544_v31 }
 0x204   :  { %v2392_v44 = vadd.f32 %v2391_v36, %v2390_v28  ;;  %v2405_v45 = vrot.slane %v2404_v37, 4  ;;  %v2415_v46 = vrot.slane %v2414_v38, 4  ;;  %v2428_v47 = vadd.f32 %v2427_v32, %v2425_v39 }
 0x205   :  { %v2440_v48 = vadd.f32 %v2439_v40, %v2438_v34  ;;  %v2453_v49 = vrot.slane %v2452_v41, 4  ;;  %v2463_v50 = vrot.slane %v2462_v42, 4  ;;  %v2476_v55 = vadd.f32 %v2475_v33, %v2473_v43 }
 0x206   :  { %v2393_v56 = vrot.slane %v2392_v44, 2  ;;  %v2406_v57 = vadd.f32 %v2405_v45, %v2404_v37  ;;  %v2416_v58 = vadd.f32 %v2415_v46, %v2414_v38  ;;  %v2429_v61 = vrot.slane %v2428_v47, 4 }
 0x207   :  { %v2441_v62 = vrot.slane %v2440_v48, 2  ;;  %v2454_v63 = vadd.f32 %v2453_v49, %v2452_v41  ;;  %v2464_v0 = vadd.f32 %v2463_v50, %v2462_v42  ;;  %v2477_v3 = vrot.slane %v2476_v55, 4 }
 0x208   :  { %v2394_v4 = vadd.f32 %v2393_v56, %v2392_v44  ;;  %v2407_v5 = vrot.slane %v2406_v57, 2  ;;  %v2417_v6 = vrot.slane %v2416_v58, 2  ;;  %v2430_v7 = vadd.f32 %v2429_v61, %v2428_v47 }
 0x209   :  { %v2442_v8 = vadd.f32 %v2441_v62, %v2440_v48  ;;  %v2455_v9 = vrot.slane %v2454_v63, 2  ;;  %v2465_v10 = vrot.slane %v2464_v0, 2  ;;  %v2478_v14 = vadd.f32 %v2477_v3, %v2476_v55 }
 0x20a   :  { %v2395_v15 = vrot.slane %v2394_v4, 1  ;;  %v2408_v16 = vadd.f32 %v2407_v5, %v2406_v57  ;;  %v2418_v17 = vadd.f32 %v2417_v6, %v2416_v58  ;;  %v2431_v20 = vrot.slane %v2430_v7, 2 }
 0x20b   :  { %v2443_v21 = vrot.slane %v2442_v8, 1  ;;  %v2456_v22 = vadd.f32 %v2455_v9, %v2454_v63  ;;  %v2466_v23 = vadd.f32 %v2465_v10, %v2464_v0  ;;  %v2479_v26 = vrot.slane %v2478_v14, 2 }
 0x20c   :  { %v2396_v27 = vadd.f32 %v2395_v15, %v2394_v4  ;;  %v2409_v28 = vrot.slane %v2408_v16, 1  ;;  %v2419_v29 = vrot.slane %v2418_v17, 1  ;;  %v2432_v32 = vadd.f32 %v2431_v20, %v2430_v7 }
 0x20d   :  { %v2457_v33 = vrot.slane %v2456_v22, 1  ;;  %v2480_v34 = vadd.f32 %v2479_v26, %v2478_v14  ;;  %v2467_v38 = vrot.slane %v2466_v23, 1  ;;  %v2493_v39 = vshrl.u32 %v2492_v13, 7 }
 0x20e   :  { %v2410_v35 = vadd.f32 %v2409_v28, %v2408_v16  ;;  %v2420_v36 = vadd.f32 %v2419_v29, %v2418_v17  ;;  %v2433_v37 = vrot.slane %v2432_v32, 1  ;;  %v2444_v40 = vadd.f32 %v2443_v21, %v2442_v8 }
 0x20f   :  { %v2481_v43 = vrot.slane %v2480_v34, 1  ;;  %v2458_v44 = vadd.f32 %v2457_v33, %v2456_v22  ;;  %v2468_v47 = vadd.f32 %v2467_v38, %v2466_v23  ;;  %v2494_v55 = vsub.s32 0, %v2493_v39 }
 0x210   :  { %v2421_v41 = vadd.f32 %v2420_v36, %v2396_v27  ;;  %v2434_v42 = vadd.f32 %v2433_v37, %v2432_v32  ;;  %v2548_v15 = vsub.s32 3, %v2493_v39 }
 0x211   :  { %v2482_v50 = vadd.f32 %v2481_v43, %v2480_v34 }
 0x212   :  { %v2435_v45 = vadd.f32 %v2434_v42, %v2410_v35  ;;  %v2445_v46 = vadd.f32 %v2444_v40, %v2421_v41 }
 0x214   :  { %v2459_v48 = vadd.f32 %v2458_v44, %v2435_v45  ;;  %v2469_v49 = vadd.f32 %v2468_v47, %v2445_v46 }
 0x216   :  { %v2483_v56 = vadd.f32 %v2482_v50, %v2459_v48  ;;  %v2485_v57 = vmul.f32 0.0078125, %v2469_v49 }
 0x218   :  { %v2486_v58 = vmul.f32 0.0078125, %v2483_v56  ;;  %v2487_v61 = vmul.f32 %v2485_v57, %v2485_v57  ;;  %v2495_v62 = vrot.slane %v2485_v57, %v2494_v55 }
 0x21a   :  { %v2488_v63 = vsub.f32 %v2486_v58, %v2487_v61  ;;  %v2496_v13 = vsub.f32 %v4475_v51, %v2495_v62  ;;  %v2497_v0 = vsub.f32 %v4479_v53, %v2495_v62  ;;  %v2498_v3 = vsub.f32 %v4477_v52, %v2495_v62 }
 0x21b   :  { %v2499_v4 = vsub.f32 %v4481_v54, %v2495_v62  ;;  %v2500_v5 = vsub.f32 %v4491_v59, %v2495_v62  ;;  %v2501_v6 = vsub.f32 %v4503_v1, %v2495_v62  ;;  %v2502_v7 = vsub.f32 %v4493_v60, %v2495_v62 }
 0x21c   :  { %v2489_v8 = vmax.f32 %v2488_v63, 0.0  ;;  %v2503_v9 = vsub.f32 %v4505_v2, %v2495_v62  ;;  %v2504_v10 = vsub.f32 %v4515_v11, %v2495_v62  ;;  %v2505_v14 = vsub.f32 %v4525_v18, %v2495_v62  ;;  %v2532_v2 = vld [vmem:[%s4604_s2] sm:$0xf] }
 0x21d   :  { %v2506_v51 = vsub.f32 %v4517_v12, %v2495_v62  ;;  %v2507_v53 = vsub.f32 %v4527_v19, %v2495_v62  ;;  %v2508_v52 = vsub.f32 %v4535_v24, %v2495_v62  ;;  %v2509_v54 = vsub.f32 %v4542_v30, %v2495_v62  ;;  %v2570_v12 = vld [vmem:[%s4605_s3] sm:$0xf] }
 0x21e   :  { %v2490_v59 = vadd.f32 1e-05, %v2489_v8  ;;  %v2510_v1 = vsub.f32 %v4537_v25, %v2495_v62  ;;  %v2511_v60 = vsub.f32 %v4544_v31, %v2495_v62  ;;  %v2540_v11 = vsub.s32 1, %v2493_v39 }
 0x21f   :  { %v2544_v18 = vsub.s32 2, %v2493_v39  ;;  %v2537_v24 = vrot.slane %v2532_v2, %v2494_v55  ;;  %v2549_v25 = vrot.slane %v2532_v2, %v2548_v15  ;;  %v2575_v20 = vrot.slane %v2570_v12, %v2494_v55 }
 0x220   :  { %3529 = vrsqrt.f32 %v2490_v59  ;;  %v2541_v16 = vrot.slane %v2532_v2, %v2540_v11  ;;  %v2579_v31 = vrot.slane %v2570_v12, %v2540_v11  ;;  %v2587_v22 = vrot.slane %v2570_v12, %v2548_v15 }
 0x221   :  { %v2545_v17 = vrot.slane %v2532_v2, %v2544_v18  ;;  %v2583_v21 = vrot.slane %v2570_v12, %v2544_v18 }
 0x22a   :  { %v3530_v19 = vpop.eup %3529 }
 0x22b   :  { %v2515_v30 = vrot.slane %v3530_v19, %v2494_v55 }
 0x22d   :  { %v2516_v23 = vmul.f32 %v2515_v30, %v2496_v13  ;;  %v2517_v26 = vmul.f32 %v2515_v30, %v2497_v0  ;;  %v2518_v27 = vmul.f32 %v2515_v30, %v2498_v3  ;;  %v2519_v28 = vmul.f32 %v2515_v30, %v2499_v4 }
 0x22e   :  { %v2520_v29 = vmul.f32 %v2515_v30, %v2500_v5  ;;  %v2521_v32 = vmul.f32 %v2515_v30, %v2501_v6  ;;  %v2522_v33 = vmul.f32 %v2515_v30, %v2502_v7  ;;  %v2523_v34 = vmul.f32 %v2515_v30, %v2503_v9 }
 0x22f   :  { %v2524_v35 = vmul.f32 %v2515_v30, %v2504_v10  ;;  %v2525_v36 = vmul.f32 %v2515_v30, %v2505_v14  ;;  %v2526_v37 = vmul.f32 %v2515_v30, %v2506_v51  ;;  %v2527_v38 = vmul.f32 %v2515_v30, %v2507_v53 }
 0x230   :  { %v2528_v39 = vmul.f32 %v2515_v30, %v2508_v52  ;;  %v2529_v40 = vmul.f32 %v2515_v30, %v2509_v54  ;;  %v2530_v41 = vmul.f32 %v2515_v30, %v2510_v1  ;;  %v2531_v42 = vmul.f32 %v2515_v30, %v2511_v60 }
 0x231   :  { %v2554_v43 = vmul.f32 %v2537_v24, %v2516_v23  ;;  %v2555_v44 = vmul.f32 %v2541_v16, %v2517_v26  ;;  %v2556_v45 = vmul.f32 %v2545_v17, %v2518_v27  ;;  %v2557_v46 = vmul.f32 %v2549_v25, %v2519_v28 }
 0x232   :  { %v2558_v47 = vmul.f32 %v2537_v24, %v2520_v29  ;;  %v2559_v48 = vmul.f32 %v2541_v16, %v2521_v32  ;;  %v2560_v49 = vmul.f32 %v2545_v17, %v2522_v33  ;;  %v2561_v50 = vmul.f32 %v2549_v25, %v2523_v34 }
 0x233   :  { %v2562_v55 = vmul.f32 %v2537_v24, %v2524_v35  ;;  %v2563_v56 = vmul.f32 %v2541_v16, %v2525_v36  ;;  %v2564_v57 = vmul.f32 %v2545_v17, %v2526_v37  ;;  %v2565_v58 = vmul.f32 %v2549_v25, %v2527_v38 }
 0x234   :  { %v2566_v61 = vmul.f32 %v2537_v24, %v2528_v39  ;;  %v2567_v62 = vmul.f32 %v2541_v16, %v2529_v40  ;;  %v2568_v63 = vmul.f32 %v2545_v17, %v2530_v41  ;;  %v2569_v13 = vmul.f32 %v2549_v25, %v2531_v42 }
 0x235   :  { %v2592_v0 = vadd.f32 %v2575_v20, %v2554_v43  ;;  %v2593_v3 = vadd.f32 %v2579_v31, %v2555_v44  ;;  %v2594_v4 = vadd.f32 %v2583_v21, %v2556_v45  ;;  %v2595_v5 = vadd.f32 %v2587_v22, %v2557_v46 }
 0x236   :  { %v2596_v6 = vadd.f32 %v2575_v20, %v2558_v47  ;;  %v2597_v7 = vadd.f32 %v2579_v31, %v2559_v48  ;;  %v2598_v8 = vadd.f32 %v2583_v21, %v2560_v49  ;;  %v2599_v9 = vadd.f32 %v2587_v22, %v2561_v50 }
 0x237   :  { %v2600_v10 = vadd.f32 %v2575_v20, %v2562_v55  ;;  %v2601_v14 = vadd.f32 %v2579_v31, %v2563_v56  ;;  %v2602_v51 = vadd.f32 %v2583_v21, %v2564_v57  ;;  %v2603_v53 = vadd.f32 %v2587_v22, %v2565_v58 }
 0x238   :  { %v2604_v52 = vadd.f32 %v2575_v20, %v2566_v61  ;;  %v2605_v54 = vadd.f32 %v2579_v31, %v2567_v62  ;;  %v2606_v59 = vadd.f32 %v2583_v21, %v2568_v63  ;;  %v2607_v1 = vadd.f32 %v2587_v22, %v2569_v13 }
 0x239   :  { %v2608_v60 = vmax.f32 %v2592_v0, 0.0  ;;  %v2609_v2 = vmax.f32 %v2593_v3, 0.0  ;;  %v2610_v11 = vmax.f32 %v2594_v4, 0.0  ;;  %v2611_v18 = vmax.f32 %v2595_v5, 0.0 }
 0x23a   :  { %v2612_v15 = vmax.f32 %v2596_v6, 0.0  ;;  %v2613_v12 = vmax.f32 %v2597_v7, 0.0  ;;  %v2614_v19 = vmax.f32 %v2598_v8, 0.0  ;;  %v2615_v24 = vmax.f32 %v2599_v9, 0.0 }
 0x23b   :  { %v2616_v30 = vmax.f32 %v2600_v10, 0.0  ;;  %v2617_v16 = vmax.f32 %v2601_v14, 0.0  ;;  %v2618_v17 = vmax.f32 %v2602_v51, 0.0  ;;  %v2619_v25 = vmax.f32 %v2603_v53, 0.0 }
 0x23c   :  { %v2620_v23 = vmax.f32 %v2604_v52, 0.0  ;;  %v2621_v26 = vmax.f32 %v2605_v54, 0.0  ;;  %v2622_v27 = vmax.f32 %v2606_v59, 0.0  ;;  %v2623_v28 = vmax.f32 %v2607_v1, 0.0 }
 0x23d   :  { %v2998_v20 = vpack.c.bf16 %v2609_v2, %v2608_v60  ;;  %v2999_v31 = vpack.c.bf16 %v2611_v18, %v2610_v11  ;;  %v3000_v21 = vpack.c.bf16 %v2613_v12, %v2612_v15  ;;  %v3001_v22 = vpack.c.bf16 %v2615_v24, %v2614_v19 }
 0x23e   :  { %v3002_v29 = vpack.c.bf16 %v2617_v16, %v2616_v30  ;;  %v3003_v32 = vpack.c.bf16 %v2619_v25, %v2618_v17  ;;  %v3004_v33 = vpack.c.bf16 %v2621_v26, %v2620_v23  ;;  %v3005_v34 = vpack.c.bf16 %v2623_v28, %v2622_v27 }
 0x23f   :  { %2672 = vst [vmem:[%s4606_s4] sm:$0xff] %v2998_v20  ;;  %2673 = vst [vmem:[%s4606_s4 + $0x8] sm:$0xff] %v2999_v31 }
 0x240   :  { %2674 = vst [vmem:[%s4606_s4 + $0x10] sm:$0xff] %v3000_v21  ;;  %2675 = vst [vmem:[%s4606_s4 + $0x18] sm:$0xff] %v3001_v22 }
 0x241   :  { %2676 = vst [vmem:[%s4606_s4 + $0x20] sm:$0xff] %v3002_v29  ;;  %2677 = vst [vmem:[%s4606_s4 + $0x28] sm:$0xff] %v3003_v32 }
 0x242   :  { %2678 = vst [vmem:[%s4606_s4 + $0x30] sm:$0xff] %v3004_v33  ;;  %2679 = vst [vmem:[%s4606_s4 + $0x38] sm:$0xff] %v3005_v34 }

// kernel: gen_dt_forward.11
= control target key start
LH: loop header
LB: loop body
LE: loop exit
PB: predicated region body
PF: predicated region fallthrough
CT: control target
= control target key end

     0   :  { %s2305_s9 = smov 0   ;;  %s2824_s0 = inlined_call_operand.vmem [shape: bf16[128,576], index: 0, kind: input, shape index: {}]   ;;  %s2825_s1 = inlined_call_operand.vmem [shape: bf16[576,512], index: 1, kind: input, shape index: {}]   ;;  %s2826_s2 = inlined_call_operand.vmem [shape: f32[128,512], index: 2, kind: output, shape index: {}]  }
   0x1 LB: > { %s1714_s10 = sadd.s32 4294967295, %s2287_s9   ;;  %p1718_p0 = scmp.ge.s32.totalorder %s2287_s9, 1  ;;  %s2287_s9 = sphi %s2305_s9, %s12_s9  }
   0x2   : > { %p114_p1 = scmp.lt.s32.totalorder %s2287_s9, 3 }
   0x4   : > { %p115_p2 = pnand %p1718_p0, %p114_p1 }
   0x5   : > { %v1973_v0 = vld [vmem:[%s2825_s1 + $0x4] ss:$16 sps:$4 sm:$0xff] (!%p115_p2)   ;;  %v1975_v1 = vld [vmem:[%s2825_s1 + $0xc] ss:$16 sps:$4 sm:$0xff] (!%p115_p2)   ;;  %v1977_v2 = vld [vmem:[%s2825_s1] ss:$16 sps:$4 sm:$0xff] (!%p115_p2)  }
   0x6   : > { %118 = sbr.rel (%p115_p2) target bundleno = 424 (0x1a8), region = 28  ;;  %1154 = vmatprep.subr.bf16.mxu0 (!%p115_p2), %v1973_v0  ;;  %v1978_v3 = vld [vmem:[%s2825_s1 + $0x8] ss:$16 sps:$4 sm:$0xff] (!%p115_p2)   ;;  %1373 = vmatprep.subr.bf16.mxu1 (!%p115_p2), %v1975_v1  ;;  %v1979_v4 = vld [vmem:[%s2825_s1 + $0x24] ss:$16 sps:$4 sm:$0xff] (!%p115_p2)   ;;  %s1719_s19 = sshll.u32 (!%p115_p2), %s1714_s10, 3 }
   0x7   : > { %1155 = vmatpush1.bf16.msra.mxu0 (!%p115_p2), %v1977_v2  ;;  %1374 = vmatpush1.bf16.msra.mxu1 (!%p115_p2), %v1978_v3  ;;  %v1981_v5 = vld [vmem:[%s2825_s1 + $0x2c] ss:$16 sps:$4 sm:$0xff] (!%p115_p2)   ;;  %v1983_v6 = vld [vmem:[%s2825_s1 + $0x20] ss:$16 sps:$4 sm:$0xff] (!%p115_p2)   ;;  %v1984_v7 = vld [vmem:[%s2825_s1 + $0x28] ss:$16 sps:$4 sm:$0xff] (!%p115_p2)  }
   0x8   : > { %1156 = vmatprep.subr.bf16.mxu0 (!%p115_p2), %v1979_v4  ;;  %1375 = vmatprep.subr.bf16.mxu1 (!%p115_p2), %v1981_v5  ;;  %v1985_v8 = vld [vmem:[%s2825_s1 + $0x44] ss:$16 sps:$4 sm:$0xff] (!%p115_p2)   ;;  %v1987_v9 = vld [vmem:[%s2825_s1 + $0x4c] ss:$16 sps:$4 sm:$0xff] (!%p115_p2)   ;;  %v1989_v10 = vld [vmem:[%s2825_s1 + $0x40] ss:$16 sps:$4 sm:$0xff] (!%p115_p2)  }
   0x9   : > { %v1990_v11 = vld [vmem:[%s2825_s1 + $0x48] ss:$16 sps:$4 sm:$0xff] (!%p115_p2)   ;;  %v1991_v12 = vld [vmem:[%s2825_s1 + $0x64] ss:$16 sps:$4 sm:$0xff] (!%p115_p2)   ;;  %v1993_v13 = vld [vmem:[%s2825_s1 + $0x6c] ss:$16 sps:$4 sm:$0xff] (!%p115_p2)  }
   0xa   : > { %v1995_v14 = vld [vmem:[%s2825_s1 + $0x60] ss:$16 sps:$4 sm:$0xff] (!%p115_p2)   ;;  %v1996_v15 = vld [vmem:[%s2825_s1 + $0x68] ss:$16 sps:$4 sm:$0xff] (!%p115_p2)   ;;  %v1997_v16 = vld [vmem:[%s2825_s1 + $0x84] ss:$16 sps:$4 sm:$0xff] (!%p115_p2)  }
   0xb   : > { %1157 = vmatpush1.bf16.msra.mxu0 (!%p115_p2), %v1983_v6  ;;  %1376 = vmatpush1.bf16.msra.mxu1 (!%p115_p2), %v1984_v7  ;;  %v1999_v17 = vld [vmem:[%s2825_s1 + $0x8c] ss:$16 sps:$4 sm:$0xff] (!%p115_p2)   ;;  %v2001_v18 = vld [vmem:[%s2825_s1 + $0x80] ss:$16 sps:$4 sm:$0xff] (!%p115_p2)   ;;  %v2002_v19 = vld [vmem:[%s2825_s1 + $0x88] ss:$16 sps:$4 sm:$0xff] (!%p115_p2)  }
   0xc   : > { %1158 = vmatprep.subr.bf16.mxu0 (!%p115_p2), %v1985_v8  ;;  %1377 = vmatprep.subr.bf16.mxu1 (!%p115_p2), %v1987_v9  ;;  %v2003_v20 = vld [vmem:[%s2825_s1 + $0xa4] ss:$16 sps:$4 sm:$0xff] (!%p115_p2)   ;;  %v2005_v21 = vld [vmem:[%s2825_s1 + $0xac] ss:$16 sps:$4 sm:$0xff] (!%p115_p2)   ;;  %v2007_v22 = vld [vmem:[%s2825_s1 + $0xa0] ss:$16 sps:$4 sm:$0xff] (!%p115_p2)  }
   0xd   : > { %v2008_v23 = vld [vmem:[%s2825_s1 + $0xa8] ss:$16 sps:$4 sm:$0xff]   ;;  %v2009_v24 = vld [vmem:[%s2825_s1 + $0xc4] ss:$16 sps:$4 sm:$0xff]   ;;  %v2011_v25 = vld [vmem:[%s2825_s1 + $0xcc] ss:$16 sps:$4 sm:$0xff]  }
   0xe   : > { %v2013_v26 = vld [vmem:[%s2825_s1 + $0xc0] ss:$16 sps:$4 sm:$0xff]   ;;  %v2014_v27 = vld [vmem:[%s2825_s1 + $0xc8] ss:$16 sps:$4 sm:$0xff]   ;;  %v2015_v28 = vld [vmem:[%s2825_s1 + $0xe4] ss:$16 sps:$4 sm:$0xff]  }
   0xf   : > { %1159 = vmatpush1.bf16.msra.mxu0 %v1989_v10  ;;  %1378 = vmatpush1.bf16.msra.mxu1 %v1990_v11  ;;  %v2017_v29 = vld [vmem:[%s2825_s1 + $0xec] ss:$16 sps:$4 sm:$0xff]   ;;  %v2019_v30 = vld [vmem:[%s2825_s1 + $0xe0] ss:$16 sps:$4 sm:$0xff]   ;;  %v2020_v31 = vld [vmem:[%s2825_s1 + $0xe8] ss:$16 sps:$4 sm:$0xff]  }
  0x10   : > { %1160 = vmatprep.subr.bf16.mxu0 %v1991_v12  ;;  %1379 = vmatprep.subr.bf16.mxu1 %v1993_v13  ;;  %v2021_v32 = vld [vmem:[%s2825_s1 + $0x104] ss:$16 sps:$4 sm:$0xff]   ;;  %p139_p3 = scmp.lt.s32.totalorder %s1719_s19, 15  ;;  %v2023_v33 = vld [vmem:[%s2825_s1 + $0x10c] ss:$16 sps:$4 sm:$0xff]   ;;  %vm1141_vm0 = vcmask 523264  }
  0x11   : > { %v2025_v34 = vld [vmem:[%s2825_s1 + $0x100] ss:$16 sps:$4 sm:$0xff]   ;;  %v2026_v35 = vld [vmem:[%s2825_s1 + $0x108] ss:$16 sps:$4 sm:$0xff]   ;;  %v2027_v36 = vld [vmem:[%s2825_s1 + $0x124] ss:$16 sps:$4 sm:$0xff]  }
  0x12   : > { %s2828_s19 = smov (!%p139_p3, %s1719_s19), 15  ;;  %v2029_v37 = vld [vmem:[%s2825_s1 + $0x12c] ss:$16 sps:$4 sm:$0xff]   ;;  %v2031_v38 = vld [vmem:[%s2825_s1 + $0x120] ss:$16 sps:$4 sm:$0xff]  }
  0x13   : > { %1161 = vmatpush1.bf16.msra.mxu0 %v1995_v14  ;;  %1380 = vmatpush1.bf16.msra.mxu1 %v1996_v15  ;;  %v2032_v39 = vld [vmem:[%s2825_s1 + $0x128] ss:$16 sps:$4 sm:$0xff]   ;;  %v2033_v40 = vld [vmem:[%s2825_s1 + $0x144] ss:$16 sps:$4 sm:$0xff]   ;;  %s1963_s15 = smul.u32 20, %s2828_s19  ;;  %s1898_s25 = sshll.u32 %s2828_s19, 5 }
  0x14   : > { %1162 = vmatprep.subr.bf16.mxu0 %v1997_v16  ;;  %1381 = vmatprep.subr.bf16.mxu1 %v1999_v17  ;;  %v2035_v41 = vld [vmem:[%s2825_s1 + $0x14c] ss:$16 sps:$4 sm:$0xff]   ;;  %v2037_v42 = vld [vmem:[%s2825_s1 + $0x140] ss:$16 sps:$4 sm:$0xff]   ;;  %v2038_v43 = vld [vmem:[%s2825_s1 + $0x148] ss:$16 sps:$4 sm:$0xff]   ;;  %s2787_s10 = scalar_lea.vmem %s2826_s2, %s1898_s25 }
  0x15   : > { %v2039_v44 = vld [vmem:[%s2825_s1 + $0x164] ss:$16 sps:$4 sm:$0xff]   ;;  %s2456_s27 = scalar_lea.vmem %s2824_s0, %s1963_s15  ;;  %v2041_v45 = vld [vmem:[%s2825_s1 + $0x16c] ss:$16 sps:$4 sm:$0xff]   ;;  %v2043_v46 = vld [vmem:[%s2825_s1 + $0x160] ss:$16 sps:$4 sm:$0xff]  }
  0x16   : > { %v2044_v47 = vld [vmem:[%s2825_s1 + $0x168] ss:$16 sps:$4 sm:$0xff]   ;;  %v2045_v49 = vld [vmem:[%s2825_s1 + $0x184] ss:$16 sps:$4 sm:$0xff]   ;;  %v2047_v50 = vld [vmem:[%s2825_s1 + $0x18c] ss:$16 sps:$4 sm:$0xff]  }
  0x17   : > { %1163 = vmatpush1.bf16.msra.mxu0 %v2001_v18  ;;  %1382 = vmatpush1.bf16.msra.mxu1 %v2002_v19  ;;  %v2071_v48 = vld [vmem:[%s2456_s27 + $0x4] ss:$20 sps:$4 sm:$0xff]   ;;  %v2049_v51 = vld [vmem:[%s2825_s1 + $0x180] ss:$16 sps:$4 sm:$0xff]   ;;  %v2053_v54 = vld [vmem:[%s2825_s1 + $0x1ac] ss:$16 sps:$4 sm:$0xff]  }
  0x18   : > { %1164 = vmatprep.subr.bf16.mxu0 %v2003_v20  ;;  %1383 = vmatprep.subr.bf16.mxu1 %v2005_v21  ;;  %v2050_v52 = vld [vmem:[%s2825_s1 + $0x188] ss:$16 sps:$4 sm:$0xff]   ;;  %v2051_v53 = vld [vmem:[%s2825_s1 + $0x1a4] ss:$16 sps:$4 sm:$0xff]   ;;  %v2055_v55 = vld [vmem:[%s2825_s1 + $0x1a0] ss:$16 sps:$4 sm:$0xff]  }
  0x19   : > { %1186 = vmatprep.mubr.bf16.mxu0 %v2071_v48  ;;  %1405 = vmatprep.mubr.bf16.mxu1 %v2071_v48  ;;  %v2056_v56 = vld [vmem:[%s2825_s1 + $0x1a8] ss:$16 sps:$4 sm:$0xff]   ;;  %v2057_v57 = vld [vmem:[%s2825_s1 + $0x1c4] ss:$16 sps:$4 sm:$0xff]   ;;  %v2059_v58 = vld [vmem:[%s2825_s1 + $0x1cc] ss:$16 sps:$4 sm:$0xff]  }
  0x1a   : > { %v2061_v59 = vld [vmem:[%s2825_s1 + $0x1c0] ss:$16 sps:$4 sm:$0xff]   ;;  %v2062_v60 = vld [vmem:[%s2825_s1 + $0x1c8] ss:$16 sps:$4 sm:$0xff]   ;;  %v2063_v61 = vld [vmem:[%s2825_s1 + $0x1e4] ss:$16 sps:$4 sm:$0xff]  }
  0x1b   : > { %1165 = vmatpush1.bf16.msra.mxu0 %v2007_v22  ;;  %1384 = vmatpush1.bf16.msra.mxu1 %v2008_v23  ;;  %v2065_v62 = vld [vmem:[%s2825_s1 + $0x1ec] ss:$16 sps:$4 sm:$0xff]   ;;  %v2067_v63 = vld [vmem:[%s2825_s1 + $0x1e0] ss:$16 sps:$4 sm:$0xff]   ;;  %v2068_v0 = vld [vmem:[%s2825_s1 + $0x1e8] ss:$16 sps:$4 sm:$0xff]  }
  0x1c   : > { %1166 = vmatprep.subr.bf16.mxu0 %v2009_v24  ;;  %1385 = vmatprep.subr.bf16.mxu1 %v2011_v25  ;;  %v2074_v1 = vld [vmem:[%s2825_s1 + $0x204] ss:$16 sps:$4 sm:$0xff]   ;;  %v2077_v2 = vld [vmem:[%s2825_s1 + $0x20c] ss:$16 sps:$4 sm:$0xff]   ;;  %v2072_v4 = vld [vmem:[%s2825_s1 + $0x200] ss:$16 sps:$4 sm:$0xff]  }
  0x1d   : > { %v2069_v3 = vld [vmem:[%s2456_s27] ss:$20 sps:$4 sm:$0xff]   ;;  %v2075_v5 = vld [vmem:[%s2825_s1 + $0x208] ss:$16 sps:$4 sm:$0xff]   ;;  %v2083_v7 = vld [vmem:[%s2825_s1 + $0x22c] ss:$16 sps:$4 sm:$0xff]  }
  0x1e   : > { %v2080_v6 = vld [vmem:[%s2825_s1 + $0x224] ss:$16 sps:$4 sm:$0xff]   ;;  %v2078_v8 = vld [vmem:[%s2825_s1 + $0x220] ss:$16 sps:$4 sm:$0xff]   ;;  %v2081_v9 = vld [vmem:[%s2825_s1 + $0x228] ss:$16 sps:$4 sm:$0xff]  }
  0x1f   : > { %1167 = vmatpush1.bf16.msra.mxu0 %v2013_v26  ;;  %1386 = vmatpush1.bf16.msra.mxu1 %v2014_v27  ;;  %v2086_v10 = vld [vmem:[%s2825_s1 + $0x244] ss:$16 sps:$4 sm:$0xff]   ;;  %v2089_v11 = vld [vmem:[%s2825_s1 + $0x24c] ss:$16 sps:$4 sm:$0xff]   ;;  %v2084_v12 = vld [vmem:[%s2825_s1 + $0x240] ss:$16 sps:$4 sm:$0xff]  }
  0x20   : > { %1168 = vmatprep.subr.bf16.mxu0 %v2015_v28  ;;  %1387 = vmatprep.subr.bf16.mxu1 %v2017_v29  ;;  %v2087_v13 = vld [vmem:[%s2825_s1 + $0x248] ss:$16 sps:$4 sm:$0xff]   ;;  %v2132_v14 = vld [vmem:[%s2456_s27 + $0x2c] ss:$20 sps:$4 sm:$0xff]   ;;  %v2092_v16 = vld [vmem:[%s2825_s1 + $0x264] ss:$16 sps:$4 sm:$0xff]  }
  0x21   : > { %v2134_v15 = vld [vmem:[%s2456_s27 + $0x28] ss:$20 sps:$4 sm:$0xff]   ;;  %v2090_v18 = vld [vmem:[%s2825_s1 + $0x260] ss:$16 sps:$4 sm:$0xff]   ;;  %v2098_v20 = vld [vmem:[%s2825_s1 + $0x284] ss:$16 sps:$4 sm:$0xff]  }
  0x22   : > { %v2095_v17 = vld [vmem:[%s2825_s1 + $0x26c] ss:$16 sps:$4 sm:$0xff]   ;;  %v2093_v19 = vld [vmem:[%s2825_s1 + $0x268] ss:$16 sps:$4 sm:$0xff]   ;;  %v2096_v22 = vld [vmem:[%s2825_s1 + $0x280] ss:$16 sps:$4 sm:$0xff]  }
  0x23   : > { %1169 = vmatpush1.bf16.msra.mxu0 %v2019_v30  ;;  %1388 = vmatpush1.bf16.msra.mxu1 %v2020_v31  ;;  %v2101_v21 = vld [vmem:[%s2825_s1 + $0x28c] ss:$16 sps:$4 sm:$0xff]   ;;  %v2147_v23 = vld [vmem:[%s2456_s27 + $0x54] ss:$20 sps:$4 sm:$0xff]   ;;  %v2149_v25 = vld [vmem:[%s2456_s27 + $0x50] ss:$20 sps:$4 sm:$0xff]  }
  0x24   : > { %1170 = vmatprep.subr.bf16.mxu0 %v2021_v32  ;;  %1389 = vmatprep.subr.bf16.mxu1 %v2023_v33  ;;  %v2099_v24 = vld [vmem:[%s2825_s1 + $0x288] ss:$16 sps:$4 sm:$0xff]   ;;  %v2104_v26 = vld [vmem:[%s2825_s1 + $0x2a4] ss:$16 sps:$4 sm:$0xff]   ;;  %v2107_v27 = vld [vmem:[%s2825_s1 + $0x2ac] ss:$16 sps:$4 sm:$0xff]  }
  0x25   : > { %v2102_v28 = vld [vmem:[%s2825_s1 + $0x2a0] ss:$16 sps:$4 sm:$0xff]   ;;  %v2105_v29 = vld [vmem:[%s2825_s1 + $0x2a8] ss:$16 sps:$4 sm:$0xff]   ;;  %v2110_v30 = vld [vmem:[%s2825_s1 + $0x2c4] ss:$16 sps:$4 sm:$0xff]  }
  0x26   : > { %v2162_v31 = vld [vmem:[%s2456_s27 + $0x7c] ss:$20 sps:$4 sm:$0xff]   ;;  %v2129_v48 = vld [vmem:[%s2825_s1 + $0x328] ss:$16 sps:$4 sm:$0xff]  }
  0x27   : > { %1171 = vmatpush1.bf16.msra.mxu0 %v2025_v34  ;;  %1390 = vmatpush1.bf16.msra.mxu1 %v2026_v35  ;;  %v2113_v32 = vld [vmem:[%s2825_s1 + $0x2cc] ss:$16 sps:$4 sm:$0xff]   ;;  %v2108_v33 = vld [vmem:[%s2825_s1 + $0x2c0] ss:$16 sps:$4 sm:$0xff]   ;;  %v2111_v34 = vld [vmem:[%s2825_s1 + $0x2c8] ss:$16 sps:$4 sm:$0xff]  }
  0x28   : > { %1172 = vmatprep.subr.bf16.mxu0 %v2027_v36  ;;  %1391 = vmatprep.subr.bf16.mxu1 %v2029_v37  ;;  %v2164_v35 = vld [vmem:[%s2456_s27 + $0x78] ss:$20 sps:$4 sm:$0xff]   ;;  %v2116_v36 = vld [vmem:[%s2825_s1 + $0x2e4] ss:$16 sps:$4 sm:$0xff]  }
  0x29   : > { %v2119_v37 = vld [vmem:[%s2825_s1 + $0x2ec] ss:$16 sps:$4 sm:$0xff]  }
  0x2b   : > { %1173 = vmatpush1.bf16.msra.mxu0 %v2031_v38  ;;  %1392 = vmatpush1.bf16.msra.mxu1 %v2032_v39  ;;  %v2114_v38 = vld [vmem:[%s2825_s1 + $0x2e0] ss:$16 sps:$4 sm:$0xff]   ;;  %v2117_v39 = vld [vmem:[%s2825_s1 + $0x2e8] ss:$16 sps:$4 sm:$0xff]  }
  0x2c   : > { %1174 = vmatprep.subr.bf16.mxu0 %v2033_v40  ;;  %1393 = vmatprep.subr.bf16.mxu1 %v2035_v41  ;;  %v2179_v40 = vld [vmem:[%s2456_s27 + $0xc] ss:$20 sps:$4 sm:$0xff]   ;;  %v2122_v41 = vld [vmem:[%s2825_s1 + $0x304] ss:$16 sps:$4 sm:$0xff]  }
  0x2f   : > { %1175 = vmatpush1.bf16.msra.mxu0 %v2037_v42  ;;  %1394 = vmatpush1.bf16.msra.mxu1 %v2038_v43  ;;  %v2125_v42 = vld [vmem:[%s2825_s1 + $0x30c] ss:$16 sps:$4 sm:$0xff]   ;;  %v2120_v43 = vld [vmem:[%s2825_s1 + $0x300] ss:$16 sps:$4 sm:$0xff]  }
  0x30   : > { %1176 = vmatprep.subr.bf16.mxu0 %v2039_v44  ;;  %1395 = vmatprep.subr.bf16.mxu1 %v2041_v45  ;;  %v2123_v44 = vld [vmem:[%s2825_s1 + $0x308] ss:$16 sps:$4 sm:$0xff]   ;;  %v2128_v45 = vld [vmem:[%s2825_s1 + $0x324] ss:$16 sps:$4 sm:$0xff]  }
  0x33   : > { %1177 = vmatpush1.bf16.msra.mxu0 %v2043_v46  ;;  %1396 = vmatpush1.bf16.msra.mxu1 %v2044_v47  ;;  %v2131_v46 = vld [vmem:[%s2825_s1 + $0x32c] ss:$16 sps:$4 sm:$0xff]   ;;  %v2126_v47 = vld [vmem:[%s2825_s1 + $0x320] ss:$16 sps:$4 sm:$0xff]  }
  0x34   : > { %1178 = vmatprep.subr.bf16.mxu0 %v2045_v49  ;;  %1397 = vmatprep.subr.bf16.mxu1 %v2047_v50  ;;  %v2137_v49 = vld [vmem:[%s2825_s1 + $0x344] ss:$16 sps:$4 sm:$0xff]   ;;  %v2140_v50 = vld [vmem:[%s2825_s1 + $0x34c] ss:$16 sps:$4 sm:$0xff]  }
  0x37   : > { %1179 = vmatpush1.bf16.msra.mxu0 %v2049_v51  ;;  %1398 = vmatpush1.bf16.msra.mxu1 %v2050_v52  ;;  %v2135_v51 = vld [vmem:[%s2825_s1 + $0x340] ss:$16 sps:$4 sm:$0xff]   ;;  %v2138_v52 = vld [vmem:[%s2825_s1 + $0x348] ss:$16 sps:$4 sm:$0xff]  }
  0x38   : > { %1180 = vmatprep.subr.bf16.mxu0 %v2051_v53  ;;  %1399 = vmatprep.subr.bf16.mxu1 %v2053_v54  ;;  %v2143_v53 = vld [vmem:[%s2825_s1 + $0x364] ss:$16 sps:$4 sm:$0xff]   ;;  %v2146_v54 = vld [vmem:[%s2825_s1 + $0x36c] ss:$16 sps:$4 sm:$0xff]  }
  0x3b   : > { %1181 = vmatpush1.bf16.msra.mxu0 %v2055_v55  ;;  %1400 = vmatpush1.bf16.msra.mxu1 %v2056_v56  ;;  %v2141_v55 = vld [vmem:[%s2825_s1 + $0x360] ss:$16 sps:$4 sm:$0xff]   ;;  %v2144_v56 = vld [vmem:[%s2825_s1 + $0x368] ss:$16 sps:$4 sm:$0xff]  }
  0x3c   : > { %1182 = vmatprep.subr.bf16.mxu0 %v2057_v57  ;;  %1401 = vmatprep.subr.bf16.mxu1 %v2059_v58  ;;  %v2152_v57 = vld [vmem:[%s2825_s1 + $0x384] ss:$16 sps:$4 sm:$0xff]   ;;  %v2155_v58 = vld [vmem:[%s2825_s1 + $0x38c] ss:$16 sps:$4 sm:$0xff]  }
  0x3f   : > { %1183 = vmatpush1.bf16.msra.mxu0 %v2061_v59  ;;  %1402 = vmatpush1.bf16.msra.mxu1 %v2062_v60  ;;  %v2150_v59 = vld [vmem:[%s2825_s1 + $0x380] ss:$16 sps:$4 sm:$0xff]   ;;  %v2153_v60 = vld [vmem:[%s2825_s1 + $0x388] ss:$16 sps:$4 sm:$0xff]  }
  0x40   : > { %1184 = vmatprep.subr.bf16.mxu0 %v2063_v61  ;;  %1403 = vmatprep.subr.bf16.mxu1 %v2065_v62  ;;  %v2158_v61 = vld [vmem:[%s2825_s1 + $0x3a4] ss:$16 sps:$4 sm:$0xff]   ;;  %v2161_v62 = vld [vmem:[%s2825_s1 + $0x3ac] ss:$16 sps:$4 sm:$0xff]  }
  0x43   : > { %1185 = vmatpush1.bf16.msra.mxu0 %v2067_v63  ;;  %1404 = vmatpush1.bf16.msra.mxu1 %v2068_v0  ;;  %v2156_v63 = vld [vmem:[%s2825_s1 + $0x3a0] ss:$16 sps:$4 sm:$0xff]   ;;  %v2159_v0 = vld [vmem:[%s2825_s1 + $0x3a8] ss:$16 sps:$4 sm:$0xff]  }
  0x44   : > { %1227 = vmatprep.subr.bf16.mxu0 %v2074_v1  ;;  %1446 = vmatprep.subr.bf16.mxu1 %v2077_v2  ;;  %v2167_v1 = vld [vmem:[%s2825_s1 + $0x3c4] ss:$16 sps:$4 sm:$0xff]   ;;  %v2170_v2 = vld [vmem:[%s2825_s1 + $0x3cc] ss:$16 sps:$4 sm:$0xff]  }
  0x46   : > { %1187 = vmatmul.mubr.bf16.vlgmr.msra.gmra.mrb[0].mxu0 %v2069_v3  ;;  %1406 = vmatmul.mubr.bf16.vlgmr.msra.gmra.mrb[0].mxu1 %v2069_v3  ;;  %v2165_v3 = vld [vmem:[%s2825_s1 + $0x3c0] ss:$16 sps:$4 sm:$0xff]  }
  0x47   : > { %1228 = vmatpush1.bf16.msra.mxu0 %v2072_v4  ;;  %1447 = vmatpush1.bf16.msra.mxu1 %v2075_v5  ;;  %v2168_v4 = vld [vmem:[%s2825_s1 + $0x3c8] ss:$16 sps:$4 sm:$0xff]   ;;  %v2173_v5 = vld [vmem:[%s2825_s1 + $0x3e4] ss:$16 sps:$4 sm:$0xff]  }
  0x48   : > { %1229 = vmatprep.subr.bf16.mxu0 %v2080_v6  ;;  %1448 = vmatprep.subr.bf16.mxu1 %v2083_v7  ;;  %v2176_v6 = vld [vmem:[%s2825_s1 + $0x3ec] ss:$16 sps:$4 sm:$0xff]   ;;  %v2171_v7 = vld [vmem:[%s2825_s1 + $0x3e0] ss:$16 sps:$4 sm:$0xff]  }
  0x49   : > { %1196 = vmatprep.mubr.bf16.mxu0 %v2132_v14  ;;  %1415 = vmatprep.mubr.bf16.mxu1 %v2132_v14  ;;  %v2186_v14 = vld [vmem:[%s2456_s27 + $0x34] ss:$20 sps:$4 sm:$0xff]  }
  0x4b   : > { %1230 = vmatpush1.bf16.msra.mxu0 %v2078_v8  ;;  %1449 = vmatpush1.bf16.msra.mxu1 %v2081_v9  ;;  %v2174_v8 = vld [vmem:[%s2825_s1 + $0x3e8] ss:$16 sps:$4 sm:$0xff]   ;;  %v2182_v9 = vld [vmem:[%s2825_s1 + $0x404] ss:$16 sps:$4 sm:$0xff]  }
  0x4c   : > { %1231 = vmatprep.subr.bf16.mxu0 %v2086_v10  ;;  %1450 = vmatprep.subr.bf16.mxu1 %v2089_v11  ;;  %v2185_v10 = vld [vmem:[%s2825_s1 + $0x40c] ss:$16 sps:$4 sm:$0xff]  }
  0x4d   : > { %v2177_v11 = vld [vmem:[%s2456_s27 + $0x8] ss:$20 sps:$4 sm:$0xff]  }
  0x4e   : > { %1197 = vmatmul.mubr.bf16.gmra.mrb[4].mxu0 %v2134_v15  ;;  %1416 = vmatmul.mubr.bf16.gmra.mrb[4].mxu1 %v2134_v15  ;;  %v2191_v15 = vld [vmem:[%s2825_s1 + $0x424] ss:$16 sps:$4 sm:$0xff]  }
  0x4f   : > { %1232 = vmatpush1.bf16.msra.mxu0 %v2084_v12  ;;  %1451 = vmatpush1.bf16.msra.mxu1 %v2087_v13  ;;  %v2180_v12 = vld [vmem:[%s2825_s1 + $0x400] ss:$16 sps:$4 sm:$0xff]   ;;  %v2183_v13 = vld [vmem:[%s2825_s1 + $0x408] ss:$16 sps:$4 sm:$0xff]  }
  0x50   : > { %1233 = vmatprep.subr.bf16.mxu0 %v2092_v16  ;;  %1452 = vmatprep.subr.bf16.mxu1 %v2095_v17  ;;  %v2194_v16 = vld [vmem:[%s2825_s1 + $0x42c] ss:$16 sps:$4 sm:$0xff]   ;;  %v2189_v17 = vld [vmem:[%s2825_s1 + $0x420] ss:$16 sps:$4 sm:$0xff]  }
  0x51   : > { %1206 = vmatprep.mubr.bf16.mxu0 %v2147_v23  ;;  %1425 = vmatprep.mubr.bf16.mxu1 %v2147_v23  ;;  %v2198_v23 = vld [vmem:[%s2825_s1 + $0x440] ss:$16 sps:$4 sm:$0xff]  }
  0x53   : > { %1234 = vmatpush1.bf16.msra.mxu0 %v2090_v18  ;;  %1453 = vmatpush1.bf16.msra.mxu1 %v2093_v19  ;;  %v2192_v18 = vld [vmem:[%s2825_s1 + $0x428] ss:$16 sps:$4 sm:$0xff]   ;;  %v2200_v19 = vld [vmem:[%s2825_s1 + $0x444] ss:$16 sps:$4 sm:$0xff]  }
  0x54   : > { %1235 = vmatprep.subr.bf16.mxu0 %v2098_v20  ;;  %1454 = vmatprep.subr.bf16.mxu1 %v2101_v21  ;;  %v2203_v20 = vld [vmem:[%s2825_s1 + $0x44c] ss:$16 sps:$4 sm:$0xff]   ;;  %v2188_v21 = vld [vmem:[%s2456_s27 + $0x30] ss:$20 sps:$4 sm:$0xff]  }
  0x56   : > { %1207 = vmatmul.mubr.bf16.gmra.mrb[8].mxu0 %v2149_v25  ;;  %1426 = vmatmul.mubr.bf16.gmra.mrb[8].mxu1 %v2149_v25  ;;  %v2209_v25 = vld [vmem:[%s2825_s1 + $0x464] ss:$16 sps:$4 sm:$0xff]  }
  0x57   : > { %1236 = vmatpush1.bf16.msra.mxu0 %v2096_v22  ;;  %1455 = vmatpush1.bf16.msra.mxu1 %v2099_v24  ;;  %v2195_v22 = vld [vmem:[%s2456_s27 + $0x5c] ss:$20 sps:$4 sm:$0xff]   ;;  %v2201_v24 = vld [vmem:[%s2825_s1 + $0x448] ss:$16 sps:$4 sm:$0xff]  }
  0x58   : > { %1237 = vmatprep.subr.bf16.mxu0 %v2104_v26  ;;  %1456 = vmatprep.subr.bf16.mxu1 %v2107_v27  ;;  %v2212_v26 = vld [vmem:[%s2825_s1 + $0x46c] ss:$16 sps:$4 sm:$0xff]   ;;  %v2207_v27 = vld [vmem:[%s2825_s1 + $0x460] ss:$16 sps:$4 sm:$0xff]  }
  0x59   : > { %1216 = vmatprep.mubr.bf16.mxu0 %v2162_v31  ;;  %1435 = vmatprep.mubr.bf16.mxu1 %v2162_v31  ;;  %v2206_v31 = vld [vmem:[%s2456_s27 + $0x80] ss:$20 sps:$4 sm:$0xff]  }
  0x5b   : > { %1238 = vmatpush1.bf16.msra.mxu0 %v2102_v28  ;;  %1457 = vmatpush1.bf16.msra.mxu1 %v2105_v29  ;;  %v2210_v28 = vld [vmem:[%s2825_s1 + $0x468] ss:$16 sps:$4 sm:$0xff]  }
  0x5c   : > { %1239 = vmatprep.subr.bf16.mxu0 %v2110_v30  ;;  %1458 = vmatprep.subr.bf16.mxu1 %v2113_v32  ;;  %v2197_v29 = vld [vmem:[%s2456_s27 + $0x58] ss:$20 sps:$4 sm:$0xff]   ;;  %v2289_v32 = vmov 0  }
  0x5d   : > { %v2204_v30 = vld [vmem:[%s2456_s27 + $0x84] ss:$20 sps:$4 sm:$0xff]  }
  0x5e   : > { %1217 = vmatmul.mubr.bf16.gmra.mrb[12].mxu0 %v2164_v35  ;;  %1436 = vmatmul.mubr.bf16.gmra.mrb[12].mxu1 %v2164_v35  ;;  %v2215_v35 = vld [vmem:[%s2456_s27 + $0x60] ss:$20 sps:$4 sm:$0xff]  }
  0x5f   : > { %1240 = vmatpush1.bf16.msra.mxu0 %v2108_v33  ;;  %1459 = vmatpush1.bf16.msra.mxu1 %v2111_v34  ;;  %v2213_v33 = vld [vmem:[%s2456_s27 + $0x10] ss:$20 sps:$4 sm:$0xff]   ;;  %v2214_v34 = vld [vmem:[%s2456_s27 + $0x38] ss:$20 sps:$4 sm:$0xff]  }
  0x60   : > { %1241 = vmatprep.subr.bf16.mxu0 %v2116_v36  ;;  %1460 = vmatprep.subr.bf16.mxu1 %v2119_v37  ;;  %v2216_v36 = vld [vmem:[%s2456_s27 + $0x88] ss:$20 sps:$4 sm:$0xff]  }
  0x61   : > { %1259 = vmatprep.mubr.bf16.mxu0 %v2179_v40  ;;  %1478 = vmatprep.mubr.bf16.mxu1 %v2179_v40 }
  0x63   : > { %1242 = vmatpush1.bf16.msra.mxu0 %v2114_v38  ;;  %1461 = vmatpush1.bf16.msra.mxu1 %v2117_v39 }
  0x64   : > { %1243 = vmatprep.subr.bf16.mxu0 %v2122_v41  ;;  %1462 = vmatprep.subr.bf16.mxu1 %v2125_v42 }
  0x67   : > { %1244 = vmatpush1.bf16.msra.mxu0 %v2120_v43  ;;  %1463 = vmatpush1.bf16.msra.mxu1 %v2123_v44 }
  0x68   : > { %1245 = vmatprep.subr.bf16.mxu0 %v2128_v45  ;;  %1464 = vmatprep.subr.bf16.mxu1 %v2131_v46 }
  0x6b   : > { %1246 = vmatpush1.bf16.msra.mxu0 %v2126_v47  ;;  %1465 = vmatpush1.bf16.msra.mxu1 %v2129_v48 }
  0x6c   : > { %1247 = vmatprep.subr.bf16.mxu0 %v2137_v49  ;;  %1466 = vmatprep.subr.bf16.mxu1 %v2140_v50 }
  0x6f   : > { %1248 = vmatpush1.bf16.msra.mxu0 %v2135_v51  ;;  %1467 = vmatpush1.bf16.msra.mxu1 %v2138_v52 }
  0x70   : > { %1249 = vmatprep.subr.bf16.mxu0 %v2143_v53  ;;  %1468 = vmatprep.subr.bf16.mxu1 %v2146_v54 }
  0x73   : > { %1250 = vmatpush1.bf16.msra.mxu0 %v2141_v55  ;;  %1469 = vmatpush1.bf16.msra.mxu1 %v2144_v56 }
  0x74   : > { %1251 = vmatprep.subr.bf16.mxu0 %v2152_v57  ;;  %1470 = vmatprep.subr.bf16.mxu1 %v2155_v58 }
  0x77   : > { %1252 = vmatpush1.bf16.msra.mxu0 %v2150_v59  ;;  %1471 = vmatpush1.bf16.msra.mxu1 %v2153_v60 }
  0x78   : > { %1253 = vmatprep.subr.bf16.mxu0 %v2158_v61  ;;  %1472 = vmatprep.subr.bf16.mxu1 %v2161_v62 }
  0x7b   : > { %1254 = vmatpush1.bf16.msra.mxu0 %v2156_v63  ;;  %1473 = vmatpush1.bf16.msra.mxu1 %v2159_v0 }
  0x7c   : > { %1255 = vmatprep.subr.bf16.mxu0 %v2167_v1  ;;  %1474 = vmatprep.subr.bf16.mxu1 %v2170_v2 }
  0x7f   : > { %1256 = vmatpush1.bf16.msra.mxu0 %v2165_v3  ;;  %1475 = vmatpush1.bf16.msra.mxu1 %v2168_v4 }
  0x80   : > { %1257 = vmatprep.subr.bf16.mxu0 %v2173_v5  ;;  %1476 = vmatprep.subr.bf16.mxu1 %v2176_v6 }
  0x83   : > { %1258 = vmatpush1.bf16.msra.mxu0 %v2171_v7  ;;  %1477 = vmatpush1.bf16.msra.mxu1 %v2174_v8 }
  0x84   : > { %1300 = vmatprep.subr.bf16.mxu0 %v2182_v9  ;;  %1519 = vmatprep.subr.bf16.mxu1 %v2185_v10 }
  0x86   : > { %1260 = vmatmul.mubr.bf16.vlgmr.msra.gmra.mrb[0].mxu0 %v2177_v11  ;;  %1479 = vmatmul.mubr.bf16.vlgmr.msra.gmra.mrb[0].mxu1 %v2177_v11 }
  0x87   : > { %1301 = vmatpush1.bf16.msra.mxu0 %v2180_v12  ;;  %1520 = vmatpush1.bf16.msra.mxu1 %v2183_v13 }
  0x88   : > { %1269 = vmatprep.mubr.bf16.mxu0 %v2186_v14  ;;  %1488 = vmatprep.mubr.bf16.mxu1 %v2186_v14 }
  0x89   : > { %1302 = vmatprep.subr.bf16.mxu0 %v2191_v15  ;;  %1521 = vmatprep.subr.bf16.mxu1 %v2194_v16 }
  0x8b   : > { %1303 = vmatpush1.bf16.msra.mxu0 %v2189_v17  ;;  %1522 = vmatpush1.bf16.msra.mxu1 %v2192_v18 }
  0x8c   : > { %1304 = vmatprep.subr.bf16.mxu0 %v2200_v19  ;;  %1523 = vmatprep.subr.bf16.mxu1 %v2203_v20 }
  0x8e   : > { %1270 = vmatmul.mubr.bf16.gmra.mrb[4].mxu0 %v2188_v21  ;;  %1489 = vmatmul.mubr.bf16.gmra.mrb[4].mxu1 %v2188_v21 }
  0x8f   : > { %1279 = vmatprep.mubr.bf16.mxu0 %v2195_v22  ;;  %1498 = vmatprep.mubr.bf16.mxu1 %v2195_v22 }
  0x90   : > { %1305 = vmatpush1.bf16.msra.mxu0 %v2198_v23  ;;  %1524 = vmatpush1.bf16.msra.mxu1 %v2201_v24 }
  0x91   : > { %1306 = vmatprep.subr.bf16.mxu0 %v2209_v25  ;;  %1525 = vmatprep.subr.bf16.mxu1 %v2212_v26 }
  0x94   : > { %1307 = vmatpush1.bf16.msra.mxu0 %v2207_v27  ;;  %1526 = vmatpush1.bf16.msra.mxu1 %v2210_v28 }
  0x96   : > { %1280 = vmatmul.mubr.bf16.gmra.mrb[8].mxu0 %v2197_v29  ;;  %1499 = vmatmul.mubr.bf16.gmra.mrb[8].mxu1 %v2197_v29 }
  0x97   : > { %1289 = vmatprep.mubr.bf16.mxu0 %v2204_v30  ;;  %1508 = vmatprep.mubr.bf16.mxu1 %v2204_v30 }
  0x9e   : > { %1290 = vmatmul.mubr.bf16.gmra.mrb[12].mxu0 %v2206_v31  ;;  %1509 = vmatmul.mubr.bf16.gmra.mrb[12].mxu1 %v2206_v31 }
  0x9f   : > { %1332 = vmatprep.mubr.bf16.mxu0 %v2289_v32  ;;  %1551 = vmatprep.mubr.bf16.mxu1 %v2289_v32 }
  0xa6   : > { %1888 = vmatmul.mubr.msk.bf16.vlgmr.msra.gmra.mrb[0].mxu0 %vm1141_vm0, %v2213_v33  ;;  %1892 = vmatmul.mubr.msk.bf16.vlgmr.msra.gmra.mrb[0].mxu1 %vm1141_vm0, %v2213_v33 }
  0xa7   : > { %1342 = vmatprep.mubr.bf16.mxu0 %v2289_v32  ;;  %1561 = vmatprep.mubr.bf16.mxu1 %v2289_v32 }
  0xae   : > { %1889 = vmatmul.mubr.msk.bf16.gmra.mrb[4].mxu0 %vm1141_vm0, %v2214_v34  ;;  %1893 = vmatmul.mubr.msk.bf16.gmra.mrb[4].mxu1 %vm1141_vm0, %v2214_v34 }
  0xaf   : > { %1352 = vmatprep.mubr.bf16.mxu0 %v2289_v32  ;;  %1571 = vmatprep.mubr.bf16.mxu1 %v2289_v32 }
  0xb6   : > { %1890 = vmatmul.mubr.msk.bf16.gmra.mrb[8].mxu0 %vm1141_vm0, %v2215_v35  ;;  %1894 = vmatmul.mubr.msk.bf16.gmra.mrb[8].mxu1 %vm1141_vm0, %v2215_v35 }
  0xb7   : > { %1362 = vmatprep.mubr.bf16.mxu0 %v2289_v32  ;;  %1581 = vmatprep.mubr.bf16.mxu1 %v2289_v32 }
  0xbe   : > { %1891 = vmatmul.mubr.msk.bf16.gmra.mrb[12].mxu0 %vm1141_vm0, %v2216_v36  ;;  %1895 = vmatmul.mubr.msk.bf16.gmra.mrb[12].mxu1 %vm1141_vm0, %v2216_v36 }
 0x179   : > { %v1334_v37 = vpop.f32.mrb[0].mxu0  ;;  %v1553_v38 = vpop.f32.mrb[0].mxu1 }
 0x17a   : > { %2217 = vtanh.f32 %v1334_v37  ;;  %v1336_v39 = vpop.f32.mrb[1].mxu0  ;;  %v1555_v40 = vpop.f32.mrb[1].mxu1 }
 0x17b   : > { %2219 = vtanh.f32 %v1553_v38  ;;  %v1338_v41 = vpop.f32.mrb[2].mxu0  ;;  %v1557_v42 = vpop.f32.mrb[2].mxu1 }
 0x17c   : > { %2221 = vtanh.f32 %v1336_v39  ;;  %v1340_v43 = vpop.f32.mrb[3].mxu0  ;;  %v1559_v44 = vpop.f32.mrb[3].mxu1 }
 0x17d   : > { %2223 = vtanh.f32 %v1555_v40 }
 0x17e   : > { %2225 = vtanh.f32 %v1338_v41 }
 0x17f   : > { %2227 = vtanh.f32 %v1557_v42 }
 0x180   : > { %2229 = vtanh.f32 %v1340_v43 }
 0x181   : > { %2231 = vtanh.f32 %v1559_v44  ;;  %v1344_v45 = vpop.f32.mrb[4].mxu0  ;;  %v1563_v46 = vpop.f32.mrb[4].mxu1 }
 0x182   : > { %2233 = vtanh.f32 %v1344_v45  ;;  %v1346_v47 = vpop.f32.mrb[5].mxu0  ;;  %v1565_v48 = vpop.f32.mrb[5].mxu1 }
 0x183   : > { %2235 = vtanh.f32 %v1563_v46  ;;  %v1348_v49 = vpop.f32.mrb[6].mxu0  ;;  %v1567_v50 = vpop.f32.mrb[6].mxu1 }
 0x184   : > { %v2218_v51 = vpop.eup %2217  ;;  %2237 = vtanh.f32 %v1346_v47  ;;  %v1350_v52 = vpop.f32.mrb[7].mxu0 }
 0x185   : > { %v1569_v53 = vpop.f32.mrb[7].mxu1  ;;  %v2220_v54 = vpop.eup %2219  ;;  %1624 = vst [vmem:[%s2787_s10] sm:$0xff] %v2218_v51  ;;  %2239 = vtanh.f32 %v1565_v48 }
 0x186   : > { %v2222_v55 = vpop.eup %2221  ;;  %1626 = vst [vmem:[%s2787_s10 + $0x10] sm:$0xff] %v2220_v54  ;;  %2241 = vtanh.f32 %v1348_v49 }
 0x187   : > { %v2224_v56 = vpop.eup %2223  ;;  %1625 = vst [vmem:[%s2787_s10 + $0x8] sm:$0xff] %v2222_v55  ;;  %2243 = vtanh.f32 %v1567_v50 }
 0x188   : > { %v2226_v57 = vpop.eup %2225  ;;  %1627 = vst [vmem:[%s2787_s10 + $0x18] sm:$0xff] %v2224_v56  ;;  %2245 = vtanh.f32 %v1350_v52 }
 0x189   : > { %v2228_v58 = vpop.eup %2227  ;;  %1628 = vst [vmem:[%s2787_s10 + $0x20] sm:$0xff] %v2226_v57  ;;  %2247 = vtanh.f32 %v1569_v53  ;;  %v1354_v59 = vpop.f32.mrb[8].mxu0 }
 0x18a   : > { %v1573_v60 = vpop.f32.mrb[8].mxu1  ;;  %v2230_v61 = vpop.eup %2229  ;;  %1630 = vst [vmem:[%s2787_s10 + $0x30] sm:$0xff] %v2228_v58  ;;  %2249 = vtanh.f32 %v1354_v59 }
 0x18b   : > { %v1356_v62 = vpop.f32.mrb[9].mxu0  ;;  %v1575_v63 = vpop.f32.mrb[9].mxu1  ;;  %1629 = vst [vmem:[%s2787_s10 + $0x28] sm:$0xff] %v2230_v61  ;;  %2251 = vtanh.f32 %v1573_v60 }
 0x18c   : > { %v2232_v0 = vpop.eup %2231  ;;  %v1358_v1 = vpop.f32.mrb[10].mxu0  ;;  %2253 = vtanh.f32 %v1356_v62 }
 0x18d   : > { %v1577_v2 = vpop.f32.mrb[10].mxu1  ;;  %v2234_v3 = vpop.eup %2233  ;;  %1631 = vst [vmem:[%s2787_s10 + $0x38] sm:$0xff] %v2232_v0  ;;  %2255 = vtanh.f32 %v1575_v63 }
 0x18e   : > { %v1360_v4 = vpop.f32.mrb[11].mxu0  ;;  %v1579_v5 = vpop.f32.mrb[11].mxu1  ;;  %1632 = vst [vmem:[%s2787_s10 + $0x40] sm:$0xff] %v2234_v3  ;;  %2257 = vtanh.f32 %v1358_v1 }
 0x18f   : > { %v2236_v6 = vpop.eup %2235  ;;  %2259 = vtanh.f32 %v1577_v2 }
 0x190   : > { %v2238_v7 = vpop.eup %2237  ;;  %1634 = vst [vmem:[%s2787_s10 + $0x50] sm:$0xff] %v2236_v6  ;;  %2261 = vtanh.f32 %v1360_v4 }
 0x191   : > { %v2240_v8 = vpop.eup %2239  ;;  %1633 = vst [vmem:[%s2787_s10 + $0x48] sm:$0xff] %v2238_v7  ;;  %2263 = vtanh.f32 %v1579_v5  ;;  %v1364_v11 = vpop.f32.mrb[12].mxu0 }
 0x192   : > { %v2242_v9 = vpop.eup %2241  ;;  %1635 = vst [vmem:[%s2787_s10 + $0x58] sm:$0xff] %v2240_v8  ;;  %v1583_v12 = vpop.f32.mrb[12].mxu1  ;;  %2265 = vtanh.f32 %v1364_v11 }
 0x193   : > { %v2244_v10 = vpop.eup %2243  ;;  %1636 = vst [vmem:[%s2787_s10 + $0x60] sm:$0xff] %v2242_v9  ;;  %v1366_v14 = vpop.f32.mrb[13].mxu0  ;;  %2267 = vtanh.f32 %v1583_v12 }
 0x194   : > { %v2246_v13 = vpop.eup %2245  ;;  %1638 = vst [vmem:[%s2787_s10 + $0x70] sm:$0xff] %v2244_v10  ;;  %v1585_v15 = vpop.f32.mrb[13].mxu1  ;;  %2269 = vtanh.f32 %v1366_v14 }
 0x195   : > { %v2248_v16 = vpop.eup %2247  ;;  %1637 = vst [vmem:[%s2787_s10 + $0x68] sm:$0xff] %v2246_v13  ;;  %v1368_v17 = vpop.f32.mrb[14].mxu0  ;;  %2271 = vtanh.f32 %v1585_v15 }
 0x196   : > { %v1587_v18 = vpop.f32.mrb[14].mxu1  ;;  %v2250_v19 = vpop.eup %2249  ;;  %1639 = vst [vmem:[%s2787_s10 + $0x78] sm:$0xff] %v2248_v16  ;;  %2273 = vtanh.f32 %v1368_v17 }
 0x197   : > { %v1370_v20 = vpop.f32.mrb[15].mxu0  ;;  %v1589_v21 = vpop.f32.mrb[15].mxu1  ;;  %1640 = vst [vmem:[%s2787_s10 + $0x80] sm:$0xff] %v2250_v19  ;;  %2275 = vtanh.f32 %v1587_v18 }
 0x198   : > { %v2252_v22 = vpop.eup %2251  ;;  %2277 = vtanh.f32 %v1370_v20 }
 0x199   : > { %v2254_v23 = vpop.eup %2253  ;;  %1642 = vst [vmem:[%s2787_s10 + $0x90] sm:$0xff] %v2252_v22  ;;  %2279 = vtanh.f32 %v1589_v21 }
 0x19a   : > { %v2256_v24 = vpop.eup %2255  ;;  %1641 = vst [vmem:[%s2787_s10 + $0x88] sm:$0xff] %v2254_v23 }
 0x19b   : > { %v2258_v25 = vpop.eup %2257  ;;  %1643 = vst [vmem:[%s2787_s10 + $0x98] sm:$0xff] %v2256_v24 }
 0x19c   : > { %v2260_v26 = vpop.eup %2259  ;;  %1644 = vst [vmem:[%s2787_s10 + $0xa0] sm:$0xff] %v2258_v25 }
 0x19d   : > { %v2262_v27 = vpop.eup %2261  ;;  %1646 = vst [vmem:[%s2787_s10 + $0xb0] sm:$0xff] %v2260_v26 }
 0x19e   : > { %v2264_v28 = vpop.eup %2263  ;;  %1645 = vst [vmem:[%s2787_s10 + $0xa8] sm:$0xff] %v2262_v27 }
 0x19f   : > { %v2266_v29 = vpop.eup %2265  ;;  %1647 = vst [vmem:[%s2787_s10 + $0xb8] sm:$0xff] %v2264_v28 }
 0x1a0   : > { %v2268_v30 = vpop.eup %2267  ;;  %1648 = vst [vmem:[%s2787_s10 + $0xc0] sm:$0xff] %v2266_v29 }
 0x1a1   : > { %v2270_v31 = vpop.eup %2269  ;;  %1650 = vst [vmem:[%s2787_s10 + $0xd0] sm:$0xff] %v2268_v30 }
 0x1a2   : > { %v2272_v32 = vpop.eup %2271  ;;  %1649 = vst [vmem:[%s2787_s10 + $0xc8] sm:$0xff] %v2270_v31 }
 0x1a3   : > { %v2274_v33 = vpop.eup %2273  ;;  %1651 = vst [vmem:[%s2787_s10 + $0xd8] sm:$0xff] %v2272_v32 }
 0x1a4   : > { %v2276_v34 = vpop.eup %2275  ;;  %1652 = vst [vmem:[%s2787_s10 + $0xe0] sm:$0xff] %v2274_v33 }
 0x1a5   : > { %v2278_v35 = vpop.eup %2277  ;;  %1654 = vst [vmem:[%s2787_s10 + $0xf0] sm:$0xff] %v2276_v34 }
 0x1a6   : > { %v2280_v36 = vpop.eup %2279  ;;  %1653 = vst [vmem:[%s2787_s10 + $0xe8] sm:$0xff] %v2278_v35 }
 0x1a7   : > { %1655 = vst [vmem:[%s2787_s10 + $0xf8] sm:$0xff] %v2280_v36 }
 0x1a8 PF: > { %s12_s9 = sadd.s32 1, %s2287_s9  }
 0x1a9   : > { %p9_p4 = scmp.ge.s32.totalorder %s12_s9, 4  }
 0x1ab   :  { %11 = sbr.rel (!%p9_p4) target bundleno = 1 (0x1), region = 58 }

</bundles_post_ra>
